<compile_context>
chip_gen: v5e
topology: v5e:2x2
jax: 0.10.0
libtpu: 0.0.40
codegen_flags: <defaults>
</compile_context>

<pallas_src>
import jax
import jax.numpy as jnp
from jax.experimental import pallas as pl
from jax.experimental.pallas import tpu as pltpu


_HEAD_PAD = 128  # pad (C+1) + 4C head outputs up to one full 128-lane register


def _boxhead_kernel(x_ref, w1_ref, b1_ref, w2_ref, b2_ref, wh_ref, bh_ref,
                    out_ref):
    x = x_ref[...]                                                  # (tm, D) bf16
    # intermediate: Linear -> Linear -> ReLU (matches the PyTorch Sequential)
    h1 = jnp.dot(x, w1_ref[...], preferred_element_type=jnp.float32) + b1_ref[...]
    h1 = h1.astype(jnp.bfloat16)
    h2 = jnp.dot(h1, w2_ref[...], preferred_element_type=jnp.float32) + b2_ref[...]
    h2 = jnp.maximum(h2, 0.0).astype(jnp.bfloat16)
    # fused classifier + regressor head, padded to 128 output lanes
    heads = jnp.dot(h2, wh_ref[...], preferred_element_type=jnp.float32) + bh_ref[...]
    out_ref[...] = heads.astype(out_ref.dtype)


def _round_up(a, b):
    return (a + b - 1) // b * b


def boxhead_forward(x, params):
    """x: (N, 256*P*P) float32.  Returns (class_logits (N, C+1), box_pred (N, 4C))."""
    w1, b1, w2, b2, wc, bc, wr, br = params
    N, D = x.shape
    H = w1.shape[1]
    Ccls = wc.shape[1]
    Creg = wr.shape[1]
    C_pad = _HEAD_PAD
    assert Ccls + Creg <= C_pad

    # Row tile: one block for small N, 256-row tiles (full MXU height) otherwise.
    if N <= 256:
        tm = _round_up(max(N, 8), 8)
    else:
        tm = 256
    N_pad = _round_up(N, tm)

    # bf16 activations / weights (f32 accumulation); biases stay f32.
    xb = x.astype(jnp.bfloat16)
    if N_pad != N:
        xb = jnp.pad(xb, ((0, N_pad - N), (0, 0)))
    w1b = w1.astype(jnp.bfloat16)
    w2b = w2.astype(jnp.bfloat16)
    # Fuse the two narrow head matmuls into one lane-dense (H, 128) matmul.
    wh = jnp.zeros((H, C_pad), jnp.bfloat16).at[:, :Ccls + Creg].set(
        jnp.concatenate([wc, wr], axis=1).astype(jnp.bfloat16))
    bh = jnp.zeros((1, C_pad), jnp.float32).at[:, :Ccls + Creg].set(
        jnp.concatenate([bc, br], axis=1))

    # Whole-array VMEM residents: single copy, no double buffering.
    def resident():
        return pl.BlockSpec(memory_space=pltpu.MemorySpace.VMEM)

    bf16_b, f32_b = 2, 4
    vmem_bytes = ((D * H + H * H + H * C_pad) * bf16_b   # resident weights (x1)
                  + (2 * H + C_pad) * f32_b              # resident biases (x1)
                  + 2 * tm * D * bf16_b                  # double-buffered x tiles
                  + 2 * tm * C_pad * f32_b               # double-buffered out tiles
                  + (8 << 20))                           # compiler scratch headroom
    vmem_bytes = int(min(vmem_bytes, 64 << 20))          # v7x physical VMEM cap

    grid = (N_pad // tm,)
    out = pl.pallas_call(
        _boxhead_kernel,
        out_shape=jax.ShapeDtypeStruct((N_pad, C_pad), jnp.float32),
        grid_spec=pltpu.PrefetchScalarGridSpec(
            num_scalar_prefetch=0,
            grid=grid,
            in_specs=[
                pl.BlockSpec((tm, D), lambda i: (i, 0)),   # x tile (streamed)
                resident(), resident(),                    # W1, b1
                resident(), resident(),                    # W2, b2
                resident(), resident(),                    # W_head, b_head
            ],
            out_specs=pl.BlockSpec((tm, C_pad), lambda i: (i, 0)),
        ),
        compiler_params=pltpu.CompilerParams(
            dimension_semantics=(("parallel",) if N_pad >= 512 else ("arbitrary",)),
            vmem_limit_bytes=vmem_bytes),
    )(xb, w1b, b1, w2b, b2, wh, bh)

    cls_logits = out[:N, :Ccls]
    box_pred = out[:N, Ccls:Ccls + Creg]
    return cls_logits, box_pred


def init_boxhead_params(key, *, Classes=3, P=7):
    """nn.Linear-style init (U[-1/sqrt(fan_in), 1/sqrt(fan_in)]); weights stored (in, out)."""
    D = 256 * P * P
    H = 1024
    Ccls = Classes + 1
    Creg = 4 * Classes

    def linear(k, fan_in, fan_out):
        kw, kb = jax.random.split(k)
        bound = 1.0 / jnp.sqrt(fan_in)
        w = jax.random.uniform(kw, (fan_in, fan_out), jnp.float32, -bound, bound)
        b = jax.random.uniform(kb, (1, fan_out), jnp.float32, -bound, bound)
        return w, b

    k1, k2, k3, k4 = jax.random.split(key, 4)
    w1, b1 = linear(k1, D, H)
    w2, b2 = linear(k2, H, H)
    wc, bc = linear(k3, H, Ccls)
    wr, br = linear(k4, H, Creg)
    return (w1, b1, w2, b2, wc, bc, wr, br)


def _reference_forward_bf16(x, params):
    """Pure-JAX reference using the same bf16-in / f32-accumulate recipe."""
    w1, b1, w2, b2, wc, bc, wr, br = params
    xb = x.astype(jnp.bfloat16)
    h1 = jnp.dot(xb, w1.astype(jnp.bfloat16),
                 preferred_element_type=jnp.float32) + b1
    h1 = h1.astype(jnp.bfloat16)
    h2 = jnp.dot(h1, w2.astype(jnp.bfloat16),
                 preferred_element_type=jnp.float32) + b2
    h2 = jnp.maximum(h2, 0.0).astype(jnp.bfloat16)
    cls = jnp.dot(h2, wc.astype(jnp.bfloat16),
                  preferred_element_type=jnp.float32) + bc
    box = jnp.dot(h2, wr.astype(jnp.bfloat16),
                  preferred_element_type=jnp.float32) + br
    return cls, box


if __name__ == "__main__":
    # Small config consistent with the module: BoxHead(Classes=3, P=2)
    # -> feature dim 256*P*P = 1024, hidden 1024, heads C+1 = 4 and 4C = 12.
    Classes, P = 3, 2
    N = 20  # deliberately not a multiple of 8 to exercise the padding path

    key = jax.random.PRNGKey(0)
    kx, kp = jax.random.split(key)
    params = init_boxhead_params(kp, Classes=Classes, P=P)
    x = jax.random.normal(kx, (N, 256 * P * P), jnp.float32)

    cls_logits, box_pred = boxhead_forward(x, params)
    cls_logits = jax.block_until_ready(cls_logits)
    box_pred = jax.block_until_ready(box_pred)

    assert cls_logits.shape == (N, Classes + 1)
    assert box_pred.shape == (N, 4 * Classes)

    # Check against a pure-JAX reference of the same bf16/f32 math.
    ref_cls, ref_box = _reference_forward_bf16(x, params)
    assert jnp.allclose(cls_logits, ref_cls, atol=1e-2, rtol=1e-2)
    assert jnp.allclose(box_pred, ref_box, atol=1e-2, rtol=1e-2)

    # TODO(synk): create_ground_truth / MultiScaleRoiAlign / postprocess_detections
    # / loss_* are training & post-processing utilities (roi_align, NMS,
    # data-dependent python loops) and are not part of forward(); they are not
    # implemented as Pallas kernels here.
    print("KERNEL_OK")
</pallas_src>

<mosaic_0001>
module attributes {stable_mosaic.version = 11 : i64} {
  func.func @_boxhead_kernel(%arg0: i32, %arg1: memref<24x1024xbf16, #tpu.memory_space<vmem>>, %arg2: memref<1024x1024xbf16, #tpu.memory_space<vmem>>, %arg3: memref<1x1024xf32, #tpu.memory_space<vmem>>, %arg4: memref<1024x1024xbf16, #tpu.memory_space<vmem>>, %arg5: memref<1x1024xf32, #tpu.memory_space<vmem>>, %arg6: memref<1024x128xbf16, #tpu.memory_space<vmem>>, %arg7: memref<1x128xf32, #tpu.memory_space<vmem>>, %arg8: memref<24x128xf32, #tpu.memory_space<vmem>>) attributes {dimension_semantics = [#tpu.dimension_semantics<arbitrary>], iteration_bounds = array<i64: 1>, scalar_prefetch = 0 : i64, scratch_operands = 0 : i64, tpu.core_type = #tpu.core_type<tc>, window_params = [{transform_indices = @transform_0, window_bounds = array<i64: 24, 1024>}, {pipeline_mode = #tpu.pipeline_mode<synchronous>, transform_indices = @transform_1, window_bounds = array<i64: 1024, 1024>}, {pipeline_mode = #tpu.pipeline_mode<synchronous>, transform_indices = @transform_2, window_bounds = array<i64: 1, 1024>}, {pipeline_mode = #tpu.pipeline_mode<synchronous>, transform_indices = @transform_3, window_bounds = array<i64: 1024, 1024>}, {pipeline_mode = #tpu.pipeline_mode<synchronous>, transform_indices = @transform_4, window_bounds = array<i64: 1, 1024>}, {pipeline_mode = #tpu.pipeline_mode<synchronous>, transform_indices = @transform_5, window_bounds = array<i64: 1024, 128>}, {pipeline_mode = #tpu.pipeline_mode<synchronous>, transform_indices = @transform_6, window_bounds = array<i64: 1, 128>}, {transform_indices = @transform_7, window_bounds = array<i64: 24, 128>}]} {
    %c0 = arith.constant 0 : index
    %c0_0 = arith.constant 0 : index
    %0 = vector.load %arg1[%c0, %c0_0] : memref<24x1024xbf16, #tpu.memory_space<vmem>>, vector<24x1024xbf16>
    %c0_1 = arith.constant 0 : index
    %c0_2 = arith.constant 0 : index
    %1 = vector.load %arg2[%c0_1, %c0_2] : memref<1024x1024xbf16, #tpu.memory_space<vmem>>, vector<1024x1024xbf16>
    %cst = arith.constant dense<0.000000e+00> : vector<24x1024xf32>
    %2 = tpu.matmul %0, %1, %cst {dimension_numbers = #tpu.dot_dimension_numbers<[1], [0], [0], [1], [0, 0, 1, 1], [], []>} : vector<24x1024xbf16>, vector<1024x1024xbf16>, vector<24x1024xf32> -> vector<24x1024xf32>
    %c0_3 = arith.constant 0 : index
    %c0_4 = arith.constant 0 : index
    %3 = vector.load %arg3[%c0_3, %c0_4] : memref<1x1024xf32, #tpu.memory_space<vmem>>, vector<1x1024xf32>
    %4 = vector.broadcast %3 : vector<1x1024xf32> to vector<24x1024xf32>
    %5 = arith.addf %2, %4 : vector<24x1024xf32>
    %6 = arith.truncf %5 : vector<24x1024xf32> to vector<24x1024xbf16>
    %c0_5 = arith.constant 0 : index
    %c0_6 = arith.constant 0 : index
    %7 = vector.load %arg4[%c0_5, %c0_6] : memref<1024x1024xbf16, #tpu.memory_space<vmem>>, vector<1024x1024xbf16>
    %cst_7 = arith.constant dense<0.000000e+00> : vector<24x1024xf32>
    %8 = tpu.matmul %6, %7, %cst_7 {dimension_numbers = #tpu.dot_dimension_numbers<[1], [0], [0], [1], [0, 0, 1, 1], [], []>} : vector<24x1024xbf16>, vector<1024x1024xbf16>, vector<24x1024xf32> -> vector<24x1024xf32>
    %c0_8 = arith.constant 0 : index
    %c0_9 = arith.constant 0 : index
    %9 = vector.load %arg5[%c0_8, %c0_9] : memref<1x1024xf32, #tpu.memory_space<vmem>>, vector<1x1024xf32>
    %10 = vector.broadcast %9 : vector<1x1024xf32> to vector<24x1024xf32>
    %11 = arith.addf %8, %10 : vector<24x1024xf32>
    %cst_10 = arith.constant 0.000000e+00 : f32
    %12 = vector.broadcast %cst_10 : f32 to vector<24x1024xf32>
    %13 = arith.maximumf %11, %12 : vector<24x1024xf32>
    %14 = arith.truncf %13 : vector<24x1024xf32> to vector<24x1024xbf16>
    %c0_11 = arith.constant 0 : index
    %c0_12 = arith.constant 0 : index
    %15 = vector.load %arg6[%c0_11, %c0_12] : memref<1024x128xbf16, #tpu.memory_space<vmem>>, vector<1024x128xbf16>
    %cst_13 = arith.constant dense<0.000000e+00> : vector<24x128xf32>
    %16 = tpu.matmul %14, %15, %cst_13 {dimension_numbers = #tpu.dot_dimension_numbers<[1], [0], [0], [1], [0, 0, 1, 1], [], []>} : vector<24x1024xbf16>, vector<1024x128xbf16>, vector<24x128xf32> -> vector<24x128xf32>
    %c0_14 = arith.constant 0 : index
    %c0_15 = arith.constant 0 : index
    %17 = vector.load %arg7[%c0_14, %c0_15] : memref<1x128xf32, #tpu.memory_space<vmem>>, vector<1x128xf32>
    %18 = vector.broadcast %17 : vector<1x128xf32> to vector<24x128xf32>
    %19 = arith.addf %16, %18 : vector<24x128xf32>
    %c0_16 = arith.constant 0 : index
    %c0_17 = arith.constant 0 : index
    %20 = vector.load %arg8[%c0_16, %c0_17] : memref<24x128xf32, #tpu.memory_space<vmem>>, vector<24x128xf32>
    tpu.vector_store %arg8[%c0_16, %c0_17], %19 {strides = array<i32>} : memref<24x128xf32, #tpu.memory_space<vmem>>, vector<24x128xf32>,
    return
  }
  func.func @transform_0(%arg0: i32) -> (i32, i32) {
    %c0_i32 = arith.constant 0 : i32
    %c0_i32_0 = arith.constant 0 : i32
    return %arg0, %c0_i32 : i32, i32
  }
  func.func @transform_1(%arg0: i32) -> (i32, i32) {
    %c0_i32 = arith.constant 0 : i32
    %c0_i32_0 = arith.constant 0 : i32
    %c0_i32_1 = arith.constant 0 : i32
    return %c0_i32, %c0_i32_0 : i32, i32
  }
  func.func @transform_2(%arg0: i32) -> (i32, i32) {
    %c0_i32 = arith.constant 0 : i32
    %c0_i32_0 = arith.constant 0 : i32
    %c0_i32_1 = arith.constant 0 : i32
    return %c0_i32, %c0_i32_0 : i32, i32
  }
  func.func @transform_3(%arg0: i32) -> (i32, i32) {
    %c0_i32 = arith.constant 0 : i32
    %c0_i32_0 = arith.constant 0 : i32
    %c0_i32_1 = arith.constant 0 : i32
    return %c0_i32, %c0_i32_0 : i32, i32
  }
  func.func @transform_4(%arg0: i32) -> (i32, i32) {
    %c0_i32 = arith.constant 0 : i32
    %c0_i32_0 = arith.constant 0 : i32
    %c0_i32_1 = arith.constant 0 : i32
    return %c0_i32, %c0_i32_0 : i32, i32
  }
  func.func @transform_5(%arg0: i32) -> (i32, i32) {
    %c0_i32 = arith.constant 0 : i32
    %c0_i32_0 = arith.constant 0 : i32
    %c0_i32_1 = arith.constant 0 : i32
    return %c0_i32, %c0_i32_0 : i32, i32
  }
  func.func @transform_6(%arg0: i32) -> (i32, i32) {
    %c0_i32 = arith.constant 0 : i32
    %c0_i32_0 = arith.constant 0 : i32
    %c0_i32_1 = arith.constant 0 : i32
    return %c0_i32, %c0_i32_0 : i32, i32
  }
  func.func @transform_7(%arg0: i32) -> (i32, i32) {
    %c0_i32 = arith.constant 0 : i32
    %c0_i32_0 = arith.constant 0 : i32
    return %arg0, %c0_i32 : i32, i32
  }
}

</mosaic_0001>

<bundles_post_ra>
// kernel: tpu_custom_call.1
= control target key start
LH: loop header
LB: loop body
LE: loop exit
PB: predicated region body
PF: predicated region fallthrough
CT: control target
= control target key end

     0   :  { %12 = vsyncpa [#allocation3], 0  ;;  %s16195_s0 = inlined_call_operand.hbm [shape: bf16[24,1024], index: 0, kind: input, shape index: {}]   ;;  %s16196_s1 = inlined_call_operand.hbm [shape: bf16[1024,1024], index: 1, kind: input, shape index: {}]   ;;  %s16197_s2 = inlined_call_operand.hbm [shape: f32[1,1024], index: 2, kind: input, shape index: {}]   ;;  %s16198_s3 = inlined_call_operand.hbm [shape: bf16[1024,1024], index: 3, kind: input, shape index: {}]   ;;  %s16199_s4 = inlined_call_operand.hbm [shape: f32[1,1024], index: 4, kind: input, shape index: {}]   ;;  %s16200_s5 = inlined_call_operand.hbm [shape: bf16[1024,128], index: 5, kind: input, shape index: {}]   ;;  %s16201_s6 = inlined_call_operand.hbm [shape: f32[1,128], index: 6, kind: input, shape index: {}]   ;;  %s16202_s7 = inlined_call_operand.hbm [shape: f32[24,128], index: 7, kind: output, shape index: {}]  }
   0x1   :  { %13 = vsyncpa [#allocation6], 0 }
   0x2   :  { %14 = vsyncpa [#allocation9], 0 }
   0x3   :  { %15 = vsyncpa [#allocation12], 0 }
   0x4   :  { %16 = vsyncpa [#allocation4], 0  ;;  %s34_s26 = sshll.u32 %s16196_s1, 4  ;;  %s15138_s27 = smov [#allocation5]   ;;  %s35_s26 = int_to_ptr.hbm [resolvable:$true] %s34_s26 }
   0x5   :  { %s36_s28 = sshll.u32 %s15138_s27, 4  ;;  %s58_s8 = sshll.u32 %s16198_s3, 4  ;;  %s37_s28 = int_to_ptr.vmem [resolvable:$true] %s36_s28  ;;  %s59_s8 = int_to_ptr.hbm [resolvable:$true] %s58_s8 }
   0x6   :  { %s15139_s9 = smov 512   ;;  %s15140_s10 = smov 32  }
   0x7   :  { %42 = dma.hbm_to_vmem [thread:$0]  %s35_s26, 65536, %s37_s28, [#allocation6], %s15139_s9, %s15139_s9, %s15140_s10  }
   0x8   :  { %s15141_s11 = smov [#allocation8]   ;;  %s82_s15 = sshll.u32 %s16200_s5, 4  ;;  %s83_s15 = int_to_ptr.hbm [resolvable:$true] %s82_s15 }
   0x9   :  { %s60_s12 = sshll.u32 %s15141_s11, 4  ;;  %s15142_s1 = smov [#allocation11]   ;;  %s61_s12 = int_to_ptr.vmem [resolvable:$true] %s60_s12 }
   0xa   :  { %66 = dma.hbm_to_vmem [thread:$0]  %s59_s8, 65536, %s61_s12, [#allocation9], %s15139_s9, %s15139_s9, %s15140_s10  }
   0xb   :  { %s84_s16 = sshll.u32 %s15142_s1, 4  ;;  %s21_s3 = sshll.u32 %s16195_s0, 4  ;;  %s85_s16 = int_to_ptr.vmem [resolvable:$true] %s84_s16  ;;  %s22_s3 = int_to_ptr.hbm [resolvable:$true] %s21_s3 }
   0xc   :  { %s15143_s19 = smov 64   ;;  %s15144_s20 = smov 4  }
   0xd   :  { %90 = dma.hbm_to_vmem [thread:$0]  %s83_s15, 8192, %s85_s16, [#allocation12], %s15143_s19, %s15143_s19, %s15144_s20  }
   0xe   :  { %s15145_s21 = smov [#allocation2]   ;;  %s48_s5 = sshll.u32 %s16197_s2, 4  ;;  %s49_s5 = int_to_ptr.hbm [resolvable:$true] %s48_s5 }
   0xf   :  { %s23_s22 = sshll.u32 %s15145_s21, 4  ;;  %s72_s27 = sshll.u32 %s16199_s4, 4  ;;  %s24_s22 = int_to_ptr.vmem [resolvable:$true] %s23_s22  ;;  %s73_s27 = int_to_ptr.hbm [resolvable:$true] %s72_s27 }
  0x10   :  { %29 = dma.hbm_to_vmem [thread:$0]  %s22_s3, 1536, %s24_s22, [#allocation3], %s15139_s9, %s15139_s9, %s15140_s10  }
  0x11   :  { %s15146_s28 = smov [#allocation7]   ;;  %s15147_s0 = smov [#allocation10]  }
  0x12   :  { %s50_s29 = sshll.u32 %s15146_s28, 4  ;;  %s74_s30 = sshll.u32 %s15147_s0, 4  ;;  %s51_s29 = int_to_ptr.vmem [resolvable:$true] %s50_s29  ;;  %s75_s30 = int_to_ptr.vmem [resolvable:$true] %s74_s30 }
  0x13   :  { %53 = dma.hbm_to_vmem [thread:$0]  %s49_s5, 128, %s51_s29, [#allocation6]  }
  0x14   :  { %s96_s12 = sshll.u32 %s16201_s6, 4  ;;  %s15148_s2 = smov [#allocation13]   ;;  %s97_s12 = int_to_ptr.hbm [resolvable:$true] %s96_s12 }
  0x15   :  { %77 = dma.hbm_to_vmem [thread:$0]  %s73_s27, 128, %s75_s30, [#allocation9]  }
  0x16   :  { %s98_s9 = sshll.u32 %s15148_s2, 4  ;;  %s99_s9 = int_to_ptr.vmem [resolvable:$true] %s98_s9 }
  0x17   :  { %101 = dma.hbm_to_vmem [thread:$0]  %s97_s12, 16, %s99_s9, [#allocation12]  }
  0x18   :  { %15128 = dma.done.wait [#allocation3], 1536  }
  0x19   :  { %15129 = vsyncadd [#allocation3], 4294965760 }
  0x1a   :  { %15130 = dma.done.wait [#allocation6], 65664  }
  0x1b   :  { %15131 = vsyncadd [#allocation6], 4294901632 }
  0x1c   :  { %15132 = dma.done.wait [#allocation9], 65664  }
  0x1d   :  { %15133 = vsyncadd [#allocation9], 4294901632 }
  0x1e   :  { %15134 = dma.done.wait [#allocation12], 8208  }
  0x1f   :  { %15135 = vsyncadd [#allocation12], 4294959088  ;;  %v9693_v0 = vld [vmem:[#allocation5 + $0x1c0] sm:$0xf]  ;;  %s15149_s4 = smov [#allocation14]   ;;  %s9419_s14 = sshll.u32 %s16202_s7, 4  ;;  %s9420_s14 = int_to_ptr.hbm [resolvable:$true] %s9419_s14 }
  0x20   :  { %v13887_v1 = vld [vmem:[#allocation5 + $0x1dc] sm:$0xf0]  ;;  %s9417_s6 = sshll.u32 %s15149_s4, 4  ;;  %s15150_s15 = smov 128   ;;  %s9418_s6 = int_to_ptr.vmem [resolvable:$true] %s9417_s6 }
  0x21   :  { %v9949_v2 = vld [vmem:[#allocation5 + $0x3c0] sm:$0xf]  ;;  %v9694_v3 = vor.u32 %v13887_v1, %v9693_v0  ;;  %s15151_s1 = smov 8  }
  0x22   :  { %v13951_v4 = vld [vmem:[#allocation5 + $0x3dc] sm:$0xf0] }
  0x23   :  { %v10205_v5 = vld [vmem:[#allocation5 + $0x5c0] sm:$0xf]  ;;  %v9950_v7 = vor.u32 %v13951_v4, %v9949_v2  ;;  %3300 = vmatpush.bf16.msra.mxu0 %v9694_v3 }
  0x24   :  { %v14015_v6 = vld [vmem:[#allocation5 + $0x5dc] sm:$0xf0] }
  0x25   :  { %v10206_v8 = vor.u32 %v14015_v6, %v10205_v5  ;;  %v10461_v9 = vld [vmem:[#allocation5 + $0x7c0] sm:$0xf]  ;;  %3318 = vmatpush.bf16.msra.mxu1 %v9950_v7 }
  0x26   :  { %v14079_v10 = vld [vmem:[#allocation5 + $0x7dc] sm:$0xf0] }
  0x27   :  { %v9661_v11 = vld [vmem:[#allocation5 + $0x180] sm:$0xf]  ;;  %v10462_v12 = vor.u32 %v14079_v10, %v10461_v9  ;;  %3336 = vmatpush.bf16.msra.mxu2 %v10206_v8 }
  0x28   :  { %v13879_v13 = vld [vmem:[#allocation5 + $0x19c] sm:$0xf0] }
  0x29   :  { %v9917_v14 = vld [vmem:[#allocation5 + $0x380] sm:$0xf]  ;;  %v9662_v16 = vor.u32 %v13879_v13, %v9661_v11  ;;  %3354 = vmatpush.bf16.msra.mxu3 %v10462_v12 }
  0x2a   :  { %v13943_v15 = vld [vmem:[#allocation5 + $0x39c] sm:$0xf0] }
  0x2b   :  { %v9918_v17 = vor.u32 %v13943_v15, %v9917_v14  ;;  %v10173_v18 = vld [vmem:[#allocation5 + $0x580] sm:$0xf]  ;;  %3301 = vmatpush.bf16.msra.mxu0 %v9662_v16 }
  0x2c   :  { %v14007_v19 = vld [vmem:[#allocation5 + $0x59c] sm:$0xf0] }
  0x2d   :  { %v10429_v20 = vld [vmem:[#allocation5 + $0x780] sm:$0xf]  ;;  %v10174_v21 = vor.u32 %v14007_v19, %v10173_v18  ;;  %3319 = vmatpush.bf16.msra.mxu1 %v9918_v17 }
  0x2e   :  { %v14071_v22 = vld [vmem:[#allocation5 + $0x79c] sm:$0xf0] }
  0x2f   :  { %v9629_v23 = vld [vmem:[#allocation5 + $0x140] sm:$0xf]  ;;  %v10430_v25 = vor.u32 %v14071_v22, %v10429_v20  ;;  %3337 = vmatpush.bf16.msra.mxu2 %v10174_v21 }
  0x30   :  { %v13871_v24 = vld [vmem:[#allocation5 + $0x15c] sm:$0xf0] }
  0x31   :  { %v9885_v26 = vld [vmem:[#allocation5 + $0x340] sm:$0xf]  ;;  %v9630_v29 = vor.u32 %v13871_v24, %v9629_v23  ;;  %3355 = vmatpush.bf16.msra.mxu3 %v10430_v25 }
  0x32   :  { %v13935_v27 = vld [vmem:[#allocation5 + $0x35c] sm:$0xf0] }
  0x33   :  { %v10141_v28 = vld [vmem:[#allocation5 + $0x540] sm:$0xf]  ;;  %v9886_v33 = vor.u32 %v13935_v27, %v9885_v26  ;;  %3302 = vmatpush.bf16.msra.mxu0 %v9630_v29 }
  0x34   :  { %v13999_v30 = vld [vmem:[#allocation5 + $0x55c] sm:$0xf0] }
  0x35   :  { %v10397_v31 = vld [vmem:[#allocation5 + $0x740] sm:$0xf]  ;;  %v10142_v34 = vor.u32 %v13999_v30, %v10141_v28  ;;  %3320 = vmatpush.bf16.msra.mxu1 %v9886_v33  ;;  %v13819_v30 = vld [vmem:[#allocation2 + $0x4] sm:$0xf] }
  0x36   :  { %v14063_v32 = vld [vmem:[#allocation5 + $0x75c] sm:$0xf0] }
  0x37   :  { %v9597_v35 = vld [vmem:[#allocation5 + $0x100] sm:$0xf]  ;;  %v10398_v38 = vor.u32 %v14063_v32, %v10397_v31  ;;  %3338 = vmatpush.bf16.msra.mxu2 %v10142_v34  ;;  %v9439_v31 = vld [vmem:[#allocation2 + $0x20] sm:$0xf0] }
  0x38   :  { %v13863_v36 = vld [vmem:[#allocation5 + $0x11c] sm:$0xf0] }
  0x39   :  { %v9853_v37 = vld [vmem:[#allocation5 + $0x300] sm:$0xf]  ;;  %v9598_v44 = vor.u32 %v13863_v36, %v9597_v35  ;;  %3356 = vmatpush.bf16.msra.mxu3 %v10398_v38  ;;  %v9445_v35 = vld [vmem:[#allocation2 + $0x8] sm:$0xf] }
  0x3a   :  { %v13927_v39 = vld [vmem:[#allocation5 + $0x31c] sm:$0xf0] }
  0x3b   :  { %v10109_v40 = vld [vmem:[#allocation5 + $0x500] sm:$0xf]  ;;  %v9854_v45 = vor.u32 %v13927_v39, %v9853_v37  ;;  %3303 = vmatpush.bf16.msra.mxu0 %v9598_v44 }
  0x3c   :  { %v13991_v41 = vld [vmem:[#allocation5 + $0x51c] sm:$0xf0] }
  0x3d   :  { %v10365_v42 = vld [vmem:[#allocation5 + $0x700] sm:$0xf]  ;;  %v10110_v46 = vor.u32 %v13991_v41, %v10109_v40  ;;  %3321 = vmatpush.bf16.msra.mxu1 %v9854_v45  ;;  %v13824_v40 = vld [vmem:[#allocation2 + $0x24] sm:$0xf0]  ;;  %v13820_v41 = vld [vmem:[#allocation2 + $0xc] sm:$0xf] }
  0x3e   :  { %v14055_v43 = vld [vmem:[#allocation5 + $0x71c] sm:$0xf0] }
  0x3f   :  { %v9565_v47 = vld [vmem:[#allocation5 + $0xc0] sm:$0xf]  ;;  %v10366_v50 = vor.u32 %v14055_v43, %v10365_v42  ;;  %3339 = vmatpush.bf16.msra.mxu2 %v10110_v46  ;;  %v9447_v42 = vld [vmem:[#allocation2 + $0x28] sm:$0xf0] }
  0x40   :  { %v13855_v48 = vld [vmem:[#allocation5 + $0xdc] sm:$0xf0] }
  0x41   :  { %v9821_v49 = vld [vmem:[#allocation5 + $0x2c0] sm:$0xf]  ;;  %v9566_v56 = vor.u32 %v13855_v48, %v9565_v47  ;;  %3357 = vmatpush.bf16.msra.mxu3 %v10366_v50 }
  0x42   :  { %v13919_v51 = vld [vmem:[#allocation5 + $0x2dc] sm:$0xf0] }
  0x43   :  { %v10077_v52 = vld [vmem:[#allocation5 + $0x4c0] sm:$0xf]  ;;  %v9822_v57 = vor.u32 %v13919_v51, %v9821_v49  ;;  %3304 = vmatpush.bf16.msra.mxu0 %v9566_v56 }
  0x44   :  { %v13983_v53 = vld [vmem:[#allocation5 + $0x4dc] sm:$0xf0] }
  0x45   :  { %v10333_v54 = vld [vmem:[#allocation5 + $0x6c0] sm:$0xf]  ;;  %v10078_v58 = vor.u32 %v13983_v53, %v10077_v52  ;;  %3322 = vmatpush.bf16.msra.mxu1 %v9822_v57  ;;  %v15215_v53 = vor.u32 %v13819_v30, %v9439_v31  ;;  %v15219_v57 = vor.u32 %v13820_v41, %v9447_v42 }
  0x46   :  { %v14047_v55 = vld [vmem:[#allocation5 + $0x6dc] sm:$0xf0] }
  0x47   :  { %v9533_v59 = vld [vmem:[#allocation5 + $0x80] sm:$0xf]  ;;  %v10334_v62 = vor.u32 %v14047_v55, %v10333_v54  ;;  %3340 = vmatpush.bf16.msra.mxu2 %v10078_v58  ;;  %v15217_v54 = vor.u32 %v13824_v40, %v9445_v35 }
  0x48   :  { %v13847_v60 = vld [vmem:[#allocation5 + $0x9c] sm:$0xf0] }
  0x49   :  { %v9789_v61 = vld [vmem:[#allocation5 + $0x280] sm:$0xf]  ;;  %v9534_v4 = vor.u32 %v13847_v60, %v9533_v59  ;;  %3358 = vmatpush.bf16.msra.mxu3 %v10334_v62 }
  0x4a   :  { %v13911_v63 = vld [vmem:[#allocation5 + $0x29c] sm:$0xf0] }
  0x4b   :  { %v10045_v0 = vld [vmem:[#allocation5 + $0x480] sm:$0xf]  ;;  %v9790_v5 = vor.u32 %v13911_v63, %v9789_v61  ;;  %3305 = vmatpush.bf16.msra.mxu0 %v9534_v4 }
  0x4c   :  { %v13975_v1 = vld [vmem:[#allocation5 + $0x49c] sm:$0xf0] }
  0x4d   :  { %v10301_v2 = vld [vmem:[#allocation5 + $0x680] sm:$0xf]  ;;  %v10046_v6 = vor.u32 %v13975_v1, %v10045_v0  ;;  %3323 = vmatpush.bf16.msra.mxu1 %v9790_v5 }
  0x4e   :  { %v14039_v3 = vld [vmem:[#allocation5 + $0x69c] sm:$0xf0] }
  0x4f   :  { %v9501_v7 = vld [vmem:[#allocation5 + $0x40] sm:$0xf]  ;;  %v10302_v10 = vor.u32 %v14039_v3, %v10301_v2  ;;  %3341 = vmatpush.bf16.msra.mxu2 %v10046_v6 }
  0x50   :  { %v13839_v8 = vld [vmem:[#allocation5 + $0x5c] sm:$0xf0] }
  0x51   :  { %v9757_v9 = vld [vmem:[#allocation5 + $0x240] sm:$0xf]  ;;  %v9502_v17 = vor.u32 %v13839_v8, %v9501_v7  ;;  %3359 = vmatpush.bf16.msra.mxu3 %v10302_v10 }
  0x52   :  { %v13903_v11 = vld [vmem:[#allocation5 + $0x25c] sm:$0xf0] }
  0x53   :  { %v10013_v12 = vld [vmem:[#allocation5 + $0x440] sm:$0xf]  ;;  %v9758_v21 = vor.u32 %v13903_v11, %v9757_v9  ;;  %3306 = vmatpush.bf16.msra.mxu0 %v9502_v17 }
  0x54   :  { %v13967_v13 = vld [vmem:[#allocation5 + $0x45c] sm:$0xf0] }
  0x55   :  { %v10269_v14 = vld [vmem:[#allocation5 + $0x640] sm:$0xf]  ;;  %v10014_v22 = vor.u32 %v13967_v13, %v10013_v12  ;;  %3324 = vmatpush.bf16.msra.mxu1 %v9758_v21 }
  0x56   :  { %v14031_v15 = vld [vmem:[#allocation5 + $0x65c] sm:$0xf0] }
  0x57   :  { %v9469_v16 = vld [vmem:[#allocation5] sm:$0xf]  ;;  %v10270_v26 = vor.u32 %v14031_v15, %v10269_v14  ;;  %3342 = vmatpush.bf16.msra.mxu2 %v10014_v22 }
  0x58   :  { %v13831_v18 = vld [vmem:[#allocation5 + $0x1c] sm:$0xf0] }
  0x59   :  { %v9725_v19 = vld [vmem:[#allocation5 + $0x200] sm:$0xf]  ;;  %v9470_v34 = vor.u32 %v13831_v18, %v9469_v16  ;;  %3360 = vmatpush.bf16.msra.mxu3 %v10270_v26 }
  0x5a   :  { %v13895_v20 = vld [vmem:[#allocation5 + $0x21c] sm:$0xf0] }
  0x5b   :  { %v9981_v23 = vld [vmem:[#allocation5 + $0x400] sm:$0xf]  ;;  %v9726_v38 = vor.u32 %v13895_v20, %v9725_v19  ;;  %3307 = vmatpush.bf16.msra.mxu0 %v9470_v34  ;;  %v139_v20 = vld [vmem:[#allocation2 + $0x48] sm:$0xff] }
  0x5c   :  { %v13959_v24 = vld [vmem:[#allocation5 + $0x41c] sm:$0xf0] }
  0x5d   :  { %v10237_v25 = vld [vmem:[#allocation5 + $0x600] sm:$0xf]  ;;  %v9982_v39 = vor.u32 %v13959_v24, %v9981_v23  ;;  %3325 = vmatpush.bf16.msra.mxu1 %v9726_v38 }
  0x5e   :  { %v14023_v27 = vld [vmem:[#allocation5 + $0x61c] sm:$0xf0] }
  0x5f   :  { %v9437_v28 = vld [vmem:[#allocation2] sm:$0xf]  ;;  %v10238_v43 = vor.u32 %v14023_v27, %v10237_v25  ;;  %3343 = vmatpush.bf16.msra.mxu2 %v9982_v39 }
  0x60   :  { %v13823_v29 = vld [vmem:[#allocation2 + $0x1c] sm:$0xf0]  ;;  %3326 = vmatmul.bf16.vlgmr.msra.gmra.mxu1 %v15215_v53 }
  0x61   :  { %v11229_v32 = vld [vmem:[#allocation5 + $0xdc0] sm:$0xf]  ;;  %v15213_v48 = vor.u32 %v13823_v29, %v9437_v28  ;;  %3361 = vmatpush.bf16.msra.mxu3 %v10238_v43 }
  0x62   :  { %v14271_v33 = vld [vmem:[#allocation5 + $0xddc] sm:$0xf0]  ;;  %3344 = vmatmul.bf16.vlgmr.msra.gmra.mxu2 %v15217_v54 }
  0x63   :  { %v10973_v36 = vld [vmem:[#allocation5 + $0xbc0] sm:$0xf]  ;;  %v11230_v44 = vor.u32 %v14271_v33, %v11229_v32  ;;  %3308 = vmatmul.bf16.vlgmr.msra.gmra.mxu0 %v15213_v48  ;;  %v702_v32 = vunpack.c.l.b16 %v139_v20 }
  0x64   :  { %v14207_v37 = vld [vmem:[#allocation5 + $0xbdc] sm:$0xf0]  ;;  %3362 = vmatmul.bf16.vlgmr.msra.gmra.mxu3 %v15219_v57 }
  0x65   :  { %v10717_v45 = vld [vmem:[#allocation5 + $0x9c0] sm:$0xf]  ;;  %v10974_v49 = vor.u32 %v14207_v37, %v10973_v36  ;;  %3408 = vmatpush.bf16.msrb.mxu2 %v11230_v44  ;;  %v703_v36 = vunpack.c.h.b16 %v139_v20  ;;  %v13947_v20 = vld [vmem:[#allocation5 + $0x3c4] sm:$0xf] }
  0x66   :  { %v14143_v46 = vld [vmem:[#allocation5 + $0x9dc] sm:$0xf0] }
  0x67   :  { %v11485_v47 = vld [vmem:[#allocation5 + $0xfc0] sm:$0xf]  ;;  %v10718_v58 = vor.u32 %v14143_v46, %v10717_v45  ;;  %3390 = vmatpush.bf16.msrb.mxu1 %v10974_v49  ;;  %v15229_v49 = vpack.c.b16 %v702_v32, %v702_v32 }
  0x68   :  { %v14335_v50 = vld [vmem:[#allocation5 + $0xfdc] sm:$0xf0] }
  0x69   :  { %v11197_v51 = vld [vmem:[#allocation5 + $0xd80] sm:$0xf]  ;;  %v11486_v59 = vor.u32 %v14335_v50, %v11485_v47  ;;  %3372 = vmatpush.bf16.msrb.mxu0 %v10718_v58 }
  0x6a   :  { %v14263_v52 = vld [vmem:[#allocation5 + $0xd9c] sm:$0xf0] }
  0x6b   :  { %v10941_v55 = vld [vmem:[#allocation5 + $0xb80] sm:$0xf]  ;;  %v11198_v60 = vor.u32 %v14263_v52, %v11197_v51  ;;  %3426 = vmatpush.bf16.msrb.mxu3 %v11486_v59  ;;  %v15231_v52 = vpack.c.b16 %v703_v36, %v703_v36 }
  0x6c   :  { %v14199_v56 = vld [vmem:[#allocation5 + $0xb9c] sm:$0xf0] }
  0x6d   :  { %v10685_v61 = vld [vmem:[#allocation5 + $0x980] sm:$0xf]  ;;  %v10942_v0 = vor.u32 %v14199_v56, %v10941_v55  ;;  %3409 = vmatpush.bf16.msrb.mxu2 %v11198_v60 }
  0x6e   :  { %v14135_v62 = vld [vmem:[#allocation5 + $0x99c] sm:$0xf0] }
  0x6f   :  { %v11453_v63 = vld [vmem:[#allocation5 + $0xf80] sm:$0xf]  ;;  %v10686_v6 = vor.u32 %v14135_v62, %v10685_v61  ;;  %3391 = vmatpush.bf16.msrb.mxu1 %v10942_v0 }
  0x70   :  { %v14327_v1 = vld [vmem:[#allocation5 + $0xf9c] sm:$0xf0] }
  0x71   :  { %v11165_v2 = vld [vmem:[#allocation5 + $0xd40] sm:$0xf]  ;;  %v11454_v7 = vor.u32 %v14327_v1, %v11453_v63  ;;  %3373 = vmatpush.bf16.msrb.mxu0 %v10686_v6 }
  0x72   :  { %v14255_v3 = vld [vmem:[#allocation5 + $0xd5c] sm:$0xf0]  ;;  %3349 = vmatmul.bf16.gmra.mxu2 %v15229_v49 }
  0x73   :  { %v10909_v4 = vld [vmem:[#allocation5 + $0xb40] sm:$0xf]  ;;  %v11166_v8 = vor.u32 %v14255_v3, %v11165_v2  ;;  %3427 = vmatpush.bf16.msrb.mxu3 %v11454_v7 }
  0x74   :  { %v14191_v5 = vld [vmem:[#allocation5 + $0xb5c] sm:$0xf0]  ;;  %3367 = vmatmul.bf16.gmra.mxu3 %v15231_v52 }
  0x75   :  { %v10653_v9 = vld [vmem:[#allocation5 + $0x940] sm:$0xf]  ;;  %v10910_v12 = vor.u32 %v14191_v5, %v10909_v4  ;;  %3410 = vmatpush.bf16.msrb.mxu2 %v11166_v8 }
  0x76   :  { %v14127_v10 = vld [vmem:[#allocation5 + $0x95c] sm:$0xf0] }
  0x77   :  { %v11421_v11 = vld [vmem:[#allocation5 + $0xf40] sm:$0xf]  ;;  %v10654_v19 = vor.u32 %v14127_v10, %v10653_v9  ;;  %3392 = vmatpush.bf16.msrb.mxu1 %v10910_v12 }
  0x78   :  { %v14319_v13 = vld [vmem:[#allocation5 + $0xf5c] sm:$0xf0] }
  0x79   :  { %v11133_v14 = vld [vmem:[#allocation5 + $0xd00] sm:$0xf]  ;;  %v11422_v21 = vor.u32 %v14319_v13, %v11421_v11  ;;  %3374 = vmatpush.bf16.msrb.mxu0 %v10654_v19 }
  0x7a   :  { %v14247_v15 = vld [vmem:[#allocation5 + $0xd1c] sm:$0xf0] }
  0x7b   :  { %v10877_v16 = vld [vmem:[#allocation5 + $0xb00] sm:$0xf]  ;;  %v11134_v22 = vor.u32 %v14247_v15, %v11133_v14  ;;  %3428 = vmatpush.bf16.msrb.mxu3 %v11422_v21  ;;  %v9951_v21 = vld [vmem:[#allocation5 + $0x3e0] sm:$0xf0] }
  0x7c   :  { %v14183_v17 = vld [vmem:[#allocation5 + $0xb1c] sm:$0xf0]  ;;  %v9954_v36 = vor.u32 %v13947_v20, %v9951_v21  ;;  %v9599_v20 = vld [vmem:[#allocation5 + $0x120] sm:$0xf0] }
  0x7d   :  { %v138_v18 = vld [vmem:[#allocation2 + $0x40] sm:$0xff]  ;;  %v10878_v26 = vor.u32 %v14183_v17, %v10877_v16  ;;  %3411 = vmatpush.bf16.msrb.mxu2 %v11134_v22 }
  0x7e   :  { %v10621_v23 = vld [vmem:[#allocation5 + $0x900] sm:$0xf]  ;;  %v700_v28 = vunpack.c.l.b16 %v138_v18  ;;  %v701_v31 = vunpack.c.h.b16 %v138_v18  ;;  %v14011_v16 = vld [vmem:[#allocation5 + $0x5c4] sm:$0xf] }
  0x7f   :  { %v14119_v24 = vld [vmem:[#allocation5 + $0x91c] sm:$0xf0]  ;;  %3393 = vmatpush.bf16.msrb.mxu1 %v10878_v26  ;;  %v10207_v17 = vld [vmem:[#allocation5 + $0x5e0] sm:$0xf0] }
  0x80   :  { %v11389_v25 = vld [vmem:[#allocation5 + $0xf00] sm:$0xf]  ;;  %v10622_v35 = vor.u32 %v14119_v24, %v10621_v23  ;;  %v15225_v42 = vpack.c.b16 %v700_v28, %v700_v28  ;;  %v15227_v47 = vpack.c.b16 %v701_v31, %v701_v31  ;;  %v9453_v28 = vld [vmem:[#allocation2 + $0x10] sm:$0xf]  ;;  %v9455_v31 = vld [vmem:[#allocation2 + $0x30] sm:$0xf0]  ;;  %v10210_v32 = vor.u32 %v14011_v16, %v10207_v17 }
  0x81   :  { %v14311_v27 = vld [vmem:[#allocation5 + $0xf1c] sm:$0xf0]  ;;  %v10111_v16 = vld [vmem:[#allocation5 + $0x520] sm:$0xf0] }
  0x82   :  { %v11101_v29 = vld [vmem:[#allocation5 + $0xcc0] sm:$0xf]  ;;  %v11390_v37 = vor.u32 %v14311_v27, %v11389_v25  ;;  %3375 = vmatpush.bf16.msrb.mxu0 %v10622_v35  ;;  %3331 = vmatmul.bf16.gmra.mxu1 %v15227_v47  ;;  %v14075_v35 = vld [vmem:[#allocation5 + $0x7c4] sm:$0xf] }
  0x83   :  { %v14239_v30 = vld [vmem:[#allocation5 + $0xcdc] sm:$0xf0]  ;;  %3313 = vmatmul.bf16.gmra.mxu0 %v15225_v42 }
  0x84   :  { %v10845_v33 = vld [vmem:[#allocation5 + $0xac0] sm:$0xf]  ;;  %v11102_v38 = vor.u32 %v14239_v30, %v11101_v29  ;;  %3429 = vmatpush.bf16.msrb.mxu3 %v11390_v37  ;;  %v13825_v29 = vld [vmem:[#allocation2 + $0x2c] sm:$0xf0]  ;;  %v13821_v30 = vld [vmem:[#allocation2 + $0x14] sm:$0xf] }
  0x85   :  { %v14175_v34 = vld [vmem:[#allocation5 + $0xadc] sm:$0xf0]  ;;  %v10463_v37 = vld [vmem:[#allocation5 + $0x7e0] sm:$0xf0] }
  0x86   :  { %v10589_v39 = vld [vmem:[#allocation5 + $0x8c0] sm:$0xf]  ;;  %v10846_v43 = vor.u32 %v14175_v34, %v10845_v33  ;;  %3412 = vmatpush.bf16.msrb.mxu2 %v11102_v38  ;;  %v13883_v33 = vld [vmem:[#allocation5 + $0x1c4] sm:$0xf] }
  0x87   :  { %v14111_v40 = vld [vmem:[#allocation5 + $0x8dc] sm:$0xf0]  ;;  %v9695_v34 = vld [vmem:[#allocation5 + $0x1e0] sm:$0xf0] }
  0x88   :  { %v11357_v41 = vld [vmem:[#allocation5 + $0xec0] sm:$0xf]  ;;  %v10590_v55 = vor.u32 %v14111_v40, %v10589_v39  ;;  %3394 = vmatpush.bf16.msrb.mxu1 %v10846_v43  ;;  %v14003_v38 = vld [vmem:[#allocation5 + $0x584] sm:$0xf]  ;;  %v13826_v43 = vld [vmem:[#allocation2 + $0x34] sm:$0xf0] }
  0x89   :  { %v14303_v44 = vld [vmem:[#allocation5 + $0xedc] sm:$0xf0]  ;;  %v10175_v39 = vld [vmem:[#allocation5 + $0x5a0] sm:$0xf0] }
  0x8a   :  { %v11069_v45 = vld [vmem:[#allocation5 + $0xc80] sm:$0xf]  ;;  %v11358_v56 = vor.u32 %v14303_v44, %v11357_v41  ;;  %3376 = vmatpush.bf16.msrb.mxu0 %v10590_v55  ;;  %v9461_v41 = vld [vmem:[#allocation2 + $0x18] sm:$0xf]  ;;  %v13822_v44 = vld [vmem:[#allocation2 + $0x1c] sm:$0xf] }
  0x8b   :  { %v14231_v46 = vld [vmem:[#allocation5 + $0xc9c] sm:$0xf0]  ;;  %v9663_v55 = vld [vmem:[#allocation5 + $0x1a0] sm:$0xf0] }
  0x8c   :  { %v10813_v50 = vld [vmem:[#allocation5 + $0xa80] sm:$0xf]  ;;  %v11070_v58 = vor.u32 %v14231_v46, %v11069_v45  ;;  %3430 = vmatpush.bf16.msrb.mxu3 %v11358_v56  ;;  %v9463_v46 = vld [vmem:[#allocation2 + $0x38] sm:$0xf0]  ;;  %v10466_v56 = vor.u32 %v14075_v35, %v10463_v37  ;;  %v13915_v37 = vld [vmem:[#allocation5 + $0x2c4] sm:$0xf] }
  0x8d   :  { %v14167_v51 = vld [vmem:[#allocation5 + $0xa9c] sm:$0xf0] }
  0x8e   :  { %v10557_v59 = vld [vmem:[#allocation5 + $0x880] sm:$0xf]  ;;  %v10814_v62 = vor.u32 %v14167_v51, %v10813_v50  ;;  %3413 = vmatpush.bf16.msrb.mxu2 %v11070_v58  ;;  %v9698_v50 = vor.u32 %v13883_v33, %v9695_v34  ;;  %v13875_v51 = vld [vmem:[#allocation5 + $0x184] sm:$0xf]  ;;  %v10178_v58 = vor.u32 %v14003_v38, %v10175_v39 }
  0x8f   :  { %v14103_v60 = vld [vmem:[#allocation5 + $0x89c] sm:$0xf0]  ;;  %v13851_v33 = vld [vmem:[#allocation5 + $0xc4] sm:$0xf] }
  0x90   :  { %v11325_v61 = vld [vmem:[#allocation5 + $0xe80] sm:$0xf]  ;;  %v10558_v4 = vor.u32 %v14103_v60, %v10557_v59  ;;  %3395 = vmatpush.bf16.msrb.mxu1 %v10814_v62  ;;  %v13939_v59 = vld [vmem:[#allocation5 + $0x384] sm:$0xf]  ;;  %v15237_v62 = vor.u32 %v13825_v29, %v9453_v28  ;;  %v140_v29 = vld [vmem:[#allocation2 + $0x50] sm:$0xff] }
  0x91   :  { %v14295_v63 = vld [vmem:[#allocation5 + $0xe9c] sm:$0xf0]  ;;  %v9919_v60 = vld [vmem:[#allocation5 + $0x3a0] sm:$0xf0] }
  0x92   :  { %v11037_v0 = vld [vmem:[#allocation5 + $0xc40] sm:$0xf]  ;;  %v11326_v6 = vor.u32 %v14295_v63, %v11325_v61  ;;  %3377 = vmatpush.bf16.msrb.mxu0 %v10558_v4  ;;  %v14067_v61 = vld [vmem:[#allocation5 + $0x784] sm:$0xf]  ;;  %v15239_v63 = vor.u32 %v13821_v30, %v9455_v31  ;;  %v15243_v4 = vor.u32 %v13822_v44, %v9463_v46 }
  0x93   :  { %v14223_v1 = vld [vmem:[#allocation5 + $0xc5c] sm:$0xf0]  ;;  %v10079_v28 = vld [vmem:[#allocation5 + $0x4e0] sm:$0xf0] }
  0x94   :  { %v10781_v2 = vld [vmem:[#allocation5 + $0xa40] sm:$0xf]  ;;  %v11038_v7 = vor.u32 %v14223_v1, %v11037_v0  ;;  %3431 = vmatpush.bf16.msrb.mxu3 %v11326_v6  ;;  %v10431_v0 = vld [vmem:[#allocation5 + $0x7a0] sm:$0xf0]  ;;  %v9922_v6 = vor.u32 %v13939_v59, %v9919_v60 }
  0x95   :  { %v14159_v3 = vld [vmem:[#allocation5 + $0xa5c] sm:$0xf0]  ;;  %v13995_v1 = vld [vmem:[#allocation5 + $0x544] sm:$0xf] }
  0x96   :  { %v10525_v5 = vld [vmem:[#allocation5 + $0x840] sm:$0xf]  ;;  %v10782_v11 = vor.u32 %v14159_v3, %v10781_v2  ;;  %3414 = vmatpush.bf16.msrb.mxu2 %v11038_v7  ;;  %v10143_v2 = vld [vmem:[#allocation5 + $0x560] sm:$0xf0]  ;;  %v15241_v3 = vor.u32 %v13826_v43, %v9461_v41  ;;  %v705_v41 = vunpack.c.h.b16 %v140_v29 }
  0x97   :  { %v14095_v8 = vld [vmem:[#allocation5 + $0x85c] sm:$0xf0]  ;;  %v13867_v7 = vld [vmem:[#allocation5 + $0x144] sm:$0xf] }
  0x98   :  { %v11293_v9 = vld [vmem:[#allocation5 + $0xe40] sm:$0xf]  ;;  %v10526_v18 = vor.u32 %v14095_v8, %v10525_v5  ;;  %3396 = vmatpush.bf16.msrb.mxu1 %v10782_v11  ;;  %v9666_v5 = vor.u32 %v13875_v51, %v9663_v55  ;;  %v9631_v8 = vld [vmem:[#allocation5 + $0x160] sm:$0xf0] }
  0x99   :  { %v14287_v10 = vld [vmem:[#allocation5 + $0xe5c] sm:$0xf0]  ;;  %v13931_v11 = vld [vmem:[#allocation5 + $0x344] sm:$0xf]  ;;  %v9634_v17 = vor.u32 %v13867_v7, %v9631_v8 }
  0x9a   :  { %v11005_v12 = vld [vmem:[#allocation5 + $0xc00] sm:$0xf]  ;;  %v11294_v22 = vor.u32 %v14287_v10, %v11293_v9  ;;  %3378 = vmatpush.bf16.msrb.mxu0 %v10526_v18  ;;  %v10434_v9 = vor.u32 %v14067_v61, %v10431_v0  ;;  %v10146_v10 = vor.u32 %v13995_v1, %v10143_v2  ;;  %v9567_v34 = vld [vmem:[#allocation5 + $0xe0] sm:$0xf0] }
  0x9b   :  { %v14215_v13 = vld [vmem:[#allocation5 + $0xc1c] sm:$0xf0]  ;;  %v9823_v38 = vld [vmem:[#allocation5 + $0x2e0] sm:$0xf0]  ;;  %v9570_v51 = vor.u32 %v13851_v33, %v9567_v34 }
  0x9c   :  { %v10749_v14 = vld [vmem:[#allocation5 + $0xa00] sm:$0xf]  ;;  %v11006_v23 = vor.u32 %v14215_v13, %v11005_v12  ;;  %3432 = vmatpush.bf16.msrb.mxu3 %v11294_v22  ;;  %v9887_v12 = vld [vmem:[#allocation5 + $0x360] sm:$0xf0]  ;;  %v9826_v55 = vor.u32 %v13915_v37, %v9823_v38 }
  0x9d   :  { %v14151_v15 = vld [vmem:[#allocation5 + $0xa1c] sm:$0xf0]  ;;  %v14059_v13 = vld [vmem:[#allocation5 + $0x744] sm:$0xf]  ;;  %v9890_v18 = vor.u32 %v13931_v11, %v9887_v12 }
  0x9e   :  { %v10493_v19 = vld [vmem:[#allocation5 + $0x800] sm:$0xf]  ;;  %v10750_v27 = vor.u32 %v14151_v15, %v10749_v14  ;;  %3415 = vmatpush.bf16.msrb.mxu2 %v11006_v23  ;;  %v10399_v14 = vld [vmem:[#allocation5 + $0x760] sm:$0xf0] }
  0x9f   :  { %v14087_v24 = vld [vmem:[#allocation5 + $0x81c] sm:$0xf0]  ;;  %v13987_v15 = vld [vmem:[#allocation5 + $0x504] sm:$0xf]  ;;  %v10402_v21 = vor.u32 %v14059_v13, %v10399_v14 }
  0xa0   :  { %v11261_v25 = vld [vmem:[#allocation5 + $0xe00] sm:$0xf]  ;;  %v10494_v40 = vor.u32 %v14087_v24, %v10493_v19  ;;  %3397 = vmatpush.bf16.msrb.mxu1 %v10750_v27  ;;  %v13859_v19 = vld [vmem:[#allocation5 + $0x104] sm:$0xf]  ;;  %v10114_v22 = vor.u32 %v13987_v15, %v10111_v16 }
  0xa1   :  { %v14279_v26 = vld [vmem:[#allocation5 + $0xe1c] sm:$0xf0]  ;;  %3416 = vmatmul.bf16.vlgmr.msrb.gmra.mxu2 %v15241_v3  ;;  %v13923_v23 = vld [vmem:[#allocation5 + $0x304] sm:$0xf]  ;;  %v9602_v30 = vor.u32 %v13859_v19, %v9599_v20 }
  0xa2   :  { %v11262_v45 = vor.u32 %v14279_v26, %v11261_v25  ;;  %3480 = vmatpush.bf16.msra.mxu2 %v10210_v32  ;;  %3379 = vmatpush.bf16.msrb.mxu0 %v10494_v40  ;;  %v9855_v24 = vld [vmem:[#allocation5 + $0x320] sm:$0xf0]  ;;  %v141_v32 = vld [vmem:[#allocation2 + $0x58] sm:$0xff]  ;;  %v704_v40 = vunpack.c.l.b16 %v140_v29 }
  0xa3   :  { %3398 = vmatmul.bf16.vlgmr.msrb.gmra.mxu1 %v15239_v63  ;;  %v14051_v25 = vld [vmem:[#allocation5 + $0x704] sm:$0xf]  ;;  %v9858_v31 = vor.u32 %v13923_v23, %v9855_v24  ;;  %v706_v46 = vunpack.c.l.b16 %v141_v32 }
  0xa4   :  { %3462 = vmatpush.bf16.msra.mxu1 %v9954_v36  ;;  %3433 = vmatpush.bf16.msrb.mxu3 %v11262_v45  ;;  %v10367_v26 = vld [vmem:[#allocation5 + $0x720] sm:$0xf0]  ;;  %v15249_v2 = vpack.c.b16 %v704_v40, %v704_v40 }
  0xa5   :  { %3380 = vmatmul.bf16.vlgmr.msrb.gmra.mxu0 %v15237_v62  ;;  %v13979_v27 = vld [vmem:[#allocation5 + $0x4c4] sm:$0xf]  ;;  %v10370_v35 = vor.u32 %v14051_v25, %v10367_v26 }
  0xa6   :  { %3444 = vmatpush.bf16.msra.mxu0 %v9698_v50  ;;  %3481 = vmatpush.bf16.msra.mxu2 %v10178_v58  ;;  %v10082_v36 = vor.u32 %v13979_v27, %v10079_v28  ;;  %v14043_v39 = vld [vmem:[#allocation5 + $0x6c4] sm:$0xf]  ;;  %v707_v50 = vunpack.c.h.b16 %v141_v32 }
  0xa7   :  { %3434 = vmatmul.bf16.vlgmr.msrb.gmra.mxu3 %v15243_v4  ;;  %v10335_v43 = vld [vmem:[#allocation5 + $0x6e0] sm:$0xf0] }
  0xa8   :  { %3498 = vmatpush.bf16.msra.mxu3 %v10466_v56  ;;  %3463 = vmatpush.bf16.msra.mxu1 %v9922_v6  ;;  %v13971_v44 = vld [vmem:[#allocation5 + $0x484] sm:$0xf]  ;;  %v10338_v59 = vor.u32 %v14043_v39, %v10335_v43 }
  0xa9   :  { %v10047_v45 = vld [vmem:[#allocation5 + $0x4a0] sm:$0xf0] }
  0xaa   :  { %3445 = vmatpush.bf16.msra.mxu0 %v9666_v5  ;;  %3482 = vmatpush.bf16.msra.mxu2 %v10146_v10  ;;  %v13843_v56 = vld [vmem:[#allocation5 + $0x84] sm:$0xf]  ;;  %v10050_v60 = vor.u32 %v13971_v44, %v10047_v45  ;;  %v15251_v5 = vpack.c.b16 %v705_v41, %v705_v41  ;;  %v15255_v10 = vpack.c.b16 %v707_v50, %v707_v50 }
  0xab   :  { %v9535_v58 = vld [vmem:[#allocation5 + $0xa0] sm:$0xf0] }
  0xac   :  { %3499 = vmatpush.bf16.msra.mxu3 %v10434_v9  ;;  %3464 = vmatpush.bf16.msra.mxu1 %v9890_v18  ;;  %v13907_v61 = vld [vmem:[#allocation5 + $0x284] sm:$0xf]  ;;  %v15253_v9 = vpack.c.b16 %v706_v46, %v706_v46  ;;  %v9538_v11 = vor.u32 %v13843_v56, %v9535_v58 }
  0xad   :  { %v9791_v0 = vld [vmem:[#allocation5 + $0x2a0] sm:$0xf0] }
  0xae   :  { %3446 = vmatpush.bf16.msra.mxu0 %v9634_v17  ;;  %3483 = vmatpush.bf16.msra.mxu2 %v10114_v22  ;;  %v14035_v1 = vld [vmem:[#allocation5 + $0x684] sm:$0xf]  ;;  %v9794_v12 = vor.u32 %v13907_v61, %v9791_v0 }
  0xaf   :  { %v10303_v6 = vld [vmem:[#allocation5 + $0x6a0] sm:$0xf0] }
  0xb0   :  { %3500 = vmatpush.bf16.msra.mxu3 %v10402_v21  ;;  %3465 = vmatpush.bf16.msra.mxu1 %v9858_v31  ;;  %v13963_v7 = vld [vmem:[#allocation5 + $0x444] sm:$0xf]  ;;  %v10306_v15 = vor.u32 %v14035_v1, %v10303_v6 }
  0xb1   :  { %v10015_v8 = vld [vmem:[#allocation5 + $0x460] sm:$0xf0]  ;;  %3421 = vmatmul.bf16.gmra.mxu2 %v15253_v9 }
  0xb2   :  { %3447 = vmatpush.bf16.msra.mxu0 %v9602_v30  ;;  %3484 = vmatpush.bf16.msra.mxu2 %v10082_v36  ;;  %v13835_v13 = vld [vmem:[#allocation5 + $0x44] sm:$0xf]  ;;  %v10018_v16 = vor.u32 %v13963_v7, %v10015_v8 }
  0xb3   :  { %v9503_v14 = vld [vmem:[#allocation5 + $0x60] sm:$0xf0]  ;;  %3403 = vmatmul.bf16.gmra.mxu1 %v15251_v5 }
  0xb4   :  { %3501 = vmatpush.bf16.msra.mxu3 %v10370_v35  ;;  %3466 = vmatpush.bf16.msra.mxu1 %v9826_v55  ;;  %v13899_v17 = vld [vmem:[#allocation5 + $0x244] sm:$0xf]  ;;  %v9506_v25 = vor.u32 %v13835_v13, %v9503_v14 }
  0xb5   :  { %v9759_v18 = vld [vmem:[#allocation5 + $0x260] sm:$0xf0]  ;;  %3385 = vmatmul.bf16.gmra.mxu0 %v15249_v2 }
  0xb6   :  { %3448 = vmatpush.bf16.msra.mxu0 %v9570_v51  ;;  %3485 = vmatpush.bf16.msra.mxu2 %v10050_v60  ;;  %v14027_v19 = vld [vmem:[#allocation5 + $0x644] sm:$0xf]  ;;  %v9762_v26 = vor.u32 %v13899_v17, %v9759_v18 }
  0xb7   :  { %v10271_v20 = vld [vmem:[#allocation5 + $0x660] sm:$0xf0]  ;;  %3439 = vmatmul.bf16.gmra.mxu3 %v15255_v10 }
  0xb8   :  { %3502 = vmatpush.bf16.msra.mxu3 %v10338_v59  ;;  %v13955_v21 = vld [vmem:[#allocation5 + $0x404] sm:$0xf]  ;;  %3467 = vmatpush.bf16.msra.mxu1 %v9794_v12  ;;  %v10274_v30 = vor.u32 %v14027_v19, %v10271_v20 }
  0xb9   :  { %v9983_v22 = vld [vmem:[#allocation5 + $0x420] sm:$0xf0] }
  0xba   :  { %v14267_v23 = vld [vmem:[#allocation5 + $0xdc4] sm:$0xf]  ;;  %3449 = vmatpush.bf16.msra.mxu0 %v9538_v11  ;;  %3486 = vmatpush.bf16.msra.mxu2 %v10018_v16  ;;  %v9986_v31 = vor.u32 %v13955_v21, %v9983_v22 }
  0xbb   :  { %v11231_v24 = vld [vmem:[#allocation5 + $0xde0] sm:$0xf0] }
  0xbc   :  { %v13827_v27 = vld [vmem:[#allocation5 + $0x4] sm:$0xf]  ;;  %3503 = vmatpush.bf16.msra.mxu3 %v10306_v15  ;;  %v11234_v35 = vor.u32 %v14267_v23, %v11231_v24  ;;  %3468 = vmatpush.bf16.msra.mxu1 %v9762_v26 }
  0xbd   :  { %v9471_v28 = vld [vmem:[#allocation5 + $0x20] sm:$0xf0] }
  0xbe   :  { %v13891_v29 = vld [vmem:[#allocation5 + $0x204] sm:$0xf]  ;;  %3450 = vmatpush.bf16.msra.mxu0 %v9506_v25  ;;  %v9474_v43 = vor.u32 %v13827_v27, %v9471_v28  ;;  %3487 = vmatpush.bf16.msra.mxu2 %v9986_v31 }
  0xbf   :  { %v9727_v32 = vld [vmem:[#allocation5 + $0x220] sm:$0xf0] }
  0xc0   :  { %v14019_v33 = vld [vmem:[#allocation5 + $0x604] sm:$0xf]  ;;  %v9730_v44 = vor.u32 %v13891_v29, %v9727_v32  ;;  %3504 = vmatpush.bf16.msra.mxu3 %v10274_v30 }
  0xc1   :  { %v10239_v34 = vld [vmem:[#allocation5 + $0x620] sm:$0xf0]  ;;  %3488 = vmatmul.bf16.vlgmr.msra.gmra.mxu2 %v15217_v54 }
  0xc2   :  { %v14139_v36 = vld [vmem:[#allocation5 + $0x9c4] sm:$0xf]  ;;  %v10242_v50 = vor.u32 %v14019_v33, %v10239_v34  ;;  %3552 = vmatpush.bf16.msrb.mxu2 %v11234_v35  ;;  %3451 = vmatpush.bf16.msra.mxu0 %v9474_v43 }
  0xc3   :  { %v10719_v37 = vld [vmem:[#allocation5 + $0x9e0] sm:$0xf0]  ;;  %3469 = vmatpush.bf16.msra.mxu1 %v9730_v44 }
  0xc4   :  { %v14203_v38 = vld [vmem:[#allocation5 + $0xbc4] sm:$0xf]  ;;  %v10722_v51 = vor.u32 %v14139_v36, %v10719_v37  ;;  %3505 = vmatpush.bf16.msra.mxu3 %v10242_v50 }
  0xc5   :  { %v10975_v39 = vld [vmem:[#allocation5 + $0xbe0] sm:$0xf0]  ;;  %3452 = vmatmul.bf16.vlgmr.msra.gmra.mxu0 %v15213_v48 }
  0xc6   :  { %v14331_v40 = vld [vmem:[#allocation5 + $0xfc4] sm:$0xf]  ;;  %v10978_v55 = vor.u32 %v14203_v38, %v10975_v39  ;;  %3516 = vmatpush.bf16.msrb.mxu0 %v10722_v51  ;;  %3470 = vmatmul.bf16.vlgmr.msra.gmra.mxu1 %v15215_v53 }
  0xc7   :  { %v11487_v41 = vld [vmem:[#allocation5 + $0xfe0] sm:$0xf0]  ;;  %3506 = vmatmul.bf16.vlgmr.msra.gmra.mxu3 %v15219_v57 }
  0xc8   :  { %v14259_v45 = vld [vmem:[#allocation5 + $0xd84] sm:$0xf]  ;;  %v11490_v56 = vor.u32 %v14331_v40, %v11487_v41  ;;  %3534 = vmatpush.bf16.msrb.mxu1 %v10978_v55 }
  0xc9   :  { %v11199_v46 = vld [vmem:[#allocation5 + $0xda0] sm:$0xf0] }
  0xca   :  { %v14131_v58 = vld [vmem:[#allocation5 + $0x984] sm:$0xf]  ;;  %v11202_v60 = vor.u32 %v14259_v45, %v11199_v46  ;;  %3570 = vmatpush.bf16.msrb.mxu3 %v11490_v56 }
  0xcb   :  { %v10687_v59 = vld [vmem:[#allocation5 + $0x9a0] sm:$0xf0] }
  0xcc   :  { %v14195_v61 = vld [vmem:[#allocation5 + $0xb84] sm:$0xf]  ;;  %v10690_v1 = vor.u32 %v14131_v58, %v10687_v59  ;;  %3553 = vmatpush.bf16.msrb.mxu2 %v11202_v60 }
  0xcd   :  { %v10943_v0 = vld [vmem:[#allocation5 + $0xba0] sm:$0xf0] }
  0xce   :  { %v14323_v6 = vld [vmem:[#allocation5 + $0xf84] sm:$0xf]  ;;  %v10946_v14 = vor.u32 %v14195_v61, %v10943_v0  ;;  %3517 = vmatpush.bf16.msrb.mxu0 %v10690_v1 }
  0xcf   :  { %v11455_v7 = vld [vmem:[#allocation5 + $0xfa0] sm:$0xf0] }
  0xd0   :  { %v14251_v8 = vld [vmem:[#allocation5 + $0xd44] sm:$0xf]  ;;  %v11458_v15 = vor.u32 %v14323_v6, %v11455_v7  ;;  %3535 = vmatpush.bf16.msrb.mxu1 %v10946_v14 }
  0xd1   :  { %v11167_v11 = vld [vmem:[#allocation5 + $0xd60] sm:$0xf0]  ;;  %3493 = vmatmul.bf16.gmra.mxu2 %v15229_v49 }
  0xd2   :  { %v14123_v12 = vld [vmem:[#allocation5 + $0x944] sm:$0xf]  ;;  %v11170_v18 = vor.u32 %v14251_v8, %v11167_v11  ;;  %3571 = vmatpush.bf16.msrb.mxu3 %v11458_v15 }
  0xd3   :  { %v10655_v13 = vld [vmem:[#allocation5 + $0x960] sm:$0xf0] }
  0xd4   :  { %v14187_v16 = vld [vmem:[#allocation5 + $0xb44] sm:$0xf]  ;;  %v10658_v19 = vor.u32 %v14123_v12, %v10655_v13  ;;  %3554 = vmatpush.bf16.msrb.mxu2 %v11170_v18 }
  0xd5   :  { %v10911_v17 = vld [vmem:[#allocation5 + $0xb60] sm:$0xf0]  ;;  %3457 = vmatmul.bf16.gmra.mxu0 %v15225_v42 }
  0xd6   :  { %v14315_v20 = vld [vmem:[#allocation5 + $0xf44] sm:$0xf]  ;;  %v10914_v26 = vor.u32 %v14187_v16, %v10911_v17  ;;  %3518 = vmatpush.bf16.msrb.mxu0 %v10658_v19  ;;  %3475 = vmatmul.bf16.gmra.mxu1 %v15227_v47 }
  0xd7   :  { %v11423_v21 = vld [vmem:[#allocation5 + $0xf60] sm:$0xf0]  ;;  %3511 = vmatmul.bf16.gmra.mxu3 %v15231_v52 }
  0xd8   :  { %v14243_v22 = vld [vmem:[#allocation5 + $0xd04] sm:$0xf]  ;;  %v11426_v27 = vor.u32 %v14315_v20, %v11423_v21  ;;  %3536 = vmatpush.bf16.msrb.mxu1 %v10914_v26  ;;  %v10213_v26 = vld [vmem:[#allocation5 + $0x5c8] sm:$0xf] }
  0xd9   :  { %v11135_v23 = vld [vmem:[#allocation5 + $0xd20] sm:$0xf0] }
  0xda   :  { %v14115_v24 = vld [vmem:[#allocation5 + $0x904] sm:$0xf]  ;;  %v11138_v30 = vor.u32 %v14243_v22, %v11135_v23  ;;  %3572 = vmatpush.bf16.msrb.mxu3 %v11426_v27  ;;  %v14016_v27 = vld [vmem:[#allocation5 + $0x5e4] sm:$0xf0] }
  0xdb   :  { %v10623_v25 = vld [vmem:[#allocation5 + $0x920] sm:$0xf0] }
  0xdc   :  { %v14179_v28 = vld [vmem:[#allocation5 + $0xb04] sm:$0xf]  ;;  %v10626_v31 = vor.u32 %v14115_v24, %v10623_v25  ;;  %3555 = vmatpush.bf16.msrb.mxu2 %v11138_v30 }
  0xdd   :  { %v10879_v29 = vld [vmem:[#allocation5 + $0xb20] sm:$0xf0] }
  0xde   :  { %v14307_v32 = vld [vmem:[#allocation5 + $0xf04] sm:$0xf]  ;;  %v10882_v38 = vor.u32 %v14179_v28, %v10879_v29  ;;  %3519 = vmatpush.bf16.msrb.mxu0 %v10626_v31  ;;  %v9701_v28 = vld [vmem:[#allocation5 + $0x1c8] sm:$0xf] }
  0xdf   :  { %v11391_v33 = vld [vmem:[#allocation5 + $0xf20] sm:$0xf0]  ;;  %v13888_v29 = vld [vmem:[#allocation5 + $0x1e4] sm:$0xf0] }
  0xe0   :  { %v14235_v34 = vld [vmem:[#allocation5 + $0xcc4] sm:$0xf]  ;;  %v11394_v39 = vor.u32 %v14307_v32, %v11391_v33  ;;  %3537 = vmatpush.bf16.msrb.mxu1 %v10882_v38  ;;  %v9957_v38 = vld [vmem:[#allocation5 + $0x3c8] sm:$0xf] }
  0xe1   :  { %v11103_v35 = vld [vmem:[#allocation5 + $0xce0] sm:$0xf0] }
  0xe2   :  { %v14107_v36 = vld [vmem:[#allocation5 + $0x8c4] sm:$0xf]  ;;  %v11106_v43 = vor.u32 %v14235_v34, %v11103_v35  ;;  %3573 = vmatpush.bf16.msrb.mxu3 %v11394_v39  ;;  %v13952_v39 = vld [vmem:[#allocation5 + $0x3e4] sm:$0xf0] }
  0xe3   :  { %v10591_v37 = vld [vmem:[#allocation5 + $0x8e0] sm:$0xf0] }
  0xe4   :  { %v14171_v40 = vld [vmem:[#allocation5 + $0xac4] sm:$0xf]  ;;  %v10594_v44 = vor.u32 %v14107_v36, %v10591_v37  ;;  %3556 = vmatpush.bf16.msrb.mxu2 %v11106_v43  ;;  %v10469_v43 = vld [vmem:[#allocation5 + $0x7c8] sm:$0xf] }
  0xe5   :  { %v10847_v41 = vld [vmem:[#allocation5 + $0xae0] sm:$0xf0] }
  0xe6   :  { %v14299_v45 = vld [vmem:[#allocation5 + $0xec4] sm:$0xf]  ;;  %v10850_v58 = vor.u32 %v14171_v40, %v10847_v41  ;;  %3520 = vmatpush.bf16.msrb.mxu0 %v10594_v44  ;;  %v10214_v40 = vor.u32 %v14016_v27, %v10213_v26  ;;  %v9702_v41 = vor.u32 %v13888_v29, %v9701_v28  ;;  %v14080_v44 = vld [vmem:[#allocation5 + $0x7e4] sm:$0xf0] }
  0xe7   :  { %v11359_v46 = vld [vmem:[#allocation5 + $0xee0] sm:$0xf0]  ;;  %v9605_v26 = vld [vmem:[#allocation5 + $0x108] sm:$0xf] }
  0xe8   :  { %v14227_v50 = vld [vmem:[#allocation5 + $0xc84] sm:$0xf]  ;;  %v11362_v59 = vor.u32 %v14299_v45, %v11359_v46  ;;  %3538 = vmatpush.bf16.msrb.mxu1 %v10850_v58  ;;  %v10181_v45 = vld [vmem:[#allocation5 + $0x588] sm:$0xf]  ;;  %v9958_v58 = vor.u32 %v13952_v39, %v9957_v38 }
  0xe9   :  { %v11071_v51 = vld [vmem:[#allocation5 + $0xca0] sm:$0xf0]  ;;  %v14008_v46 = vld [vmem:[#allocation5 + $0x5a4] sm:$0xf0] }
  0xea   :  { %v14099_v55 = vld [vmem:[#allocation5 + $0x884] sm:$0xf]  ;;  %v11074_v0 = vor.u32 %v14227_v50, %v11071_v51  ;;  %3574 = vmatpush.bf16.msrb.mxu3 %v11362_v59  ;;  %v9669_v50 = vld [vmem:[#allocation5 + $0x188] sm:$0xf]  ;;  %v10470_v59 = vor.u32 %v14080_v44, %v10469_v43 }
  0xeb   :  { %v10559_v56 = vld [vmem:[#allocation5 + $0x8a0] sm:$0xf0]  ;;  %v13880_v51 = vld [vmem:[#allocation5 + $0x1a4] sm:$0xf0] }
  0xec   :  { %v14163_v60 = vld [vmem:[#allocation5 + $0xa84] sm:$0xf]  ;;  %v10562_v1 = vor.u32 %v14099_v55, %v10559_v56  ;;  %3557 = vmatpush.bf16.msrb.mxu2 %v11074_v0  ;;  %v9670_v0 = vor.u32 %v13880_v51, %v9669_v50  ;;  %v13864_v27 = vld [vmem:[#allocation5 + $0x124] sm:$0xf0] }
  0xed   :  { %v10815_v61 = vld [vmem:[#allocation5 + $0xaa0] sm:$0xf0]  ;;  %v9861_v28 = vld [vmem:[#allocation5 + $0x308] sm:$0xf] }
  0xee   :  { %v14291_v6 = vld [vmem:[#allocation5 + $0xe84] sm:$0xf]  ;;  %v10818_v14 = vor.u32 %v14163_v60, %v10815_v61  ;;  %3521 = vmatpush.bf16.msrb.mxu0 %v10562_v1  ;;  %v9925_v60 = vld [vmem:[#allocation5 + $0x388] sm:$0xf]  ;;  %v10182_v61 = vor.u32 %v14008_v46, %v10181_v45 }
  0xef   :  { %v11327_v7 = vld [vmem:[#allocation5 + $0xea0] sm:$0xf0]  ;;  %v13944_v1 = vld [vmem:[#allocation5 + $0x3a4] sm:$0xf0] }
  0xf0   :  { %v14219_v8 = vld [vmem:[#allocation5 + $0xc44] sm:$0xf]  ;;  %v11330_v15 = vor.u32 %v14291_v6, %v11327_v7  ;;  %3539 = vmatpush.bf16.msrb.mxu1 %v10818_v14  ;;  %v10437_v6 = vld [vmem:[#allocation5 + $0x788] sm:$0xf] }
  0xf1   :  { %v11039_v11 = vld [vmem:[#allocation5 + $0xc60] sm:$0xf0]  ;;  %v14072_v7 = vld [vmem:[#allocation5 + $0x7a4] sm:$0xf0] }
  0xf2   :  { %v14091_v12 = vld [vmem:[#allocation5 + $0x844] sm:$0xf]  ;;  %v11042_v19 = vor.u32 %v14219_v8, %v11039_v11  ;;  %3575 = vmatpush.bf16.msrb.mxu3 %v11330_v15  ;;  %v10149_v8 = vld [vmem:[#allocation5 + $0x548] sm:$0xf] }
  0xf3   :  { %v10527_v13 = vld [vmem:[#allocation5 + $0x860] sm:$0xf0]  ;;  %v14000_v11 = vld [vmem:[#allocation5 + $0x564] sm:$0xf0] }
  0xf4   :  { %v14155_v16 = vld [vmem:[#allocation5 + $0xa44] sm:$0xf]  ;;  %v10530_v20 = vor.u32 %v14091_v12, %v10527_v13  ;;  %3558 = vmatpush.bf16.msrb.mxu2 %v11042_v19  ;;  %v9926_v12 = vor.u32 %v13944_v1, %v9925_v60  ;;  %v10438_v13 = vor.u32 %v14072_v7, %v10437_v6  ;;  %v9637_v14 = vld [vmem:[#allocation5 + $0x148] sm:$0xf] }
  0xf5   :  { %v10783_v17 = vld [vmem:[#allocation5 + $0xa60] sm:$0xf0]  ;;  %v13872_v15 = vld [vmem:[#allocation5 + $0x164] sm:$0xf0] }
  0xf6   :  { %v14283_v18 = vld [vmem:[#allocation5 + $0xe44] sm:$0xf]  ;;  %v10786_v30 = vor.u32 %v14155_v16, %v10783_v17  ;;  %3522 = vmatpush.bf16.msrb.mxu0 %v10530_v20  ;;  %v9893_v16 = vld [vmem:[#allocation5 + $0x348] sm:$0xf]  ;;  %v10150_v20 = vor.u32 %v14000_v11, %v10149_v8 }
  0xf7   :  { %v11295_v21 = vld [vmem:[#allocation5 + $0xe60] sm:$0xf0]  ;;  %v13936_v17 = vld [vmem:[#allocation5 + $0x364] sm:$0xf0] }
  0xf8   :  { %v14211_v22 = vld [vmem:[#allocation5 + $0xc04] sm:$0xf]  ;;  %v11298_v31 = vor.u32 %v14283_v18, %v11295_v21  ;;  %3540 = vmatpush.bf16.msrb.mxu1 %v10786_v30  ;;  %v10405_v18 = vld [vmem:[#allocation5 + $0x748] sm:$0xf]  ;;  %v9638_v21 = vor.u32 %v13872_v15, %v9637_v14 }
  0xf9   :  { %v11007_v23 = vld [vmem:[#allocation5 + $0xc20] sm:$0xf0]  ;;  %v14064_v19 = vld [vmem:[#allocation5 + $0x764] sm:$0xf0] }
  0xfa   :  { %v14083_v24 = vld [vmem:[#allocation5 + $0x804] sm:$0xf]  ;;  %v11010_v35 = vor.u32 %v14211_v22, %v11007_v23  ;;  %3576 = vmatpush.bf16.msrb.mxu3 %v11298_v31  ;;  %v10117_v22 = vld [vmem:[#allocation5 + $0x508] sm:$0xf] }
  0xfb   :  { %v10495_v25 = vld [vmem:[#allocation5 + $0x820] sm:$0xf0]  ;;  %v13992_v23 = vld [vmem:[#allocation5 + $0x524] sm:$0xf0] }
  0xfc   :  { %v14147_v32 = vld [vmem:[#allocation5 + $0xa04] sm:$0xf]  ;;  %v10498_v36 = vor.u32 %v14083_v24, %v10495_v25  ;;  %3559 = vmatpush.bf16.msrb.mxu2 %v11010_v35  ;;  %v9894_v24 = vor.u32 %v13936_v17, %v9893_v16  ;;  %v10406_v25 = vor.u32 %v14064_v19, %v10405_v18  ;;  %v13928_v29 = vld [vmem:[#allocation5 + $0x324] sm:$0xf0] }
  0xfd   :  { %v10751_v33 = vld [vmem:[#allocation5 + $0xa20] sm:$0xf0]  ;;  %v10373_v30 = vld [vmem:[#allocation5 + $0x708] sm:$0xf] }
  0xfe   :  { %v14275_v34 = vld [vmem:[#allocation5 + $0xe04] sm:$0xf]  ;;  %v10754_v55 = vor.u32 %v14147_v32, %v10751_v33  ;;  %3523 = vmatpush.bf16.msrb.mxu0 %v10498_v36  ;;  %v14056_v31 = vld [vmem:[#allocation5 + $0x724] sm:$0xf0]  ;;  %v10118_v32 = vor.u32 %v13992_v23, %v10117_v22  ;;  %v9606_v33 = vor.u32 %v13864_v27, %v9605_v26  ;;  %v9862_v36 = vor.u32 %v13928_v29, %v9861_v28 }
  0xff   :  { %v11263_v37 = vld [vmem:[#allocation5 + $0xe20] sm:$0xf0]  ;;  %3560 = vmatmul.bf16.vlgmr.msrb.gmra.mxu2 %v15241_v3  ;;  %v13984_v35 = vld [vmem:[#allocation5 + $0x4e4] sm:$0xf0] }
 0x100   :  { %v11266_v56 = vor.u32 %v14275_v34, %v11263_v37  ;;  %3624 = vmatpush.bf16.msra.mxu2 %v10214_v40  ;;  %3541 = vmatpush.bf16.msrb.mxu1 %v10754_v55  ;;  %v10085_v34 = vld [vmem:[#allocation5 + $0x4c8] sm:$0xf]  ;;  %v10374_v37 = vor.u32 %v14056_v31, %v10373_v30 }
 0x101   :  { %3524 = vmatmul.bf16.vlgmr.msrb.gmra.mxu0 %v15237_v62  ;;  %v9573_v38 = vld [vmem:[#allocation5 + $0xc8] sm:$0xf]  ;;  %v10086_v45 = vor.u32 %v13984_v35, %v10085_v34 }
 0x102   :  { %3588 = vmatpush.bf16.msra.mxu0 %v9702_v41  ;;  %3577 = vmatpush.bf16.msrb.mxu3 %v11266_v56  ;;  %v13856_v39 = vld [vmem:[#allocation5 + $0xe4] sm:$0xf0] }
 0x103   :  { %3542 = vmatmul.bf16.vlgmr.msrb.gmra.mxu1 %v15239_v63  ;;  %v9829_v40 = vld [vmem:[#allocation5 + $0x2c8] sm:$0xf]  ;;  %v9574_v46 = vor.u32 %v13856_v39, %v9573_v38 }
 0x104   :  { %3606 = vmatpush.bf16.msra.mxu1 %v9958_v58  ;;  %3625 = vmatpush.bf16.msra.mxu2 %v10182_v61  ;;  %v13920_v41 = vld [vmem:[#allocation5 + $0x2e4] sm:$0xf0] }
 0x105   :  { %3578 = vmatmul.bf16.vlgmr.msrb.gmra.mxu3 %v15243_v4  ;;  %v10341_v43 = vld [vmem:[#allocation5 + $0x6c8] sm:$0xf]  ;;  %v9830_v55 = vor.u32 %v13920_v41, %v9829_v40 }
 0x106   :  { %3642 = vmatpush.bf16.msra.mxu3 %v10470_v59  ;;  %3589 = vmatpush.bf16.msra.mxu0 %v9670_v0  ;;  %v14048_v44 = vld [vmem:[#allocation5 + $0x6e4] sm:$0xf0] }
 0x107   :  { %v10053_v50 = vld [vmem:[#allocation5 + $0x488] sm:$0xf]  ;;  %v10342_v56 = vor.u32 %v14048_v44, %v10341_v43 }
 0x108   :  { %3607 = vmatpush.bf16.msra.mxu1 %v9926_v12  ;;  %3626 = vmatpush.bf16.msra.mxu2 %v10150_v20  ;;  %v13976_v51 = vld [vmem:[#allocation5 + $0x4a4] sm:$0xf0] }
 0x109   :  { %v9541_v58 = vld [vmem:[#allocation5 + $0x88] sm:$0xf]  ;;  %v10054_v6 = vor.u32 %v13976_v51, %v10053_v50 }
 0x10a   :  { %3643 = vmatpush.bf16.msra.mxu3 %v10438_v13  ;;  %3590 = vmatpush.bf16.msra.mxu0 %v9638_v21  ;;  %v13848_v59 = vld [vmem:[#allocation5 + $0xa4] sm:$0xf0] }
 0x10b   :  { %v9797_v60 = vld [vmem:[#allocation5 + $0x288] sm:$0xf]  ;;  %v9542_v7 = vor.u32 %v13848_v59, %v9541_v58 }
 0x10c   :  { %3608 = vmatpush.bf16.msra.mxu1 %v9894_v24  ;;  %3627 = vmatpush.bf16.msra.mxu2 %v10118_v32  ;;  %v13912_v61 = vld [vmem:[#allocation5 + $0x2a4] sm:$0xf0] }
 0x10d   :  { %v10309_v0 = vld [vmem:[#allocation5 + $0x688] sm:$0xf]  ;;  %v9798_v12 = vor.u32 %v13912_v61, %v9797_v60 }
 0x10e   :  { %3644 = vmatpush.bf16.msra.mxu3 %v10406_v25  ;;  %3591 = vmatpush.bf16.msra.mxu0 %v9606_v33  ;;  %v14040_v1 = vld [vmem:[#allocation5 + $0x6a4] sm:$0xf0] }
 0x10f   :  { %v10021_v8 = vld [vmem:[#allocation5 + $0x448] sm:$0xf]  ;;  %v10310_v13 = vor.u32 %v14040_v1, %v10309_v0  ;;  %3565 = vmatmul.bf16.gmra.mxu2 %v15253_v9 }
 0x110   :  { %3609 = vmatpush.bf16.msra.mxu1 %v9862_v36  ;;  %3628 = vmatpush.bf16.msra.mxu2 %v10086_v45  ;;  %v13968_v11 = vld [vmem:[#allocation5 + $0x464] sm:$0xf0]  ;;  %v15277_v45 = vld [vmem:[#allocation7] sm:$0xff] }
 0x111   :  { %v9509_v14 = vld [vmem:[#allocation5 + $0x48] sm:$0xf]  ;;  %v10022_v21 = vor.u32 %v13968_v11, %v10021_v8  ;;  %3529 = vmatmul.bf16.gmra.mxu0 %v15249_v2  ;;  %v15280_v11 = vperm.slane %v15277_v45, 0 }
 0x112   :  { %3645 = vmatpush.bf16.msra.mxu3 %v10374_v37  ;;  %3592 = vmatpush.bf16.msra.mxu0 %v9574_v46  ;;  %v13840_v15 = vld [vmem:[#allocation5 + $0x64] sm:$0xf0] }
 0x113   :  { %v9765_v16 = vld [vmem:[#allocation5 + $0x248] sm:$0xf]  ;;  %v9510_v22 = vor.u32 %v13840_v15, %v9509_v14  ;;  %3547 = vmatmul.bf16.gmra.mxu1 %v15251_v5 }
 0x114   :  { %3610 = vmatpush.bf16.msra.mxu1 %v9830_v55  ;;  %v13904_v17 = vld [vmem:[#allocation5 + $0x264] sm:$0xf0]  ;;  %3629 = vmatpush.bf16.msra.mxu2 %v10054_v6 }
 0x115   :  { %v10277_v18 = vld [vmem:[#allocation5 + $0x648] sm:$0xf]  ;;  %v9766_v26 = vor.u32 %v13904_v17, %v9765_v16  ;;  %3583 = vmatmul.bf16.gmra.mxu3 %v15255_v10 }
 0x116   :  { %3646 = vmatpush.bf16.msra.mxu3 %v10342_v56  ;;  %v14032_v19 = vld [vmem:[#allocation5 + $0x664] sm:$0xf0]  ;;  %3593 = vmatpush.bf16.msra.mxu0 %v9542_v7 }
 0x117   :  { %v9989_v20 = vld [vmem:[#allocation5 + $0x408] sm:$0xf]  ;;  %v10278_v27 = vor.u32 %v14032_v19, %v10277_v18  ;;  %v3309_v19 = vpop.f32.mrf.mxu0 }
 0x118   :  { %v13960_v23 = vld [vmem:[#allocation5 + $0x424] sm:$0xf0]  ;;  %3611 = vmatpush.bf16.msra.mxu1 %v9798_v12  ;;  %3630 = vmatpush.bf16.msra.mxu2 %v10022_v21 }
 0x119   :  { %v9477_v24 = vld [vmem:[#allocation5 + $0x8] sm:$0xf]  ;;  %v9990_v37 = vor.u32 %v13960_v23, %v9989_v20  ;;  %v3310_v23 = vadd.f32 %v3309_v19, %v15280_v11 }
 0x11a   :  { %v13832_v25 = vld [vmem:[#allocation5 + $0x24] sm:$0xf0]  ;;  %3647 = vmatpush.bf16.msra.mxu3 %v10310_v13  ;;  %3594 = vmatpush.bf16.msra.mxu0 %v9510_v22 }
 0x11b   :  { %v9733_v28 = vld [vmem:[#allocation5 + $0x208] sm:$0xf]  ;;  %v9478_v38 = vor.u32 %v13832_v25, %v9477_v24  ;;  %v3327_v24 = vpop.f32.mrf.mxu1 }
 0x11c   :  { %v13896_v29 = vld [vmem:[#allocation5 + $0x224] sm:$0xf0]  ;;  %3612 = vmatpush.bf16.msra.mxu1 %v9766_v26  ;;  %3631 = vmatpush.bf16.msra.mxu2 %v9990_v37 }
 0x11d   :  { %v10245_v30 = vld [vmem:[#allocation5 + $0x608] sm:$0xf]  ;;  %v9734_v43 = vor.u32 %v13896_v29, %v9733_v28  ;;  %v3328_v29 = vadd.f32 %v3327_v24, %v3310_v23 }
 0x11e   :  { %v14024_v31 = vld [vmem:[#allocation5 + $0x624] sm:$0xf0]  ;;  %3648 = vmatpush.bf16.msra.mxu3 %v10278_v27  ;;  %3595 = vmatpush.bf16.msra.mxu0 %v9478_v38 }
 0x11f   :  { %v11237_v32 = vld [vmem:[#allocation5 + $0xdc8] sm:$0xf]  ;;  %v10246_v44 = vor.u32 %v14024_v31, %v10245_v30  ;;  %3632 = vmatmul.bf16.vlgmr.msra.gmra.mxu2 %v15217_v54 }
 0x120   :  { %v14272_v33 = vld [vmem:[#allocation5 + $0xde4] sm:$0xf0]  ;;  %3613 = vmatpush.bf16.msra.mxu1 %v9734_v43  ;;  %v3345_v43 = vpop.f32.mrf.mxu2 }
 0x121   :  { %v10725_v34 = vld [vmem:[#allocation5 + $0x9c8] sm:$0xf]  ;;  %v11238_v46 = vor.u32 %v14272_v33, %v11237_v32  ;;  %3596 = vmatmul.bf16.vlgmr.msra.gmra.mxu0 %v15213_v48 }
 0x122   :  { %v14144_v35 = vld [vmem:[#allocation5 + $0x9e4] sm:$0xf0]  ;;  %3649 = vmatpush.bf16.msra.mxu3 %v10246_v44 }
 0x123   :  { %v10981_v36 = vld [vmem:[#allocation5 + $0xbc8] sm:$0xf]  ;;  %v10726_v50 = vor.u32 %v14144_v35, %v10725_v34  ;;  %3696 = vmatpush.bf16.msrb.mxu2 %v11238_v46  ;;  %3614 = vmatmul.bf16.vlgmr.msra.gmra.mxu1 %v15215_v53 }
 0x124   :  { %v14208_v39 = vld [vmem:[#allocation5 + $0xbe4] sm:$0xf0] }
 0x125   :  { %v11493_v40 = vld [vmem:[#allocation5 + $0xfc8] sm:$0xf]  ;;  %v10982_v56 = vor.u32 %v14208_v39, %v10981_v36  ;;  %3660 = vmatpush.bf16.msrb.mxu0 %v10726_v50  ;;  %3650 = vmatmul.bf16.vlgmr.msra.gmra.mxu3 %v15219_v57 }
 0x126   :  { %v14336_v41 = vld [vmem:[#allocation5 + $0xfe4] sm:$0xf0] }
 0x127   :  { %v11205_v51 = vld [vmem:[#allocation5 + $0xd88] sm:$0xf]  ;;  %v11494_v58 = vor.u32 %v14336_v41, %v11493_v40  ;;  %3678 = vmatpush.bf16.msrb.mxu1 %v10982_v56  ;;  %v3346_v56 = vadd.f32 %v3345_v43, %v3328_v29 }
 0x128   :  { %v14264_v55 = vld [vmem:[#allocation5 + $0xda4] sm:$0xf0] }
 0x129   :  { %v10693_v59 = vld [vmem:[#allocation5 + $0x988] sm:$0xf]  ;;  %v11206_v7 = vor.u32 %v14264_v55, %v11205_v51  ;;  %3714 = vmatpush.bf16.msrb.mxu3 %v11494_v58  ;;  %v3363_v58 = vpop.f32.mrf.mxu3 }
 0x12a   :  { %v14136_v60 = vld [vmem:[#allocation5 + $0x9a4] sm:$0xf0] }
 0x12b   :  { %v10949_v61 = vld [vmem:[#allocation5 + $0xb88] sm:$0xf]  ;;  %v10694_v8 = vor.u32 %v14136_v60, %v10693_v59  ;;  %3697 = vmatpush.bf16.msrb.mxu2 %v11206_v7  ;;  %v3311_v59 = vpop.f32.mrf.mxu0  ;;  %v15288_v7 = vadd.f32 %v3363_v58, %v3346_v56 }
 0x12c   :  { %v14200_v0 = vld [vmem:[#allocation5 + $0xba4] sm:$0xf0] }
 0x12d   :  { %v11461_v1 = vld [vmem:[#allocation5 + $0xf88] sm:$0xf]  ;;  %v10950_v12 = vor.u32 %v14200_v0, %v10949_v61  ;;  %3661 = vmatpush.bf16.msrb.mxu0 %v10694_v8 }
 0x12e   :  { %v14328_v6 = vld [vmem:[#allocation5 + $0xfa4] sm:$0xf0] }
 0x12f   :  { %v11462_v13 = vor.u32 %v14328_v6, %v11461_v1  ;;  %v11173_v14 = vld [vmem:[#allocation5 + $0xd48] sm:$0xf]  ;;  %3679 = vmatpush.bf16.msrb.mxu1 %v10950_v12  ;;  %v3312_v1 = vadd.f32 %v3311_v59, %v15280_v11  ;;  %v3329_v6 = vpop.f32.mrf.mxu1  ;;  %3637 = vmatmul.bf16.gmra.mxu2 %v15229_v49 }
 0x130   :  { %v14256_v15 = vld [vmem:[#allocation5 + $0xd64] sm:$0xf0] }
 0x131   :  { %v10661_v16 = vld [vmem:[#allocation5 + $0x948] sm:$0xf]  ;;  %3715 = vmatpush.bf16.msrb.mxu3 %v11462_v13  ;;  %v11174_v25 = vor.u32 %v14256_v15, %v11173_v14  ;;  %v3330_v15 = vadd.f32 %v3329_v6, %v3312_v1  ;;  %3601 = vmatmul.bf16.gmra.mxu0 %v15225_v42  ;;  %v14012_v6 = vld [vmem:[#allocation5 + $0x5cc] sm:$0xf] }
 0x132   :  { %v14128_v17 = vld [vmem:[#allocation5 + $0x964] sm:$0xf0] }
 0x133   :  { %v10917_v18 = vld [vmem:[#allocation5 + $0xb48] sm:$0xf]  ;;  %v10662_v26 = vor.u32 %v14128_v17, %v10661_v16  ;;  %3698 = vmatpush.bf16.msrb.mxu2 %v11174_v25  ;;  %3619 = vmatmul.bf16.gmra.mxu1 %v15227_v47 }
 0x134   :  { %v14192_v20 = vld [vmem:[#allocation5 + $0xb64] sm:$0xf0] }
 0x135   :  { %v11429_v21 = vld [vmem:[#allocation5 + $0xf48] sm:$0xf]  ;;  %v10918_v30 = vor.u32 %v14192_v20, %v10917_v18  ;;  %3662 = vmatpush.bf16.msrb.mxu0 %v10662_v26  ;;  %3655 = vmatmul.bf16.gmra.mxu3 %v15231_v52 }
 0x136   :  { %v14320_v22 = vld [vmem:[#allocation5 + $0xf64] sm:$0xf0] }
 0x137   :  { %v11141_v27 = vld [vmem:[#allocation5 + $0xd08] sm:$0xf]  ;;  %v11430_v31 = vor.u32 %v14320_v22, %v11429_v21  ;;  %3680 = vmatpush.bf16.msrb.mxu1 %v10918_v30 }
 0x138   :  { %v14248_v28 = vld [vmem:[#allocation5 + $0xd24] sm:$0xf0] }
 0x139   :  { %v10629_v32 = vld [vmem:[#allocation5 + $0x908] sm:$0xf]  ;;  %v11142_v38 = vor.u32 %v14248_v28, %v11141_v27  ;;  %3716 = vmatpush.bf16.msrb.mxu3 %v11430_v31  ;;  %v3347_v28 = vpop.f32.mrf.mxu2 }
 0x13a   :  { %v14120_v33 = vld [vmem:[#allocation5 + $0x924] sm:$0xf0] }
 0x13b   :  { %v10885_v34 = vld [vmem:[#allocation5 + $0xb08] sm:$0xf]  ;;  %v10630_v39 = vor.u32 %v14120_v33, %v10629_v32  ;;  %3699 = vmatpush.bf16.msrb.mxu2 %v11142_v38 }
 0x13c   :  { %v14184_v35 = vld [vmem:[#allocation5 + $0xb24] sm:$0xf0] }
 0x13d   :  { %v11397_v36 = vld [vmem:[#allocation5 + $0xf08] sm:$0xf]  ;;  %v10886_v44 = vor.u32 %v14184_v35, %v10885_v34  ;;  %3663 = vmatpush.bf16.msrb.mxu0 %v10630_v39  ;;  %v3348_v34 = vadd.f32 %v3347_v28, %v3330_v15  ;;  %v3365_v35 = vpop.f32.mrf.mxu3  ;;  %v14004_v28 = vld [vmem:[#allocation5 + $0x58c] sm:$0xf] }
 0x13e   :  { %v14312_v37 = vld [vmem:[#allocation5 + $0xf24] sm:$0xf0] }
 0x13f   :  { %v11109_v40 = vld [vmem:[#allocation5 + $0xcc8] sm:$0xf]  ;;  %v11398_v46 = vor.u32 %v14312_v37, %v11397_v36  ;;  %3681 = vmatpush.bf16.msrb.mxu1 %v10886_v44  ;;  %v3314_v36 = vpop.f32.mrf.mxu0  ;;  %v15291_v44 = vadd.f32 %v3365_v35, %v3348_v34  ;;  %v9671_v34 = vld [vmem:[#allocation5 + $0x1a8] sm:$0xf0] }
 0x140   :  { %v14240_v41 = vld [vmem:[#allocation5 + $0xce4] sm:$0xf0]  ;;  %v13940_v35 = vld [vmem:[#allocation5 + $0x38c] sm:$0xf] }
 0x141   :  { %v10597_v50 = vld [vmem:[#allocation5 + $0x8c8] sm:$0xf]  ;;  %v11110_v8 = vor.u32 %v14240_v41, %v11109_v40  ;;  %3717 = vmatpush.bf16.msrb.mxu3 %v11398_v46  ;;  %v3315_v40 = vadd.f32 %v3314_v36, %v15280_v11  ;;  %v3332_v41 = vpop.f32.mrf.mxu1 }
 0x142   :  { %v14112_v51 = vld [vmem:[#allocation5 + $0x8e4] sm:$0xf0] }
 0x143   :  { %v10853_v55 = vld [vmem:[#allocation5 + $0xac8] sm:$0xf]  ;;  %v10598_v12 = vor.u32 %v14112_v51, %v10597_v50  ;;  %3700 = vmatpush.bf16.msrb.mxu2 %v11110_v8  ;;  %v3333_v58 = vadd.f32 %v3332_v41, %v3315_v40  ;;  %v10215_v8 = vld [vmem:[#allocation5 + $0x5e8] sm:$0xf0] }
 0x144   :  { %v14176_v60 = vld [vmem:[#allocation5 + $0xae4] sm:$0xf0] }
 0x145   :  { %v11365_v61 = vld [vmem:[#allocation5 + $0xec8] sm:$0xf]  ;;  %v10854_v16 = vor.u32 %v14176_v60, %v10853_v55  ;;  %3664 = vmatpush.bf16.msrb.mxu0 %v10598_v12  ;;  %v13884_v12 = vld [vmem:[#allocation5 + $0x1cc] sm:$0xf] }
 0x146   :  { %v14304_v0 = vld [vmem:[#allocation5 + $0xee4] sm:$0xf0] }
 0x147   :  { %v11077_v13 = vld [vmem:[#allocation5 + $0xc88] sm:$0xf]  ;;  %v11366_v17 = vor.u32 %v14304_v0, %v11365_v61  ;;  %3682 = vmatpush.bf16.msrb.mxu1 %v10854_v16 }
 0x148   :  { %v14232_v14 = vld [vmem:[#allocation5 + $0xca4] sm:$0xf0] }
 0x149   :  { %v10565_v18 = vld [vmem:[#allocation5 + $0x888] sm:$0xf]  ;;  %v11078_v24 = vor.u32 %v14232_v14, %v11077_v13  ;;  %3718 = vmatpush.bf16.msrb.mxu3 %v11366_v17  ;;  %v9703_v13 = vld [vmem:[#allocation5 + $0x1e8] sm:$0xf0] }
 0x14a   :  { %v14104_v19 = vld [vmem:[#allocation5 + $0x8a4] sm:$0xf0]  ;;  %v13948_v14 = vld [vmem:[#allocation5 + $0x3cc] sm:$0xf] }
 0x14b   :  { %v10821_v20 = vld [vmem:[#allocation5 + $0xa88] sm:$0xf]  ;;  %v10566_v25 = vor.u32 %v14104_v19, %v10565_v18  ;;  %3701 = vmatpush.bf16.msrb.mxu2 %v11078_v24  ;;  %v9959_v17 = vld [vmem:[#allocation5 + $0x3e8] sm:$0xf0]  ;;  %v3368_v24 = vpop.f32.mrf.mxu3 }
 0x14c   :  { %v14168_v21 = vld [vmem:[#allocation5 + $0xaa4] sm:$0xf0]  ;;  %v14076_v18 = vld [vmem:[#allocation5 + $0x7cc] sm:$0xf] }
 0x14d   :  { %v11333_v22 = vld [vmem:[#allocation5 + $0xe88] sm:$0xf]  ;;  %v10822_v29 = vor.u32 %v14168_v21, %v10821_v20  ;;  %3665 = vmatpush.bf16.msrb.mxu0 %v10566_v25  ;;  %v10471_v19 = vld [vmem:[#allocation5 + $0x7e8] sm:$0xf0]  ;;  %v3350_v20 = vpop.f32.mrf.mxu2  ;;  %v3316_v25 = vpop.f32.mrf.mxu0 }
 0x14e   :  { %v14296_v23 = vld [vmem:[#allocation5 + $0xea4] sm:$0xf0] }
 0x14f   :  { %v11045_v26 = vld [vmem:[#allocation5 + $0xc48] sm:$0xf]  ;;  %v11334_v30 = vor.u32 %v14296_v23, %v11333_v22  ;;  %3683 = vmatpush.bf16.msrb.mxu1 %v10822_v29  ;;  %v3351_v23 = vadd.f32 %v3350_v20, %v3333_v58  ;;  %v10183_v29 = vld [vmem:[#allocation5 + $0x5a8] sm:$0xf0] }
 0x150   :  { %v14224_v27 = vld [vmem:[#allocation5 + $0xc64] sm:$0xf0]  ;;  %v10186_v40 = vor.u32 %v14004_v28, %v10183_v29  ;;  %v9639_v58 = vld [vmem:[#allocation5 + $0x168] sm:$0xf0] }
 0x151   :  { %v10533_v31 = vld [vmem:[#allocation5 + $0x848] sm:$0xf]  ;;  %v11046_v46 = vor.u32 %v14224_v27, %v11045_v26  ;;  %3719 = vmatpush.bf16.msrb.mxu3 %v11334_v30  ;;  %v10218_v26 = vor.u32 %v14012_v6, %v10215_v8  ;;  %v9706_v27 = vor.u32 %v13884_v12, %v9703_v13  ;;  %v3334_v30 = vpop.f32.mrf.mxu1  ;;  %v15297_v36 = vadd.f32 %v3368_v24, %v3351_v23  ;;  %v13924_v20 = vld [vmem:[#allocation5 + $0x30c] sm:$0xf] }
 0x152   :  { %v14096_v32 = vld [vmem:[#allocation5 + $0x864] sm:$0xf0]  ;;  %v14052_v23 = vld [vmem:[#allocation5 + $0x70c] sm:$0xf] }
 0x153   :  { %v10789_v33 = vld [vmem:[#allocation5 + $0xa48] sm:$0xf]  ;;  %v10534_v50 = vor.u32 %v14096_v32, %v10533_v31  ;;  %3702 = vmatpush.bf16.msrb.mxu2 %v11046_v46  ;;  %v9962_v31 = vor.u32 %v13948_v14, %v9959_v17  ;;  %v10474_v32 = vor.u32 %v14076_v18, %v10471_v19  ;;  %v13988_v14 = vld [vmem:[#allocation5 + $0x50c] sm:$0xf] }
 0x154   :  { %v14160_v37 = vld [vmem:[#allocation5 + $0xa64] sm:$0xf0]  ;;  %v13860_v18 = vld [vmem:[#allocation5 + $0x10c] sm:$0xf] }
 0x155   :  { %v11301_v38 = vld [vmem:[#allocation5 + $0xe48] sm:$0xf]  ;;  %v10790_v59 = vor.u32 %v14160_v37, %v10789_v33  ;;  %3666 = vmatpush.bf16.msrb.mxu0 %v10534_v50  ;;  %v13876_v33 = vld [vmem:[#allocation5 + $0x18c] sm:$0xf] }
 0x156   :  { %v14288_v39 = vld [vmem:[#allocation5 + $0xe64] sm:$0xf0]  ;;  %v9927_v37 = vld [vmem:[#allocation5 + $0x3a8] sm:$0xf0]  ;;  %v9674_v41 = vor.u32 %v13876_v33, %v9671_v34 }
 0x157   :  { %v11013_v43 = vld [vmem:[#allocation5 + $0xc08] sm:$0xf]  ;;  %v11302_v60 = vor.u32 %v14288_v39, %v11301_v38  ;;  %3684 = vmatpush.bf16.msrb.mxu1 %v10790_v59  ;;  %v14068_v38 = vld [vmem:[#allocation5 + $0x78c] sm:$0xf] }
 0x158   :  { %v14216_v51 = vld [vmem:[#allocation5 + $0xc24] sm:$0xf0]  ;;  %v10439_v39 = vld [vmem:[#allocation5 + $0x7a8] sm:$0xf0] }
 0x159   :  { %v10501_v55 = vld [vmem:[#allocation5 + $0x808] sm:$0xf]  ;;  %v11014_v15 = vor.u32 %v14216_v51, %v11013_v43  ;;  %3720 = vmatpush.bf16.msrb.mxu3 %v11302_v60  ;;  %v9930_v43 = vor.u32 %v13940_v35, %v9927_v37  ;;  %v10442_v46 = vor.u32 %v14068_v38, %v10439_v39  ;;  %v13996_v50 = vld [vmem:[#allocation5 + $0x54c] sm:$0xf]  ;;  %v3370_v60 = vpop.f32.mrf.mxu3  ;;  %v3399_v6 = vpop.f32.mrf.mxu1 }
 0x15a   :  { %v14088_v56 = vld [vmem:[#allocation5 + $0x824] sm:$0xf0]  ;;  %v10151_v51 = vld [vmem:[#allocation5 + $0x568] sm:$0xf0] }
 0x15b   :  { %v10757_v61 = vld [vmem:[#allocation5 + $0xa08] sm:$0xf]  ;;  %v10502_v16 = vor.u32 %v14088_v56, %v10501_v55  ;;  %3703 = vmatpush.bf16.msrb.mxu2 %v11014_v15  ;;  %v3352_v55 = vpop.f32.mrf.mxu2  ;;  %v13868_v56 = vld [vmem:[#allocation5 + $0x14c] sm:$0xf]  ;;  %v10154_v12 = vor.u32 %v13996_v50, %v10151_v51 }
 0x15c   :  { %v14152_v0 = vld [vmem:[#allocation5 + $0xa24] sm:$0xf0]  ;;  %v13932_v59 = vld [vmem:[#allocation5 + $0x34c] sm:$0xf]  ;;  %v9642_v13 = vor.u32 %v13868_v56, %v9639_v58 }
 0x15d   :  { %v11269_v1 = vld [vmem:[#allocation5 + $0xe08] sm:$0xf]  ;;  %v10758_v21 = vor.u32 %v14152_v0, %v10757_v61  ;;  %3667 = vmatpush.bf16.msrb.mxu0 %v10502_v16  ;;  %v9895_v61 = vld [vmem:[#allocation5 + $0x368] sm:$0xf0] }
 0x15e   :  { %v14280_v11 = vld [vmem:[#allocation5 + $0xe24] sm:$0xf0]  ;;  %v14060_v0 = vld [vmem:[#allocation5 + $0x74c] sm:$0xf]  ;;  %v9898_v16 = vor.u32 %v13932_v59, %v9895_v61  ;;  %3704 = vmatmul.bf16.vlgmr.msrb.gmra.mxu2 %v15241_v3 }
 0x15f   :  { %v11270_v22 = vor.u32 %v14280_v11, %v11269_v1  ;;  %3685 = vmatpush.bf16.msrb.mxu1 %v10758_v21  ;;  %3768 = vmatpush.bf16.msra.mxu2 %v10218_v26  ;;  %v10407_v1 = vld [vmem:[#allocation5 + $0x768] sm:$0xf0]  ;;  %v3381_v11 = vpop.f32.mrf.mxu0 }
 0x160   :  { %v3382_v8 = vadd.f32 %v3381_v11, %v15288_v7  ;;  %v10119_v15 = vld [vmem:[#allocation5 + $0x528] sm:$0xf0]  ;;  %v10410_v17 = vor.u32 %v14060_v0, %v10407_v1  ;;  %3668 = vmatmul.bf16.vlgmr.msrb.gmra.mxu0 %v15237_v62 }
 0x161   :  { %3721 = vmatpush.bf16.msrb.mxu3 %v11270_v22  ;;  %3732 = vmatpush.bf16.msra.mxu0 %v9706_v27  ;;  %v9607_v19 = vld [vmem:[#allocation5 + $0x128] sm:$0xf0]  ;;  %v10122_v7 = vor.u32 %v13988_v14, %v10119_v15  ;;  %v3435_v34 = vpop.f32.mrf.mxu3 }
 0x162   :  { %v3400_v21 = vadd.f32 %v3399_v6, %v3382_v8  ;;  %3686 = vmatmul.bf16.vlgmr.msrb.gmra.mxu1 %v15239_v63  ;;  %v9863_v22 = vld [vmem:[#allocation5 + $0x328] sm:$0xf0]  ;;  %v9610_v25 = vor.u32 %v13860_v18, %v9607_v19 }
 0x163   :  { %3750 = vmatpush.bf16.msra.mxu1 %v9962_v31  ;;  %3769 = vmatpush.bf16.msra.mxu2 %v10186_v40  ;;  %v10375_v24 = vld [vmem:[#allocation5 + $0x728] sm:$0xf0]  ;;  %v9866_v28 = vor.u32 %v13924_v20, %v9863_v22  ;;  %v3417_v33 = vpop.f32.mrf.mxu2 }
 0x164   :  { %3722 = vmatmul.bf16.vlgmr.msrb.gmra.mxu3 %v15243_v4  ;;  %v13980_v26 = vld [vmem:[#allocation5 + $0x4cc] sm:$0xf]  ;;  %v10378_v29 = vor.u32 %v14052_v23, %v10375_v24  ;;  %v3418_v39 = vadd.f32 %v3417_v33, %v3400_v21 }
 0x165   :  { %3786 = vmatpush.bf16.msra.mxu3 %v10474_v32  ;;  %3733 = vmatpush.bf16.msra.mxu0 %v9674_v41  ;;  %v10087_v27 = vld [vmem:[#allocation5 + $0x4e8] sm:$0xf0]  ;;  %v3401_v41 = vpop.f32.mrf.mxu1 }
 0x166   :  { %v13852_v30 = vld [vmem:[#allocation5 + $0xcc] sm:$0xf]  ;;  %v3436_v56 = vadd.f32 %v3435_v34, %v3418_v39 }
 0x167   :  { %3751 = vmatpush.bf16.msra.mxu1 %v9930_v43  ;;  %3770 = vmatpush.bf16.msra.mxu2 %v10154_v12  ;;  %v9575_v31 = vld [vmem:[#allocation5 + $0xe8] sm:$0xf0]  ;;  %v3383_v40 = vpop.f32.mrf.mxu0 }
 0x168   :  { %v13916_v32 = vld [vmem:[#allocation5 + $0x2cc] sm:$0xf]  ;;  %v3384_v43 = vadd.f32 %v3383_v40, %v15291_v44  ;;  %v9578_v50 = vor.u32 %v13852_v30, %v9575_v31 }
 0x169   :  { %3787 = vmatpush.bf16.msra.mxu3 %v10442_v46  ;;  %3734 = vmatpush.bf16.msra.mxu0 %v9642_v13  ;;  %v9831_v35 = vld [vmem:[#allocation5 + $0x2e8] sm:$0xf0]  ;;  %v10090_v46 = vor.u32 %v13980_v26, %v10087_v27  ;;  %v3437_v21 = vpop.f32.mrf.mxu3 }
 0x16a   :  { %v14044_v37 = vld [vmem:[#allocation5 + $0x6cc] sm:$0xf]  ;;  %v9834_v58 = vor.u32 %v13916_v32, %v9831_v35  ;;  %v3402_v1 = vadd.f32 %v3401_v41, %v3384_v43 }
 0x16b   :  { %3752 = vmatpush.bf16.msra.mxu1 %v9898_v16  ;;  %v10343_v38 = vld [vmem:[#allocation5 + $0x6e8] sm:$0xf0]  ;;  %3771 = vmatpush.bf16.msra.mxu2 %v10122_v7  ;;  %v3419_v20 = vpop.f32.mrf.mxu2 }
 0x16c   :  { %v13972_v51 = vld [vmem:[#allocation5 + $0x48c] sm:$0xf]  ;;  %v10346_v59 = vor.u32 %v14044_v37, %v10343_v38  ;;  %v3420_v7 = vadd.f32 %v3419_v20, %v3402_v1 }
 0x16d   :  { %3788 = vmatpush.bf16.msra.mxu3 %v10410_v17  ;;  %3735 = vmatpush.bf16.msra.mxu0 %v9610_v25  ;;  %v10055_v55 = vld [vmem:[#allocation5 + $0x4a8] sm:$0xf0]  ;;  %v3404_v26 = vpop.f32.mrf.mxu1 }
 0x16e   :  { %v13844_v60 = vld [vmem:[#allocation5 + $0x8c] sm:$0xf]  ;;  %v10058_v44 = vor.u32 %v13972_v51, %v10055_v55  ;;  %v3438_v34 = vadd.f32 %v3437_v21, %v3420_v7  ;;  %3709 = vmatmul.bf16.gmra.mxu2 %v15253_v9 }
 0x16f   :  { %3753 = vmatpush.bf16.msra.mxu1 %v9866_v28  ;;  %v9543_v61 = vld [vmem:[#allocation5 + $0xa8] sm:$0xf0]  ;;  %3772 = vmatpush.bf16.msra.mxu2 %v10090_v46  ;;  %v3386_v25 = vpop.f32.mrf.mxu0 }
 0x170   :  { %v13908_v0 = vld [vmem:[#allocation5 + $0x28c] sm:$0xf]  ;;  %v9546_v12 = vor.u32 %v13844_v60, %v9543_v61  ;;  %v3387_v28 = vadd.f32 %v3386_v25, %v15297_v36  ;;  %3673 = vmatmul.bf16.gmra.mxu0 %v15249_v2 }
 0x171   :  { %3789 = vmatpush.bf16.msra.mxu3 %v10378_v29  ;;  %v9799_v11 = vld [vmem:[#allocation5 + $0x2a8] sm:$0xf0]  ;;  %3736 = vmatpush.bf16.msra.mxu0 %v9578_v50  ;;  %v15308_v50 = vpack.c.bf16 %v3438_v34, %v3436_v56 }
 0x172   :  { %v14036_v6 = vld [vmem:[#allocation5 + $0x68c] sm:$0xf]  ;;  %v9802_v15 = vor.u32 %v13908_v0, %v9799_v11  ;;  %v3405_v41 = vadd.f32 %v3404_v26, %v3387_v28  ;;  %3691 = vmatmul.bf16.gmra.mxu1 %v15251_v5 }
 0x173   :  { %v10311_v8 = vld [vmem:[#allocation5 + $0x6a8] sm:$0xf0]  ;;  %3754 = vmatpush.bf16.msra.mxu1 %v9834_v58  ;;  %3773 = vmatpush.bf16.msra.mxu2 %v10058_v44  ;;  %v3422_v56 = vpop.f32.mrf.mxu2 }
 0x174   :  { %v13964_v13 = vld [vmem:[#allocation5 + $0x44c] sm:$0xf]  ;;  %v10314_v16 = vor.u32 %v14036_v6, %v10311_v8  ;;  %3727 = vmatmul.bf16.gmra.mxu3 %v15255_v10  ;;  %v3440_v8 = vpop.f32.mrf.mxu3 }
 0x175   :  { %v10023_v14 = vld [vmem:[#allocation5 + $0x468] sm:$0xf0]  ;;  %3790 = vmatpush.bf16.msra.mxu3 %v10346_v59  ;;  %3737 = vmatpush.bf16.msra.mxu0 %v9546_v12 }
 0x176   :  { %v13836_v17 = vld [vmem:[#allocation5 + $0x4c] sm:$0xf]  ;;  %v10026_v29 = vor.u32 %v13964_v13, %v10023_v14 }
 0x177   :  { %v9511_v18 = vld [vmem:[#allocation5 + $0x68] sm:$0xf0]  ;;  %3755 = vmatpush.bf16.msra.mxu1 %v9802_v15  ;;  %v3423_v15 = vadd.f32 %v3422_v56, %v3405_v41 }
 0x178   :  { %v13900_v19 = vld [vmem:[#allocation5 + $0x24c] sm:$0xf]  ;;  %v9514_v30 = vor.u32 %v13836_v17, %v9511_v18  ;;  %3774 = vmatpush.bf16.msra.mxu2 %v10026_v29  ;;  %v3406_v17 = vpop.f32.mrf.mxu1 }
 0x179   :  { %v9767_v22 = vld [vmem:[#allocation5 + $0x268] sm:$0xf0]  ;;  %3791 = vmatpush.bf16.msra.mxu3 %v10314_v16  ;;  %v3388_v16 = vpop.f32.mrf.mxu0  ;;  %v15312_v25 = vadd.f32 %v3440_v8, %v3423_v15 }
 0x17a   :  { %v14028_v23 = vld [vmem:[#allocation5 + $0x64c] sm:$0xf]  ;;  %v9770_v35 = vor.u32 %v13900_v19, %v9767_v22  ;;  %3738 = vmatpush.bf16.msra.mxu0 %v9514_v30  ;;  %v15315_v30 = vperm.slane %v15277_v45, 1 }
 0x17b   :  { %v10279_v24 = vld [vmem:[#allocation5 + $0x668] sm:$0xf0] }
 0x17c   :  { %v13956_v27 = vld [vmem:[#allocation5 + $0x40c] sm:$0xf]  ;;  %v10282_v37 = vor.u32 %v14028_v23, %v10279_v24  ;;  %3756 = vmatpush.bf16.msra.mxu1 %v9770_v35 }
 0x17d   :  { %v9991_v31 = vld [vmem:[#allocation5 + $0x428] sm:$0xf0] }
 0x17e   :  { %v13828_v32 = vld [vmem:[#allocation5 + $0xc] sm:$0xf]  ;;  %v9994_v59 = vor.u32 %v13956_v27, %v9991_v31  ;;  %3792 = vmatpush.bf16.msra.mxu3 %v10282_v37  ;;  %v3424_v37 = vpop.f32.mrf.mxu2 }
 0x17f   :  { %v9479_v33 = vld [vmem:[#allocation5 + $0x28] sm:$0xf0] }
 0x180   :  { %v13892_v38 = vld [vmem:[#allocation5 + $0x20c] sm:$0xf]  ;;  %v9482_v60 = vor.u32 %v13828_v32, %v9479_v33  ;;  %3775 = vmatpush.bf16.msra.mxu2 %v9994_v59 }
 0x181   :  { %v9735_v39 = vld [vmem:[#allocation5 + $0x228] sm:$0xf0] }
 0x182   :  { %v14020_v40 = vld [vmem:[#allocation5 + $0x60c] sm:$0xf]  ;;  %v9738_v11 = vor.u32 %v13892_v38, %v9735_v39  ;;  %3739 = vmatpush.bf16.msra.mxu0 %v9482_v60  ;;  %v3442_v38 = vpop.f32.mrf.mxu3 }
 0x183   :  { %v10247_v36 = vld [vmem:[#allocation5 + $0x628] sm:$0xf0]  ;;  %3776 = vmatmul.bf16.vlgmr.msra.gmra.mxu2 %v15217_v54 }
 0x184   :  { %v14268_v43 = vld [vmem:[#allocation5 + $0xdcc] sm:$0xf]  ;;  %v10250_v6 = vor.u32 %v14020_v40, %v10247_v36  ;;  %3757 = vmatpush.bf16.msra.mxu1 %v9738_v11  ;;  %v3453_v36 = vpop.f32.mrf.mxu0 }
 0x185   :  { %v11239_v46 = vld [vmem:[#allocation5 + $0xde8] sm:$0xf0]  ;;  %3740 = vmatmul.bf16.vlgmr.msra.gmra.mxu0 %v15213_v48 }
 0x186   :  { %v14140_v51 = vld [vmem:[#allocation5 + $0x9cc] sm:$0xf]  ;;  %v11242_v44 = vor.u32 %v14268_v43, %v11239_v46  ;;  %3793 = vmatpush.bf16.msra.mxu3 %v10250_v6  ;;  %v3471_v43 = vpop.f32.mrf.mxu1  ;;  %v3454_v46 = vadd.f32 %v3453_v36, %v15315_v30 }
 0x187   :  { %v10727_v55 = vld [vmem:[#allocation5 + $0x9e8] sm:$0xf0]  ;;  %3758 = vmatmul.bf16.vlgmr.msra.gmra.mxu1 %v15215_v53 }
 0x188   :  { %v14204_v58 = vld [vmem:[#allocation5 + $0xbcc] sm:$0xf]  ;;  %v10730_v12 = vor.u32 %v14140_v51, %v10727_v55  ;;  %3840 = vmatpush.bf16.msrb.mxu2 %v11242_v44  ;;  %v3472_v11 = vadd.f32 %v3471_v43, %v3454_v46 }
 0x189   :  { %v10983_v61 = vld [vmem:[#allocation5 + $0xbe8] sm:$0xf0]  ;;  %3794 = vmatmul.bf16.vlgmr.msra.gmra.mxu3 %v15219_v57 }
 0x18a   :  { %v14332_v0 = vld [vmem:[#allocation5 + $0xfcc] sm:$0xf]  ;;  %v10986_v18 = vor.u32 %v14204_v58, %v10983_v61  ;;  %3804 = vmatpush.bf16.msrb.mxu0 %v10730_v12 }
 0x18b   :  { %v11495_v1 = vld [vmem:[#allocation5 + $0xfe8] sm:$0xf0] }
 0x18c   :  { %v14260_v13 = vld [vmem:[#allocation5 + $0xd8c] sm:$0xf]  ;;  %v11498_v19 = vor.u32 %v14332_v0, %v11495_v1  ;;  %3822 = vmatpush.bf16.msrb.mxu1 %v10986_v18 }
 0x18d   :  { %v11207_v14 = vld [vmem:[#allocation5 + $0xda8] sm:$0xf0] }
 0x18e   :  { %v14132_v20 = vld [vmem:[#allocation5 + $0x98c] sm:$0xf]  ;;  %v11210_v26 = vor.u32 %v14260_v13, %v11207_v14  ;;  %3858 = vmatpush.bf16.msrb.mxu3 %v11498_v19 }
 0x18f   :  { %v10695_v21 = vld [vmem:[#allocation5 + $0x9a8] sm:$0xf0] }
 0x190   :  { %v14196_v22 = vld [vmem:[#allocation5 + $0xb8c] sm:$0xf]  ;;  %v10698_v27 = vor.u32 %v14132_v20, %v10695_v21  ;;  %3841 = vmatpush.bf16.msrb.mxu2 %v11210_v26  ;;  %v3489_v20 = vpop.f32.mrf.mxu2  ;;  %v3507_v21 = vpop.f32.mrf.mxu3 }
 0x191   :  { %v10951_v23 = vld [vmem:[#allocation5 + $0xba8] sm:$0xf0]  ;;  %v3455_v26 = vpop.f32.mrf.mxu0 }
 0x192   :  { %v14324_v24 = vld [vmem:[#allocation5 + $0xf8c] sm:$0xf]  ;;  %v10954_v28 = vor.u32 %v14196_v22, %v10951_v23  ;;  %3805 = vmatpush.bf16.msrb.mxu0 %v10698_v27  ;;  %v3473_v27 = vpop.f32.mrf.mxu1 }
 0x193   :  { %v11463_v7 = vld [vmem:[#allocation5 + $0xfa8] sm:$0xf0]  ;;  %3781 = vmatmul.bf16.gmra.mxu2 %v15229_v49 }
 0x194   :  { %v11466_v29 = vor.u32 %v14324_v24, %v11463_v7  ;;  %v14252_v31 = vld [vmem:[#allocation5 + $0xd4c] sm:$0xf]  ;;  %3823 = vmatpush.bf16.msrb.mxu1 %v10954_v28  ;;  %v3490_v7 = vadd.f32 %v3489_v20, %v3472_v11  ;;  %v3456_v28 = vadd.f32 %v3455_v26, %v15315_v30 }
 0x195   :  { %v11175_v32 = vld [vmem:[#allocation5 + $0xd68] sm:$0xf0]  ;;  %3745 = vmatmul.bf16.gmra.mxu0 %v15225_v42 }
 0x196   :  { %v14124_v33 = vld [vmem:[#allocation5 + $0x94c] sm:$0xf]  ;;  %3859 = vmatpush.bf16.msrb.mxu3 %v11466_v29  ;;  %v11178_v45 = vor.u32 %v14252_v31, %v11175_v32 }
 0x197   :  { %v10663_v34 = vld [vmem:[#allocation5 + $0x968] sm:$0xf0]  ;;  %3763 = vmatmul.bf16.gmra.mxu1 %v15227_v47 }
 0x198   :  { %v14188_v35 = vld [vmem:[#allocation5 + $0xb4c] sm:$0xf]  ;;  %v10666_v51 = vor.u32 %v14124_v33, %v10663_v34  ;;  %3842 = vmatpush.bf16.msrb.mxu2 %v11178_v45  ;;  %v15323_v34 = vadd.f32 %v3507_v21, %v3490_v7  ;;  %v3491_v11 = vpop.f32.mrf.mxu2 }
 0x199   :  { %v10919_v39 = vld [vmem:[#allocation5 + $0xb68] sm:$0xf0]  ;;  %3799 = vmatmul.bf16.gmra.mxu3 %v15231_v52 }
 0x19a   :  { %v14316_v40 = vld [vmem:[#allocation5 + $0xf4c] sm:$0xf]  ;;  %v10922_v59 = vor.u32 %v14188_v35, %v10919_v39  ;;  %3806 = vmatpush.bf16.msrb.mxu0 %v10666_v51 }
 0x19b   :  { %v11431_v41 = vld [vmem:[#allocation5 + $0xf68] sm:$0xf0] }
 0x19c   :  { %v14244_v55 = vld [vmem:[#allocation5 + $0xd0c] sm:$0xf]  ;;  %v11434_v60 = vor.u32 %v14316_v40, %v11431_v41  ;;  %3824 = vmatpush.bf16.msrb.mxu1 %v10922_v59  ;;  %v3474_v41 = vadd.f32 %v3473_v27, %v3456_v28 }
 0x19d   :  { %v11143_v58 = vld [vmem:[#allocation5 + $0xd28] sm:$0xf0] }
 0x19e   :  { %v14116_v61 = vld [vmem:[#allocation5 + $0x90c] sm:$0xf]  ;;  %v11146_v44 = vor.u32 %v14244_v55, %v11143_v58  ;;  %3860 = vmatpush.bf16.msrb.mxu3 %v11434_v60 }
 0x19f   :  { %v10631_v0 = vld [vmem:[#allocation5 + $0x928] sm:$0xf0] }
 0x1a0   :  { %v14180_v1 = vld [vmem:[#allocation5 + $0xb0c] sm:$0xf]  ;;  %v10634_v12 = vor.u32 %v14116_v61, %v10631_v0  ;;  %3843 = vmatpush.bf16.msrb.mxu2 %v11146_v44 }
 0x1a1   :  { %v10887_v6 = vld [vmem:[#allocation5 + $0xb28] sm:$0xf0] }
 0x1a2   :  { %v14308_v56 = vld [vmem:[#allocation5 + $0xf0c] sm:$0xf]  ;;  %v10890_v15 = vor.u32 %v14180_v1, %v10887_v6  ;;  %3807 = vmatpush.bf16.msrb.mxu0 %v10634_v12  ;;  %v3509_v6 = vpop.f32.mrf.mxu3  ;;  %v3492_v12 = vadd.f32 %v3491_v11, %v3474_v41  ;;  %v14081_v41 = vld [vmem:[#allocation5 + $0x7ec] sm:$0xf0] }
 0x1a3   :  { %v11399_v8 = vld [vmem:[#allocation5 + $0xf28] sm:$0xf0] }
 0x1a4   :  { %v14236_v13 = vld [vmem:[#allocation5 + $0xccc] sm:$0xf]  ;;  %v11402_v16 = vor.u32 %v14308_v56, %v11399_v8  ;;  %3825 = vmatpush.bf16.msrb.mxu1 %v10890_v15 }
 0x1a5   :  { %v11111_v14 = vld [vmem:[#allocation5 + $0xce8] sm:$0xf0] }
 0x1a6   :  { %v14108_v17 = vld [vmem:[#allocation5 + $0x8cc] sm:$0xf]  ;;  %v11114_v29 = vor.u32 %v14236_v13, %v11111_v14  ;;  %3861 = vmatpush.bf16.msrb.mxu3 %v11402_v16  ;;  %v3458_v13 = vpop.f32.mrf.mxu0  ;;  %v3476_v14 = vpop.f32.mrf.mxu1 }
 0x1a7   :  { %v10599_v18 = vld [vmem:[#allocation5 + $0x8e8] sm:$0xf0]  ;;  %v3459_v16 = vadd.f32 %v3458_v13, %v15315_v30  ;;  %v14073_v13 = vld [vmem:[#allocation5 + $0x7ac] sm:$0xf0] }
 0x1a8   :  { %v14172_v19 = vld [vmem:[#allocation5 + $0xacc] sm:$0xf]  ;;  %v10602_v31 = vor.u32 %v14108_v17, %v10599_v18  ;;  %3844 = vmatpush.bf16.msrb.mxu2 %v11114_v29  ;;  %v10221_v29 = vld [vmem:[#allocation5 + $0x5d0] sm:$0xf] }
 0x1a9   :  { %v10855_v22 = vld [vmem:[#allocation5 + $0xae8] sm:$0xf0]  ;;  %v3477_v28 = vadd.f32 %v3476_v14, %v3459_v16 }
 0x1aa   :  { %v14300_v23 = vld [vmem:[#allocation5 + $0xecc] sm:$0xf]  ;;  %v10858_v35 = vor.u32 %v14172_v19, %v10855_v22  ;;  %3808 = vmatpush.bf16.msrb.mxu0 %v10602_v31  ;;  %v15326_v22 = vadd.f32 %v3509_v6, %v3492_v12  ;;  %v14017_v31 = vld [vmem:[#allocation5 + $0x5ec] sm:$0xf0] }
 0x1ab   :  { %v11367_v24 = vld [vmem:[#allocation5 + $0xee8] sm:$0xf0]  ;;  %v9677_v6 = vld [vmem:[#allocation5 + $0x190] sm:$0xf] }
 0x1ac   :  { %v14228_v32 = vld [vmem:[#allocation5 + $0xc8c] sm:$0xf]  ;;  %v11370_v37 = vor.u32 %v14300_v23, %v11367_v24  ;;  %3826 = vmatpush.bf16.msrb.mxu1 %v10858_v35  ;;  %v9965_v35 = vld [vmem:[#allocation5 + $0x3d0] sm:$0xf] }
 0x1ad   :  { %v11079_v33 = vld [vmem:[#allocation5 + $0xca8] sm:$0xf0]  ;;  %v10445_v12 = vld [vmem:[#allocation5 + $0x790] sm:$0xf] }
 0x1ae   :  { %v14100_v38 = vld [vmem:[#allocation5 + $0x88c] sm:$0xf]  ;;  %v11082_v45 = vor.u32 %v14228_v32, %v11079_v33  ;;  %3862 = vmatpush.bf16.msrb.mxu3 %v11370_v37  ;;  %v9709_v32 = vld [vmem:[#allocation5 + $0x1d0] sm:$0xf] }
 0x1af   :  { %v10567_v39 = vld [vmem:[#allocation5 + $0x8a8] sm:$0xf0]  ;;  %v13889_v33 = vld [vmem:[#allocation5 + $0x1ec] sm:$0xf0] }
 0x1b0   :  { %v14164_v40 = vld [vmem:[#allocation5 + $0xa8c] sm:$0xf]  ;;  %v10570_v51 = vor.u32 %v14100_v38, %v10567_v39  ;;  %3845 = vmatpush.bf16.msrb.mxu2 %v11082_v45  ;;  %v13953_v39 = vld [vmem:[#allocation5 + $0x3ec] sm:$0xf0]  ;;  %v3512_v45 = vpop.f32.mrf.mxu3 }
 0x1b1   :  { %v10823_v36 = vld [vmem:[#allocation5 + $0xaa8] sm:$0xf0] }
 0x1b2   :  { %v14292_v43 = vld [vmem:[#allocation5 + $0xe8c] sm:$0xf]  ;;  %v10826_v59 = vor.u32 %v14164_v40, %v10823_v36  ;;  %3809 = vmatpush.bf16.msrb.mxu0 %v10570_v51  ;;  %v10477_v40 = vld [vmem:[#allocation5 + $0x7d0] sm:$0xf]  ;;  %v10222_v51 = vor.u32 %v14017_v31, %v10221_v29 }
 0x1b3   :  { %v11335_v46 = vld [vmem:[#allocation5 + $0xea8] sm:$0xf0]  ;;  %v10478_v11 = vor.u32 %v14081_v41, %v10477_v40  ;;  %v9613_v41 = vld [vmem:[#allocation5 + $0x110] sm:$0xf] }
 0x1b4   :  { %v14220_v55 = vld [vmem:[#allocation5 + $0xc4c] sm:$0xf]  ;;  %v11338_v60 = vor.u32 %v14292_v43, %v11335_v46  ;;  %3827 = vmatpush.bf16.msrb.mxu1 %v10826_v59  ;;  %v3494_v46 = vpop.f32.mrf.mxu2  ;;  %v14009_v59 = vld [vmem:[#allocation5 + $0x5ac] sm:$0xf0] }
 0x1b5   :  { %v11047_v58 = vld [vmem:[#allocation5 + $0xc68] sm:$0xf0] }
 0x1b6   :  { %v14092_v61 = vld [vmem:[#allocation5 + $0x84c] sm:$0xf]  ;;  %v11050_v17 = vor.u32 %v14220_v55, %v11047_v58  ;;  %3863 = vmatpush.bf16.msrb.mxu3 %v11338_v60  ;;  %v9710_v55 = vor.u32 %v13889_v33, %v9709_v32  ;;  %v10189_v58 = vld [vmem:[#allocation5 + $0x590] sm:$0xf]  ;;  %v3495_v60 = vadd.f32 %v3494_v46, %v3477_v28 }
 0x1b7   :  { %v10535_v0 = vld [vmem:[#allocation5 + $0x868] sm:$0xf0]  ;;  %v10413_v28 = vld [vmem:[#allocation5 + $0x750] sm:$0xf] }
 0x1b8   :  { %v14156_v1 = vld [vmem:[#allocation5 + $0xa4c] sm:$0xf]  ;;  %v10538_v18 = vor.u32 %v14092_v61, %v10535_v0  ;;  %3846 = vmatpush.bf16.msrb.mxu2 %v11050_v17  ;;  %v3460_v61 = vpop.f32.mrf.mxu0  ;;  %v3478_v0 = vpop.f32.mrf.mxu1  ;;  %v15332_v14 = vadd.f32 %v3512_v45, %v3495_v60  ;;  %v13929_v45 = vld [vmem:[#allocation5 + $0x32c] sm:$0xf0] }
 0x1b9   :  { %v10791_v56 = vld [vmem:[#allocation5 + $0xa68] sm:$0xf0]  ;;  %v13985_v60 = vld [vmem:[#allocation5 + $0x4ec] sm:$0xf0] }
 0x1ba   :  { %v14284_v8 = vld [vmem:[#allocation5 + $0xe4c] sm:$0xf]  ;;  %v10794_v23 = vor.u32 %v14156_v1, %v10791_v56  ;;  %3810 = vmatpush.bf16.msrb.mxu0 %v10538_v18  ;;  %v9966_v1 = vor.u32 %v13953_v39, %v9965_v35  ;;  %v13881_v56 = vld [vmem:[#allocation5 + $0x1ac] sm:$0xf0]  ;;  %v10446_v18 = vor.u32 %v14073_v13, %v10445_v12 }
 0x1bb   :  { %v11303_v44 = vld [vmem:[#allocation5 + $0xe68] sm:$0xf0]  ;;  %v9678_v16 = vor.u32 %v13881_v56, %v9677_v6  ;;  %v9837_v6 = vld [vmem:[#allocation5 + $0x2d0] sm:$0xf] }
 0x1bc   :  { %v14212_v15 = vld [vmem:[#allocation5 + $0xc0c] sm:$0xf]  ;;  %v11306_v24 = vor.u32 %v14284_v8, %v11303_v44  ;;  %3828 = vmatpush.bf16.msrb.mxu1 %v10794_v23  ;;  %v9933_v8 = vld [vmem:[#allocation5 + $0x390] sm:$0xf] }
 0x1bd   :  { %v11015_v19 = vld [vmem:[#allocation5 + $0xc28] sm:$0xf0]  ;;  %v13945_v44 = vld [vmem:[#allocation5 + $0x3ac] sm:$0xf0] }
 0x1be   :  { %v14084_v20 = vld [vmem:[#allocation5 + $0x80c] sm:$0xf]  ;;  %v11018_v37 = vor.u32 %v14212_v15, %v11015_v19  ;;  %3864 = vmatpush.bf16.msrb.mxu3 %v11306_v24  ;;  %v10190_v15 = vor.u32 %v14009_v59, %v10189_v58  ;;  %v9934_v17 = vor.u32 %v13945_v44, %v9933_v8  ;;  %v10157_v19 = vld [vmem:[#allocation5 + $0x550] sm:$0xf] }
 0x1bf   :  { %v10503_v21 = vld [vmem:[#allocation5 + $0x828] sm:$0xf0]  ;;  %v13873_v23 = vld [vmem:[#allocation5 + $0x16c] sm:$0xf0] }
 0x1c0   :  { %v14148_v7 = vld [vmem:[#allocation5 + $0xa0c] sm:$0xf]  ;;  %v10506_v38 = vor.u32 %v14084_v20, %v10503_v21  ;;  %3847 = vmatpush.bf16.msrb.mxu2 %v11018_v37  ;;  %v14001_v20 = vld [vmem:[#allocation5 + $0x56c] sm:$0xf0]  ;;  %v3525_v29 = vpop.f32.mrf.mxu0  ;;  %v3543_v31 = vpop.f32.mrf.mxu1 }
 0x1c1   :  { %v10759_v26 = vld [vmem:[#allocation5 + $0xa28] sm:$0xf0]  ;;  %v9645_v21 = vld [vmem:[#allocation5 + $0x150] sm:$0xf]  ;;  %v3526_v32 = vadd.f32 %v3525_v29, %v15323_v34  ;;  %v10158_v33 = vor.u32 %v14001_v20, %v10157_v19 }
 0x1c2   :  { %v14276_v27 = vld [vmem:[#allocation5 + $0xe0c] sm:$0xf]  ;;  %v10762_v36 = vor.u32 %v14148_v7, %v10759_v26  ;;  %3811 = vmatpush.bf16.msrb.mxu0 %v10506_v38  ;;  %v9901_v24 = vld [vmem:[#allocation5 + $0x350] sm:$0xf]  ;;  %v3496_v7 = vpop.f32.mrf.mxu2  ;;  %v3514_v26 = vpop.f32.mrf.mxu3  ;;  %v9646_v35 = vor.u32 %v13873_v23, %v9645_v21 }
 0x1c3   :  { %v11271_v30 = vld [vmem:[#allocation5 + $0xe28] sm:$0xf0]  ;;  %v10125_v37 = vld [vmem:[#allocation5 + $0x510] sm:$0xf]  ;;  %v3544_v46 = vadd.f32 %v3543_v31, %v3526_v32  ;;  %3848 = vmatmul.bf16.vlgmr.msrb.gmra.mxu2 %v15241_v3 }
 0x1c4   :  { %v11274_v43 = vor.u32 %v14276_v27, %v11271_v30  ;;  %3829 = vmatpush.bf16.msrb.mxu1 %v10762_v36  ;;  %3912 = vmatpush.bf16.msra.mxu2 %v10222_v51  ;;  %v13937_v27 = vld [vmem:[#allocation5 + $0x36c] sm:$0xf0] }
 0x1c5   :  { %v14065_v30 = vld [vmem:[#allocation5 + $0x76c] sm:$0xf0]  ;;  %v9902_v39 = vor.u32 %v13937_v27, %v9901_v24  ;;  %3812 = vmatmul.bf16.vlgmr.msrb.gmra.mxu0 %v15237_v62 }
 0x1c6   :  { %3865 = vmatpush.bf16.msrb.mxu3 %v11274_v43  ;;  %3876 = vmatpush.bf16.msra.mxu0 %v9710_v55  ;;  %v13993_v38 = vld [vmem:[#allocation5 + $0x52c] sm:$0xf0]  ;;  %v10414_v40 = vor.u32 %v14065_v30, %v10413_v28 }
 0x1c7   :  { %v13865_v36 = vld [vmem:[#allocation5 + $0x12c] sm:$0xf0]  ;;  %3830 = vmatmul.bf16.vlgmr.msrb.gmra.mxu1 %v15239_v63  ;;  %v10126_v34 = vor.u32 %v13993_v38, %v10125_v37 }
 0x1c8   :  { %3894 = vmatpush.bf16.msra.mxu1 %v9966_v1  ;;  %3913 = vmatpush.bf16.msra.mxu2 %v10190_v15  ;;  %v9869_v43 = vld [vmem:[#allocation5 + $0x310] sm:$0xf]  ;;  %v9614_v58 = vor.u32 %v13865_v36, %v9613_v41 }
 0x1c9   :  { %v10381_v51 = vld [vmem:[#allocation5 + $0x710] sm:$0xf]  ;;  %3866 = vmatmul.bf16.vlgmr.msrb.gmra.mxu3 %v15243_v4  ;;  %v9870_v61 = vor.u32 %v13929_v45, %v9869_v43 }
 0x1ca   :  { %3930 = vmatpush.bf16.msra.mxu3 %v10478_v11  ;;  %3877 = vmatpush.bf16.msra.mxu0 %v9678_v16  ;;  %v14057_v55 = vld [vmem:[#allocation5 + $0x72c] sm:$0xf0]  ;;  %v3561_v56 = vpop.f32.mrf.mxu2  ;;  %v3579_v8 = vpop.f32.mrf.mxu3 }
 0x1cb   :  { %v10093_v59 = vld [vmem:[#allocation5 + $0x4d0] sm:$0xf]  ;;  %v10382_v0 = vor.u32 %v14057_v55, %v10381_v51  ;;  %v3562_v15 = vadd.f32 %v3561_v56, %v3544_v46  ;;  %v3527_v16 = vpop.f32.mrf.mxu0 }
 0x1cc   :  { %3895 = vmatpush.bf16.msra.mxu1 %v9934_v17  ;;  %3914 = vmatpush.bf16.msra.mxu2 %v10158_v33  ;;  %v9581_v1 = vld [vmem:[#allocation5 + $0xd0] sm:$0xf]  ;;  %v3545_v17 = vpop.f32.mrf.mxu1  ;;  %v10094_v19 = vor.u32 %v13985_v60, %v10093_v59 }
 0x1cd   :  { %v13857_v11 = vld [vmem:[#allocation5 + $0xec] sm:$0xf0]  ;;  %v3580_v24 = vadd.f32 %v3579_v8, %v3562_v15 }
 0x1ce   :  { %3931 = vmatpush.bf16.msra.mxu3 %v10446_v18  ;;  %3878 = vmatpush.bf16.msra.mxu0 %v9646_v35  ;;  %v13921_v44 = vld [vmem:[#allocation5 + $0x2ec] sm:$0xf0]  ;;  %v3528_v18 = vadd.f32 %v3527_v16, %v15326_v22  ;;  %v9582_v20 = vor.u32 %v13857_v11, %v9581_v1 }
 0x1cf   :  { %v10349_v12 = vld [vmem:[#allocation5 + $0x6d0] sm:$0xf]  ;;  %v9838_v7 = vor.u32 %v13921_v44, %v9837_v6 }
 0x1d0   :  { %3896 = vmatpush.bf16.msra.mxu1 %v9902_v39  ;;  %v14049_v13 = vld [vmem:[#allocation5 + $0x6ec] sm:$0xf0]  ;;  %3915 = vmatpush.bf16.msra.mxu2 %v10126_v34  ;;  %v3546_v29 = vadd.f32 %v3545_v17, %v3528_v18 }
 0x1d1   :  { %v10061_v21 = vld [vmem:[#allocation5 + $0x490] sm:$0xf]  ;;  %v10350_v26 = vor.u32 %v14049_v13, %v10349_v12 }
 0x1d2   :  { %3932 = vmatpush.bf16.msra.mxu3 %v10414_v40  ;;  %3879 = vmatpush.bf16.msra.mxu0 %v9614_v58  ;;  %v13977_v23 = vld [vmem:[#allocation5 + $0x4ac] sm:$0xf0]  ;;  %v3563_v46 = vpop.f32.mrf.mxu2  ;;  %v3581_v45 = vpop.f32.mrf.mxu3 }
 0x1d3   :  { %v9549_v27 = vld [vmem:[#allocation5 + $0x90] sm:$0xf]  ;;  %v10062_v22 = vor.u32 %v13977_v23, %v10061_v21  ;;  %v3564_v58 = vadd.f32 %v3563_v46, %v3546_v29  ;;  %v3530_v59 = vpop.f32.mrf.mxu0  ;;  %3853 = vmatmul.bf16.gmra.mxu2 %v15253_v9 }
 0x1d4   :  { %3897 = vmatpush.bf16.msra.mxu1 %v9870_v61  ;;  %v13849_v28 = vld [vmem:[#allocation5 + $0xac] sm:$0xf0]  ;;  %3916 = vmatpush.bf16.msra.mxu2 %v10094_v19  ;;  %v3548_v60 = vpop.f32.mrf.mxu1 }
 0x1d5   :  { %v9805_v30 = vld [vmem:[#allocation5 + $0x290] sm:$0xf]  ;;  %v9550_v35 = vor.u32 %v13849_v28, %v9549_v27  ;;  %v3582_v44 = vadd.f32 %v3581_v45, %v3564_v58  ;;  %3817 = vmatmul.bf16.gmra.mxu0 %v15249_v2 }
 0x1d6   :  { %3933 = vmatpush.bf16.msra.mxu3 %v10382_v0  ;;  %v13913_v31 = vld [vmem:[#allocation5 + $0x2ac] sm:$0xf0]  ;;  %3880 = vmatpush.bf16.msra.mxu0 %v9582_v20  ;;  %v3531_v0 = vadd.f32 %v3530_v59, %v15332_v14 }
 0x1d7   :  { %v10317_v32 = vld [vmem:[#allocation5 + $0x690] sm:$0xf]  ;;  %v9806_v39 = vor.u32 %v13913_v31, %v9805_v30  ;;  %3835 = vmatmul.bf16.gmra.mxu1 %v15251_v5  ;;  %v15343_v21 = vpack.c.bf16 %v3582_v44, %v3580_v24 }
 0x1d8   :  { %v14041_v33 = vld [vmem:[#allocation5 + $0x6ac] sm:$0xf0]  ;;  %3898 = vmatpush.bf16.msra.mxu1 %v9838_v7  ;;  %3917 = vmatpush.bf16.msra.mxu2 %v10062_v22  ;;  %v3549_v18 = vadd.f32 %v3548_v60, %v3531_v0 }
 0x1d9   :  { %v10029_v37 = vld [vmem:[#allocation5 + $0x450] sm:$0xf]  ;;  %v10318_v40 = vor.u32 %v14041_v33, %v10317_v32  ;;  %3871 = vmatmul.bf16.gmra.mxu3 %v15255_v10 }
 0x1da   :  { %v13969_v38 = vld [vmem:[#allocation5 + $0x46c] sm:$0xf0]  ;;  %3934 = vmatpush.bf16.msra.mxu3 %v10350_v26  ;;  %3881 = vmatpush.bf16.msra.mxu0 %v9550_v35  ;;  %v3566_v24 = vpop.f32.mrf.mxu2  ;;  %v3584_v22 = vpop.f32.mrf.mxu3 }
 0x1db   :  { %v9517_v41 = vld [vmem:[#allocation5 + $0x50] sm:$0xf]  ;;  %v10030_v1 = vor.u32 %v13969_v38, %v10029_v37 }
 0x1dc   :  { %v13841_v36 = vld [vmem:[#allocation5 + $0x6c] sm:$0xf0]  ;;  %3899 = vmatpush.bf16.msra.mxu1 %v9806_v39 }
 0x1dd   :  { %v9773_v43 = vld [vmem:[#allocation5 + $0x250] sm:$0xf]  ;;  %v9518_v11 = vor.u32 %v13841_v36, %v9517_v41  ;;  %3918 = vmatpush.bf16.msra.mxu2 %v10030_v1  ;;  %v3532_v41 = vpop.f32.mrf.mxu0  ;;  %v3550_v36 = vpop.f32.mrf.mxu1 }
 0x1de   :  { %v13905_v51 = vld [vmem:[#allocation5 + $0x26c] sm:$0xf0]  ;;  %3935 = vmatpush.bf16.msra.mxu3 %v10318_v40  ;;  %v3567_v40 = vadd.f32 %v3566_v24, %v3549_v18 }
 0x1df   :  { %v10285_v55 = vld [vmem:[#allocation5 + $0x650] sm:$0xf]  ;;  %v9774_v12 = vor.u32 %v13905_v51, %v9773_v43  ;;  %3882 = vmatpush.bf16.msra.mxu0 %v9518_v11 }
 0x1e0   :  { %v14033_v34 = vld [vmem:[#allocation5 + $0x66c] sm:$0xf0]  ;;  %v15347_v60 = vadd.f32 %v3584_v22, %v3567_v40 }
 0x1e1   :  { %v9997_v61 = vld [vmem:[#allocation5 + $0x410] sm:$0xf]  ;;  %v10286_v13 = vor.u32 %v14033_v34, %v10285_v55  ;;  %3900 = vmatpush.bf16.msra.mxu1 %v9774_v12 }
 0x1e2   :  { %v13961_v6 = vld [vmem:[#allocation5 + $0x42c] sm:$0xf0] }
 0x1e3   :  { %v9485_v56 = vld [vmem:[#allocation5 + $0x10] sm:$0xf]  ;;  %v9998_v27 = vor.u32 %v13961_v6, %v9997_v61  ;;  %3936 = vmatpush.bf16.msra.mxu3 %v10286_v13  ;;  %v15349_v6 = vld [vmem:[#allocation7] sm:$0xff] }
 0x1e4   :  { %v13833_v8 = vld [vmem:[#allocation5 + $0x2c] sm:$0xf0] }
 0x1e5   :  { %v9741_v15 = vld [vmem:[#allocation5 + $0x210] sm:$0xf]  ;;  %v9486_v28 = vor.u32 %v13833_v8, %v9485_v56  ;;  %3919 = vmatpush.bf16.msra.mxu2 %v9998_v27  ;;  %v15352_v56 = vperm.slane %v15349_v6, 2 }
 0x1e6   :  { %v13897_v16 = vld [vmem:[#allocation5 + $0x22c] sm:$0xf0] }
 0x1e7   :  { %v10253_v17 = vld [vmem:[#allocation5 + $0x610] sm:$0xf]  ;;  %v9742_v32 = vor.u32 %v13897_v16, %v9741_v15  ;;  %3883 = vmatpush.bf16.msra.mxu0 %v9486_v28  ;;  %v3568_v16 = vpop.f32.mrf.mxu2 }
 0x1e8   :  { %v14025_v14 = vld [vmem:[#allocation5 + $0x62c] sm:$0xf0]  ;;  %3920 = vmatmul.bf16.vlgmr.msra.gmra.mxu2 %v15217_v54 }
 0x1e9   :  { %v11245_v19 = vld [vmem:[#allocation5 + $0xdd0] sm:$0xf]  ;;  %v10254_v33 = vor.u32 %v14025_v14, %v10253_v17  ;;  %3901 = vmatpush.bf16.msra.mxu1 %v9742_v32  ;;  %v3586_v17 = vpop.f32.mrf.mxu3 }
 0x1ea   :  { %v14273_v20 = vld [vmem:[#allocation5 + $0xdec] sm:$0xf0]  ;;  %3884 = vmatmul.bf16.vlgmr.msra.gmra.mxu0 %v15213_v48 }
 0x1eb   :  { %v10733_v23 = vld [vmem:[#allocation5 + $0x9d0] sm:$0xf]  ;;  %v11246_v35 = vor.u32 %v14273_v20, %v11245_v19  ;;  %3937 = vmatpush.bf16.msra.mxu3 %v10254_v33  ;;  %v3597_v20 = vpop.f32.mrf.mxu0 }
 0x1ec   :  { %v14145_v7 = vld [vmem:[#allocation5 + $0x9ec] sm:$0xf0]  ;;  %3902 = vmatmul.bf16.vlgmr.msra.gmra.mxu1 %v15215_v53 }
 0x1ed   :  { %v10989_v26 = vld [vmem:[#allocation5 + $0xbd0] sm:$0xf]  ;;  %v10734_v37 = vor.u32 %v14145_v7, %v10733_v23  ;;  %3984 = vmatpush.bf16.msrb.mxu2 %v11246_v35  ;;  %v3615_v23 = vpop.f32.mrf.mxu1  ;;  %v3598_v7 = vadd.f32 %v3597_v20, %v15352_v56 }
 0x1ee   :  { %v14209_v30 = vld [vmem:[#allocation5 + $0xbec] sm:$0xf0]  ;;  %3938 = vmatmul.bf16.vlgmr.msra.gmra.mxu3 %v15219_v57 }
 0x1ef   :  { %v11501_v29 = vld [vmem:[#allocation5 + $0xfd0] sm:$0xf]  ;;  %v10990_v43 = vor.u32 %v14209_v30, %v10989_v26  ;;  %3948 = vmatpush.bf16.msrb.mxu0 %v10734_v37  ;;  %v3616_v22 = vadd.f32 %v3615_v23, %v3598_v7 }
 0x1f0   :  { %v14337_v31 = vld [vmem:[#allocation5 + $0xfec] sm:$0xf0] }
 0x1f1   :  { %v11213_v38 = vld [vmem:[#allocation5 + $0xd90] sm:$0xf]  ;;  %v11502_v46 = vor.u32 %v14337_v31, %v11501_v29  ;;  %3966 = vmatpush.bf16.msrb.mxu1 %v10990_v43 }
 0x1f2   :  { %v14265_v39 = vld [vmem:[#allocation5 + $0xdac] sm:$0xf0] }
 0x1f3   :  { %v10701_v45 = vld [vmem:[#allocation5 + $0x990] sm:$0xf]  ;;  %v11214_v61 = vor.u32 %v14265_v39, %v11213_v38  ;;  %4002 = vmatpush.bf16.msrb.mxu3 %v11502_v46 }
 0x1f4   :  { %v14137_v51 = vld [vmem:[#allocation5 + $0x9ac] sm:$0xf0] }
 0x1f5   :  { %v10957_v55 = vld [vmem:[#allocation5 + $0xb90] sm:$0xf]  ;;  %v10702_v0 = vor.u32 %v14137_v51, %v10701_v45  ;;  %3985 = vmatpush.bf16.msrb.mxu2 %v11214_v61 }
 0x1f6   :  { %v14201_v34 = vld [vmem:[#allocation5 + $0xbac] sm:$0xf0] }
 0x1f7   :  { %v11469_v58 = vld [vmem:[#allocation5 + $0xf90] sm:$0xf]  ;;  %v10958_v1 = vor.u32 %v14201_v34, %v10957_v55  ;;  %3949 = vmatpush.bf16.msrb.mxu0 %v10702_v0  ;;  %v3633_v34 = vpop.f32.mrf.mxu2 }
 0x1f8   :  { %v14329_v59 = vld [vmem:[#allocation5 + $0xfac] sm:$0xf0]  ;;  %3925 = vmatmul.bf16.gmra.mxu2 %v15229_v49 }
 0x1f9   :  { %v11470_v11 = vor.u32 %v14329_v59, %v11469_v58  ;;  %v11181_v8 = vld [vmem:[#allocation5 + $0xd50] sm:$0xf]  ;;  %3967 = vmatpush.bf16.msrb.mxu1 %v10958_v1  ;;  %v3651_v58 = vpop.f32.mrf.mxu3  ;;  %v3634_v1 = vadd.f32 %v3633_v34, %v3616_v22 }
 0x1fa   :  { %v14257_v44 = vld [vmem:[#allocation5 + $0xd6c] sm:$0xf0]  ;;  %3889 = vmatmul.bf16.gmra.mxu0 %v15225_v42 }
 0x1fb   :  { %v10669_v12 = vld [vmem:[#allocation5 + $0x950] sm:$0xf]  ;;  %4003 = vmatpush.bf16.msrb.mxu3 %v11470_v11  ;;  %v11182_v26 = vor.u32 %v14257_v44, %v11181_v8  ;;  %v3599_v11 = vpop.f32.mrf.mxu0  ;;  %v3617_v8 = vpop.f32.mrf.mxu1  ;;  %v15360_v17 = vadd.f32 %v3651_v58, %v3634_v1 }
 0x1fc   :  { %v14129_v13 = vld [vmem:[#allocation5 + $0x96c] sm:$0xf0]  ;;  %v3600_v44 = vadd.f32 %v3599_v11, %v15352_v56  ;;  %3907 = vmatmul.bf16.gmra.mxu1 %v15227_v47 }
 0x1fd   :  { %v10925_v15 = vld [vmem:[#allocation5 + $0xb50] sm:$0xf]  ;;  %v10670_v27 = vor.u32 %v14129_v13, %v10669_v12  ;;  %3986 = vmatpush.bf16.msrb.mxu2 %v11182_v26 }
 0x1fe   :  { %v14193_v18 = vld [vmem:[#allocation5 + $0xb6c] sm:$0xf0]  ;;  %v3618_v7 = vadd.f32 %v3617_v8, %v3600_v44  ;;  %3943 = vmatmul.bf16.gmra.mxu3 %v15231_v52 }
 0x1ff   :  { %v11437_v14 = vld [vmem:[#allocation5 + $0xf50] sm:$0xf]  ;;  %v10926_v29 = vor.u32 %v14193_v18, %v10925_v15  ;;  %3950 = vmatpush.bf16.msrb.mxu0 %v10670_v27 }
 0x200   :  { %v14321_v19 = vld [vmem:[#allocation5 + $0xf6c] sm:$0xf0] }
 0x201   :  { %v11149_v28 = vld [vmem:[#allocation5 + $0xd10] sm:$0xf]  ;;  %v11438_v31 = vor.u32 %v14321_v19, %v11437_v14  ;;  %3968 = vmatpush.bf16.msrb.mxu1 %v10926_v29 }
 0x202   :  { %v14249_v30 = vld [vmem:[#allocation5 + $0xd2c] sm:$0xf0] }
 0x203   :  { %v10637_v32 = vld [vmem:[#allocation5 + $0x910] sm:$0xf]  ;;  %v11150_v39 = vor.u32 %v14249_v30, %v11149_v28  ;;  %4004 = vmatpush.bf16.msrb.mxu3 %v11438_v31 }
 0x204   :  { %v14121_v33 = vld [vmem:[#allocation5 + $0x92c] sm:$0xf0] }
 0x205   :  { %v10893_v24 = vld [vmem:[#allocation5 + $0xb10] sm:$0xf]  ;;  %v10638_v40 = vor.u32 %v14121_v33, %v10637_v32  ;;  %3987 = vmatpush.bf16.msrb.mxu2 %v11150_v39  ;;  %v3653_v39 = vpop.f32.mrf.mxu3 }
 0x206   :  { %v14185_v35 = vld [vmem:[#allocation5 + $0xb2c] sm:$0xf0] }
 0x207   :  { %v11405_v37 = vld [vmem:[#allocation5 + $0xf10] sm:$0xf]  ;;  %v10894_v43 = vor.u32 %v14185_v35, %v10893_v24  ;;  %3951 = vmatpush.bf16.msrb.mxu0 %v10638_v40 }
 0x208   :  { %v14313_v38 = vld [vmem:[#allocation5 + $0xf2c] sm:$0xf0] }
 0x209   :  { %v11117_v41 = vld [vmem:[#allocation5 + $0xcd0] sm:$0xf]  ;;  %v11406_v46 = vor.u32 %v14313_v38, %v11405_v37  ;;  %3969 = vmatpush.bf16.msrb.mxu1 %v10894_v43  ;;  %v3635_v38 = vpop.f32.mrf.mxu2 }
 0x20a   :  { %v14241_v36 = vld [vmem:[#allocation5 + $0xcec] sm:$0xf0]  ;;  %v3636_v43 = vadd.f32 %v3635_v38, %v3618_v7 }
 0x20b   :  { %v10605_v45 = vld [vmem:[#allocation5 + $0x8d0] sm:$0xf]  ;;  %v11118_v12 = vor.u32 %v14241_v36, %v11117_v41  ;;  %4005 = vmatpush.bf16.msrb.mxu3 %v11406_v46  ;;  %v3602_v46 = vpop.f32.mrf.mxu0 }
 0x20c   :  { %v14113_v51 = vld [vmem:[#allocation5 + $0x8ec] sm:$0xf0]  ;;  %v15363_v1 = vadd.f32 %v3653_v39, %v3636_v43  ;;  %v9679_v43 = vld [vmem:[#allocation5 + $0x1b0] sm:$0xf0] }
 0x20d   :  { %v10861_v55 = vld [vmem:[#allocation5 + $0xad0] sm:$0xf]  ;;  %v10606_v13 = vor.u32 %v14113_v51, %v10605_v45  ;;  %3988 = vmatpush.bf16.msrb.mxu2 %v11118_v12  ;;  %v3620_v45 = vpop.f32.mrf.mxu1 }
 0x20e   :  { %v14177_v59 = vld [vmem:[#allocation5 + $0xaec] sm:$0xf0] }
 0x20f   :  { %v11373_v61 = vld [vmem:[#allocation5 + $0xed0] sm:$0xf]  ;;  %v10862_v18 = vor.u32 %v14177_v59, %v10861_v55  ;;  %3952 = vmatpush.bf16.msrb.mxu0 %v10606_v13  ;;  %v3603_v55 = vadd.f32 %v3602_v46, %v15352_v56  ;;  %v13941_v46 = vld [vmem:[#allocation5 + $0x394] sm:$0xf] }
 0x210   :  { %v14305_v0 = vld [vmem:[#allocation5 + $0xeec] sm:$0xf0] }
 0x211   :  { %v11085_v15 = vld [vmem:[#allocation5 + $0xc90] sm:$0xf]  ;;  %v11374_v14 = vor.u32 %v14305_v0, %v11373_v61  ;;  %3970 = vmatpush.bf16.msrb.mxu1 %v10862_v18  ;;  %v10223_v18 = vld [vmem:[#allocation5 + $0x5f0] sm:$0xf0] }
 0x212   :  { %v14233_v16 = vld [vmem:[#allocation5 + $0xcac] sm:$0xf0] }
 0x213   :  { %v10573_v19 = vld [vmem:[#allocation5 + $0x890] sm:$0xf]  ;;  %v11086_v30 = vor.u32 %v14233_v16, %v11085_v15  ;;  %4006 = vmatpush.bf16.msrb.mxu3 %v11374_v14  ;;  %v3621_v15 = vadd.f32 %v3620_v45, %v3603_v55  ;;  %v14013_v16 = vld [vmem:[#allocation5 + $0x5d4] sm:$0xf]  ;;  %v3604_v38 = vpop.f32.mrf.mxu0 }
 0x214   :  { %v14105_v20 = vld [vmem:[#allocation5 + $0x8ac] sm:$0xf0]  ;;  %v13885_v14 = vld [vmem:[#allocation5 + $0x1d4] sm:$0xf] }
 0x215   :  { %v10829_v23 = vld [vmem:[#allocation5 + $0xa90] sm:$0xf]  ;;  %v10574_v29 = vor.u32 %v14105_v20, %v10573_v19  ;;  %3989 = vmatpush.bf16.msrb.mxu2 %v11086_v30  ;;  %v9711_v19 = vld [vmem:[#allocation5 + $0x1f0] sm:$0xf0]  ;;  %v3622_v39 = vpop.f32.mrf.mxu1 }
 0x216   :  { %v14169_v26 = vld [vmem:[#allocation5 + $0xaac] sm:$0xf0]  ;;  %v13949_v20 = vld [vmem:[#allocation5 + $0x3d4] sm:$0xf] }
 0x217   :  { %v11341_v27 = vld [vmem:[#allocation5 + $0xe90] sm:$0xf]  ;;  %v10830_v33 = vor.u32 %v14169_v26, %v10829_v23  ;;  %3953 = vmatpush.bf16.msrb.mxu0 %v10574_v29  ;;  %v9967_v26 = vld [vmem:[#allocation5 + $0x3f0] sm:$0xf0] }
 0x218   :  { %v14297_v28 = vld [vmem:[#allocation5 + $0xeac] sm:$0xf0]  ;;  %v9935_v45 = vld [vmem:[#allocation5 + $0x3b0] sm:$0xf0] }
 0x219   :  { %v11053_v31 = vld [vmem:[#allocation5 + $0xc50] sm:$0xf]  ;;  %v11342_v24 = vor.u32 %v14297_v28, %v11341_v27  ;;  %3971 = vmatpush.bf16.msrb.mxu1 %v10830_v33  ;;  %v14077_v27 = vld [vmem:[#allocation5 + $0x7d4] sm:$0xf]  ;;  %v10226_v33 = vor.u32 %v14013_v16, %v10223_v18 }
 0x21a   :  { %v14225_v32 = vld [vmem:[#allocation5 + $0xc6c] sm:$0xf0]  ;;  %v10479_v28 = vld [vmem:[#allocation5 + $0x7f0] sm:$0xf0] }
 0x21b   :  { %v10541_v22 = vld [vmem:[#allocation5 + $0x850] sm:$0xf]  ;;  %v11054_v34 = vor.u32 %v14225_v32, %v11053_v31  ;;  %4007 = vmatpush.bf16.msrb.mxu3 %v11342_v24  ;;  %v3638_v31 = vpop.f32.mrf.mxu2  ;;  %v3656_v32 = vpop.f32.mrf.mxu3  ;;  %v9714_v24 = vor.u32 %v13885_v14, %v9711_v19  ;;  %v10447_v55 = vld [vmem:[#allocation5 + $0x7b0] sm:$0xf0] }
 0x21c   :  { %v14097_v35 = vld [vmem:[#allocation5 + $0x86c] sm:$0xf0]  ;;  %v9903_v16 = vld [vmem:[#allocation5 + $0x370] sm:$0xf0]  ;;  %v3669_v19 = vpop.f32.mrf.mxu0 }
 0x21d   :  { %v10797_v37 = vld [vmem:[#allocation5 + $0xa50] sm:$0xf]  ;;  %v10542_v58 = vor.u32 %v14097_v35, %v10541_v22  ;;  %3990 = vmatpush.bf16.msrb.mxu2 %v11054_v34  ;;  %v14005_v22 = vld [vmem:[#allocation5 + $0x594] sm:$0xf] }
 0x21e   :  { %v14161_v40 = vld [vmem:[#allocation5 + $0xa6c] sm:$0xf0]  ;;  %v10191_v35 = vld [vmem:[#allocation5 + $0x5b0] sm:$0xf0] }
 0x21f   :  { %v11309_v41 = vld [vmem:[#allocation5 + $0xe50] sm:$0xf]  ;;  %v10798_v11 = vor.u32 %v14161_v40, %v10797_v37  ;;  %3954 = vmatpush.bf16.msrb.mxu0 %v10542_v58  ;;  %v3639_v37 = vadd.f32 %v3638_v31, %v3621_v15  ;;  %v9970_v40 = vor.u32 %v13949_v20, %v9967_v26  ;;  %v10194_v58 = vor.u32 %v14005_v22, %v10191_v35  ;;  %v14061_v18 = vld [vmem:[#allocation5 + $0x754] sm:$0xf]  ;;  %v3687_v20 = vpop.f32.mrf.mxu1 }
 0x220   :  { %v14289_v36 = vld [vmem:[#allocation5 + $0xe6c] sm:$0xf0]  ;;  %v10415_v14 = vld [vmem:[#allocation5 + $0x770] sm:$0xf0] }
 0x221   :  { %v11021_v51 = vld [vmem:[#allocation5 + $0xc10] sm:$0xf]  ;;  %v11310_v8 = vor.u32 %v14289_v36, %v11309_v41  ;;  %3972 = vmatpush.bf16.msrb.mxu1 %v10798_v11  ;;  %v10482_v41 = vor.u32 %v14077_v27, %v10479_v28  ;;  %v13877_v36 = vld [vmem:[#allocation5 + $0x194] sm:$0xf]  ;;  %v15369_v34 = vadd.f32 %v3656_v32, %v3639_v37 }
 0x222   :  { %v14217_v59 = vld [vmem:[#allocation5 + $0xc2c] sm:$0xf0]  ;;  %v13997_v11 = vld [vmem:[#allocation5 + $0x554] sm:$0xf] }
 0x223   :  { %v10509_v61 = vld [vmem:[#allocation5 + $0x810] sm:$0xf]  ;;  %v11022_v23 = vor.u32 %v14217_v59, %v11021_v51  ;;  %4008 = vmatpush.bf16.msrb.mxu3 %v11310_v8  ;;  %v14069_v51 = vld [vmem:[#allocation5 + $0x794] sm:$0xf]  ;;  %v9682_v59 = vor.u32 %v13877_v36, %v9679_v43  ;;  %v3640_v15 = vpop.f32.mrf.mxu2 }
 0x224   :  { %v14089_v0 = vld [vmem:[#allocation5 + $0x82c] sm:$0xf0]  ;;  %v10159_v8 = vld [vmem:[#allocation5 + $0x570] sm:$0xf0] }
 0x225   :  { %v10765_v44 = vld [vmem:[#allocation5 + $0xa10] sm:$0xf]  ;;  %v10510_v7 = vor.u32 %v14089_v0, %v10509_v61  ;;  %3991 = vmatpush.bf16.msrb.mxu2 %v11022_v23  ;;  %v9938_v61 = vor.u32 %v13941_v46, %v9935_v45  ;;  %v10450_v0 = vor.u32 %v14069_v51, %v10447_v55  ;;  %v3670_v23 = vadd.f32 %v3669_v19, %v15360_v17  ;;  %v13989_v27 = vld [vmem:[#allocation5 + $0x514] sm:$0xf] }
 0x226   :  { %v14153_v12 = vld [vmem:[#allocation5 + $0xa2c] sm:$0xf0]  ;;  %v10127_v28 = vld [vmem:[#allocation5 + $0x530] sm:$0xf0] }
 0x227   :  { %v11277_v13 = vld [vmem:[#allocation5 + $0xe10] sm:$0xf]  ;;  %v10766_v30 = vor.u32 %v14153_v12, %v10765_v44  ;;  %3955 = vmatpush.bf16.msrb.mxu0 %v10510_v7  ;;  %v13869_v44 = vld [vmem:[#allocation5 + $0x154] sm:$0xf]  ;;  %v10162_v7 = vor.u32 %v13997_v11, %v10159_v8  ;;  %v10130_v17 = vor.u32 %v13989_v27, %v10127_v28  ;;  %v3671_v11 = vpop.f32.mrf.mxu0  ;;  %v3689_v8 = vpop.f32.mrf.mxu1 }
 0x228   :  { %v14281_v56 = vld [vmem:[#allocation5 + $0xe2c] sm:$0xf0]  ;;  %v9647_v12 = vld [vmem:[#allocation5 + $0x170] sm:$0xf0]  ;;  %3992 = vmatmul.bf16.vlgmr.msrb.gmra.mxu2 %v15241_v3 }
 0x229   :  { %v11278_v29 = vor.u32 %v14281_v56, %v11277_v13  ;;  %3973 = vmatpush.bf16.msrb.mxu1 %v10766_v30  ;;  %4056 = vmatpush.bf16.msra.mxu2 %v10226_v33  ;;  %v13933_v13 = vld [vmem:[#allocation5 + $0x354] sm:$0xf]  ;;  %v3658_v56 = vpop.f32.mrf.mxu3  ;;  %v9650_v26 = vor.u32 %v13869_v44, %v9647_v12  ;;  %v3672_v44 = vadd.f32 %v3671_v11, %v15363_v1 }
 0x22a   :  { %v9906_v30 = vor.u32 %v13933_v13, %v9903_v16  ;;  %v13861_v31 = vld [vmem:[#allocation5 + $0x114] sm:$0xf]  ;;  %3956 = vmatmul.bf16.vlgmr.msrb.gmra.mxu0 %v15237_v62 }
 0x22b   :  { %4009 = vmatpush.bf16.msrb.mxu3 %v11278_v29  ;;  %4020 = vmatpush.bf16.msra.mxu0 %v9714_v24  ;;  %v10418_v29 = vor.u32 %v14061_v18, %v10415_v14  ;;  %v9615_v32 = vld [vmem:[#allocation5 + $0x130] sm:$0xf0]  ;;  %v3688_v24 = vadd.f32 %v3687_v20, %v3670_v23  ;;  %v3705_v51 = vpop.f32.mrf.mxu2 }
 0x22c   :  { %v13925_v33 = vld [vmem:[#allocation5 + $0x314] sm:$0xf]  ;;  %3974 = vmatmul.bf16.vlgmr.msrb.gmra.mxu1 %v15239_v63  ;;  %v9618_v38 = vor.u32 %v13861_v31, %v9615_v32 }
 0x22d   :  { %4038 = vmatpush.bf16.msra.mxu1 %v9970_v40  ;;  %4057 = vmatpush.bf16.msra.mxu2 %v10194_v58  ;;  %v9871_v22 = vld [vmem:[#allocation5 + $0x330] sm:$0xf0] }
 0x22e   :  { %v14053_v35 = vld [vmem:[#allocation5 + $0x714] sm:$0xf]  ;;  %4010 = vmatmul.bf16.vlgmr.msrb.gmra.mxu3 %v15243_v4 }
 0x22f   :  { %4074 = vmatpush.bf16.msra.mxu3 %v10482_v41  ;;  %4021 = vmatpush.bf16.msra.mxu0 %v9682_v59  ;;  %v10383_v37 = vld [vmem:[#allocation5 + $0x730] sm:$0xf0]  ;;  %v9874_v41 = vor.u32 %v13925_v33, %v9871_v22 }
 0x230   :  { %v13981_v39 = vld [vmem:[#allocation5 + $0x4d4] sm:$0xf]  ;;  %v10386_v36 = vor.u32 %v14053_v35, %v10383_v37 }
 0x231   :  { %4039 = vmatpush.bf16.msra.mxu1 %v9938_v61  ;;  %4058 = vmatpush.bf16.msra.mxu2 %v10162_v7  ;;  %v10095_v40 = vld [vmem:[#allocation5 + $0x4f0] sm:$0xf0]  ;;  %v3723_v55 = vpop.f32.mrf.mxu3  ;;  %v3690_v7 = vadd.f32 %v3689_v8, %v3672_v44 }
 0x232   :  { %v13853_v43 = vld [vmem:[#allocation5 + $0xd4] sm:$0xf]  ;;  %v10098_v12 = vor.u32 %v13981_v39, %v10095_v40 }
 0x233   :  { %4075 = vmatpush.bf16.msra.mxu3 %v10450_v0  ;;  %4022 = vmatpush.bf16.msra.mxu0 %v9650_v26  ;;  %v9583_v46 = vld [vmem:[#allocation5 + $0xf0] sm:$0xf0]  ;;  %v3706_v0 = vadd.f32 %v3705_v51, %v3688_v24  ;;  %v3707_v37 = vpop.f32.mrf.mxu2 }
 0x234   :  { %v13917_v45 = vld [vmem:[#allocation5 + $0x2d4] sm:$0xf]  ;;  %v9586_v13 = vor.u32 %v13853_v43, %v9583_v46  ;;  %v3692_v43 = vpop.f32.mrf.mxu1 }
 0x235   :  { %4040 = vmatpush.bf16.msra.mxu1 %v9906_v30  ;;  %v9839_v58 = vld [vmem:[#allocation5 + $0x2f0] sm:$0xf0]  ;;  %4059 = vmatpush.bf16.msra.mxu2 %v10130_v17  ;;  %v3724_v16 = vadd.f32 %v3723_v55, %v3706_v0 }
 0x236   :  { %v14045_v59 = vld [vmem:[#allocation5 + $0x6d4] sm:$0xf]  ;;  %v9842_v18 = vor.u32 %v13917_v45, %v9839_v58 }
 0x237   :  { %4076 = vmatpush.bf16.msra.mxu3 %v10418_v29  ;;  %v10351_v61 = vld [vmem:[#allocation5 + $0x6f0] sm:$0xf0]  ;;  %4023 = vmatpush.bf16.msra.mxu0 %v9618_v38 }
 0x238   :  { %v13973_v15 = vld [vmem:[#allocation5 + $0x494] sm:$0xf]  ;;  %v10354_v14 = vor.u32 %v14045_v59, %v10351_v61  ;;  %3997 = vmatmul.bf16.gmra.mxu2 %v15253_v9 }
 0x239   :  { %v10063_v56 = vld [vmem:[#allocation5 + $0x4b0] sm:$0xf0]  ;;  %4041 = vmatpush.bf16.msra.mxu1 %v9874_v41  ;;  %4060 = vmatpush.bf16.msra.mxu2 %v10098_v12  ;;  %v3725_v17 = vpop.f32.mrf.mxu3  ;;  %v3708_v41 = vadd.f32 %v3707_v37, %v3690_v7 }
 0x23a   :  { %v13845_v19 = vld [vmem:[#allocation5 + $0x94] sm:$0xf]  ;;  %v10066_v1 = vor.u32 %v13973_v15, %v10063_v56  ;;  %3961 = vmatmul.bf16.gmra.mxu0 %v15249_v2 }
 0x23b   :  { %4077 = vmatpush.bf16.msra.mxu3 %v10386_v36  ;;  %v9551_v20 = vld [vmem:[#allocation5 + $0xb0] sm:$0xf0]  ;;  %4024 = vmatpush.bf16.msra.mxu0 %v9586_v13  ;;  %v3674_v36 = vpop.f32.mrf.mxu0  ;;  %v3726_v0 = vadd.f32 %v3725_v17, %v3708_v41 }
 0x23c   :  { %v13909_v23 = vld [vmem:[#allocation5 + $0x294] sm:$0xf]  ;;  %v9554_v30 = vor.u32 %v13845_v19, %v9551_v20  ;;  %v3675_v45 = vadd.f32 %v3674_v36, %v15369_v34  ;;  %3979 = vmatmul.bf16.gmra.mxu1 %v15251_v5  ;;  %v3694_v17 = vpop.f32.mrf.mxu1 }
 0x23d   :  { %v9807_v26 = vld [vmem:[#allocation5 + $0x2b0] sm:$0xf0]  ;;  %4042 = vmatpush.bf16.msra.mxu1 %v9842_v18  ;;  %4061 = vmatpush.bf16.msra.mxu2 %v10066_v1 }
 0x23e   :  { %v14037_v27 = vld [vmem:[#allocation5 + $0x694] sm:$0xf]  ;;  %v9810_v32 = vor.u32 %v13909_v23, %v9807_v26  ;;  %v3693_v15 = vadd.f32 %v3692_v43, %v3675_v45  ;;  %4015 = vmatmul.bf16.gmra.mxu3 %v15255_v10 }
 0x23f   :  { %v10319_v28 = vld [vmem:[#allocation5 + $0x6b0] sm:$0xf0]  ;;  %4078 = vmatpush.bf16.msra.mxu3 %v10354_v14  ;;  %4025 = vmatpush.bf16.msra.mxu0 %v9554_v30  ;;  %v15380_v14 = vpack.c.bf16 %v3726_v0, %v3724_v16  ;;  %v3710_v16 = vpop.f32.mrf.mxu2  ;;  %v15387_v0 = vperm.slane %v15349_v6, 3 }
 0x240   :  { %v13965_v29 = vld [vmem:[#allocation5 + $0x454] sm:$0xf]  ;;  %v10322_v33 = vor.u32 %v14037_v27, %v10319_v28 }
 0x241   :  { %v10031_v31 = vld [vmem:[#allocation5 + $0x470] sm:$0xf0]  ;;  %4043 = vmatpush.bf16.msra.mxu1 %v9810_v32 }
 0x242   :  { %v13837_v24 = vld [vmem:[#allocation5 + $0x54] sm:$0xf]  ;;  %v10034_v51 = vor.u32 %v13965_v29, %v10031_v31  ;;  %v3728_v31 = vpop.f32.mrf.mxu3 }
 0x243   :  { %v9519_v22 = vld [vmem:[#allocation5 + $0x70] sm:$0xf0]  ;;  %4079 = vmatpush.bf16.msra.mxu3 %v10322_v33  ;;  %v3676_v37 = vpop.f32.mrf.mxu0 }
 0x244   :  { %v13901_v35 = vld [vmem:[#allocation5 + $0x254] sm:$0xf]  ;;  %v9522_v55 = vor.u32 %v13837_v24, %v9519_v22  ;;  %4062 = vmatpush.bf16.msra.mxu2 %v10034_v51 }
 0x245   :  { %v9775_v38 = vld [vmem:[#allocation5 + $0x270] sm:$0xf0] }
 0x246   :  { %v14029_v39 = vld [vmem:[#allocation5 + $0x654] sm:$0xf]  ;;  %v9778_v11 = vor.u32 %v13901_v35, %v9775_v38  ;;  %4026 = vmatpush.bf16.msra.mxu0 %v9522_v55  ;;  %v3711_v35 = vadd.f32 %v3710_v16, %v3693_v15 }
 0x247   :  { %v10287_v40 = vld [vmem:[#allocation5 + $0x670] sm:$0xf0]  ;;  %v3712_v15 = vpop.f32.mrf.mxu2 }
 0x248   :  { %v13957_v46 = vld [vmem:[#allocation5 + $0x414] sm:$0xf]  ;;  %v10290_v8 = vor.u32 %v14029_v39, %v10287_v40  ;;  %4044 = vmatpush.bf16.msra.mxu1 %v9778_v11  ;;  %v15384_v51 = vadd.f32 %v3728_v31, %v3711_v35 }
 0x249   :  { %v9999_v58 = vld [vmem:[#allocation5 + $0x430] sm:$0xf0] }
 0x24a   :  { %v13829_v59 = vld [vmem:[#allocation5 + $0x14] sm:$0xf]  ;;  %v10002_v7 = vor.u32 %v13957_v46, %v9999_v58  ;;  %4080 = vmatpush.bf16.msra.mxu3 %v10290_v8 }
 0x24b   :  { %v9487_v61 = vld [vmem:[#allocation5 + $0x30] sm:$0xf0] }
 0x24c   :  { %v13893_v44 = vld [vmem:[#allocation5 + $0x214] sm:$0xf]  ;;  %v9490_v26 = vor.u32 %v13829_v59, %v9487_v61  ;;  %4063 = vmatpush.bf16.msra.mxu2 %v10002_v7 }
 0x24d   :  { %v9743_v12 = vld [vmem:[#allocation5 + $0x230] sm:$0xf0] }
 0x24e   :  { %v14021_v13 = vld [vmem:[#allocation5 + $0x614] sm:$0xf]  ;;  %v9746_v30 = vor.u32 %v13893_v44, %v9743_v12  ;;  %4027 = vmatpush.bf16.msra.mxu0 %v9490_v26 }
 0x24f   :  { %v10255_v34 = vld [vmem:[#allocation5 + $0x630] sm:$0xf0]  ;;  %4064 = vmatmul.bf16.vlgmr.msra.gmra.mxu2 %v15217_v54 }
 0x250   :  { %v14269_v56 = vld [vmem:[#allocation5 + $0xdd4] sm:$0xf]  ;;  %v10258_v29 = vor.u32 %v14021_v13, %v10255_v34  ;;  %4045 = vmatpush.bf16.msra.mxu1 %v9746_v30  ;;  %v3730_v34 = vpop.f32.mrf.mxu3 }
 0x251   :  { %v11247_v18 = vld [vmem:[#allocation5 + $0xdf0] sm:$0xf0]  ;;  %4028 = vmatmul.bf16.vlgmr.msra.gmra.mxu0 %v15213_v48 }
 0x252   :  { %v14141_v19 = vld [vmem:[#allocation5 + $0x9d4] sm:$0xf]  ;;  %v11250_v32 = vor.u32 %v14269_v56, %v11247_v18  ;;  %4081 = vmatpush.bf16.msra.mxu3 %v10258_v29 }
 0x253   :  { %v10735_v20 = vld [vmem:[#allocation5 + $0x9f0] sm:$0xf0]  ;;  %4046 = vmatmul.bf16.vlgmr.msra.gmra.mxu1 %v15215_v53 }
 0x254   :  { %v14205_v23 = vld [vmem:[#allocation5 + $0xbd4] sm:$0xf]  ;;  %v10738_v33 = vor.u32 %v14141_v19, %v10735_v20  ;;  %4128 = vmatpush.bf16.msrb.mxu2 %v11250_v32  ;;  %v3741_v20 = vpop.f32.mrf.mxu0 }
 0x255   :  { %v10991_v27 = vld [vmem:[#allocation5 + $0xbf0] sm:$0xf0]  ;;  %v3742_v7 = vadd.f32 %v3741_v20, %v15387_v0  ;;  %4082 = vmatmul.bf16.vlgmr.msra.gmra.mxu3 %v15219_v57 }
 0x256   :  { %v14333_v28 = vld [vmem:[#allocation5 + $0xfd4] sm:$0xf]  ;;  %v10994_v38 = vor.u32 %v14205_v23, %v10991_v27  ;;  %4092 = vmatpush.bf16.msrb.mxu0 %v10738_v33  ;;  %v3759_v23 = vpop.f32.mrf.mxu1 }
 0x257   :  { %v11503_v1 = vld [vmem:[#allocation5 + $0xff0] sm:$0xf0]  ;;  %v3760_v32 = vadd.f32 %v3759_v23, %v3742_v7 }
 0x258   :  { %v14261_v24 = vld [vmem:[#allocation5 + $0xd94] sm:$0xf]  ;;  %v11506_v39 = vor.u32 %v14333_v28, %v11503_v1  ;;  %4110 = vmatpush.bf16.msrb.mxu1 %v10994_v38 }
 0x259   :  { %v11215_v22 = vld [vmem:[#allocation5 + $0xdb0] sm:$0xf0] }
 0x25a   :  { %v14133_v40 = vld [vmem:[#allocation5 + $0x994] sm:$0xf]  ;;  %v11218_v55 = vor.u32 %v14261_v24, %v11215_v22  ;;  %4146 = vmatpush.bf16.msrb.mxu3 %v11506_v39 }
 0x25b   :  { %v10703_v41 = vld [vmem:[#allocation5 + $0x9b0] sm:$0xf0] }
 0x25c   :  { %v14197_v36 = vld [vmem:[#allocation5 + $0xb94] sm:$0xf]  ;;  %v10706_v58 = vor.u32 %v14133_v40, %v10703_v41  ;;  %4129 = vmatpush.bf16.msrb.mxu2 %v11218_v55 }
 0x25d   :  { %v10959_v43 = vld [vmem:[#allocation5 + $0xbb0] sm:$0xf0] }
 0x25e   :  { %v14325_v46 = vld [vmem:[#allocation5 + $0xf94] sm:$0xf]  ;;  %v10962_v59 = vor.u32 %v14197_v36, %v10959_v43  ;;  %4093 = vmatpush.bf16.msrb.mxu0 %v10706_v58 }
 0x25f   :  { %v11471_v45 = vld [vmem:[#allocation5 + $0xfb0] sm:$0xf0]  ;;  %4069 = vmatmul.bf16.gmra.mxu2 %v15229_v49 }
 0x260   :  { %v11474_v61 = vor.u32 %v14325_v46, %v11471_v45  ;;  %v14253_v11 = vld [vmem:[#allocation5 + $0xd54] sm:$0xf]  ;;  %4111 = vmatpush.bf16.msrb.mxu1 %v10962_v59  ;;  %v3777_v46 = vpop.f32.mrf.mxu2  ;;  %v3795_v45 = vpop.f32.mrf.mxu3 }
 0x261   :  { %v11183_v8 = vld [vmem:[#allocation5 + $0xd70] sm:$0xf0]  ;;  %4033 = vmatmul.bf16.gmra.mxu0 %v15225_v42 }
 0x262   :  { %v14125_v44 = vld [vmem:[#allocation5 + $0x954] sm:$0xf]  ;;  %4147 = vmatpush.bf16.msrb.mxu3 %v11474_v61  ;;  %v11186_v6 = vor.u32 %v14253_v11, %v11183_v8  ;;  %v3778_v61 = vadd.f32 %v3777_v46, %v3760_v32  ;;  %v3743_v11 = vpop.f32.mrf.mxu0  ;;  %v3761_v8 = vpop.f32.mrf.mxu1 }
 0x263   :  { %v10671_v12 = vld [vmem:[#allocation5 + $0x970] sm:$0xf0]  ;;  %4051 = vmatmul.bf16.gmra.mxu1 %v15227_v47 }
 0x264   :  { %v14189_v13 = vld [vmem:[#allocation5 + $0xb54] sm:$0xf]  ;;  %v10674_v26 = vor.u32 %v14125_v44, %v10671_v12  ;;  %4130 = vmatpush.bf16.msrb.mxu2 %v11186_v6  ;;  %v3744_v44 = vadd.f32 %v3743_v11, %v15387_v0 }
 0x265   :  { %v10927_v56 = vld [vmem:[#allocation5 + $0xb70] sm:$0xf0]  ;;  %4087 = vmatmul.bf16.gmra.mxu3 %v15231_v52 }
 0x266   :  { %v14317_v18 = vld [vmem:[#allocation5 + $0xf54] sm:$0xf]  ;;  %v10930_v1 = vor.u32 %v14189_v13, %v10927_v56  ;;  %4094 = vmatpush.bf16.msrb.mxu0 %v10674_v26  ;;  %v15395_v56 = vadd.f32 %v3795_v45, %v3778_v61  ;;  %v3762_v6 = vadd.f32 %v3761_v8, %v3744_v44 }
 0x267   :  { %v11439_v19 = vld [vmem:[#allocation5 + $0xf70] sm:$0xf0] }
 0x268   :  { %v14245_v27 = vld [vmem:[#allocation5 + $0xd14] sm:$0xf]  ;;  %v11442_v30 = vor.u32 %v14317_v18, %v11439_v19  ;;  %4112 = vmatpush.bf16.msrb.mxu1 %v10930_v1 }
 0x269   :  { %v11151_v28 = vld [vmem:[#allocation5 + $0xd30] sm:$0xf0] }
 0x26a   :  { %v14117_v29 = vld [vmem:[#allocation5 + $0x914] sm:$0xf]  ;;  %v11154_v35 = vor.u32 %v14245_v27, %v11151_v28  ;;  %4148 = vmatpush.bf16.msrb.mxu3 %v11442_v30 }
 0x26b   :  { %v10639_v16 = vld [vmem:[#allocation5 + $0x930] sm:$0xf0] }
 0x26c   :  { %v14181_v31 = vld [vmem:[#allocation5 + $0xb14] sm:$0xf]  ;;  %v10642_v37 = vor.u32 %v14117_v29, %v10639_v16  ;;  %4131 = vmatpush.bf16.msrb.mxu2 %v11154_v35  ;;  %v3779_v35 = vpop.f32.mrf.mxu2 }
 0x26d   :  { %v10895_v33 = vld [vmem:[#allocation5 + $0xb30] sm:$0xf0] }
 0x26e   :  { %v14309_v24 = vld [vmem:[#allocation5 + $0xf14] sm:$0xf]  ;;  %v10898_v39 = vor.u32 %v14181_v31, %v10895_v33  ;;  %4095 = vmatpush.bf16.msrb.mxu0 %v10642_v37  ;;  %v3797_v37 = vpop.f32.mrf.mxu3 }
 0x26f   :  { %v11407_v22 = vld [vmem:[#allocation5 + $0xf30] sm:$0xf0] }
 0x270   :  { %v14237_v17 = vld [vmem:[#allocation5 + $0xcd4] sm:$0xf]  ;;  %v11410_v40 = vor.u32 %v14309_v24, %v11407_v22  ;;  %4113 = vmatpush.bf16.msrb.mxu1 %v10898_v39 }
 0x271   :  { %v11119_v38 = vld [vmem:[#allocation5 + $0xcf0] sm:$0xf0] }
 0x272   :  { %v14109_v41 = vld [vmem:[#allocation5 + $0x8d4] sm:$0xf]  ;;  %v11122_v12 = vor.u32 %v14237_v17, %v11119_v38  ;;  %4149 = vmatpush.bf16.msrb.mxu3 %v11410_v40  ;;  %v3780_v40 = vadd.f32 %v3779_v35, %v3762_v6 }
 0x273   :  { %v10607_v36 = vld [vmem:[#allocation5 + $0x8f0] sm:$0xf0] }
 0x274   :  { %v14173_v43 = vld [vmem:[#allocation5 + $0xad4] sm:$0xf]  ;;  %v10610_v13 = vor.u32 %v14109_v41, %v10607_v36  ;;  %4132 = vmatpush.bf16.msrb.mxu2 %v11122_v12  ;;  %v3746_v41 = vpop.f32.mrf.mxu0  ;;  %v3764_v36 = vpop.f32.mrf.mxu1  ;;  %v15398_v11 = vadd.f32 %v3797_v37, %v3780_v40  ;;  %v9685_v40 = vld [vmem:[#allocation5 + $0x198] sm:$0xf] }
 0x275   :  { %v10863_v55 = vld [vmem:[#allocation5 + $0xaf0] sm:$0xf0]  ;;  %v3747_v46 = vadd.f32 %v3746_v41, %v15387_v0  ;;  %v13882_v41 = vld [vmem:[#allocation5 + $0x1b4] sm:$0xf0] }
 0x276   :  { %v14301_v58 = vld [vmem:[#allocation5 + $0xed4] sm:$0xf]  ;;  %v10866_v18 = vor.u32 %v14173_v43, %v10863_v55  ;;  %4096 = vmatpush.bf16.msrb.mxu0 %v10610_v13 }
 0x277   :  { %v11375_v59 = vld [vmem:[#allocation5 + $0xef0] sm:$0xf0] }
 0x278   :  { %v14229_v15 = vld [vmem:[#allocation5 + $0xc94] sm:$0xf]  ;;  %v11378_v19 = vor.u32 %v14301_v58, %v11375_v59  ;;  %4114 = vmatpush.bf16.msrb.mxu1 %v10866_v18  ;;  %v10229_v18 = vld [vmem:[#allocation5 + $0x5d8] sm:$0xf] }
 0x279   :  { %v11087_v34 = vld [vmem:[#allocation5 + $0xcb0] sm:$0xf0] }
 0x27a   :  { %v14101_v20 = vld [vmem:[#allocation5 + $0x894] sm:$0xf]  ;;  %v11090_v1 = vor.u32 %v14229_v15, %v11087_v34  ;;  %4150 = vmatpush.bf16.msrb.mxu3 %v11378_v19  ;;  %v3765_v34 = vadd.f32 %v3764_v36, %v3747_v46  ;;  %v14018_v19 = vld [vmem:[#allocation5 + $0x5f4] sm:$0xf0] }
 0x27b   :  { %v10575_v23 = vld [vmem:[#allocation5 + $0x8b0] sm:$0xf0]  ;;  %v9941_v36 = vld [vmem:[#allocation5 + $0x398] sm:$0xf] }
 0x27c   :  { %v14165_v7 = vld [vmem:[#allocation5 + $0xa94] sm:$0xf]  ;;  %v10578_v30 = vor.u32 %v14101_v20, %v10575_v23  ;;  %4133 = vmatpush.bf16.msrb.mxu2 %v11090_v1  ;;  %v9717_v20 = vld [vmem:[#allocation5 + $0x1d8] sm:$0xf]  ;;  %v3748_v37 = vpop.f32.mrf.mxu0 }
 0x27d   :  { %v10831_v26 = vld [vmem:[#allocation5 + $0xab0] sm:$0xf0]  ;;  %v13890_v23 = vld [vmem:[#allocation5 + $0x1f4] sm:$0xf0] }
 0x27e   :  { %v14293_v27 = vld [vmem:[#allocation5 + $0xe94] sm:$0xf]  ;;  %v10834_v31 = vor.u32 %v14165_v7, %v10831_v26  ;;  %4097 = vmatpush.bf16.msrb.mxu0 %v10578_v30  ;;  %v9973_v7 = vld [vmem:[#allocation5 + $0x3d8] sm:$0xf] }
 0x27f   :  { %v11343_v28 = vld [vmem:[#allocation5 + $0xeb0] sm:$0xf0]  ;;  %v14082_v1 = vld [vmem:[#allocation5 + $0x7f4] sm:$0xf0] }
 0x280   :  { %v14221_v29 = vld [vmem:[#allocation5 + $0xc54] sm:$0xf]  ;;  %v11346_v32 = vor.u32 %v14293_v27, %v11343_v28  ;;  %4115 = vmatpush.bf16.msrb.mxu1 %v10834_v31  ;;  %v13954_v27 = vld [vmem:[#allocation5 + $0x3f4] sm:$0xf0]  ;;  %v3800_v31 = vpop.f32.mrf.mxu3 }
 0x281   :  { %v11055_v16 = vld [vmem:[#allocation5 + $0xc70] sm:$0xf0]  ;;  %v10485_v28 = vld [vmem:[#allocation5 + $0x7d8] sm:$0xf] }
 0x282   :  { %v14093_v33 = vld [vmem:[#allocation5 + $0x854] sm:$0xf]  ;;  %v11058_v45 = vor.u32 %v14221_v29, %v11055_v16  ;;  %4151 = vmatpush.bf16.msrb.mxu3 %v11346_v32  ;;  %v3782_v16 = vpop.f32.mrf.mxu2  ;;  %v10230_v32 = vor.u32 %v14018_v19, %v10229_v18  ;;  %v10453_v46 = vld [vmem:[#allocation5 + $0x798] sm:$0xf] }
 0x283   :  { %v10543_v24 = vld [vmem:[#allocation5 + $0x870] sm:$0xf0]  ;;  %v3783_v35 = vadd.f32 %v3782_v16, %v3765_v34  ;;  %v9909_v34 = vld [vmem:[#allocation5 + $0x358] sm:$0xf] }
 0x284   :  { %v14157_v22 = vld [vmem:[#allocation5 + $0xa54] sm:$0xf]  ;;  %v10546_v55 = vor.u32 %v14093_v33, %v10543_v24  ;;  %4134 = vmatpush.bf16.msrb.mxu2 %v11058_v45  ;;  %v9718_v33 = vor.u32 %v13890_v23, %v9717_v20  ;;  %v10197_v24 = vld [vmem:[#allocation5 + $0x598] sm:$0xf] }
 0x285   :  { %v10799_v17 = vld [vmem:[#allocation5 + $0xa70] sm:$0xf0]  ;;  %v14074_v45 = vld [vmem:[#allocation5 + $0x7b4] sm:$0xf0] }
 0x286   :  { %v14285_v38 = vld [vmem:[#allocation5 + $0xe54] sm:$0xf]  ;;  %v10802_v8 = vor.u32 %v14157_v22, %v10799_v17  ;;  %4098 = vmatpush.bf16.msrb.mxu0 %v10546_v55  ;;  %v14010_v22 = vld [vmem:[#allocation5 + $0x5b4] sm:$0xf0]  ;;  %v3766_v17 = vpop.f32.mrf.mxu1  ;;  %v15404_v55 = vadd.f32 %v3800_v31, %v3783_v35 }
 0x287   :  { %v11311_v39 = vld [vmem:[#allocation5 + $0xe70] sm:$0xf0]  ;;  %v13938_v19 = vld [vmem:[#allocation5 + $0x374] sm:$0xf0] }
 0x288   :  { %v14213_v43 = vld [vmem:[#allocation5 + $0xc14] sm:$0xf]  ;;  %v11314_v44 = vor.u32 %v14285_v38, %v11311_v39  ;;  %4116 = vmatpush.bf16.msrb.mxu1 %v10802_v8  ;;  %v9974_v38 = vor.u32 %v13954_v27, %v9973_v7  ;;  %v10486_v39 = vor.u32 %v14082_v1, %v10485_v28  ;;  %v10454_v8 = vor.u32 %v14074_v45, %v10453_v46  ;;  %v3802_v18 = vpop.f32.mrf.mxu3  ;;  %v10421_v20 = vld [vmem:[#allocation5 + $0x758] sm:$0xf]  ;;  %v3813_v7 = vpop.f32.mrf.mxu0 }
 0x289   :  { %v11023_v58 = vld [vmem:[#allocation5 + $0xc30] sm:$0xf0]  ;;  %v14066_v23 = vld [vmem:[#allocation5 + $0x774] sm:$0xf0] }
 0x28a   :  { %v14085_v59 = vld [vmem:[#allocation5 + $0x814] sm:$0xf]  ;;  %v11026_v6 = vor.u32 %v14213_v43, %v11023_v58  ;;  %4152 = vmatpush.bf16.msrb.mxu3 %v11314_v44  ;;  %v13946_v43 = vld [vmem:[#allocation5 + $0x3b4] sm:$0xf0]  ;;  %v10198_v58 = vor.u32 %v14010_v22, %v10197_v24  ;;  %v10422_v16 = vor.u32 %v14066_v23, %v10421_v20 }
 0x28b   :  { %v10511_v61 = vld [vmem:[#allocation5 + $0x830] sm:$0xf0]  ;;  %v10165_v44 = vld [vmem:[#allocation5 + $0x558] sm:$0xf] }
 0x28c   :  { %v14149_v12 = vld [vmem:[#allocation5 + $0xa14] sm:$0xf]  ;;  %v10514_v26 = vor.u32 %v14085_v59, %v10511_v61  ;;  %4135 = vmatpush.bf16.msrb.mxu2 %v11026_v6  ;;  %v9686_v59 = vor.u32 %v13882_v41, %v9685_v40  ;;  %v9942_v61 = vor.u32 %v13946_v43, %v9941_v36  ;;  %v10133_v1 = vld [vmem:[#allocation5 + $0x518] sm:$0xf] }
 0x28d   :  { %v10767_v13 = vld [vmem:[#allocation5 + $0xa30] sm:$0xf0]  ;;  %v9621_v31 = vld [vmem:[#allocation5 + $0x118] sm:$0xf] }
 0x28e   :  { %v14277_v15 = vld [vmem:[#allocation5 + $0xe14] sm:$0xf]  ;;  %v10770_v30 = vor.u32 %v14149_v12, %v10767_v13  ;;  %4099 = vmatpush.bf16.msrb.mxu0 %v10514_v26  ;;  %v14002_v12 = vld [vmem:[#allocation5 + $0x574] sm:$0xf0]  ;;  %v3831_v6 = vpop.f32.mrf.mxu1  ;;  %v3814_v26 = vadd.f32 %v3813_v7, %v15395_v56 }
 0x28f   :  { %v11279_v0 = vld [vmem:[#allocation5 + $0xe30] sm:$0xf0]  ;;  %v9653_v13 = vld [vmem:[#allocation5 + $0x158] sm:$0xf]  ;;  %v10166_v27 = vor.u32 %v14002_v12, %v10165_v44  ;;  %4136 = vmatmul.bf16.vlgmr.msrb.gmra.mxu2 %v15241_v3 }
 0x290   :  { %v11282_v29 = vor.u32 %v14277_v15, %v11279_v0  ;;  %4117 = vmatpush.bf16.msrb.mxu1 %v10770_v30  ;;  %4200 = vmatpush.bf16.msra.mxu2 %v10230_v32  ;;  %v13874_v15 = vld [vmem:[#allocation5 + $0x174] sm:$0xf0]  ;;  %v3784_v0 = vpop.f32.mrf.mxu2  ;;  %v3832_v24 = vadd.f32 %v3831_v6, %v3814_v26  ;;  %v3815_v12 = vpop.f32.mrf.mxu0 }
 0x291   :  { %v9654_v28 = vor.u32 %v13874_v15, %v9653_v13  ;;  %v13994_v30 = vld [vmem:[#allocation5 + $0x534] sm:$0xf0]  ;;  %4100 = vmatmul.bf16.vlgmr.msrb.gmra.mxu0 %v15237_v62  ;;  %v3816_v15 = vadd.f32 %v3815_v12, %v15398_v11 }
 0x292   :  { %4153 = vmatpush.bf16.msrb.mxu3 %v11282_v29  ;;  %4164 = vmatpush.bf16.msra.mxu0 %v9718_v33  ;;  %v9910_v29 = vor.u32 %v13938_v19, %v9909_v34  ;;  %v13866_v32 = vld [vmem:[#allocation5 + $0x134] sm:$0xf0]  ;;  %v10134_v56 = vor.u32 %v13994_v30, %v10133_v1 }
 0x293   :  { %v9877_v33 = vld [vmem:[#allocation5 + $0x318] sm:$0xf]  ;;  %4118 = vmatmul.bf16.vlgmr.msrb.gmra.mxu1 %v15239_v63  ;;  %v9622_v17 = vor.u32 %v13866_v32, %v9621_v31 }
 0x294   :  { %4182 = vmatpush.bf16.msra.mxu1 %v9974_v38  ;;  %4201 = vmatpush.bf16.msra.mxu2 %v10198_v58  ;;  %v13930_v22 = vld [vmem:[#allocation5 + $0x334] sm:$0xf0]  ;;  %v3867_v58 = vpop.f32.mrf.mxu3 }
 0x295   :  { %v10389_v35 = vld [vmem:[#allocation5 + $0x718] sm:$0xf]  ;;  %4154 = vmatmul.bf16.vlgmr.msrb.gmra.mxu3 %v15243_v4  ;;  %v9878_v40 = vor.u32 %v13930_v22, %v9877_v33 }
 0x296   :  { %4218 = vmatpush.bf16.msra.mxu3 %v10486_v39  ;;  %4165 = vmatpush.bf16.msra.mxu0 %v9686_v59  ;;  %v14058_v37 = vld [vmem:[#allocation5 + $0x734] sm:$0xf0]  ;;  %v3833_v13 = vpop.f32.mrf.mxu1 }
 0x297   :  { %v10101_v38 = vld [vmem:[#allocation5 + $0x4d8] sm:$0xf]  ;;  %v10390_v41 = vor.u32 %v14058_v37, %v10389_v35 }
 0x298   :  { %4183 = vmatpush.bf16.msra.mxu1 %v9942_v61  ;;  %4202 = vmatpush.bf16.msra.mxu2 %v10166_v27  ;;  %v13986_v39 = vld [vmem:[#allocation5 + $0x4f4] sm:$0xf0]  ;;  %v3849_v45 = vpop.f32.mrf.mxu2 }
 0x299   :  { %v9589_v36 = vld [vmem:[#allocation5 + $0xd8] sm:$0xf]  ;;  %v3850_v44 = vadd.f32 %v3849_v45, %v3832_v24  ;;  %v10102_v34 = vor.u32 %v13986_v39, %v10101_v38 }
 0x29a   :  { %4219 = vmatpush.bf16.msra.mxu3 %v10454_v8  ;;  %4166 = vmatpush.bf16.msra.mxu0 %v9654_v28  ;;  %v13858_v43 = vld [vmem:[#allocation5 + $0xf4] sm:$0xf0]  ;;  %v3834_v28 = vadd.f32 %v3833_v13, %v3816_v15 }
 0x29b   :  { %v9845_v46 = vld [vmem:[#allocation5 + $0x2d8] sm:$0xf]  ;;  %v9590_v0 = vor.u32 %v13858_v43, %v9589_v36  ;;  %v3868_v20 = vadd.f32 %v3867_v58, %v3850_v44  ;;  %v3818_v36 = vpop.f32.mrf.mxu0 }
 0x29c   :  { %4184 = vmatpush.bf16.msra.mxu1 %v9910_v29  ;;  %v13922_v59 = vld [vmem:[#allocation5 + $0x2f4] sm:$0xf0]  ;;  %4203 = vmatpush.bf16.msra.mxu2 %v10134_v56  ;;  %v3819_v45 = vadd.f32 %v3818_v36, %v15404_v55 }
 0x29d   :  { %v10357_v61 = vld [vmem:[#allocation5 + $0x6d8] sm:$0xf]  ;;  %v9846_v23 = vor.u32 %v13922_v59, %v9845_v46 }
 0x29e   :  { %4220 = vmatpush.bf16.msra.mxu3 %v10422_v16  ;;  %v14050_v8 = vld [vmem:[#allocation5 + $0x6f4] sm:$0xf0]  ;;  %4167 = vmatpush.bf16.msra.mxu0 %v9622_v17  ;;  %v3869_v17 = vpop.f32.mrf.mxu3  ;;  %v3836_v43 = vpop.f32.mrf.mxu1 }
 0x29f   :  { %v10069_v18 = vld [vmem:[#allocation5 + $0x498] sm:$0xf]  ;;  %v10358_v7 = vor.u32 %v14050_v8, %v10357_v61  ;;  %4141 = vmatmul.bf16.gmra.mxu2 %v15253_v9 }
 0x2a0   :  { %v13978_v19 = vld [vmem:[#allocation5 + $0x4b4] sm:$0xf0]  ;;  %4185 = vmatpush.bf16.msra.mxu1 %v9878_v40  ;;  %4204 = vmatpush.bf16.msra.mxu2 %v10102_v34  ;;  %v3851_v56 = vpop.f32.mrf.mxu2 }
 0x2a1   :  { %v9557_v6 = vld [vmem:[#allocation5 + $0x98] sm:$0xf]  ;;  %v10070_v11 = vor.u32 %v13978_v19, %v10069_v18  ;;  %v3837_v19 = vadd.f32 %v3836_v43, %v3819_v45  ;;  %4105 = vmatmul.bf16.gmra.mxu0 %v15249_v2 }
 0x2a2   :  { %4221 = vmatpush.bf16.msra.mxu3 %v10390_v41  ;;  %v13850_v26 = vld [vmem:[#allocation5 + $0xb4] sm:$0xf0]  ;;  %4168 = vmatpush.bf16.msra.mxu0 %v9590_v0  ;;  %v3852_v41 = vadd.f32 %v3851_v56, %v3834_v28 }
 0x2a3   :  { %v9813_v27 = vld [vmem:[#allocation5 + $0x298] sm:$0xf]  ;;  %v9558_v16 = vor.u32 %v13850_v26, %v9557_v6  ;;  %4123 = vmatmul.bf16.gmra.mxu1 %v15251_v5 }
 0x2a4   :  { %v13914_v1 = vld [vmem:[#allocation5 + $0x2b4] sm:$0xf0]  ;;  %4186 = vmatpush.bf16.msra.mxu1 %v9846_v23  ;;  %4205 = vmatpush.bf16.msra.mxu2 %v10070_v11  ;;  %v3870_v12 = vadd.f32 %v3869_v17, %v3852_v41  ;;  %v3820_v17 = vpop.f32.mrf.mxu0 }
 0x2a5   :  { %v10325_v30 = vld [vmem:[#allocation5 + $0x698] sm:$0xf]  ;;  %v9814_v33 = vor.u32 %v13914_v1, %v9813_v27  ;;  %4159 = vmatmul.bf16.gmra.mxu3 %v15255_v10 }
 0x2a6   :  { %v14042_v29 = vld [vmem:[#allocation5 + $0x6b4] sm:$0xf0]  ;;  %4222 = vmatpush.bf16.msra.mxu3 %v10358_v7  ;;  %4169 = vmatpush.bf16.msra.mxu0 %v9558_v16  ;;  %v15415_v6 = vpack.c.bf16 %v3870_v12, %v3868_v20 }
 0x2a7   :  { %v10037_v31 = vld [vmem:[#allocation5 + $0x458] sm:$0xf]  ;;  %v10326_v24 = vor.u32 %v14042_v29, %v10325_v30 }
 0x2a8   :  { %v13970_v32 = vld [vmem:[#allocation5 + $0x474] sm:$0xf0]  ;;  %4187 = vmatpush.bf16.msra.mxu1 %v9814_v33  ;;  %v3854_v20 = vpop.f32.mrf.mxu2  ;;  %v3872_v33 = vpop.f32.mrf.mxu3 }
 0x2a9   :  { %v9525_v22 = vld [vmem:[#allocation5 + $0x58] sm:$0xf]  ;;  %v10038_v58 = vor.u32 %v13970_v32, %v10037_v31  ;;  %v3855_v56 = vadd.f32 %v3854_v20, %v3837_v19 }
 0x2aa   :  { %v13842_v35 = vld [vmem:[#allocation5 + $0x74] sm:$0xf0]  ;;  %4223 = vmatpush.bf16.msra.mxu3 %v10326_v24 }
 0x2ab   :  { %v9781_v37 = vld [vmem:[#allocation5 + $0x258] sm:$0xf]  ;;  %v9526_v59 = vor.u32 %v13842_v35, %v9525_v22  ;;  %4206 = vmatpush.bf16.msra.mxu2 %v10038_v58 }
 0x2ac   :  { %v13906_v38 = vld [vmem:[#allocation5 + $0x274] sm:$0xf0] }
 0x2ad   :  { %v10293_v39 = vld [vmem:[#allocation5 + $0x658] sm:$0xf]  ;;  %v9782_v13 = vor.u32 %v13906_v38, %v9781_v37  ;;  %4170 = vmatpush.bf16.msra.mxu0 %v9526_v59  ;;  %v3838_v38 = vpop.f32.mrf.mxu1  ;;  %v15419_v59 = vadd.f32 %v3872_v33, %v3855_v56 }
 0x2ae   :  { %v14034_v40 = vld [vmem:[#allocation5 + $0x674] sm:$0xf0] }
 0x2af   :  { %v10005_v46 = vld [vmem:[#allocation5 + $0x418] sm:$0xf]  ;;  %v10294_v15 = vor.u32 %v14034_v40, %v10293_v39  ;;  %4188 = vmatpush.bf16.msra.mxu1 %v9782_v13  ;;  %v15421_v13 = vld [vmem:[#allocation7] sm:$0xff] }
 0x2b0   :  { %v13962_v61 = vld [vmem:[#allocation5 + $0x434] sm:$0xf0] }
 0x2b1   :  { %v9493_v8 = vld [vmem:[#allocation5 + $0x18] sm:$0xf]  ;;  %v10006_v1 = vor.u32 %v13962_v61, %v10005_v46  ;;  %4224 = vmatpush.bf16.msra.mxu3 %v10294_v15  ;;  %v15424_v15 = vperm.slane %v15421_v13, 4 }
 0x2b2   :  { %v13834_v44 = vld [vmem:[#allocation5 + $0x34] sm:$0xf0] }
 0x2b3   :  { %v9749_v34 = vld [vmem:[#allocation5 + $0x218] sm:$0xf]  ;;  %v9494_v30 = vor.u32 %v13834_v44, %v9493_v8  ;;  %4207 = vmatpush.bf16.msra.mxu2 %v10006_v1  ;;  %v3885_v1 = vpop.f32.mrf.mxu0 }
 0x2b4   :  { %v13898_v0 = vld [vmem:[#allocation5 + $0x234] sm:$0xf0] }
 0x2b5   :  { %v10261_v18 = vld [vmem:[#allocation5 + $0x618] sm:$0xf]  ;;  %v9750_v31 = vor.u32 %v13898_v0, %v9749_v34  ;;  %4171 = vmatpush.bf16.msra.mxu0 %v9494_v30  ;;  %v3903_v30 = vpop.f32.mrf.mxu1 }
 0x2b6   :  { %v14026_v55 = vld [vmem:[#allocation5 + $0x634] sm:$0xf0]  ;;  %4208 = vmatmul.bf16.vlgmr.msra.gmra.mxu2 %v15217_v54 }
 0x2b7   :  { %v11253_v23 = vld [vmem:[#allocation5 + $0xdd8] sm:$0xf]  ;;  %v10262_v32 = vor.u32 %v14026_v55, %v10261_v18  ;;  %4189 = vmatpush.bf16.msra.mxu1 %v9750_v31 }
 0x2b8   :  { %v14274_v7 = vld [vmem:[#allocation5 + $0xdf4] sm:$0xf0]  ;;  %4172 = vmatmul.bf16.vlgmr.msra.gmra.mxu0 %v15213_v48 }
 0x2b9   :  { %v10741_v26 = vld [vmem:[#allocation5 + $0x9d8] sm:$0xf]  ;;  %v11254_v24 = vor.u32 %v14274_v7, %v11253_v23  ;;  %4225 = vmatpush.bf16.msra.mxu3 %v10262_v32  ;;  %v3856_v23 = vpop.f32.mrf.mxu2  ;;  %v3874_v7 = vpop.f32.mrf.mxu3 }
 0x2ba   :  { %v14146_v27 = vld [vmem:[#allocation5 + $0x9f4] sm:$0xf0]  ;;  %4190 = vmatmul.bf16.vlgmr.msra.gmra.mxu1 %v15215_v53 }
 0x2bb   :  { %v10997_v28 = vld [vmem:[#allocation5 + $0xbd8] sm:$0xf]  ;;  %v10742_v22 = vor.u32 %v14146_v27, %v10741_v26  ;;  %4272 = vmatpush.bf16.msrb.mxu2 %v11254_v24 }
 0x2bc   :  { %v14210_v29 = vld [vmem:[#allocation5 + $0xbf4] sm:$0xf0]  ;;  %4226 = vmatmul.bf16.vlgmr.msra.gmra.mxu3 %v15219_v57 }
 0x2bd   :  { %v11509_v11 = vld [vmem:[#allocation5 + $0xfd8] sm:$0xf]  ;;  %v10998_v39 = vor.u32 %v14210_v29, %v10997_v28  ;;  %4236 = vmatpush.bf16.msrb.mxu0 %v10742_v22  ;;  %v3886_v29 = vadd.f32 %v3885_v1, %v15424_v15 }
 0x2be   :  { %v14338_v16 = vld [vmem:[#allocation5 + $0xff4] sm:$0xf0] }
 0x2bf   :  { %v11221_v35 = vld [vmem:[#allocation5 + $0xd98] sm:$0xf]  ;;  %v11510_v40 = vor.u32 %v14338_v16, %v11509_v11  ;;  %4254 = vmatpush.bf16.msrb.mxu1 %v10998_v39 }
 0x2c0   :  { %v14266_v37 = vld [vmem:[#allocation5 + $0xdb4] sm:$0xf0] }
 0x2c1   :  { %v10709_v41 = vld [vmem:[#allocation5 + $0x998] sm:$0xf]  ;;  %v11222_v61 = vor.u32 %v14266_v37, %v11221_v35  ;;  %4290 = vmatpush.bf16.msrb.mxu3 %v11510_v40  ;;  %v3904_v37 = vadd.f32 %v3903_v30, %v3886_v29 }
 0x2c2   :  { %v14138_v36 = vld [vmem:[#allocation5 + $0x9b4] sm:$0xf0] }
 0x2c3   :  { %v10965_v43 = vld [vmem:[#allocation5 + $0xb98] sm:$0xf]  ;;  %v10710_v8 = vor.u32 %v14138_v36, %v10709_v41  ;;  %4273 = vmatpush.bf16.msrb.mxu2 %v11222_v61 }
 0x2c4   :  { %v14202_v46 = vld [vmem:[#allocation5 + $0xbb4] sm:$0xf0] }
 0x2c5   :  { %v11477_v45 = vld [vmem:[#allocation5 + $0xf98] sm:$0xf]  ;;  %v10966_v44 = vor.u32 %v14202_v46, %v10965_v43  ;;  %4237 = vmatpush.bf16.msrb.mxu0 %v10710_v8  ;;  %v3921_v8 = vpop.f32.mrf.mxu2 }
 0x2c6   :  { %v14330_v58 = vld [vmem:[#allocation5 + $0xfb4] sm:$0xf0]  ;;  %4213 = vmatmul.bf16.gmra.mxu2 %v15229_v49 }
 0x2c7   :  { %v11478_v12 = vor.u32 %v14330_v58, %v11477_v45  ;;  %v11189_v34 = vld [vmem:[#allocation5 + $0xd58] sm:$0xf]  ;;  %4255 = vmatpush.bf16.msrb.mxu1 %v10966_v44  ;;  %v3939_v44 = vpop.f32.mrf.mxu3 }
 0x2c8   :  { %v14258_v0 = vld [vmem:[#allocation5 + $0xd74] sm:$0xf0]  ;;  %4177 = vmatmul.bf16.gmra.mxu0 %v15225_v42 }
 0x2c9   :  { %v10677_v18 = vld [vmem:[#allocation5 + $0x958] sm:$0xf]  ;;  %4291 = vmatpush.bf16.msrb.mxu3 %v11478_v12  ;;  %v11190_v11 = vor.u32 %v14258_v0, %v11189_v34 }
 0x2ca   :  { %v14130_v19 = vld [vmem:[#allocation5 + $0x974] sm:$0xf0]  ;;  %4195 = vmatmul.bf16.gmra.mxu1 %v15227_v47 }
 0x2cb   :  { %v10933_v55 = vld [vmem:[#allocation5 + $0xb58] sm:$0xf]  ;;  %v10678_v16 = vor.u32 %v14130_v19, %v10677_v18  ;;  %4274 = vmatpush.bf16.msrb.mxu2 %v11190_v11  ;;  %v3922_v18 = vadd.f32 %v3921_v8, %v3904_v37  ;;  %v3887_v19 = vpop.f32.mrf.mxu0 }
 0x2cc   :  { %v14194_v26 = vld [vmem:[#allocation5 + $0xb74] sm:$0xf0]  ;;  %v3888_v23 = vadd.f32 %v3887_v19, %v15424_v15  ;;  %4231 = vmatmul.bf16.gmra.mxu3 %v15231_v52 }
 0x2cd   :  { %v11445_v27 = vld [vmem:[#allocation5 + $0xf58] sm:$0xf]  ;;  %v10934_v20 = vor.u32 %v14194_v26, %v10933_v55  ;;  %4238 = vmatpush.bf16.msrb.mxu0 %v10678_v16  ;;  %v3905_v55 = vpop.f32.mrf.mxu1  ;;  %v15432_v1 = vadd.f32 %v3939_v44, %v3922_v18 }
 0x2ce   :  { %v14322_v28 = vld [vmem:[#allocation5 + $0xf74] sm:$0xf0] }
 0x2cf   :  { %v11157_v31 = vld [vmem:[#allocation5 + $0xd18] sm:$0xf]  ;;  %v11446_v33 = vor.u32 %v14322_v28, %v11445_v27  ;;  %4256 = vmatpush.bf16.msrb.mxu1 %v10934_v20 }
 0x2d0   :  { %v14250_v32 = vld [vmem:[#allocation5 + $0xd34] sm:$0xf0] }
 0x2d1   :  { %v10645_v24 = vld [vmem:[#allocation5 + $0x918] sm:$0xf]  ;;  %v11158_v39 = vor.u32 %v14250_v32, %v11157_v31  ;;  %4292 = vmatpush.bf16.msrb.mxu3 %v11446_v33  ;;  %v3906_v32 = vadd.f32 %v3905_v55, %v3888_v23 }
 0x2d2   :  { %v14122_v22 = vld [vmem:[#allocation5 + $0x934] sm:$0xf0] }
 0x2d3   :  { %v10901_v35 = vld [vmem:[#allocation5 + $0xb18] sm:$0xf]  ;;  %v10646_v40 = vor.u32 %v14122_v22, %v10645_v24  ;;  %4275 = vmatpush.bf16.msrb.mxu2 %v11158_v39  ;;  %v3890_v8 = vpop.f32.mrf.mxu0 }
 0x2d4   :  { %v14186_v56 = vld [vmem:[#allocation5 + $0xb34] sm:$0xf0] }
 0x2d5   :  { %v11413_v17 = vld [vmem:[#allocation5 + $0xf18] sm:$0xf]  ;;  %v10902_v43 = vor.u32 %v14186_v56, %v10901_v35  ;;  %4239 = vmatpush.bf16.msrb.mxu0 %v10646_v40  ;;  %v3908_v44 = vpop.f32.mrf.mxu1 }
 0x2d6   :  { %v14314_v38 = vld [vmem:[#allocation5 + $0xf34] sm:$0xf0] }
 0x2d7   :  { %v11125_v41 = vld [vmem:[#allocation5 + $0xcd8] sm:$0xf]  ;;  %v11414_v46 = vor.u32 %v14314_v38, %v11413_v17  ;;  %4257 = vmatpush.bf16.msrb.mxu1 %v10902_v43  ;;  %v3941_v43 = vpop.f32.mrf.mxu3 }
 0x2d8   :  { %v14242_v36 = vld [vmem:[#allocation5 + $0xcf4] sm:$0xf0] }
 0x2d9   :  { %v10613_v45 = vld [vmem:[#allocation5 + $0x8d8] sm:$0xf]  ;;  %v11126_v7 = vor.u32 %v14242_v36, %v11125_v41  ;;  %4293 = vmatpush.bf16.msrb.mxu3 %v11414_v46  ;;  %v3923_v36 = vpop.f32.mrf.mxu2 }
 0x2da   :  { %v14114_v58 = vld [vmem:[#allocation5 + $0x8f4] sm:$0xf0] }
 0x2db   :  { %v10869_v61 = vld [vmem:[#allocation5 + $0xad8] sm:$0xf]  ;;  %v10614_v26 = vor.u32 %v14114_v58, %v10613_v45  ;;  %4276 = vmatpush.bf16.msrb.mxu2 %v11126_v7 }
 0x2dc   :  { %v14178_v12 = vld [vmem:[#allocation5 + $0xaf4] sm:$0xf0] }
 0x2dd   :  { %v11381_v34 = vld [vmem:[#allocation5 + $0xed8] sm:$0xf]  ;;  %v10870_v30 = vor.u32 %v14178_v12, %v10869_v61  ;;  %4240 = vmatpush.bf16.msrb.mxu0 %v10614_v26  ;;  %v3924_v61 = vadd.f32 %v3923_v36, %v3906_v32  ;;  %v13886_v32 = vld [vmem:[#allocation5 + $0x1dc] sm:$0xf] }
 0x2de   :  { %v14306_v0 = vld [vmem:[#allocation5 + $0xef4] sm:$0xf0] }
 0x2df   :  { %v11093_v27 = vld [vmem:[#allocation5 + $0xc98] sm:$0xf]  ;;  %v11382_v29 = vor.u32 %v14306_v0, %v11381_v34  ;;  %4258 = vmatpush.bf16.msrb.mxu1 %v10870_v30  ;;  %v3891_v34 = vadd.f32 %v3890_v8, %v15424_v15  ;;  %v15435_v7 = vadd.f32 %v3941_v43, %v3924_v61  ;;  %v14006_v43 = vld [vmem:[#allocation5 + $0x59c] sm:$0xf]  ;;  %v3910_v61 = vpop.f32.mrf.mxu1 }
 0x2e0   :  { %v14234_v28 = vld [vmem:[#allocation5 + $0xcb4] sm:$0xf0]  ;;  %v9879_v61 = vld [vmem:[#allocation5 + $0x338] sm:$0xf0] }
 0x2e1   :  { %v10581_v11 = vld [vmem:[#allocation5 + $0x898] sm:$0xf]  ;;  %v11094_v22 = vor.u32 %v14234_v28, %v11093_v27  ;;  %4294 = vmatpush.bf16.msrb.mxu3 %v11382_v29 }
 0x2e2   :  { %v14106_v16 = vld [vmem:[#allocation5 + $0x8b4] sm:$0xf0] }
 0x2e3   :  { %v10837_v31 = vld [vmem:[#allocation5 + $0xa98] sm:$0xf]  ;;  %v10582_v35 = vor.u32 %v14106_v16, %v10581_v11  ;;  %4277 = vmatpush.bf16.msrb.mxu2 %v11094_v22  ;;  %v3909_v11 = vadd.f32 %v3908_v44, %v3891_v34  ;;  %v14014_v16 = vld [vmem:[#allocation5 + $0x5dc] sm:$0xf] }
 0x2e4   :  { %v14170_v20 = vld [vmem:[#allocation5 + $0xab4] sm:$0xf0]  ;;  %v9687_v34 = vld [vmem:[#allocation5 + $0x1b8] sm:$0xf0] }
 0x2e5   :  { %v11349_v33 = vld [vmem:[#allocation5 + $0xe98] sm:$0xf]  ;;  %v10838_v17 = vor.u32 %v14170_v20, %v10837_v31  ;;  %4241 = vmatpush.bf16.msrb.mxu0 %v10582_v35  ;;  %v10231_v31 = vld [vmem:[#allocation5 + $0x5f8] sm:$0xf0] }
 0x2e6   :  { %v14298_v24 = vld [vmem:[#allocation5 + $0xeb4] sm:$0xf0]  ;;  %v9719_v20 = vld [vmem:[#allocation5 + $0x1f8] sm:$0xf0] }
 0x2e7   :  { %v11061_v37 = vld [vmem:[#allocation5 + $0xc58] sm:$0xf]  ;;  %v11350_v38 = vor.u32 %v14298_v24, %v11349_v33  ;;  %4259 = vmatpush.bf16.msrb.mxu1 %v10838_v17  ;;  %v13950_v33 = vld [vmem:[#allocation5 + $0x3dc] sm:$0xf]  ;;  %v9722_v36 = vor.u32 %v13886_v32, %v9719_v20 }
 0x2e8   :  { %v14226_v56 = vld [vmem:[#allocation5 + $0xc74] sm:$0xf0]  ;;  %v9975_v35 = vld [vmem:[#allocation5 + $0x3f8] sm:$0xf0] }
 0x2e9   :  { %v10549_v39 = vld [vmem:[#allocation5 + $0x858] sm:$0xf]  ;;  %v11062_v0 = vor.u32 %v14226_v56, %v11061_v37  ;;  %4295 = vmatpush.bf16.msrb.mxu3 %v11350_v38  ;;  %v14078_v37 = vld [vmem:[#allocation5 + $0x7dc] sm:$0xf]  ;;  %v9978_v8 = vor.u32 %v13950_v33, %v9975_v35 }
 0x2ea   :  { %v14098_v40 = vld [vmem:[#allocation5 + $0x874] sm:$0xf0]  ;;  %v10487_v56 = vld [vmem:[#allocation5 + $0x7f8] sm:$0xf0] }
 0x2eb   :  { %v10805_v41 = vld [vmem:[#allocation5 + $0xa58] sm:$0xf]  ;;  %v10550_v18 = vor.u32 %v14098_v40, %v10549_v39  ;;  %4278 = vmatpush.bf16.msrb.mxu2 %v11062_v0  ;;  %v3926_v39 = vpop.f32.mrf.mxu2  ;;  %v3944_v40 = vpop.f32.mrf.mxu3  ;;  %v10490_v44 = vor.u32 %v14078_v37, %v10487_v56  ;;  %v13942_v0 = vld [vmem:[#allocation5 + $0x39c] sm:$0xf] }
 0x2ec   :  { %v14162_v46 = vld [vmem:[#allocation5 + $0xa74] sm:$0xf0]  ;;  %v9911_v33 = vld [vmem:[#allocation5 + $0x378] sm:$0xf0]  ;;  %v3975_v37 = vpop.f32.mrf.mxu1 }
 0x2ed   :  { %v11317_v45 = vld [vmem:[#allocation5 + $0xe58] sm:$0xf]  ;;  %v10806_v26 = vor.u32 %v14162_v46, %v10805_v41  ;;  %4242 = vmatpush.bf16.msrb.mxu0 %v10550_v18  ;;  %v10234_v41 = vor.u32 %v14014_v16, %v10231_v31  ;;  %v10199_v46 = vld [vmem:[#allocation5 + $0x5b8] sm:$0xf0] }
 0x2ee   :  { %v14290_v58 = vld [vmem:[#allocation5 + $0xe74] sm:$0xf0]  ;;  %v9943_v18 = vld [vmem:[#allocation5 + $0x3b8] sm:$0xf0] }
 0x2ef   :  { %v11029_v12 = vld [vmem:[#allocation5 + $0xc18] sm:$0xf]  ;;  %v11318_v27 = vor.u32 %v14290_v58, %v11317_v45  ;;  %4260 = vmatpush.bf16.msrb.mxu1 %v10806_v26  ;;  %v3927_v45 = vadd.f32 %v3926_v39, %v3909_v11  ;;  %v3892_v58 = vpop.f32.mrf.mxu0  ;;  %v10202_v26 = vor.u32 %v14006_v43, %v10199_v46  ;;  %v10167_v11 = vld [vmem:[#allocation5 + $0x578] sm:$0xf0] }
 0x2f0   :  { %v14218_v19 = vld [vmem:[#allocation5 + $0xc34] sm:$0xf0]  ;;  %v9655_v16 = vld [vmem:[#allocation5 + $0x178] sm:$0xf0] }
 0x2f1   :  { %v10517_v55 = vld [vmem:[#allocation5 + $0x818] sm:$0xf]  ;;  %v11030_v24 = vor.u32 %v14218_v19, %v11029_v12  ;;  %4296 = vmatpush.bf16.msrb.mxu3 %v11318_v27  ;;  %v13878_v12 = vld [vmem:[#allocation5 + $0x19c] sm:$0xf] }
 0x2f2   :  { %v14090_v23 = vld [vmem:[#allocation5 + $0x834] sm:$0xf0]  ;;  %v14070_v19 = vld [vmem:[#allocation5 + $0x79c] sm:$0xf]  ;;  %v9690_v27 = vor.u32 %v13878_v12, %v9687_v34 }
 0x2f3   :  { %v10773_v28 = vld [vmem:[#allocation5 + $0xa18] sm:$0xf]  ;;  %v10518_v22 = vor.u32 %v14090_v23, %v10517_v55  ;;  %4279 = vmatpush.bf16.msrb.mxu2 %v11030_v24  ;;  %v10455_v55 = vld [vmem:[#allocation5 + $0x7b8] sm:$0xf0]  ;;  %v15441_v23 = vadd.f32 %v3944_v40, %v3927_v45  ;;  %v3928_v32 = vpop.f32.mrf.mxu2  ;;  %v3946_v20 = vpop.f32.mrf.mxu3 }
 0x2f4   :  { %v14154_v30 = vld [vmem:[#allocation5 + $0xa34] sm:$0xf0]  ;;  %v13934_v31 = vld [vmem:[#allocation5 + $0x35c] sm:$0xf]  ;;  %v3977_v32 = vpop.f32.mrf.mxu1 }
 0x2f5   :  { %v11285_v29 = vld [vmem:[#allocation5 + $0xe18] sm:$0xf]  ;;  %v10774_v17 = vor.u32 %v14154_v30, %v10773_v28  ;;  %4243 = vmatpush.bf16.msrb.mxu0 %v10518_v22  ;;  %v9946_v28 = vor.u32 %v13942_v0, %v9943_v18  ;;  %v10458_v30 = vor.u32 %v14070_v19, %v10455_v55  ;;  %v14062_v24 = vld [vmem:[#allocation5 + $0x75c] sm:$0xf] }
 0x2f6   :  { %v14282_v15 = vld [vmem:[#allocation5 + $0xe34] sm:$0xf0]  ;;  %v10423_v22 = vld [vmem:[#allocation5 + $0x778] sm:$0xf0]  ;;  %4280 = vmatmul.bf16.vlgmr.msrb.gmra.mxu2 %v15241_v3 }
 0x2f7   :  { %v11286_v38 = vor.u32 %v14282_v15, %v11285_v29  ;;  %4261 = vmatpush.bf16.msrb.mxu1 %v10774_v17  ;;  %4344 = vmatpush.bf16.msra.mxu2 %v10234_v41  ;;  %v13998_v29 = vld [vmem:[#allocation5 + $0x55c] sm:$0xf]  ;;  %v3957_v35 = vpop.f32.mrf.mxu0  ;;  %v9914_v41 = vor.u32 %v13934_v31, %v9911_v33 }
 0x2f8   :  { %v13870_v15 = vld [vmem:[#allocation5 + $0x15c] sm:$0xf]  ;;  %v3958_v56 = vadd.f32 %v3957_v35, %v15432_v1  ;;  %v10170_v17 = vor.u32 %v13998_v29, %v10167_v11  ;;  %4244 = vmatmul.bf16.vlgmr.msrb.gmra.mxu0 %v15237_v62 }
 0x2f9   :  { %4297 = vmatpush.bf16.msrb.mxu3 %v11286_v38  ;;  %4308 = vmatpush.bf16.msra.mxu0 %v9722_v36  ;;  %v9658_v38 = vor.u32 %v13870_v15, %v9655_v16  ;;  %v13990_v39 = vld [vmem:[#allocation5 + $0x51c] sm:$0xf]  ;;  %v10426_v36 = vor.u32 %v14062_v24, %v10423_v22 }
 0x2fa   :  { %v10135_v40 = vld [vmem:[#allocation5 + $0x538] sm:$0xf0]  ;;  %v3976_v58 = vadd.f32 %v3975_v37, %v3958_v56  ;;  %4262 = vmatmul.bf16.vlgmr.msrb.gmra.mxu1 %v15239_v63 }
 0x2fb   :  { %4326 = vmatpush.bf16.msra.mxu1 %v9978_v8  ;;  %4345 = vmatpush.bf16.msra.mxu2 %v10202_v26  ;;  %v13862_v43 = vld [vmem:[#allocation5 + $0x11c] sm:$0xf]  ;;  %v10138_v1 = vor.u32 %v13990_v39, %v10135_v40 }
 0x2fc   :  { %v9623_v46 = vld [vmem:[#allocation5 + $0x138] sm:$0xf0]  ;;  %4298 = vmatmul.bf16.vlgmr.msrb.gmra.mxu3 %v15243_v4 }
 0x2fd   :  { %4362 = vmatpush.bf16.msra.mxu3 %v10490_v44  ;;  %4309 = vmatpush.bf16.msra.mxu0 %v9690_v27  ;;  %v13926_v45 = vld [vmem:[#allocation5 + $0x31c] sm:$0xf]  ;;  %v9626_v12 = vor.u32 %v13862_v43, %v9623_v46 }
 0x2fe   :  { %v14054_v8 = vld [vmem:[#allocation5 + $0x71c] sm:$0xf]  ;;  %v9882_v18 = vor.u32 %v13926_v45, %v9879_v61 }
 0x2ff   :  { %4327 = vmatpush.bf16.msra.mxu1 %v9946_v28  ;;  %v10391_v44 = vld [vmem:[#allocation5 + $0x738] sm:$0xf0]  ;;  %4346 = vmatpush.bf16.msra.mxu2 %v10170_v17  ;;  %v3993_v28 = vpop.f32.mrf.mxu2  ;;  %v3959_v31 = vpop.f32.mrf.mxu0 }
 0x300   :  { %v13982_v34 = vld [vmem:[#allocation5 + $0x4dc] sm:$0xf]  ;;  %v10394_v19 = vor.u32 %v14054_v8, %v10391_v44  ;;  %v3994_v16 = vadd.f32 %v3993_v28, %v3976_v58  ;;  %v3960_v20 = vadd.f32 %v3959_v31, %v15435_v7 }
 0x301   :  { %4363 = vmatpush.bf16.msra.mxu3 %v10458_v30  ;;  %4310 = vmatpush.bf16.msra.mxu0 %v9658_v38  ;;  %v10103_v0 = vld [vmem:[#allocation5 + $0x4f8] sm:$0xf0]  ;;  %v4011_v30 = vpop.f32.mrf.mxu3 }
 0x302   :  { %v13854_v55 = vld [vmem:[#allocation5 + $0xdc] sm:$0xf]  ;;  %v10106_v33 = vor.u32 %v13982_v34, %v10103_v0  ;;  %v4012_v37 = vadd.f32 %v4011_v30, %v3994_v16  ;;  %v3980_v30 = vpop.f32.mrf.mxu1 }
 0x303   :  { %4328 = vmatpush.bf16.msra.mxu1 %v9914_v41  ;;  %v9591_v26 = vld [vmem:[#allocation5 + $0xf8] sm:$0xf0]  ;;  %4347 = vmatpush.bf16.msra.mxu2 %v10138_v1  ;;  %v3978_v41 = vadd.f32 %v3977_v32, %v3960_v20 }
 0x304   :  { %v13918_v27 = vld [vmem:[#allocation5 + $0x2dc] sm:$0xf]  ;;  %v9594_v24 = vor.u32 %v13854_v55, %v9591_v26 }
 0x305   :  { %4364 = vmatpush.bf16.msra.mxu3 %v10426_v36  ;;  %v9847_v29 = vld [vmem:[#allocation5 + $0x2f8] sm:$0xf0]  ;;  %4311 = vmatpush.bf16.msra.mxu0 %v9626_v12 }
 0x306   :  { %v14046_v11 = vld [vmem:[#allocation5 + $0x6dc] sm:$0xf]  ;;  %v9850_v56 = vor.u32 %v13918_v27, %v9847_v29  ;;  %4285 = vmatmul.bf16.gmra.mxu2 %v15253_v9 }
 0x307   :  { %v10359_v15 = vld [vmem:[#allocation5 + $0x6f8] sm:$0xf0]  ;;  %4329 = vmatpush.bf16.msra.mxu1 %v9882_v18  ;;  %4348 = vmatpush.bf16.msra.mxu2 %v10106_v33  ;;  %v3995_v0 = vpop.f32.mrf.mxu2  ;;  %v3962_v28 = vpop.f32.mrf.mxu0 }
 0x308   :  { %v13974_v22 = vld [vmem:[#allocation5 + $0x49c] sm:$0xf]  ;;  %v10362_v17 = vor.u32 %v14046_v11, %v10359_v15  ;;  %v3996_v27 = vadd.f32 %v3995_v0, %v3978_v41  ;;  %v3963_v11 = vadd.f32 %v3962_v28, %v15441_v23  ;;  %4249 = vmatmul.bf16.gmra.mxu0 %v15249_v2 }
 0x309   :  { %v10071_v35 = vld [vmem:[#allocation5 + $0x4b8] sm:$0xf0]  ;;  %4365 = vmatpush.bf16.msra.mxu3 %v10394_v19  ;;  %4312 = vmatpush.bf16.msra.mxu0 %v9594_v24  ;;  %v4013_v18 = vpop.f32.mrf.mxu3 }
 0x30a   :  { %v13846_v38 = vld [vmem:[#allocation5 + $0x9c] sm:$0xf]  ;;  %v10074_v7 = vor.u32 %v13974_v22, %v10071_v35  ;;  %v4014_v33 = vadd.f32 %v4013_v18, %v3996_v27  ;;  %4267 = vmatmul.bf16.gmra.mxu1 %v15251_v5  ;;  %v3982_v27 = vpop.f32.mrf.mxu1 }
 0x30b   :  { %v9559_v39 = vld [vmem:[#allocation5 + $0xb8] sm:$0xf0]  ;;  %4330 = vmatpush.bf16.msra.mxu1 %v9850_v56 }
 0x30c   :  { %v13910_v40 = vld [vmem:[#allocation5 + $0x29c] sm:$0xf]  ;;  %v9562_v45 = vor.u32 %v13846_v38, %v9559_v39  ;;  %4349 = vmatpush.bf16.msra.mxu2 %v10074_v7  ;;  %v3981_v38 = vadd.f32 %v3980_v30, %v3963_v11  ;;  %v15452_v41 = vpack.c.bf16 %v4014_v33, %v4012_v37  ;;  %4303 = vmatmul.bf16.gmra.mxu3 %v15255_v10 }
 0x30d   :  { %v9815_v36 = vld [vmem:[#allocation5 + $0x2b8] sm:$0xf0]  ;;  %4366 = vmatpush.bf16.msra.mxu3 %v10362_v17 }
 0x30e   :  { %v14038_v43 = vld [vmem:[#allocation5 + $0x69c] sm:$0xf]  ;;  %v9818_v8 = vor.u32 %v13910_v40, %v9815_v36  ;;  %4313 = vmatpush.bf16.msra.mxu0 %v9562_v45 }
 0x30f   :  { %v10327_v46 = vld [vmem:[#allocation5 + $0x6b8] sm:$0xf0]  ;;  %v3998_v37 = vpop.f32.mrf.mxu2 }
 0x310   :  { %v13966_v58 = vld [vmem:[#allocation5 + $0x45c] sm:$0xf]  ;;  %v10330_v44 = vor.u32 %v14038_v43, %v10327_v46  ;;  %4331 = vmatpush.bf16.msra.mxu1 %v9818_v8 }
 0x311   :  { %v10039_v61 = vld [vmem:[#allocation5 + $0x478] sm:$0xf0] }
 0x312   :  { %v13838_v1 = vld [vmem:[#allocation5 + $0x5c] sm:$0xf]  ;;  %v10042_v15 = vor.u32 %v13966_v58, %v10039_v61  ;;  %4367 = vmatpush.bf16.msra.mxu3 %v10330_v44 }
 0x313   :  { %v9527_v12 = vld [vmem:[#allocation5 + $0x78] sm:$0xf0] }
 0x314   :  { %v13902_v34 = vld [vmem:[#allocation5 + $0x25c] sm:$0xf]  ;;  %v9530_v16 = vor.u32 %v13838_v1, %v9527_v12  ;;  %4350 = vmatpush.bf16.msra.mxu2 %v10042_v15  ;;  %v4016_v12 = vpop.f32.mrf.mxu3 }
 0x315   :  { %v9783_v19 = vld [vmem:[#allocation5 + $0x278] sm:$0xf0] }
 0x316   :  { %v14030_v55 = vld [vmem:[#allocation5 + $0x65c] sm:$0xf]  ;;  %v9786_v24 = vor.u32 %v13902_v34, %v9783_v19  ;;  %4314 = vmatpush.bf16.msra.mxu0 %v9530_v16 }
 0x317   :  { %v10295_v26 = vld [vmem:[#allocation5 + $0x678] sm:$0xf0] }
 0x318   :  { %v13958_v29 = vld [vmem:[#allocation5 + $0x41c] sm:$0xf]  ;;  %v10298_v22 = vor.u32 %v14030_v55, %v10295_v26  ;;  %4332 = vmatpush.bf16.msra.mxu1 %v9786_v24  ;;  %v3999_v55 = vadd.f32 %v3998_v37, %v3981_v38  ;;  %v3964_v26 = vpop.f32.mrf.mxu0 }
 0x319   :  { %v10007_v31 = vld [vmem:[#allocation5 + $0x438] sm:$0xf0] }
 0x31a   :  { %v13830_v32 = vld [vmem:[#allocation5 + $0x1c] sm:$0xf]  ;;  %v10010_v7 = vor.u32 %v13958_v29, %v10007_v31  ;;  %4368 = vmatpush.bf16.msra.mxu3 %v10298_v22 }
 0x31b   :  { %v9495_v20 = vld [vmem:[#allocation5 + $0x38] sm:$0xf0] }
 0x31c   :  { %v13894_v35 = vld [vmem:[#allocation5 + $0x21c] sm:$0xf]  ;;  %v9498_v45 = vor.u32 %v13830_v32, %v9495_v20  ;;  %4351 = vmatpush.bf16.msra.mxu2 %v10010_v7  ;;  %v15456_v20 = vadd.f32 %v4016_v12, %v3999_v55 }
 0x31d   :  { %v9751_v56 = vld [vmem:[#allocation5 + $0x238] sm:$0xf0] }
 0x31e   :  { %v14022_v17 = vld [vmem:[#allocation5 + $0x61c] sm:$0xf]  ;;  %v9754_v44 = vor.u32 %v13894_v35, %v9751_v56  ;;  %4315 = vmatpush.bf16.msra.mxu0 %v9498_v45  ;;  %v15459_v56 = vperm.slane %v15421_v13, 5 }
 0x31f   :  { %v10263_v23 = vld [vmem:[#allocation5 + $0x638] sm:$0xf0]  ;;  %4352 = vmatmul.bf16.vlgmr.msra.gmra.mxu2 %v15217_v54 }
 0x320   :  { %v14270_v39 = vld [vmem:[#allocation5 + $0xddc] sm:$0xf]  ;;  %v10266_v1 = vor.u32 %v14022_v17, %v10263_v23  ;;  %4333 = vmatpush.bf16.msra.mxu1 %v9754_v44 }
 0x321   :  { %v11255_v40 = vld [vmem:[#allocation5 + $0xdf8] sm:$0xf0]  ;;  %4316 = vmatmul.bf16.vlgmr.msra.gmra.mxu0 %v15213_v48 }
 0x322   :  { %v14142_v36 = vld [vmem:[#allocation5 + $0x9dc] sm:$0xf]  ;;  %v11258_v34 = vor.u32 %v14270_v39, %v11255_v40  ;;  %4369 = vmatpush.bf16.msra.mxu3 %v10266_v1 }
 0x323   :  { %v10743_v43 = vld [vmem:[#allocation5 + $0x9f8] sm:$0xf0]  ;;  %4334 = vmatmul.bf16.vlgmr.msra.gmra.mxu1 %v15215_v53 }
 0x324   :  { %v14206_v46 = vld [vmem:[#allocation5 + $0xbdc] sm:$0xf]  ;;  %v10746_v0 = vor.u32 %v14142_v36, %v10743_v43  ;;  %4416 = vmatpush.bf16.msrb.mxu2 %v11258_v34  ;;  %v4000_v36 = vpop.f32.mrf.mxu2  ;;  %v4018_v43 = vpop.f32.mrf.mxu3 }
 0x325   :  { %v10999_v58 = vld [vmem:[#allocation5 + $0xbf8] sm:$0xf0]  ;;  %4370 = vmatmul.bf16.vlgmr.msra.gmra.mxu3 %v15219_v57 }
 0x326   :  { %v14334_v61 = vld [vmem:[#allocation5 + $0xfdc] sm:$0xf]  ;;  %v11002_v28 = vor.u32 %v14206_v46, %v10999_v58  ;;  %4380 = vmatpush.bf16.msrb.mxu0 %v10746_v0  ;;  %v4029_v58 = vpop.f32.mrf.mxu0 }
 0x327   :  { %v11511_v8 = vld [vmem:[#allocation5 + $0xff8] sm:$0xf0] }
 0x328   :  { %v14262_v18 = vld [vmem:[#allocation5 + $0xd9c] sm:$0xf]  ;;  %v11514_v30 = vor.u32 %v14334_v61, %v11511_v8  ;;  %4398 = vmatpush.bf16.msrb.mxu1 %v11002_v28  ;;  %v4047_v61 = vpop.f32.mrf.mxu1  ;;  %v4030_v8 = vadd.f32 %v4029_v58, %v15459_v56 }
 0x329   :  { %v11223_v19 = vld [vmem:[#allocation5 + $0xdb8] sm:$0xf0] }
 0x32a   :  { %v14134_v29 = vld [vmem:[#allocation5 + $0x99c] sm:$0xf]  ;;  %v11226_v33 = vor.u32 %v14262_v18, %v11223_v19  ;;  %4434 = vmatpush.bf16.msrb.mxu3 %v11514_v30  ;;  %v4048_v55 = vadd.f32 %v4047_v61, %v4030_v8 }
 0x32b   :  { %v10711_v11 = vld [vmem:[#allocation5 + $0x9b8] sm:$0xf0] }
 0x32c   :  { %v14198_v15 = vld [vmem:[#allocation5 + $0xb9c] sm:$0xf]  ;;  %v10714_v24 = vor.u32 %v14134_v29, %v10711_v11  ;;  %4417 = vmatpush.bf16.msrb.mxu2 %v11226_v33  ;;  %v4065_v33 = vpop.f32.mrf.mxu2 }
 0x32d   :  { %v10967_v16 = vld [vmem:[#allocation5 + $0xbb8] sm:$0xf0] }
 0x32e   :  { %v14326_v31 = vld [vmem:[#allocation5 + $0xf9c] sm:$0xf]  ;;  %v10970_v22 = vor.u32 %v14198_v15, %v10967_v16  ;;  %4381 = vmatpush.bf16.msrb.mxu0 %v10714_v24  ;;  %v4083_v24 = vpop.f32.mrf.mxu3  ;;  %v4031_v57 = vpop.f32.mrf.mxu0 }
 0x32f   :  { %v11479_v32 = vld [vmem:[#allocation5 + $0xfb8] sm:$0xf0]  ;;  %4357 = vmatmul.bf16.gmra.mxu2 %v15229_v49 }
 0x330   :  { %v11482_v35 = vor.u32 %v14326_v31, %v11479_v32  ;;  %v14254_v17 = vld [vmem:[#allocation5 + $0xd5c] sm:$0xf]  ;;  %4399 = vmatpush.bf16.msrb.mxu1 %v10970_v22 }
 0x331   :  { %v11191_v38 = vld [vmem:[#allocation5 + $0xd78] sm:$0xf0]  ;;  %4321 = vmatmul.bf16.gmra.mxu0 %v15225_v42 }
 0x332   :  { %v14126_v23 = vld [vmem:[#allocation5 + $0x95c] sm:$0xf]  ;;  %4435 = vmatpush.bf16.msrb.mxu3 %v11482_v35  ;;  %v11194_v13 = vor.u32 %v14254_v17, %v11191_v38  ;;  %v4066_v17 = vadd.f32 %v4065_v33, %v4048_v55  ;;  %v4049_v38 = vpop.f32.mrf.mxu1 }
 0x333   :  { %v10679_v39 = vld [vmem:[#allocation5 + $0x978] sm:$0xf0]  ;;  %4339 = vmatmul.bf16.gmra.mxu1 %v15227_v47 }
 0x334   :  { %v14190_v40 = vld [vmem:[#allocation5 + $0xb5c] sm:$0xf]  ;;  %v10682_v44 = vor.u32 %v14126_v23, %v10679_v39  ;;  %4418 = vmatpush.bf16.msrb.mxu2 %v11194_v13  ;;  %v4032_v23 = vadd.f32 %v4031_v57, %v15459_v56 }
 0x335   :  { %v10935_v46 = vld [vmem:[#allocation5 + $0xb78] sm:$0xf0]  ;;  %4375 = vmatmul.bf16.gmra.mxu3 %v15231_v52  ;;  %v14391_v52 = vld [vmem:[#allocation8 + $0x19c] sm:$0xf0] }
 0x336   :  { %v14318_v7 = vld [vmem:[#allocation5 + $0xf5c] sm:$0xf]  ;;  %v10938_v12 = vor.u32 %v14190_v40, %v10935_v46  ;;  %4382 = vmatpush.bf16.msrb.mxu0 %v10682_v44  ;;  %v15467_v46 = vadd.f32 %v4083_v24, %v4066_v17  ;;  %v4050_v13 = vadd.f32 %v4049_v38, %v4032_v23 }
 0x337   :  { %v11447_v45 = vld [vmem:[#allocation5 + $0xf78] sm:$0xf0] }
 0x338   :  { %v14246_v1 = vld [vmem:[#allocation5 + $0xd1c] sm:$0xf]  ;;  %v11450_v34 = vor.u32 %v14318_v7, %v11447_v45  ;;  %4400 = vmatpush.bf16.msrb.mxu1 %v10938_v12 }
 0x339   :  { %v11159_v37 = vld [vmem:[#allocation5 + $0xd38] sm:$0xf0] }
 0x33a   :  { %v14118_v0 = vld [vmem:[#allocation5 + $0x91c] sm:$0xf]  ;;  %v11162_v30 = vor.u32 %v14246_v1, %v11159_v37  ;;  %4436 = vmatpush.bf16.msrb.mxu3 %v11450_v34 }
 0x33b   :  { %v10647_v18 = vld [vmem:[#allocation5 + $0x938] sm:$0xf0] }
 0x33c   :  { %v14182_v19 = vld [vmem:[#allocation5 + $0xb1c] sm:$0xf]  ;;  %v10650_v29 = vor.u32 %v14118_v0, %v10647_v18  ;;  %4419 = vmatpush.bf16.msrb.mxu2 %v11162_v30  ;;  %v4067_v30 = vpop.f32.mrf.mxu2 }
 0x33d   :  { %v10903_v26 = vld [vmem:[#allocation5 + $0xb38] sm:$0xf0] }
 0x33e   :  { %v14310_v27 = vld [vmem:[#allocation5 + $0xf1c] sm:$0xf]  ;;  %v10906_v16 = vor.u32 %v14182_v19, %v10903_v26  ;;  %4383 = vmatpush.bf16.msrb.mxu0 %v10650_v29  ;;  %v4085_v29 = vpop.f32.mrf.mxu3 }
 0x33f   :  { %v11415_v28 = vld [vmem:[#allocation5 + $0xf38] sm:$0xf0] }
 0x340   :  { %v14238_v11 = vld [vmem:[#allocation5 + $0xcdc] sm:$0xf]  ;;  %v11418_v31 = vor.u32 %v14310_v27, %v11415_v28  ;;  %4401 = vmatpush.bf16.msrb.mxu1 %v10906_v16 }
 0x341   :  { %v11127_v15 = vld [vmem:[#allocation5 + $0xcf8] sm:$0xf0] }
 0x342   :  { %v14110_v48 = vld [vmem:[#allocation5 + $0x8dc] sm:$0xf]  ;;  %v11130_v39 = vor.u32 %v14238_v11, %v11127_v15  ;;  %4437 = vmatpush.bf16.msrb.mxu3 %v11418_v31  ;;  %v4068_v31 = vadd.f32 %v4067_v30, %v4050_v13 }
 0x343   :  { %v10615_v32 = vld [vmem:[#allocation5 + $0x8f8] sm:$0xf0] }
 0x344   :  { %v14174_v53 = vld [vmem:[#allocation5 + $0xadc] sm:$0xf]  ;;  %v10618_v40 = vor.u32 %v14110_v48, %v10615_v32  ;;  %4420 = vmatpush.bf16.msrb.mxu2 %v11130_v39  ;;  %v4034_v48 = vpop.f32.mrf.mxu0  ;;  %v4052_v32 = vpop.f32.mrf.mxu1  ;;  %v15470_v57 = vadd.f32 %v4085_v29, %v4068_v31  ;;  %v11965_v29 = vld [vmem:[#allocation8 + $0x380] sm:$0xf] }
 0x345   :  { %v10871_v22 = vld [vmem:[#allocation5 + $0xaf8] sm:$0xf0]  ;;  %v4035_v33 = vadd.f32 %v4034_v48, %v15459_v56  ;;  %v12477_v31 = vld [vmem:[#allocation8 + $0x780] sm:$0xf] }
 0x346   :  { %v14302_v35 = vld [vmem:[#allocation5 + $0xedc] sm:$0xf]  ;;  %v10874_v7 = vor.u32 %v14174_v53, %v10871_v22  ;;  %4384 = vmatpush.bf16.msrb.mxu0 %v10618_v40  ;;  %v14583_v48 = vld [vmem:[#allocation8 + $0x79c] sm:$0xf0] }
 0x347   :  { %v11383_v54 = vld [vmem:[#allocation5 + $0xef8] sm:$0xf0] }
 0x348   :  { %v14230_v36 = vld [vmem:[#allocation5 + $0xc9c] sm:$0xf]  ;;  %v11386_v45 = vor.u32 %v14302_v35, %v11383_v54  ;;  %4402 = vmatpush.bf16.msrb.mxu1 %v10874_v7  ;;  %v11741_v7 = vld [vmem:[#allocation8 + $0x1c0] sm:$0xf] }
 0x349   :  { %v11095_v43 = vld [vmem:[#allocation5 + $0xcb8] sm:$0xf0] }
 0x34a   :  { %v14102_v58 = vld [vmem:[#allocation5 + $0x89c] sm:$0xf]  ;;  %v11098_v12 = vor.u32 %v14230_v36, %v11095_v43  ;;  %4438 = vmatpush.bf16.msrb.mxu3 %v11386_v45  ;;  %v4053_v43 = vadd.f32 %v4052_v32, %v4035_v33  ;;  %v14399_v45 = vld [vmem:[#allocation8 + $0x1dc] sm:$0xf0] }
 0x34b   :  { %v10583_v61 = vld [vmem:[#allocation5 + $0x8b8] sm:$0xf0] }
 0x34c   :  { %v14166_v8 = vld [vmem:[#allocation5 + $0xa9c] sm:$0xf]  ;;  %v10586_v34 = vor.u32 %v14102_v58, %v10583_v61  ;;  %4421 = vmatpush.bf16.msrb.mxu2 %v11098_v12  ;;  %v11997_v58 = vld [vmem:[#allocation8 + $0x3c0] sm:$0xf] }
 0x34d   :  { %v10839_v44 = vld [vmem:[#allocation5 + $0xab8] sm:$0xf0]  ;;  %v14463_v61 = vld [vmem:[#allocation8 + $0x3dc] sm:$0xf0] }
 0x34e   :  { %v14294_v1 = vld [vmem:[#allocation5 + $0xe9c] sm:$0xf]  ;;  %v10842_v19 = vor.u32 %v14166_v8, %v10839_v44  ;;  %4385 = vmatpush.bf16.msrb.mxu0 %v10586_v34  ;;  %v12253_v8 = vld [vmem:[#allocation8 + $0x5c0] sm:$0xf]  ;;  %v4070_v34 = vpop.f32.mrf.mxu2  ;;  %v11998_v49 = vor.u32 %v14463_v61, %v11997_v58 }
 0x34f   :  { %v11351_v37 = vld [vmem:[#allocation5 + $0xeb8] sm:$0xf0]  ;;  %v14591_v12 = vld [vmem:[#allocation8 + $0x7dc] sm:$0xf0] }
 0x350   :  { %v14222_v0 = vld [vmem:[#allocation5 + $0xc5c] sm:$0xf]  ;;  %v11354_v55 = vor.u32 %v14294_v1, %v11351_v37  ;;  %4403 = vmatpush.bf16.msrb.mxu1 %v10842_v19  ;;  %v14527_v1 = vld [vmem:[#allocation8 + $0x5dc] sm:$0xf0] }
 0x351   :  { %v11063_v18 = vld [vmem:[#allocation5 + $0xc78] sm:$0xf0]  ;;  %v12509_v37 = vld [vmem:[#allocation8 + $0x7c0] sm:$0xf] }
 0x352   :  { %v14094_v26 = vld [vmem:[#allocation5 + $0x85c] sm:$0xf]  ;;  %v11066_v24 = vor.u32 %v14222_v0, %v11063_v18  ;;  %4439 = vmatpush.bf16.msrb.mxu3 %v11354_v55  ;;  %v4088_v0 = vpop.f32.mrf.mxu3  ;;  %v11742_v18 = vor.u32 %v14399_v45, %v11741_v7  ;;  %v11709_v19 = vld [vmem:[#allocation8 + $0x180] sm:$0xf]  ;;  %v4071_v55 = vadd.f32 %v4070_v34, %v4053_v43  ;;  %v12510_v30 = vor.u32 %v14591_v12, %v12509_v37 }
 0x353   :  { %v10551_v27 = vld [vmem:[#allocation5 + $0x878] sm:$0xf0]  ;;  %v12445_v43 = vld [vmem:[#allocation8 + $0x740] sm:$0xf] }
 0x354   :  { %v14158_v28 = vld [vmem:[#allocation5 + $0xa5c] sm:$0xf]  ;;  %v10554_v22 = vor.u32 %v14094_v26, %v10551_v27  ;;  %4422 = vmatpush.bf16.msrb.mxu2 %v11066_v24  ;;  %v4036_v26 = vpop.f32.mrf.mxu0  ;;  %v4054_v27 = vpop.f32.mrf.mxu1  ;;  %v15476_v32 = vadd.f32 %v4088_v0, %v4071_v55  ;;  %v11901_v37 = vld [vmem:[#allocation8 + $0x300] sm:$0xf] }
 0x355   :  { %v10807_v11 = vld [vmem:[#allocation5 + $0xa78] sm:$0xf0]  ;;  %v14439_v12 = vld [vmem:[#allocation8 + $0x31c] sm:$0xf0] }
 0x356   :  { %v14286_v15 = vld [vmem:[#allocation5 + $0xe5c] sm:$0xf]  ;;  %v10810_v38 = vor.u32 %v14158_v28, %v10807_v11  ;;  %4386 = vmatpush.bf16.msrb.mxu0 %v10554_v22  ;;  %v12254_v28 = vor.u32 %v14527_v1, %v12253_v8  ;;  %v14455_v11 = vld [vmem:[#allocation8 + $0x39c] sm:$0xf0]  ;;  %v12478_v22 = vor.u32 %v14583_v48, %v12477_v31 }
 0x357   :  { %v11319_v16 = vld [vmem:[#allocation5 + $0xe78] sm:$0xf0]  ;;  %v11966_v33 = vor.u32 %v14455_v11, %v11965_v29  ;;  %v11645_v8 = vld [vmem:[#allocation8 + $0x100] sm:$0xf] }
 0x358   :  { %v14214_v53 = vld [vmem:[#allocation5 + $0xc1c] sm:$0xf]  ;;  %v11322_v23 = vor.u32 %v14286_v15, %v11319_v16  ;;  %4404 = vmatpush.bf16.msrb.mxu1 %v10810_v38  ;;  %v12221_v15 = vld [vmem:[#allocation8 + $0x580] sm:$0xf] }
 0x359   :  { %v11031_v35 = vld [vmem:[#allocation5 + $0xc38] sm:$0xf0]  ;;  %v14519_v16 = vld [vmem:[#allocation8 + $0x59c] sm:$0xf0] }
 0x35a   :  { %v14086_v54 = vld [vmem:[#allocation5 + $0x81c] sm:$0xf]  ;;  %v11034_v13 = vor.u32 %v14214_v53, %v11031_v35  ;;  %4440 = vmatpush.bf16.msrb.mxu3 %v11322_v23  ;;  %v11710_v53 = vor.u32 %v14391_v52, %v11709_v19  ;;  %v12222_v24 = vor.u32 %v14519_v16, %v12221_v15  ;;  %v11677_v35 = vld [vmem:[#allocation8 + $0x140] sm:$0xf] }
 0x35b   :  { %v10519_v17 = vld [vmem:[#allocation5 + $0x838] sm:$0xf0]  ;;  %v14447_v38 = vld [vmem:[#allocation8 + $0x35c] sm:$0xf0] }
 0x35c   :  { %v14150_v39 = vld [vmem:[#allocation5 + $0xa1c] sm:$0xf]  ;;  %v10522_v44 = vor.u32 %v14086_v54, %v10519_v17  ;;  %4423 = vmatpush.bf16.msrb.mxu2 %v11034_v13  ;;  %v14383_v54 = vld [vmem:[#allocation8 + $0x15c] sm:$0xf0]  ;;  %v4101_v7 = vpop.f32.mrf.mxu0  ;;  %v4119_v45 = vpop.f32.mrf.mxu1 }
 0x35d   :  { %v10775_v40 = vld [vmem:[#allocation5 + $0xa38] sm:$0xf0]  ;;  %v11933_v17 = vld [vmem:[#allocation8 + $0x340] sm:$0xf]  ;;  %v11678_v58 = vor.u32 %v14383_v54, %v11677_v35 }
 0x35e   :  { %v14278_v36 = vld [vmem:[#allocation5 + $0xe1c] sm:$0xf]  ;;  %v10778_v42 = vor.u32 %v14150_v39, %v10775_v40  ;;  %4387 = vmatpush.bf16.msrb.mxu0 %v10522_v44  ;;  %v12189_v23 = vld [vmem:[#allocation8 + $0x540] sm:$0xf]  ;;  %v4072_v39 = vpop.f32.mrf.mxu2  ;;  %v4090_v40 = vpop.f32.mrf.mxu3  ;;  %v11934_v61 = vor.u32 %v14447_v38, %v11933_v17 }
 0x35f   :  { %v11287_v56 = vld [vmem:[#allocation5 + $0xe38] sm:$0xf0]  ;;  %v14375_v13 = vld [vmem:[#allocation8 + $0x11c] sm:$0xf0]  ;;  %4424 = vmatmul.bf16.vlgmr.msrb.gmra.mxu2 %v15241_v3 }
 0x360   :  { %v11290_v47 = vor.u32 %v14278_v36, %v11287_v56  ;;  %4405 = vmatpush.bf16.msrb.mxu1 %v10778_v42  ;;  %7594 = vmatpush.bf16.msra.mxu2 %v12254_v28  ;;  %v14511_v36 = vld [vmem:[#allocation8 + $0x55c] sm:$0xf0] }
 0x361   :  { %v14575_v56 = vld [vmem:[#allocation8 + $0x75c] sm:$0xf0]  ;;  %v12190_v44 = vor.u32 %v14511_v36, %v12189_v23  ;;  %4388 = vmatmul.bf16.vlgmr.msrb.gmra.mxu0 %v15237_v62 }
 0x362   :  { %4441 = vmatpush.bf16.msrb.mxu3 %v11290_v47  ;;  %7558 = vmatpush.bf16.msra.mxu0 %v11742_v18  ;;  %v12446_v1 = vor.u32 %v14575_v56, %v12445_v43  ;;  %v12157_v42 = vld [vmem:[#allocation8 + $0x500] sm:$0xf]  ;;  %v11646_v18 = vor.u32 %v14375_v13, %v11645_v8 }
 0x363   :  { %4406 = vmatmul.bf16.vlgmr.msrb.gmra.mxu1 %v15239_v63  ;;  %v14503_v47 = vld [vmem:[#allocation8 + $0x51c] sm:$0xf0] }
 0x364   :  { %7576 = vmatpush.bf16.msra.mxu1 %v11998_v49  ;;  %7595 = vmatpush.bf16.msra.mxu2 %v12222_v24  ;;  %v12413_v34 = vld [vmem:[#allocation8 + $0x700] sm:$0xf]  ;;  %v11902_v49 = vor.u32 %v14439_v12, %v11901_v37  ;;  %v12158_v55 = vor.u32 %v14503_v47, %v12157_v42  ;;  %v4103_v15 = vpop.f32.mrf.mxu0  ;;  %v4121_v16 = vpop.f32.mrf.mxu1 }
 0x365   :  { %v14567_v0 = vld [vmem:[#allocation8 + $0x71c] sm:$0xf0]  ;;  %4442 = vmatmul.bf16.vlgmr.msrb.gmra.mxu3 %v15243_v4  ;;  %v4102_v4 = vadd.f32 %v4101_v7, %v15467_v46 }
 0x366   :  { %7612 = vmatpush.bf16.msra.mxu3 %v12510_v30  ;;  %7559 = vmatpush.bf16.msra.mxu0 %v11710_v53  ;;  %v11613_v19 = vld [vmem:[#allocation8 + $0xc0] sm:$0xf]  ;;  %v12414_v26 = vor.u32 %v14567_v0, %v12413_v34  ;;  %v4137_v28 = vpop.f32.mrf.mxu2  ;;  %v4155_v30 = vpop.f32.mrf.mxu3 }
 0x367   :  { %v14367_v52 = vld [vmem:[#allocation8 + $0xdc] sm:$0xf0]  ;;  %v4120_v40 = vadd.f32 %v4119_v45, %v4102_v4 }
 0x368   :  { %7577 = vmatpush.bf16.msra.mxu1 %v11966_v33  ;;  %7596 = vmatpush.bf16.msra.mxu2 %v12190_v44  ;;  %v11869_v62 = vld [vmem:[#allocation8 + $0x2c0] sm:$0xf]  ;;  %v11614_v31 = vor.u32 %v14367_v52, %v11613_v19 }
 0x369   :  { %v14431_v27 = vld [vmem:[#allocation8 + $0x2dc] sm:$0xf0]  ;;  %v4138_v8 = vadd.f32 %v4137_v28, %v4120_v40 }
 0x36a   :  { %7613 = vmatpush.bf16.msra.mxu3 %v12478_v22  ;;  %7560 = vmatpush.bf16.msra.mxu0 %v11678_v58  ;;  %v12125_v63 = vld [vmem:[#allocation8 + $0x4c0] sm:$0xf]  ;;  %v11870_v48 = vor.u32 %v14431_v27, %v11869_v62  ;;  %v4104_v22 = vadd.f32 %v4103_v15, %v15470_v57 }
 0x36b   :  { %v14495_v29 = vld [vmem:[#allocation8 + $0x4dc] sm:$0xf0]  ;;  %v4156_v27 = vadd.f32 %v4155_v30, %v4138_v8 }
 0x36c   :  { %7578 = vmatpush.bf16.msra.mxu1 %v11934_v61  ;;  %v12381_v11 = vld [vmem:[#allocation8 + $0x6c0] sm:$0xf]  ;;  %7597 = vmatpush.bf16.msra.mxu2 %v12158_v55  ;;  %v12126_v35 = vor.u32 %v14495_v29, %v12125_v63  ;;  %v4122_v57 = vadd.f32 %v4121_v16, %v4104_v22  ;;  %v15484_v0 = vpop.f32.mrf.mxu0 }
 0x36d   :  { %v14559_v3 = vld [vmem:[#allocation8 + $0x6dc] sm:$0xf0] }
 0x36e   :  { %7614 = vmatpush.bf16.msra.mxu3 %v12446_v1  ;;  %7561 = vmatpush.bf16.msra.mxu0 %v11646_v18  ;;  %v11581_v53 = vld [vmem:[#allocation8 + $0x80] sm:$0xf]  ;;  %v12382_v54 = vor.u32 %v14559_v3, %v12381_v11  ;;  %v4139_v12 = vpop.f32.mrf.mxu2  ;;  %v4157_v42 = vpop.f32.mrf.mxu3 }
 0x36f   :  { %v14359_v33 = vld [vmem:[#allocation8 + $0x9c] sm:$0xf0]  ;;  %v4140_v34 = vadd.f32 %v4139_v12, %v4122_v57  ;;  %v15486_v18 = vpop.f32.mrf.mxu1  ;;  %4429 = vmatmul.bf16.gmra.mxu2 %v15253_v9 }
 0x370   :  { %7579 = vmatpush.bf16.msra.mxu1 %v11902_v49  ;;  %v11837_v24 = vld [vmem:[#allocation8 + $0x280] sm:$0xf]  ;;  %v11582_v36 = vor.u32 %v14359_v33, %v11581_v53  ;;  %7598 = vmatpush.bf16.msra.mxu2 %v12126_v35 }
 0x371   :  { %v14423_v17 = vld [vmem:[#allocation8 + $0x29c] sm:$0xf0]  ;;  %v4158_v63 = vadd.f32 %v4157_v42, %v4140_v34  ;;  %4393 = vmatmul.bf16.gmra.mxu0 %v15249_v2 }
 0x372   :  { %7615 = vmatpush.bf16.msra.mxu3 %v12414_v26  ;;  %v12093_v38 = vld [vmem:[#allocation8 + $0x480] sm:$0xf]  ;;  %7562 = vmatpush.bf16.msra.mxu0 %v11614_v31  ;;  %v11838_v43 = vor.u32 %v14423_v17, %v11837_v24 }
 0x373   :  { %v14487_v23 = vld [vmem:[#allocation8 + $0x49c] sm:$0xf0]  ;;  %4411 = vmatmul.bf16.gmra.mxu1 %v15251_v5  ;;  %v15490_v31 = vpack.c.bf16 %v4158_v63, %v4156_v27 }
 0x374   :  { %v12349_v39 = vld [vmem:[#allocation8 + $0x680] sm:$0xf]  ;;  %7580 = vmatpush.bf16.msra.mxu1 %v11870_v48  ;;  %v12094_v56 = vor.u32 %v14487_v23, %v12093_v38  ;;  %v4108_v23 = vpop.f32.mrf.mxu0 }
 0x375   :  { %v14551_v46 = vld [vmem:[#allocation8 + $0x69c] sm:$0xf0]  ;;  %4447 = vmatmul.bf16.gmra.mxu3 %v15255_v10 }
 0x376   :  { %v11549_v7 = vld [vmem:[#allocation8 + $0x40] sm:$0xf]  ;;  %7616 = vmatpush.bf16.msra.mxu3 %v12382_v54  ;;  %v12350_v13 = vor.u32 %v14551_v46, %v12349_v39  ;;  %7563 = vmatpush.bf16.msra.mxu0 %v11582_v36  ;;  %v15494_v54 = vpop.f32.mrf.mxu2  ;;  %v15496_v17 = vpop.f32.mrf.mxu3 }
 0x377   :  { %v14351_v58 = vld [vmem:[#allocation8 + $0x5c] sm:$0xf0]  ;;  %7599 = vmatpush.bf16.msra.mxu2 %v12094_v56  ;;  %v4126_v39 = vpop.f32.mrf.mxu1 }
 0x378   :  { %v11805_v61 = vld [vmem:[#allocation8 + $0x240] sm:$0xf]  ;;  %7581 = vmatpush.bf16.msra.mxu1 %v11838_v43  ;;  %v11550_v49 = vor.u32 %v14351_v58, %v11549_v7 }
 0x379   :  { %v14415_v44 = vld [vmem:[#allocation8 + $0x25c] sm:$0xf0] }
 0x37a   :  { %v12061_v1 = vld [vmem:[#allocation8 + $0x440] sm:$0xf]  ;;  %v11806_v19 = vor.u32 %v14415_v44, %v11805_v61  ;;  %7617 = vmatpush.bf16.msra.mxu3 %v12350_v13  ;;  %7564 = vmatpush.bf16.msra.mxu0 %v11550_v49 }
 0x37b   :  { %v14479_v37 = vld [vmem:[#allocation8 + $0x45c] sm:$0xf0] }
 0x37c   :  { %v12317_v47 = vld [vmem:[#allocation8 + $0x640] sm:$0xf]  ;;  %v12062_v52 = vor.u32 %v14479_v37, %v12061_v1  ;;  %7582 = vmatpush.bf16.msra.mxu1 %v11806_v19 }
 0x37d   :  { %v14543_v45 = vld [vmem:[#allocation8 + $0x65c] sm:$0xf0] }
 0x37e   :  { %v11517_v55 = vld [vmem:[#allocation8] sm:$0xf]  ;;  %v12318_v28 = vor.u32 %v14543_v45, %v12317_v47  ;;  %7600 = vmatpush.bf16.msra.mxu2 %v12062_v52  ;;  %v4144_v37 = vpop.f32.mrf.mxu2  ;;  %v4162_v12 = vpop.f32.mrf.mxu3 }
 0x37f   :  { %v14343_v26 = vld [vmem:[#allocation8 + $0x1c] sm:$0xf0]  ;;  %v15498_v45 = vpop.f32.mrf.mxu0  ;;  %v15500_v34 = vpop.f32.mrf.mxu1  ;;  %v15520_v37 = vpack.c.bf16 %v15312_v25, %v15312_v25  ;;  %v15536_v25 = vpack.c.bf16 %v15419_v59, %v15419_v59  ;;  %v15542_v59 = vld [vmem:[#allocation7] sm:$0xff] }
 0x380   :  { %v11773_v62 = vld [vmem:[#allocation8 + $0x200] sm:$0xf]  ;;  %v11518_v33 = vor.u32 %v14343_v26, %v11517_v55  ;;  %7618 = vmatpush.bf16.msra.mxu3 %v12318_v28 }
 0x381   :  { %v14407_v29 = vld [vmem:[#allocation8 + $0x21c] sm:$0xf0] }
 0x382   :  { %v12029_v11 = vld [vmem:[#allocation8 + $0x400] sm:$0xf]  ;;  %v11774_v24 = vor.u32 %v14407_v29, %v11773_v62  ;;  %7565 = vmatpush.bf16.msra.mxu0 %v11518_v33 }
 0x383   :  { %v14471_v3 = vld [vmem:[#allocation8 + $0x41c] sm:$0xf0] }
 0x384   :  { %v12285_v4 = vld [vmem:[#allocation8 + $0x600] sm:$0xf]  ;;  %v12030_v5 = vor.u32 %v14471_v3, %v12029_v11  ;;  %7583 = vmatpush.bf16.msra.mxu1 %v11774_v24 }
 0x385   :  { %v14535_v15 = vld [vmem:[#allocation8 + $0x61c] sm:$0xf0]  ;;  %7566 = vmatmul.bf16.vlgmr.msra.gmra.mxu0 %v15308_v50 }
 0x386   :  { %v12765_v16 = vld [vmem:[#allocation8 + $0x9c0] sm:$0xf]  ;;  %v12286_v35 = vor.u32 %v14535_v15, %v12285_v4  ;;  %7601 = vmatpush.bf16.msra.mxu2 %v12030_v5 }
 0x387   :  { %v14655_v30 = vld [vmem:[#allocation8 + $0x9dc] sm:$0xf0]  ;;  %7584 = vmatmul.bf16.vlgmr.msra.gmra.mxu1 %v15343_v21 }
 0x388   :  { %v13021_v48 = vld [vmem:[#allocation8 + $0xbc0] sm:$0xf]  ;;  %v12766_v9 = vor.u32 %v14655_v30, %v12765_v16  ;;  %7619 = vmatpush.bf16.msra.mxu3 %v12286_v35 }
 0x389   :  { %v14719_v53 = vld [vmem:[#allocation8 + $0xbdc] sm:$0xf0]  ;;  %7602 = vmatmul.bf16.vlgmr.msra.gmra.mxu2 %v15380_v14 }
 0x38a   :  { %v13277_v22 = vld [vmem:[#allocation8 + $0xdc0] sm:$0xf]  ;;  %v13022_v38 = vor.u32 %v14719_v53, %v13021_v48  ;;  %7630 = vmatpush.bf16.msrb.mxu0 %v12766_v9  ;;  %v15506_v48 = vpop.f32.mrf.mxu2  ;;  %v15508_v53 = vpop.f32.mrf.mxu3 }
 0x38b   :  { %v14783_v2 = vld [vmem:[#allocation8 + $0xddc] sm:$0xf0]  ;;  %7620 = vmatmul.bf16.vlgmr.msra.gmra.mxu3 %v15415_v6 }
 0x38c   :  { %v12733_v10 = vld [vmem:[#allocation8 + $0x980] sm:$0xf]  ;;  %v13278_v43 = vor.u32 %v14783_v2, %v13277_v22  ;;  %7648 = vmatpush.bf16.msrb.mxu1 %v13022_v38  ;;  %v15510_v22 = vpop.f32.mrf.mxu0  ;;  %v15512_v2 = vpop.f32.mrf.mxu1 }
 0x38d   :  { %v14647_v46 = vld [vmem:[#allocation8 + $0x99c] sm:$0xf0] }
 0x38e   :  { %v12989_v40 = vld [vmem:[#allocation8 + $0xb80] sm:$0xf]  ;;  %v12734_v58 = vor.u32 %v14647_v46, %v12733_v10  ;;  %7666 = vmatpush.bf16.msrb.mxu2 %v13278_v43 }
 0x38f   :  { %v14711_v36 = vld [vmem:[#allocation8 + $0xb9c] sm:$0xf0] }
 0x390   :  { %v13245_v56 = vld [vmem:[#allocation8 + $0xd80] sm:$0xf]  ;;  %v12990_v61 = vor.u32 %v14711_v36, %v12989_v40  ;;  %7631 = vmatpush.bf16.msrb.mxu0 %v12734_v58 }
 0x391   :  { %v14775_v7 = vld [vmem:[#allocation8 + $0xd9c] sm:$0xf0] }
 0x392   :  { %v13246_v8 = vor.u32 %v14775_v7, %v13245_v56  ;;  %v12701_v57 = vld [vmem:[#allocation8 + $0x940] sm:$0xf]  ;;  %7649 = vmatpush.bf16.msrb.mxu1 %v12990_v61 }
 0x393   :  { %v14639_v13 = vld [vmem:[#allocation8 + $0x95c] sm:$0xf0] }
 0x394   :  { %v12957_v44 = vld [vmem:[#allocation8 + $0xb40] sm:$0xf]  ;;  %7667 = vmatpush.bf16.msrb.mxu2 %v13246_v8  ;;  %v12702_v49 = vor.u32 %v14639_v13, %v12701_v57  ;;  %v15514_v57 = vpop.f32.mrf.mxu2  ;;  %v15516_v13 = vpop.f32.mrf.mxu3 }
 0x395   :  { %v14703_v1 = vld [vmem:[#allocation8 + $0xb5c] sm:$0xf0]  ;;  %v15522_v12 = vpop.f32.mrf.mxu0  ;;  %7571 = vmatmul.bf16.gmra.mxu0 %v15520_v37 }
 0x396   :  { %v13213_v42 = vld [vmem:[#allocation8 + $0xd40] sm:$0xf]  ;;  %v12958_v19 = vor.u32 %v14703_v1, %v12957_v44  ;;  %7632 = vmatpush.bf16.msrb.mxu0 %v12702_v49 }
 0x397   :  { %v14767_v47 = vld [vmem:[#allocation8 + $0xd5c] sm:$0xf0] }
 0x398   :  { %v12669_v52 = vld [vmem:[#allocation8 + $0x900] sm:$0xf]  ;;  %v13214_v27 = vor.u32 %v14767_v47, %v13213_v42  ;;  %7650 = vmatpush.bf16.msrb.mxu1 %v12958_v19  ;;  %v15524_v42 = vpop.f32.mrf.mxu1  ;;  %v15528_v47 = vpack.c.bf16 %v15347_v60, %v15347_v60 }
 0x399   :  { %v14631_v55 = vld [vmem:[#allocation8 + $0x91c] sm:$0xf0] }
 0x39a   :  { %v12925_v26 = vld [vmem:[#allocation8 + $0xb00] sm:$0xf]  ;;  %v12670_v29 = vor.u32 %v14631_v55, %v12669_v52  ;;  %7668 = vmatpush.bf16.msrb.mxu2 %v13214_v27  ;;  %7589 = vmatmul.bf16.gmra.mxu1 %v15528_v47 }
 0x39b   :  { %v14695_v62 = vld [vmem:[#allocation8 + $0xb1c] sm:$0xf0]  ;;  %7625 = vmatmul.bf16.gmra.mxu3 %v15536_v25 }
 0x39c   :  { %v13181_v63 = vld [vmem:[#allocation8 + $0xd00] sm:$0xf]  ;;  %v12926_v11 = vor.u32 %v14695_v62, %v12925_v26  ;;  %7633 = vmatpush.bf16.msrb.mxu0 %v12670_v29  ;;  %v15532_v26 = vpack.c.bf16 %v15384_v51, %v15384_v51  ;;  %v14459_v29 = vld [vmem:[#allocation8 + $0x3c4] sm:$0xf] }
 0x39d   :  { %v14759_v28 = vld [vmem:[#allocation8 + $0xd1c] sm:$0xf0] }
 0x39e   :  { %v12637_v3 = vld [vmem:[#allocation8 + $0x8c0] sm:$0xf]  ;;  %v13182_v30 = vor.u32 %v14759_v28, %v13181_v63  ;;  %7651 = vmatpush.bf16.msrb.mxu1 %v12926_v11  ;;  %v14395_v63 = vld [vmem:[#allocation8 + $0x1c4] sm:$0xf]  ;;  %7607 = vmatmul.bf16.gmra.mxu2 %v15532_v26 }
 0x39f   :  { %v14623_v4 = vld [vmem:[#allocation8 + $0x8dc] sm:$0xf0]  ;;  %v11743_v28 = vld [vmem:[#allocation8 + $0x1e0] sm:$0xf0] }
 0x3a0   :  { %v12893_v15 = vld [vmem:[#allocation8 + $0xac0] sm:$0xf]  ;;  %v12638_v5 = vor.u32 %v14623_v4, %v12637_v3  ;;  %7669 = vmatpush.bf16.msrb.mxu2 %v13182_v30  ;;  %v11999_v11 = vld [vmem:[#allocation8 + $0x3e0] sm:$0xf0]  ;;  %v15545_v4 = vperm.slane %v15542_v59, 6 }
 0x3a1   :  { %v14687_v16 = vld [vmem:[#allocation8 + $0xadc] sm:$0xf0]  ;;  %v14523_v30 = vld [vmem:[#allocation8 + $0x5c4] sm:$0xf] }
 0x3a2   :  { %v13149_v33 = vld [vmem:[#allocation8 + $0xcc0] sm:$0xf]  ;;  %v12894_v35 = vor.u32 %v14687_v16, %v12893_v15  ;;  %7634 = vmatpush.bf16.msrb.mxu0 %v12638_v5  ;;  %v12002_v5 = vor.u32 %v14459_v29, %v11999_v11 }
 0x3a3   :  { %v14751_v24 = vld [vmem:[#allocation8 + $0xcdc] sm:$0xf0] }
 0x3a4   :  { %v12605_v9 = vld [vmem:[#allocation8 + $0x880] sm:$0xf]  ;;  %v13150_v39 = vor.u32 %v14751_v24, %v13149_v33  ;;  %7652 = vmatpush.bf16.msrb.mxu1 %v12894_v35  ;;  %v12255_v33 = vld [vmem:[#allocation8 + $0x5e0] sm:$0xf0]  ;;  %v11746_v24 = vor.u32 %v14395_v63, %v11743_v28 }
 0x3a5   :  { %v14615_v38 = vld [vmem:[#allocation8 + $0x89c] sm:$0xf0]  ;;  %v14387_v35 = vld [vmem:[#allocation8 + $0x184] sm:$0xf] }
 0x3a6   :  { %v12861_v10 = vld [vmem:[#allocation8 + $0xa80] sm:$0xf]  ;;  %v12606_v36 = vor.u32 %v14615_v38, %v12605_v9  ;;  %7670 = vmatpush.bf16.msrb.mxu2 %v13150_v39  ;;  %v15547_v9 = vpop.f32.mrf.mxu2  ;;  %v15549_v38 = vpop.f32.mrf.mxu3  ;;  %v11967_v39 = vld [vmem:[#allocation8 + $0x3a0] sm:$0xf0] }
 0x3a7   :  { %v14679_v23 = vld [vmem:[#allocation8 + $0xa9c] sm:$0xf0]  ;;  %v14371_v28 = vld [vmem:[#allocation8 + $0x104] sm:$0xf] }
 0x3a8   :  { %v13117_v46 = vld [vmem:[#allocation8 + $0xc80] sm:$0xf]  ;;  %v12862_v43 = vor.u32 %v14679_v23, %v12861_v10  ;;  %7635 = vmatpush.bf16.msrb.mxu0 %v12606_v36  ;;  %v11711_v10 = vld [vmem:[#allocation8 + $0x1a0] sm:$0xf0]  ;;  %v4198_v36 = vpop.f32.mrf.mxu1 }
 0x3a9   :  { %v14743_v40 = vld [vmem:[#allocation8 + $0xc9c] sm:$0xf0]  ;;  %v14451_v23 = vld [vmem:[#allocation8 + $0x384] sm:$0xf] }
 0x3aa   :  { %v12573_v56 = vld [vmem:[#allocation8 + $0x840] sm:$0xf]  ;;  %v13118_v8 = vor.u32 %v14743_v40, %v13117_v46  ;;  %7653 = vmatpush.bf16.msrb.mxu1 %v12862_v43  ;;  %v4180_v40 = vpop.f32.mrf.mxu0  ;;  %v12258_v43 = vor.u32 %v14523_v30, %v12255_v33  ;;  %v11871_v36 = vld [vmem:[#allocation8 + $0x2e0] sm:$0xf0] }
 0x3ab   :  { %v14607_v7 = vld [vmem:[#allocation8 + $0x85c] sm:$0xf0]  ;;  %v14427_v40 = vld [vmem:[#allocation8 + $0x2c4] sm:$0xf] }
 0x3ac   :  { %v12829_v58 = vld [vmem:[#allocation8 + $0xa40] sm:$0xf]  ;;  %v12574_v49 = vor.u32 %v14607_v7, %v12573_v56  ;;  %7671 = vmatpush.bf16.msrb.mxu2 %v13118_v8  ;;  %v4174_v56 = vadd.f32 %v15498_v45, %v15545_v4  ;;  %v14515_v7 = vld [vmem:[#allocation8 + $0x584] sm:$0xf]  ;;  %v11970_v8 = vor.u32 %v14451_v23, %v11967_v39  ;;  %v4176_v45 = vadd.f32 %v15510_v22, %v15545_v4 }
 0x3ad   :  { %v14671_v61 = vld [vmem:[#allocation8 + $0xa5c] sm:$0xf0]  ;;  %v14363_v23 = vld [vmem:[#allocation8 + $0xc4] sm:$0xf]  ;;  %v4107_v39 = vadd.f32 %v15484_v0, %v15476_v32 }
 0x3ae   :  { %v13085_v44 = vld [vmem:[#allocation8 + $0xc40] sm:$0xf]  ;;  %v12830_v19 = vor.u32 %v14671_v61, %v12829_v58  ;;  %7636 = vmatpush.bf16.msrb.mxu0 %v12574_v49  ;;  %v12223_v58 = vld [vmem:[#allocation8 + $0x5a0] sm:$0xf0]  ;;  %v11714_v61 = vor.u32 %v14387_v35, %v11711_v10  ;;  %v4216_v29 = vpop.f32.mrf.mxu2  ;;  %v4234_v11 = vpop.f32.mrf.mxu3  ;;  %v4194_v22 = vadd.f32 %v15512_v2, %v4176_v45 }
 0x3af   :  { %v14735_v1 = vld [vmem:[#allocation8 + $0xc5c] sm:$0xf0]  ;;  %v14443_v49 = vld [vmem:[#allocation8 + $0x344] sm:$0xf]  ;;  %v4125_v0 = vadd.f32 %v15486_v18, %v4107_v39 }
 0x3b0   :  { %v12541_v52 = vld [vmem:[#allocation8 + $0x800] sm:$0xf]  ;;  %v13086_v60 = vor.u32 %v14735_v1, %v13085_v44  ;;  %7654 = vmatpush.bf16.msrb.mxu1 %v12830_v19  ;;  %v14379_v44 = vld [vmem:[#allocation8 + $0x144] sm:$0xf]  ;;  %v4263_v30 = vpop.f32.mrf.mxu1 }
 0x3b1   :  { %v14599_v55 = vld [vmem:[#allocation8 + $0x81c] sm:$0xf0]  ;;  %v11679_v1 = vld [vmem:[#allocation8 + $0x160] sm:$0xf0]  ;;  %v4143_v45 = vadd.f32 %v15494_v54, %v4125_v0 }
 0x3b2   :  { %v12797_v62 = vld [vmem:[#allocation8 + $0xa00] sm:$0xf]  ;;  %v12542_v15 = vor.u32 %v14599_v55, %v12541_v52  ;;  %7672 = vmatpush.bf16.msrb.mxu2 %v13086_v60  ;;  %v11935_v19 = vld [vmem:[#allocation8 + $0x360] sm:$0xf0]  ;;  %v12226_v52 = vor.u32 %v14515_v7, %v12223_v58  ;;  %v4192_v55 = vadd.f32 %v15500_v34, %v4174_v56  ;;  %v11682_v63 = vor.u32 %v14379_v44, %v11679_v1 }
 0x3b3   :  { %v14663_v27 = vld [vmem:[#allocation8 + $0xa1c] sm:$0xf0]  ;;  %v11938_v60 = vor.u32 %v14443_v49, %v11935_v19  ;;  %v14491_v2 = vld [vmem:[#allocation8 + $0x4c4] sm:$0xf] }
 0x3b4   :  { %v13053_v51 = vld [vmem:[#allocation8 + $0xc00] sm:$0xf]  ;;  %v12798_v16 = vor.u32 %v14663_v27, %v12797_v62  ;;  %7637 = vmatpush.bf16.msrb.mxu0 %v12542_v15  ;;  %v14507_v62 = vld [vmem:[#allocation8 + $0x544] sm:$0xf]  ;;  %v4210_v34 = vadd.f32 %v15506_v48, %v4192_v55  ;;  %v4212_v48 = vadd.f32 %v15514_v57, %v4194_v22 }
 0x3b5   :  { %v14727_v3 = vld [vmem:[#allocation8 + $0xc1c] sm:$0xf0]  ;;  %v12191_v27 = vld [vmem:[#allocation8 + $0x560] sm:$0xf0] }
 0x3b6   :  { %v13054_v46 = vor.u32 %v14727_v3, %v13053_v51  ;;  %7655 = vmatpush.bf16.msrb.mxu1 %v12798_v16  ;;  %v11647_v51 = vld [vmem:[#allocation8 + $0x120] sm:$0xf0]  ;;  %v4245_v16 = vpop.f32.mrf.mxu0  ;;  %v12194_v33 = vor.u32 %v14507_v62, %v12191_v27  ;;  %v4228_v7 = vadd.f32 %v15508_v53, %v4210_v34  ;;  %v4299_v44 = vpop.f32.mrf.mxu3  ;;  %v4230_v57 = vadd.f32 %v15516_v13, %v4212_v48 }
 0x3b7   :  { %v14435_v3 = vld [vmem:[#allocation8 + $0x304] sm:$0xf]  ;;  %v11650_v35 = vor.u32 %v14371_v28, %v11647_v51  ;;  %7638 = vmatmul.bf16.vlgmr.msrb.gmra.mxu0 %v15452_v41 }
 0x3b8   :  { %7702 = vmatpush.bf16.msra.mxu0 %v11746_v24  ;;  %7673 = vmatpush.bf16.msrb.mxu2 %v13054_v46  ;;  %v11903_v15 = vld [vmem:[#allocation8 + $0x320] sm:$0xf0]  ;;  %v4246_v55 = vadd.f32 %v4245_v16, %v4228_v7  ;;  %v4265_v53 = vpop.f32.mrf.mxu1  ;;  %v4161_v16 = vadd.f32 %v15496_v17, %v4143_v45  ;;  %v15574_v7 = vpack.c.bf16 %v15456_v20, %v15456_v20  ;;  %v14847_v20 = vld [vmem:[#allocation8 + $0xfdc] sm:$0xf0] }
 0x3b9   :  { %v14499_v24 = vld [vmem:[#allocation8 + $0x504] sm:$0xf]  ;;  %v11906_v10 = vor.u32 %v14435_v3, %v11903_v15  ;;  %7656 = vmatmul.bf16.vlgmr.msrb.gmra.mxu1 %v15490_v31 }
 0x3ba   :  { %7720 = vmatpush.bf16.msra.mxu1 %v12002_v5  ;;  %v12159_v5 = vld [vmem:[#allocation8 + $0x520] sm:$0xf0] }
 0x3bb   :  { %v11615_v46 = vld [vmem:[#allocation8 + $0xe0] sm:$0xf0] }
 0x3bc   :  { %7738 = vmatpush.bf16.msra.mxu2 %v12258_v43  ;;  %7703 = vmatpush.bf16.msra.mxu0 %v11714_v61  ;;  %v12162_v43 = vor.u32 %v14499_v24, %v12159_v5  ;;  %v12127_v56 = vld [vmem:[#allocation8 + $0x4e0] sm:$0xf0]  ;;  %v11618_v58 = vor.u32 %v14363_v23, %v11615_v46  ;;  %v11874_v61 = vor.u32 %v14427_v40, %v11871_v36 }
 0x3bd   :  { %v14355_v32 = vld [vmem:[#allocation8 + $0x84] sm:$0xf]  ;;  %v12130_v27 = vor.u32 %v14491_v2, %v12127_v56 }
 0x3be   :  { %7721 = vmatpush.bf16.msra.mxu1 %v11970_v8  ;;  %v4281_v8 = vpop.f32.mrf.mxu2  ;;  %v11583_v1 = vld [vmem:[#allocation8 + $0xa0] sm:$0xf0]  ;;  %v4247_v62 = vpop.f32.mrf.mxu0 }
 0x3bf   :  { %v14419_v49 = vld [vmem:[#allocation8 + $0x284] sm:$0xf]  ;;  %v4248_v18 = vadd.f32 %v4247_v62, %v4230_v57  ;;  %v11586_v28 = vor.u32 %v14355_v32, %v11583_v1  ;;  %v4301_v23 = vpop.f32.mrf.mxu3 }
 0x3c0   :  { %7739 = vmatpush.bf16.msra.mxu2 %v12226_v52  ;;  %7704 = vmatpush.bf16.msra.mxu0 %v11682_v63  ;;  %v11839_v19 = vld [vmem:[#allocation8 + $0x2a0] sm:$0xf0]  ;;  %v4179_v52 = vadd.f32 %v15522_v12, %v15545_v4  ;;  %v4264_v4 = vadd.f32 %v4263_v30, %v4246_v55  ;;  %v4268_v48 = vpop.f32.mrf.mxu1 }
 0x3c1   :  { %v14483_v63 = vld [vmem:[#allocation8 + $0x484] sm:$0xf]  ;;  %v11842_v29 = vor.u32 %v14419_v49, %v11839_v19  ;;  %v4266_v5 = vadd.f32 %v4265_v53, %v4248_v18 }
 0x3c2   :  { %7722 = vmatpush.bf16.msra.mxu1 %v11938_v60  ;;  %v12095_v60 = vld [vmem:[#allocation8 + $0x4a0] sm:$0xf0]  ;;  %v4197_v12 = vadd.f32 %v15524_v42, %v4179_v52  ;;  %v4282_v24 = vadd.f32 %v4281_v8, %v4264_v4  ;;  %v13533_v52 = vld [vmem:[#allocation8 + $0xfc0] sm:$0xf] }
 0x3c3   :  { %v14347_v11 = vld [vmem:[#allocation8 + $0x44] sm:$0xf]  ;;  %v12098_v15 = vor.u32 %v14483_v63, %v12095_v60 }
 0x3c4   :  { %7740 = vmatpush.bf16.msra.mxu2 %v12194_v33  ;;  %7705 = vmatpush.bf16.msra.mxu0 %v11650_v35  ;;  %v11551_v51 = vld [vmem:[#allocation8 + $0x60] sm:$0xf0]  ;;  %v4215_v42 = vadd.f32 %v15547_v9, %v4197_v12  ;;  %v4300_v8 = vadd.f32 %v4299_v44, %v4282_v24 }
 0x3c5   :  { %v14411_v13 = vld [vmem:[#allocation8 + $0x244] sm:$0xf]  ;;  %v11554_v33 = vor.u32 %v14347_v11, %v11551_v51 }
 0x3c6   :  { %7723 = vmatpush.bf16.msra.mxu1 %v11906_v10  ;;  %v11807_v3 = vld [vmem:[#allocation8 + $0x260] sm:$0xf0]  ;;  %v4283_v10 = vpop.f32.mrf.mxu2  ;;  %v4250_v36 = vpop.f32.mrf.mxu0  ;;  %v4233_v55 = vadd.f32 %v15549_v38, %v4215_v42 }
 0x3c7   :  { %v14475_v54 = vld [vmem:[#allocation8 + $0x444] sm:$0xf]  ;;  %v11810_v22 = vor.u32 %v14411_v13, %v11807_v3  ;;  %v4284_v30 = vadd.f32 %v4283_v10, %v4266_v5  ;;  %7643 = vmatmul.bf16.gmra.mxu0 %v15574_v7  ;;  %v4304_v13 = vpop.f32.mrf.mxu3 }
 0x3c8   :  { %7741 = vmatpush.bf16.msra.mxu2 %v12162_v43  ;;  %7706 = vmatpush.bf16.msra.mxu0 %v11618_v58  ;;  %v12063_v34 = vld [vmem:[#allocation8 + $0x460] sm:$0xf0]  ;;  %v15576_v58 = vpack.c.bf16 %v4161_v16, %v4161_v16  ;;  %v4251_v11 = vadd.f32 %v4250_v36, %v4233_v55  ;;  %v13437_v55 = vld [vmem:[#allocation8 + $0xf00] sm:$0xf] }
 0x3c9   :  { %v14339_v35 = vld [vmem:[#allocation8 + $0x4] sm:$0xf]  ;;  %v12066_v56 = vor.u32 %v14475_v54, %v12063_v34  ;;  %v4302_v1 = vadd.f32 %v4301_v23, %v4284_v30  ;;  %v14839_v54 = vld [vmem:[#allocation8 + $0xf9c] sm:$0xf0] }
 0x3ca   :  { %7724 = vmatpush.bf16.msra.mxu1 %v11874_v61  ;;  %v11519_v39 = vld [vmem:[#allocation8 + $0x20] sm:$0xf0]  ;;  %v4269_v10 = vadd.f32 %v4268_v48, %v4251_v11 }
 0x3cb   :  { %v14403_v46 = vld [vmem:[#allocation8 + $0x204] sm:$0xf]  ;;  %v11522_v9 = vor.u32 %v14339_v35, %v11519_v39  ;;  %7661 = vmatmul.bf16.gmra.mxu1 %v15576_v58  ;;  %v15581_v62 = vpack.c.bf16 %v4302_v1, %v4300_v8 }
 0x3cc   :  { %7742 = vmatpush.bf16.msra.mxu2 %v12130_v27  ;;  %7707 = vmatpush.bf16.msra.mxu0 %v11586_v28  ;;  %v11775_v40 = vld [vmem:[#allocation8 + $0x220] sm:$0xf0]  ;;  %v13534_v28 = vor.u32 %v14847_v20, %v13533_v52 }
 0x3cd   :  { %v14651_v17 = vld [vmem:[#allocation8 + $0x9c4] sm:$0xf]  ;;  %v11778_v49 = vor.u32 %v14403_v46, %v11775_v40  ;;  %7674 = vmatmul.bf16.vlgmr.msrb.gmra.mxu2 %v15581_v62  ;;  %v13469_v46 = vld [vmem:[#allocation8 + $0xf40] sm:$0xf] }
 0x3ce   :  { %7725 = vmatpush.bf16.msra.mxu1 %v11842_v29  ;;  %v12767_v43 = vld [vmem:[#allocation8 + $0x9e0] sm:$0xf0]  ;;  %v4286_v51 = vpop.f32.mrf.mxu2  ;;  %v4252_v4 = vpop.f32.mrf.mxu0  ;;  %7684 = vmatpush.bf16.msrb.mxu3 %v13534_v28  ;;  %v14831_v40 = vld [vmem:[#allocation8 + $0xf5c] sm:$0xf0] }
 0x3cf   :  { %v14715_v2 = vld [vmem:[#allocation8 + $0xbc4] sm:$0xf]  ;;  %v12770_v19 = vor.u32 %v14651_v17, %v12767_v43  ;;  %v4287_v42 = vadd.f32 %v4286_v51, %v4269_v10  ;;  %v4306_v48 = vpop.f32.mrf.mxu3  ;;  %v13405_v28 = vld [vmem:[#allocation8 + $0xec0] sm:$0xf] }
 0x3d0   :  { %7743 = vmatpush.bf16.msra.mxu2 %v12098_v15  ;;  %v13023_v61 = vld [vmem:[#allocation8 + $0xbe0] sm:$0xf0]  ;;  %7708 = vmatpush.bf16.msra.mxu0 %v11554_v33  ;;  %v4270_v15 = vpop.f32.mrf.mxu1  ;;  %v13501_v33 = vld [vmem:[#allocation8 + $0xf80] sm:$0xf] }
 0x3d1   :  { %v14467_v32 = vld [vmem:[#allocation8 + $0x404] sm:$0xf]  ;;  %v13026_v53 = vor.u32 %v14715_v2, %v13023_v61 }
 0x3d2   :  { %v12031_v0 = vld [vmem:[#allocation8 + $0x420] sm:$0xf0]  ;;  %7726 = vmatpush.bf16.msra.mxu1 %v11810_v22  ;;  %v13502_v22 = vor.u32 %v14839_v54, %v13501_v33 }
 0x3d3   :  { %v14643_v57 = vld [vmem:[#allocation8 + $0x984] sm:$0xf]  ;;  %v12034_v44 = vor.u32 %v14467_v32, %v12031_v0  ;;  %v13470_v32 = vor.u32 %v14831_v40, %v13469_v46  ;;  %v13373_v46 = vld [vmem:[#allocation8 + $0xe80] sm:$0xf] }
 0x3d4   :  { %v12735_v27 = vld [vmem:[#allocation8 + $0x9a0] sm:$0xf0]  ;;  %7744 = vmatpush.bf16.msra.mxu2 %v12066_v56  ;;  %7709 = vmatpush.bf16.msra.mxu0 %v11522_v9  ;;  %v14807_v40 = vld [vmem:[#allocation8 + $0xe9c] sm:$0xf0] }
 0x3d5   :  { %v14779_v45 = vld [vmem:[#allocation8 + $0xdc4] sm:$0xf]  ;;  %v12738_v38 = vor.u32 %v14643_v57, %v12735_v27  ;;  %7685 = vmatpush.bf16.msrb.mxu3 %v13502_v22 }
 0x3d6   :  { %v13279_v63 = vld [vmem:[#allocation8 + $0xde0] sm:$0xf0]  ;;  %7727 = vmatpush.bf16.msra.mxu1 %v11778_v49  ;;  %v4288_v8 = vpop.f32.mrf.mxu2  ;;  %v4305_v49 = vadd.f32 %v4304_v13, %v4287_v42 }
 0x3d7   :  { %v14707_v60 = vld [vmem:[#allocation8 + $0xb84] sm:$0xf]  ;;  %v13282_v29 = vor.u32 %v14779_v45, %v13279_v63  ;;  %7710 = vmatmul.bf16.vlgmr.msra.gmra.mxu0 %v15308_v50 }
 0x3d8   :  { %v12991_v18 = vld [vmem:[#allocation8 + $0xba0] sm:$0xf0]  ;;  %7774 = vmatpush.bf16.msrb.mxu0 %v12770_v19  ;;  %7745 = vmatpush.bf16.msra.mxu2 %v12034_v44  ;;  %v15584_v19 = vpop.f32.mrf.mxu0  ;;  %v15586_v57 = vpop.f32.mrf.mxu1  ;;  %v15590_v11 = vpack.c.bf16 %v4305_v49, %v4305_v49 }
 0x3d9   :  { %v14635_v3 = vld [vmem:[#allocation8 + $0x944] sm:$0xf]  ;;  %v12994_v16 = vor.u32 %v14707_v60, %v12991_v18  ;;  %7686 = vmatpush.bf16.msrb.mxu3 %v13470_v32  ;;  %v14799_v32 = vld [vmem:[#allocation8 + $0xe5c] sm:$0xf0] }
 0x3da   :  { %v12703_v12 = vld [vmem:[#allocation8 + $0x960] sm:$0xf0]  ;;  %7792 = vmatpush.bf16.msrb.mxu1 %v13026_v53  ;;  %v14823_v53 = vld [vmem:[#allocation8 + $0xf1c] sm:$0xf0] }
 0x3db   :  { %v14771_v34 = vld [vmem:[#allocation8 + $0xd84] sm:$0xf]  ;;  %v12706_v39 = vor.u32 %v14635_v3, %v12703_v12  ;;  %v13438_v63 = vor.u32 %v14823_v53, %v13437_v55  ;;  %7728 = vmatmul.bf16.vlgmr.msra.gmra.mxu1 %v15343_v21 }
 0x3dc   :  { %v14699_v24 = vld [vmem:[#allocation8 + $0xb44] sm:$0xf]  ;;  %7810 = vmatpush.bf16.msrb.mxu2 %v13282_v29  ;;  %7775 = vmatpush.bf16.msrb.mxu0 %v12738_v38  ;;  %v14815_v29 = vld [vmem:[#allocation8 + $0xedc] sm:$0xf0] }
 0x3dd   :  { %v12959_v5 = vld [vmem:[#allocation8 + $0xb60] sm:$0xf0]  ;;  %7687 = vmatpush.bf16.msrb.mxu3 %v13438_v63  ;;  %v13406_v33 = vor.u32 %v14815_v29, %v13405_v28  ;;  %7679 = vmatmul.bf16.gmra.mxu2 %v15590_v11 }
 0x3de   :  { %v13247_v35 = vld [vmem:[#allocation8 + $0xda0] sm:$0xf0]  ;;  %7793 = vmatpush.bf16.msrb.mxu1 %v12994_v16  ;;  %v12962_v30 = vor.u32 %v14699_v24, %v12959_v5  ;;  %v15595_v24 = vpop.f32.mrf.mxu3 }
 0x3df   :  { %v13250_v23 = vor.u32 %v14771_v34, %v13247_v35  ;;  %v14627_v36 = vld [vmem:[#allocation8 + $0x904] sm:$0xf]  ;;  %v15593_v34 = vpop.f32.mrf.mxu2 }
 0x3e0   :  { %v14763_v17 = vld [vmem:[#allocation8 + $0xd44] sm:$0xf]  ;;  %7776 = vmatpush.bf16.msrb.mxu0 %v12706_v39  ;;  %v15597_v35 = vpop.f32.mrf.mxu0  ;;  %v15599_v10 = vpop.f32.mrf.mxu1 }
 0x3e1   :  { %v13215_v43 = vld [vmem:[#allocation8 + $0xd60] sm:$0xf0]  ;;  %7811 = vmatpush.bf16.msrb.mxu2 %v13250_v23  ;;  %7688 = vmatpush.bf16.msrb.mxu3 %v13406_v33  ;;  %v14392_v33 = vld [vmem:[#allocation8 + $0x1a4] sm:$0xf0] }
 0x3e2   :  { %v12671_v2 = vld [vmem:[#allocation8 + $0x920] sm:$0xf0]  ;;  %v13218_v0 = vor.u32 %v14763_v17, %v13215_v43  ;;  %7794 = vmatpush.bf16.msrb.mxu1 %v12962_v30  ;;  %v13374_v17 = vor.u32 %v14807_v40, %v13373_v46  ;;  %v12261_v40 = vld [vmem:[#allocation8 + $0x5c8] sm:$0xf] }
 0x3e3   :  { %v14691_v56 = vld [vmem:[#allocation8 + $0xb04] sm:$0xf]  ;;  %v12674_v52 = vor.u32 %v14627_v36, %v12671_v2 }
 0x3e4   :  { %v12927_v61 = vld [vmem:[#allocation8 + $0xb20] sm:$0xf0] }
 0x3e5   :  { %v14619_v1 = vld [vmem:[#allocation8 + $0x8c4] sm:$0xf]  ;;  %v12930_v20 = vor.u32 %v14691_v56, %v12927_v61  ;;  %7812 = vmatpush.bf16.msrb.mxu2 %v13218_v0  ;;  %7777 = vmatpush.bf16.msrb.mxu0 %v12674_v52  ;;  %v13341_v61 = vld [vmem:[#allocation8 + $0xe40] sm:$0xf] }
 0x3e6   :  { %v12639_v9 = vld [vmem:[#allocation8 + $0x8e0] sm:$0xf0]  ;;  %7689 = vmatpush.bf16.msrb.mxu3 %v13374_v17  ;;  %v13342_v55 = vor.u32 %v14799_v32, %v13341_v61  ;;  %v11685_v17 = vld [vmem:[#allocation8 + $0x148] sm:$0xf] }
 0x3e7   :  { %v14755_v27 = vld [vmem:[#allocation8 + $0xd04] sm:$0xf]  ;;  %7795 = vmatpush.bf16.msrb.mxu1 %v12930_v20  ;;  %v12642_v51 = vor.u32 %v14619_v1, %v12639_v9  ;;  %v11749_v20 = vld [vmem:[#allocation8 + $0x1c8] sm:$0xf]  ;;  %v15601_v63 = vpop.f32.mrf.mxu2  ;;  %7715 = vmatmul.bf16.gmra.mxu0 %v15520_v37 }
 0x3e8   :  { %v14683_v44 = vld [vmem:[#allocation8 + $0xac4] sm:$0xf]  ;;  %v15607_v28 = vpop.f32.mrf.mxu1  ;;  %v11941_v61 = vld [vmem:[#allocation8 + $0x348] sm:$0xf] }
 0x3e9   :  { %v12895_v45 = vld [vmem:[#allocation8 + $0xae0] sm:$0xf0]  ;;  %7778 = vmatpush.bf16.msrb.mxu0 %v12642_v51  ;;  %v14448_v32 = vld [vmem:[#allocation8 + $0x364] sm:$0xf0] }
 0x3ea   :  { %v13183_v60 = vld [vmem:[#allocation8 + $0xd20] sm:$0xf0]  ;;  %v12898_v13 = vor.u32 %v14683_v44, %v12895_v45  ;;  %v12005_v44 = vld [vmem:[#allocation8 + $0x3c8] sm:$0xf]  ;;  %7690 = vmatpush.bf16.msrb.mxu3 %v13342_v55  ;;  %v11942_v55 = vor.u32 %v14448_v32, %v11941_v61 }
 0x3eb   :  { %v13186_v18 = vor.u32 %v14755_v27, %v13183_v60  ;;  %v14611_v38 = vld [vmem:[#allocation8 + $0x884] sm:$0xf]  ;;  %v14400_v27 = vld [vmem:[#allocation8 + $0x1e4] sm:$0xf0]  ;;  %v15603_v60 = vpop.f32.mrf.mxu3  ;;  %7733 = vmatmul.bf16.gmra.mxu1 %v15528_v47 }
 0x3ec   :  { %v14747_v3 = vld [vmem:[#allocation8 + $0xcc4] sm:$0xf]  ;;  %7796 = vmatpush.bf16.msrb.mxu1 %v12898_v13  ;;  %v14464_v45 = vld [vmem:[#allocation8 + $0x3e4] sm:$0xf0]  ;;  %v13309_v13 = vld [vmem:[#allocation8 + $0xe00] sm:$0xf] }
 0x3ed   :  { %v13151_v12 = vld [vmem:[#allocation8 + $0xce0] sm:$0xf0]  ;;  %7813 = vmatpush.bf16.msrb.mxu2 %v13186_v18  ;;  %v15605_v18 = vpop.f32.mrf.mxu0  ;;  %v11589_v32 = vld [vmem:[#allocation8 + $0x88] sm:$0xf] }
 0x3ee   :  { %v12607_v4 = vld [vmem:[#allocation8 + $0x8a0] sm:$0xf0]  ;;  %v13154_v54 = vor.u32 %v14747_v3, %v13151_v12  ;;  %v11750_v12 = vor.u32 %v14400_v27, %v11749_v20  ;;  %7746 = vmatmul.bf16.vlgmr.msra.gmra.mxu2 %v15380_v14 }
 0x3ef   :  { %v14675_v15 = vld [vmem:[#allocation8 + $0xa84] sm:$0xf]  ;;  %v12610_v23 = vor.u32 %v14611_v38, %v12607_v4  ;;  %v14791_v38 = vld [vmem:[#allocation8 + $0xe1c] sm:$0xf0]  ;;  %v12006_v4 = vor.u32 %v14464_v45, %v12005_v44  ;;  %v14520_v44 = vld [vmem:[#allocation8 + $0x5a4] sm:$0xf0] }
 0x3f0   :  { %v12863_v16 = vld [vmem:[#allocation8 + $0xaa0] sm:$0xf0] }
 0x3f1   :  { %v14603_v5 = vld [vmem:[#allocation8 + $0x844] sm:$0xf]  ;;  %v12866_v39 = vor.u32 %v14675_v15, %v12863_v16  ;;  %7814 = vmatpush.bf16.msrb.mxu2 %v13154_v54  ;;  %7779 = vmatpush.bf16.msrb.mxu0 %v12610_v23  ;;  %v11717_v15 = vld [vmem:[#allocation8 + $0x188] sm:$0xf] }
 0x3f2   :  { %v12575_v22 = vld [vmem:[#allocation8 + $0x860] sm:$0xf0]  ;;  %v11973_v54 = vld [vmem:[#allocation8 + $0x388] sm:$0xf] }
 0x3f3   :  { %v14739_v42 = vld [vmem:[#allocation8 + $0xc84] sm:$0xf]  ;;  %7797 = vmatpush.bf16.msrb.mxu1 %v12866_v39  ;;  %v12578_v0 = vor.u32 %v14603_v5, %v12575_v22  ;;  %v14456_v5 = vld [vmem:[#allocation8 + $0x3a4] sm:$0xf0]  ;;  %v13310_v22 = vor.u32 %v14791_v38, %v13309_v13 }
 0x3f4   :  { %v14667_v30 = vld [vmem:[#allocation8 + $0xa44] sm:$0xf]  ;;  %v14440_v13 = vld [vmem:[#allocation8 + $0x324] sm:$0xf0] }
 0x3f5   :  { %v12831_v36 = vld [vmem:[#allocation8 + $0xa60] sm:$0xf0]  ;;  %7780 = vmatpush.bf16.msrb.mxu0 %v12578_v0  ;;  %7691 = vmatpush.bf16.msrb.mxu3 %v13310_v22 }
 0x3f6   :  { %v13119_v43 = vld [vmem:[#allocation8 + $0xca0] sm:$0xf0]  ;;  %v12834_v8 = vor.u32 %v14667_v30, %v12831_v36  ;;  %v11718_v30 = vor.u32 %v14392_v33, %v11717_v15  ;;  %v11974_v36 = vor.u32 %v14456_v5, %v11973_v54  ;;  %v11621_v33 = vld [vmem:[#allocation8 + $0xc8] sm:$0xf] }
 0x3f7   :  { %v13122_v2 = vor.u32 %v14739_v42, %v13119_v43  ;;  %v14595_v56 = vld [vmem:[#allocation8 + $0x804] sm:$0xf]  ;;  %v15612_v42 = vperm.slane %v15542_v59, 7  ;;  %v4324_v59 = vpop.f32.mrf.mxu0  ;;  %v14512_v5 = vld [vmem:[#allocation8 + $0x564] sm:$0xf0] }
 0x3f8   :  { %v12543_v48 = vld [vmem:[#allocation8 + $0x820] sm:$0xf0]  ;;  %7798 = vmatpush.bf16.msrb.mxu1 %v12834_v8  ;;  %v15615_v8 = vpop.f32.mrf.mxu2  ;;  %v14504_v59 = vld [vmem:[#allocation8 + $0x524] sm:$0xf0] }
 0x3f9   :  { %v14731_v1 = vld [vmem:[#allocation8 + $0xc44] sm:$0xf]  ;;  %7815 = vmatpush.bf16.msrb.mxu2 %v13122_v2  ;;  %v12546_v29 = vor.u32 %v14595_v56, %v12543_v48  ;;  %v14528_v2 = vld [vmem:[#allocation8 + $0x5e4] sm:$0xf0]  ;;  %v15617_v48 = vpop.f32.mrf.mxu3  ;;  %v4318_v45 = vadd.f32 %v15584_v19, %v15612_v42  ;;  %v4320_v19 = vadd.f32 %v15597_v35, %v15612_v42 }
 0x3fa   :  { %v13087_v9 = vld [vmem:[#allocation8 + $0xc60] sm:$0xf0]  ;;  %v14384_v56 = vld [vmem:[#allocation8 + $0x164] sm:$0xf0]  ;;  %v12262_v0 = vor.u32 %v14528_v2, %v12261_v40 }
 0x3fb   :  { %v14659_v49 = vld [vmem:[#allocation8 + $0xa04] sm:$0xf]  ;;  %v13090_v53 = vor.u32 %v14731_v1, %v13087_v9  ;;  %7781 = vmatpush.bf16.msrb.mxu0 %v12546_v29  ;;  %v4342_v1 = vpop.f32.mrf.mxu1  ;;  %v11686_v20 = vor.u32 %v14384_v56, %v11685_v17  ;;  %v14376_v29 = vld [vmem:[#allocation8 + $0x124] sm:$0xf0]  ;;  %v4336_v22 = vadd.f32 %v15586_v57, %v4318_v45 }
 0x3fc   :  { %v12799_v52 = vld [vmem:[#allocation8 + $0xa20] sm:$0xf0]  ;;  %v12165_v35 = vld [vmem:[#allocation8 + $0x508] sm:$0xf] }
 0x3fd   :  { %v12802_v51 = vor.u32 %v14659_v49, %v12799_v52  ;;  %v14723_v3 = vld [vmem:[#allocation8 + $0xc04] sm:$0xf]  ;;  %7816 = vmatpush.bf16.msrb.mxu2 %v13090_v53  ;;  %v12229_v52 = vld [vmem:[#allocation8 + $0x588] sm:$0xf]  ;;  %v4354_v1 = vadd.f32 %v15593_v34, %v4336_v22 }
 0x3fe   :  { %v13055_v16 = vld [vmem:[#allocation8 + $0xc20] sm:$0xf0]  ;;  %v11653_v53 = vld [vmem:[#allocation8 + $0x108] sm:$0xf]  ;;  %v12230_v38 = vor.u32 %v14520_v44, %v12229_v52  ;;  %7782 = vmatmul.bf16.vlgmr.msrb.gmra.mxu0 %v15452_v41  ;;  %7751 = vmatmul.bf16.gmra.mxu2 %v15532_v26 }
 0x3ff   :  { %v13058_v23 = vor.u32 %v14723_v3, %v13055_v16  ;;  %7799 = vmatpush.bf16.msrb.mxu1 %v12802_v51  ;;  %v14587_v39 = vld [vmem:[#allocation8 + $0x7c4] sm:$0xf]  ;;  %7846 = vmatpush.bf16.msra.mxu0 %v11750_v12  ;;  %v11909_v51 = vld [vmem:[#allocation8 + $0x308] sm:$0xf]  ;;  %v11654_v15 = vor.u32 %v14376_v29, %v11653_v53  ;;  %v4389_v17 = vpop.f32.mrf.mxu0 }
 0x400   :  { %v12511_v46 = vld [vmem:[#allocation8 + $0x7e0] sm:$0xf0]  ;;  %v11910_v16 = vor.u32 %v14440_v13, %v11909_v51  ;;  %v11845_v52 = vld [vmem:[#allocation8 + $0x288] sm:$0xf] }
 0x401   :  { %v12514_v43 = vor.u32 %v14587_v39, %v12511_v46  ;;  %7817 = vmatpush.bf16.msrb.mxu2 %v13058_v23  ;;  %v14579_v9 = vld [vmem:[#allocation8 + $0x784] sm:$0xf]  ;;  %v14368_v23 = vld [vmem:[#allocation8 + $0xe4] sm:$0xf0] }
 0x402   :  { %v12479_v49 = vld [vmem:[#allocation8 + $0x7a0] sm:$0xf0]  ;;  %v11877_v39 = vld [vmem:[#allocation8 + $0x2c8] sm:$0xf]  ;;  %v11622_v61 = vor.u32 %v14368_v23, %v11621_v33  ;;  %7800 = vmatmul.bf16.vlgmr.msrb.gmra.mxu1 %v15490_v31 }
 0x403   :  { %7864 = vmatpush.bf16.msra.mxu1 %v12006_v4  ;;  %7756 = vmatpush.bf16.msra.mxu3 %v12514_v43  ;;  %v12482_v27 = vor.u32 %v14579_v9, %v12479_v49  ;;  %v14571_v3 = vld [vmem:[#allocation8 + $0x744] sm:$0xf]  ;;  %v12197_v4 = vld [vmem:[#allocation8 + $0x548] sm:$0xf]  ;;  %v15624_v43 = vpop.f32.mrf.mxu1  ;;  %v4338_v9 = vadd.f32 %v15599_v10, %v4320_v19 }
 0x404   :  { %7847 = vmatpush.bf16.msra.mxu0 %v11718_v30  ;;  %v12447_v12 = vld [vmem:[#allocation8 + $0x760] sm:$0xf0]  ;;  %v14432_v46 = vld [vmem:[#allocation8 + $0x2e4] sm:$0xf0]  ;;  %v12198_v40 = vor.u32 %v14512_v5, %v12197_v4  ;;  %v4360_v30 = vpop.f32.mrf.mxu2 }
 0x405   :  { %7882 = vmatpush.bf16.msra.mxu2 %v12262_v0  ;;  %v12450_v54 = vor.u32 %v14571_v3, %v12447_v12  ;;  %v14563_v2 = vld [vmem:[#allocation8 + $0x704] sm:$0xf]  ;;  %v11878_v57 = vor.u32 %v14432_v46, %v11877_v39  ;;  %v14360_v49 = vld [vmem:[#allocation8 + $0xa4] sm:$0xf0]  ;;  %v4356_v53 = vadd.f32 %v15601_v63, %v4338_v9 }
 0x406   :  { %v12415_v56 = vld [vmem:[#allocation8 + $0x720] sm:$0xf0]  ;;  %v12133_v45 = vld [vmem:[#allocation8 + $0x4c8] sm:$0xf]  ;;  %v11590_v34 = vor.u32 %v14360_v49, %v11589_v32 }
 0x407   :  { %7865 = vmatpush.bf16.msra.mxu1 %v11974_v36  ;;  %7757 = vmatpush.bf16.msra.mxu3 %v12482_v27  ;;  %v4378_v36 = vpop.f32.mrf.mxu3  ;;  %v12418_v0 = vor.u32 %v14563_v2, %v12415_v56  ;;  %v14555_v27 = vld [vmem:[#allocation8 + $0x6c4] sm:$0xf]  ;;  %v11557_v10 = vld [vmem:[#allocation8 + $0x48] sm:$0xf]  ;;  %v4374_v33 = vadd.f32 %v15603_v60, %v4356_v53  ;;  %v4391_v22 = vpop.f32.mrf.mxu0 }
 0x408   :  { %7848 = vmatpush.bf16.msra.mxu0 %v11686_v20  ;;  %v14424_v20 = vld [vmem:[#allocation8 + $0x2a4] sm:$0xf0]  ;;  %v12383_v44 = vld [vmem:[#allocation8 + $0x6e0] sm:$0xf0] }
 0x409   :  { %7883 = vmatpush.bf16.msra.mxu2 %v12230_v38  ;;  %v11846_v29 = vor.u32 %v14424_v20, %v11845_v52  ;;  %v12386_v51 = vor.u32 %v14555_v27, %v12383_v44  ;;  %v14496_v13 = vld [vmem:[#allocation8 + $0x4e4] sm:$0xf0]  ;;  %v4372_v38 = vadd.f32 %v15595_v24, %v4354_v1  ;;  %v14547_v24 = vld [vmem:[#allocation8 + $0x684] sm:$0xf] }
 0x40a   :  { %v14352_v3 = vld [vmem:[#allocation8 + $0x64] sm:$0xf0]  ;;  %v12134_v63 = vor.u32 %v14496_v13, %v12133_v45  ;;  %v12351_v46 = vld [vmem:[#allocation8 + $0x6a0] sm:$0xf0] }
 0x40b   :  { %7866 = vmatpush.bf16.msra.mxu1 %v11942_v55  ;;  %7758 = vmatpush.bf16.msra.mxu3 %v12450_v54  ;;  %v12166_v55 = vor.u32 %v14504_v59, %v12165_v35  ;;  %v11813_v12 = vld [vmem:[#allocation8 + $0x248] sm:$0xf]  ;;  %v4323_v54 = vadd.f32 %v15605_v18, %v15612_v42  ;;  %v4390_v5 = vadd.f32 %v4389_v17, %v4372_v38  ;;  %v4409_v19 = vpop.f32.mrf.mxu1  ;;  %v14539_v35 = vld [vmem:[#allocation8 + $0x644] sm:$0xf] }
 0x40c   :  { %7849 = vmatpush.bf16.msra.mxu0 %v11654_v15  ;;  %v14416_v4 = vld [vmem:[#allocation8 + $0x264] sm:$0xf0]  ;;  %v4425_v15 = vpop.f32.mrf.mxu2  ;;  %v11558_v30 = vor.u32 %v14352_v3, %v11557_v10  ;;  %v12354_v60 = vor.u32 %v14547_v24, %v12351_v46  ;;  %v12319_v59 = vld [vmem:[#allocation8 + $0x660] sm:$0xf0] }
 0x40d   :  { %7884 = vmatpush.bf16.msra.mxu2 %v12198_v40  ;;  %v11525_v23 = vld [vmem:[#allocation8 + $0x8] sm:$0xf]  ;;  %v11814_v36 = vor.u32 %v14416_v4, %v11813_v12  ;;  %v4341_v1 = vadd.f32 %v15607_v28, %v4323_v54  ;;  %v4408_v9 = vadd.f32 %v15624_v43, %v4390_v5  ;;  %v12322_v49 = vor.u32 %v14539_v35, %v12319_v59  ;;  %v12287_v54 = vld [vmem:[#allocation8 + $0x620] sm:$0xf0] }
 0x40e   :  { %v14344_v39 = vld [vmem:[#allocation8 + $0x24] sm:$0xf0]  ;;  %7787 = vmatmul.bf16.gmra.mxu0 %v15574_v7  ;;  %7818 = vmatmul.bf16.vlgmr.msrb.gmra.mxu2 %v15581_v62 }
 0x40f   :  { %7867 = vmatpush.bf16.msra.mxu1 %v11910_v16  ;;  %7759 = vmatpush.bf16.msra.mxu3 %v12418_v0  ;;  %v15633_v16 = vpop.f32.mrf.mxu3  ;;  %v12101_v40 = vld [vmem:[#allocation8 + $0x488] sm:$0xf]  ;;  %v4426_v44 = vadd.f32 %v4425_v15, %v4408_v9  ;;  %v4359_v3 = vadd.f32 %v15615_v8, %v4341_v1  ;;  %v4394_v4 = vpop.f32.mrf.mxu0 }
 0x410   :  { %7850 = vmatpush.bf16.msra.mxu0 %v11622_v61  ;;  %v11781_v2 = vld [vmem:[#allocation8 + $0x208] sm:$0xf] }
 0x411   :  { %7885 = vmatpush.bf16.msra.mxu2 %v12166_v55  ;;  %v14408_v56 = vld [vmem:[#allocation8 + $0x224] sm:$0xf0]  ;;  %v11526_v55 = vor.u32 %v14344_v39, %v11525_v23 }
 0x412   :  { %v14488_v61 = vld [vmem:[#allocation8 + $0x4a4] sm:$0xf0]  ;;  %v11782_v53 = vor.u32 %v14408_v56, %v11781_v2  ;;  %7805 = vmatmul.bf16.gmra.mxu1 %v15576_v58  ;;  %v4377_v2 = vadd.f32 %v15617_v48, %v4359_v3 }
 0x413   :  { %7868 = vmatpush.bf16.msra.mxu1 %v11878_v57  ;;  %7760 = vmatpush.bf16.msra.mxu3 %v12386_v51  ;;  %v4392_v57 = vadd.f32 %v4391_v22, %v4374_v33  ;;  %v12773_v18 = vld [vmem:[#allocation8 + $0x9c8] sm:$0xf]  ;;  %v12102_v32 = vor.u32 %v14488_v61, %v12101_v40  ;;  %v14531_v33 = vld [vmem:[#allocation8 + $0x604] sm:$0xf] }
 0x414   :  { %7851 = vmatpush.bf16.msra.mxu0 %v11590_v34  ;;  %v14656_v42 = vld [vmem:[#allocation8 + $0x9e4] sm:$0xf0]  ;;  %v4427_v51 = vpop.f32.mrf.mxu2  ;;  %v12290_v15 = vor.u32 %v14531_v33, %v12287_v54 }
 0x415   :  { %7886 = vmatpush.bf16.msra.mxu2 %v12134_v63  ;;  %v13029_v17 = vld [vmem:[#allocation8 + $0xbc8] sm:$0xf]  ;;  %v4410_v45 = vadd.f32 %v4409_v19, %v4392_v57  ;;  %v12774_v34 = vor.u32 %v14656_v42, %v12773_v18  ;;  %v4412_v63 = vpop.f32.mrf.mxu1  ;;  %v4444_v19 = vadd.f32 %v15633_v16, %v4426_v44  ;;  %v14843_v16 = vld [vmem:[#allocation8 + $0xfc4] sm:$0xf]  ;;  %v4395_v42 = vadd.f32 %v4394_v4, %v4377_v2 }
 0x416   :  { %v14720_v0 = vld [vmem:[#allocation8 + $0xbe4] sm:$0xf0]  ;;  %v14819_v2 = vld [vmem:[#allocation8 + $0xf04] sm:$0xf] }
 0x417   :  { %7869 = vmatpush.bf16.msra.mxu1 %v11846_v29  ;;  %7761 = vmatpush.bf16.msra.mxu3 %v12354_v60  ;;  %v12069_v52 = vld [vmem:[#allocation8 + $0x448] sm:$0xf]  ;;  %v13030_v29 = vor.u32 %v14720_v0, %v13029_v17  ;;  %v4445_v13 = vpop.f32.mrf.mxu3  ;;  %v4428_v12 = vadd.f32 %v4427_v51, %v4410_v45  ;;  %v13535_v60 = vld [vmem:[#allocation8 + $0xfe0] sm:$0xf0] }
 0x418   :  { %v14480_v20 = vld [vmem:[#allocation8 + $0x464] sm:$0xf0]  ;;  %7852 = vmatpush.bf16.msra.mxu0 %v11558_v30  ;;  %v13538_v57 = vor.u32 %v14843_v16, %v13535_v60  ;;  %v15649_v17 = vld [vmem:[#allocation10] sm:$0xff] }
 0x419   :  { %7887 = vmatpush.bf16.msra.mxu2 %v12102_v32  ;;  %v12070_v27 = vor.u32 %v14480_v20, %v12069_v52  ;;  %v12741_v10 = vld [vmem:[#allocation8 + $0x988] sm:$0xf]  ;;  %v4446_v23 = vadd.f32 %v4445_v13, %v4428_v12  ;;  %v4396_v20 = vpop.f32.mrf.mxu0  ;;  %v15652_v51 = vperm.slane %v15649_v17, 0  ;;  %v13439_v16 = vld [vmem:[#allocation8 + $0xf20] sm:$0xf0] }
 0x41a   :  { %v14648_v28 = vld [vmem:[#allocation8 + $0x9a4] sm:$0xf0]  ;;  %v13407_v20 = vld [vmem:[#allocation8 + $0xee0] sm:$0xf0] }
 0x41b   :  { %7870 = vmatpush.bf16.msra.mxu1 %v11814_v36  ;;  %v12997_v38 = vld [vmem:[#allocation8 + $0xb88] sm:$0xf]  ;;  %7762 = vmatpush.bf16.msra.mxu3 %v12322_v49  ;;  %v12742_v8 = vor.u32 %v14648_v28, %v12741_v10  ;;  %v15645_v56 = vpack.c.bf16 %v4446_v23, %v4444_v19 }
 0x41c   :  { %v14712_v43 = vld [vmem:[#allocation8 + $0xba4] sm:$0xf0]  ;;  %7853 = vmatpush.bf16.msra.mxu0 %v11526_v55  ;;  %v4430_v35 = vpop.f32.mrf.mxu2 }
 0x41d   :  { %7888 = vmatpush.bf16.msra.mxu2 %v12070_v27  ;;  %v12037_v5 = vld [vmem:[#allocation8 + $0x408] sm:$0xf]  ;;  %v12998_v46 = vor.u32 %v14712_v43, %v12997_v38  ;;  %7692 = vmatmul.bf16.vlgmr.msrb.gmra.mxu3 %v15645_v56  ;;  %v4414_v55 = vpop.f32.mrf.mxu1  ;;  %v13503_v27 = vld [vmem:[#allocation8 + $0xfa0] sm:$0xf0] }
 0x41e   :  { %v14472_v22 = vld [vmem:[#allocation8 + $0x424] sm:$0xf0]  ;;  %v14827_v38 = vld [vmem:[#allocation8 + $0xf44] sm:$0xf]  ;;  %7823 = vmatmul.bf16.gmra.mxu2 %v15590_v11 }
 0x41f   :  { %7871 = vmatpush.bf16.msra.mxu1 %v11782_v53  ;;  %v12709_v39 = vld [vmem:[#allocation8 + $0x948] sm:$0xf]  ;;  %v12038_v24 = vor.u32 %v14472_v22, %v12037_v5  ;;  %7763 = vmatpush.bf16.msra.mxu3 %v12290_v15  ;;  %v4448_v48 = vpop.f32.mrf.mxu3  ;;  %v14835_v53 = vld [vmem:[#allocation8 + $0xf84] sm:$0xf] }
 0x420   :  { %7918 = vmatpush.bf16.msrb.mxu0 %v12774_v34  ;;  %v14640_v40 = vld [vmem:[#allocation8 + $0x964] sm:$0xf0]  ;;  %v13506_v45 = vor.u32 %v14835_v53, %v13503_v27  ;;  %v13471_v43 = vld [vmem:[#allocation8 + $0xf60] sm:$0xf0] }
 0x421   :  { %v12965_v30 = vld [vmem:[#allocation8 + $0xb48] sm:$0xf]  ;;  %7889 = vmatpush.bf16.msra.mxu2 %v12038_v24  ;;  %v12710_v59 = vor.u32 %v14640_v40, %v12709_v39  ;;  %v13474_v4 = vor.u32 %v14827_v38, %v13471_v43  ;;  %7854 = vmatmul.bf16.vlgmr.msra.gmra.mxu0 %v15308_v50 }
 0x422   :  { %v14704_v36 = vld [vmem:[#allocation8 + $0xb64] sm:$0xf0]  ;;  %7872 = vmatmul.bf16.vlgmr.msra.gmra.mxu1 %v15343_v21 }
 0x423   :  { %7936 = vmatpush.bf16.msrb.mxu1 %v13030_v29  ;;  %v13285_v61 = vld [vmem:[#allocation8 + $0xdc8] sm:$0xf]  ;;  %v12966_v1 = vor.u32 %v14704_v36, %v12965_v30  ;;  %7828 = vmatpush.bf16.msrb.mxu3 %v13538_v57  ;;  %v4413_v29 = vadd.f32 %v4412_v63, %v4395_v42  ;;  %v13442_v42 = vor.u32 %v14819_v2, %v13439_v16  ;;  %v14795_v2 = vld [vmem:[#allocation8 + $0xe44] sm:$0xf] }
 0x424   :  { %v14784_v18 = vld [vmem:[#allocation8 + $0xde4] sm:$0xf0]  ;;  %7919 = vmatpush.bf16.msrb.mxu0 %v12742_v8  ;;  %v4432_v19 = vpop.f32.mrf.mxu2  ;;  %v13343_v16 = vld [vmem:[#allocation8 + $0xe60] sm:$0xf0] }
 0x425   :  { %v12677_v32 = vld [vmem:[#allocation8 + $0x908] sm:$0xf]  ;;  %v13286_v0 = vor.u32 %v14784_v18, %v13285_v61  ;;  %v4431_v3 = vadd.f32 %v4430_v35, %v4413_v29  ;;  %v7585_v40 = vpop.f32.mrf.mxu1  ;;  %v14396_v19 = vld [vmem:[#allocation8 + $0x1cc] sm:$0xf] }
 0x426   :  { %v14632_v9 = vld [vmem:[#allocation8 + $0x924] sm:$0xf0] }
 0x427   :  { %7937 = vmatpush.bf16.msrb.mxu1 %v12998_v46  ;;  %v12933_v49 = vld [vmem:[#allocation8 + $0xb08] sm:$0xf]  ;;  %7954 = vmatpush.bf16.msrb.mxu2 %v13286_v0  ;;  %v12678_v13 = vor.u32 %v14632_v9, %v12677_v32  ;;  %v4450_v23 = vpop.f32.mrf.mxu3  ;;  %v4449_v8 = vadd.f32 %v4448_v48, %v4431_v3  ;;  %v7567_v46 = vpop.f32.mrf.mxu0 }
 0x428   :  { %v14696_v52 = vld [vmem:[#allocation8 + $0xb24] sm:$0xf0]  ;;  %7920 = vmatpush.bf16.msrb.mxu0 %v12710_v59  ;;  %7829 = vmatpush.bf16.msrb.mxu3 %v13506_v45  ;;  %v7568_v61 = vadd.f32 %v7567_v46, %v15652_v51  ;;  %v14460_v46 = vld [vmem:[#allocation8 + $0x3cc] sm:$0xf] }
 0x429   :  { %v13253_v44 = vld [vmem:[#allocation8 + $0xd88] sm:$0xf]  ;;  %v12934_v28 = vor.u32 %v14696_v52, %v12933_v49  ;;  %v14811_v52 = vld [vmem:[#allocation8 + $0xec4] sm:$0xf] }
 0x42a   :  { %v14776_v34 = vld [vmem:[#allocation8 + $0xda4] sm:$0xf0]  ;;  %v7586_v35 = vadd.f32 %v7585_v40, %v7568_v61  ;;  %v12007_v40 = vld [vmem:[#allocation8 + $0x3e8] sm:$0xf0] }
 0x42b   :  { %v13254_v10 = vor.u32 %v14776_v34, %v13253_v44  ;;  %7938 = vmatpush.bf16.msrb.mxu1 %v12966_v1  ;;  %v12645_v12 = vld [vmem:[#allocation8 + $0x8c8] sm:$0xf]  ;;  %v15657_v1 = vpack.c.bf16 %v4449_v8, %v4449_v8  ;;  %v13410_v44 = vor.u32 %v14811_v52, %v13407_v20  ;;  %v11751_v8 = vld [vmem:[#allocation8 + $0x1e8] sm:$0xf0] }
 0x42c   :  { %v13221_v33 = vld [vmem:[#allocation8 + $0xd48] sm:$0xf]  ;;  %7921 = vmatpush.bf16.msrb.mxu0 %v12678_v13  ;;  %7830 = vmatpush.bf16.msrb.mxu3 %v13474_v4  ;;  %v7603_v29 = vpop.f32.mrf.mxu2 }
 0x42d   :  { %7955 = vmatpush.bf16.msrb.mxu2 %v13254_v10  ;;  %v14768_v54 = vld [vmem:[#allocation8 + $0xd64] sm:$0xf0]  ;;  %7697 = vmatmul.bf16.gmra.mxu3 %v15657_v1  ;;  %v7604_v43 = vadd.f32 %v7603_v29, %v7586_v35  ;;  %v11719_v35 = vld [vmem:[#allocation8 + $0x1a8] sm:$0xf0] }
 0x42e   :  { %v14624_v5 = vld [vmem:[#allocation8 + $0x8e4] sm:$0xf0]  ;;  %v13222_v22 = vor.u32 %v14768_v54, %v13221_v33  ;;  %v14803_v54 = vld [vmem:[#allocation8 + $0xe84] sm:$0xf]  ;;  %7890 = vmatmul.bf16.vlgmr.msra.gmra.mxu2 %v15380_v14 }
 0x42f   :  { %v12901_v15 = vld [vmem:[#allocation8 + $0xac8] sm:$0xf]  ;;  %7939 = vmatpush.bf16.msrb.mxu1 %v12934_v28  ;;  %v12646_v30 = vor.u32 %v14624_v5, %v12645_v12  ;;  %v7621_v10 = vpop.f32.mrf.mxu3  ;;  %v7569_v3 = vpop.f32.mrf.mxu0  ;;  %v13375_v5 = vld [vmem:[#allocation8 + $0xea0] sm:$0xf0] }
 0x430   :  { %v14688_v63 = vld [vmem:[#allocation8 + $0xae4] sm:$0xf0]  ;;  %7831 = vmatpush.bf16.msrb.mxu3 %v13442_v42  ;;  %v7587_v12 = vpop.f32.mrf.mxu1  ;;  %v13378_v23 = vor.u32 %v14803_v54, %v13375_v5  ;;  %v11754_v42 = vor.u32 %v14396_v19, %v11751_v8  ;;  %v14524_v5 = vld [vmem:[#allocation8 + $0x5cc] sm:$0xf] }
 0x431   :  { %v12613_v39 = vld [vmem:[#allocation8 + $0x888] sm:$0xf]  ;;  %v12902_v36 = vor.u32 %v14688_v63, %v12901_v15  ;;  %7956 = vmatpush.bf16.msrb.mxu2 %v13222_v22  ;;  %7922 = vmatpush.bf16.msrb.mxu0 %v12646_v30  ;;  %v7570_v63 = vadd.f32 %v7569_v3, %v15652_v51  ;;  %v11943_v3 = vld [vmem:[#allocation8 + $0x368] sm:$0xf0] }
 0x432   :  { %v14616_v24 = vld [vmem:[#allocation8 + $0x8a4] sm:$0xf0]  ;;  %7859 = vmatmul.bf16.gmra.mxu0 %v15520_v37  ;;  %7877 = vmatmul.bf16.gmra.mxu1 %v15528_v47  ;;  %v14436_v8 = vld [vmem:[#allocation8 + $0x30c] sm:$0xf] }
 0x433   :  { %v13189_v60 = vld [vmem:[#allocation8 + $0xd08] sm:$0xf]  ;;  %7940 = vmatpush.bf16.msrb.mxu1 %v12902_v36  ;;  %v12614_v9 = vor.u32 %v14616_v24, %v12613_v39  ;;  %v15662_v24 = vadd.f32 %v7621_v10, %v7604_v43  ;;  %v15664_v36 = vadd.f32 %v7587_v12, %v7570_v63  ;;  %v14444_v43 = vld [vmem:[#allocation8 + $0x34c] sm:$0xf] }
 0x434   :  { %v12869_v57 = vld [vmem:[#allocation8 + $0xa88] sm:$0xf]  ;;  %7832 = vmatpush.bf16.msrb.mxu3 %v13410_v44  ;;  %v15666_v52 = vpop.f32.mrf.mxu2  ;;  %v13311_v44 = vld [vmem:[#allocation8 + $0xe20] sm:$0xf0]  ;;  %v11946_v63 = vor.u32 %v14444_v43, %v11943_v3  ;;  %v11591_v43 = vld [vmem:[#allocation8 + $0xa8] sm:$0xf0] }
 0x435   :  { %v14680_v18 = vld [vmem:[#allocation8 + $0xaa4] sm:$0xf0]  ;;  %7923 = vmatpush.bf16.msrb.mxu0 %v12614_v9  ;;  %v13346_v9 = vor.u32 %v14795_v2, %v13343_v16 }
 0x436   :  { %v14760_v32 = vld [vmem:[#allocation8 + $0xd24] sm:$0xf0]  ;;  %v12870_v49 = vor.u32 %v14680_v18, %v12869_v57 }
 0x437   :  { %v13190_v0 = vor.u32 %v14760_v32, %v13189_v60  ;;  %v12581_v48 = vld [vmem:[#allocation8 + $0x848] sm:$0xf]  ;;  %v12010_v32 = vor.u32 %v14460_v46, %v12007_v40  ;;  %v15668_v20 = vpop.f32.mrf.mxu3  ;;  %v11911_v46 = vld [vmem:[#allocation8 + $0x328] sm:$0xf0] }
 0x438   :  { %v14608_v59 = vld [vmem:[#allocation8 + $0x864] sm:$0xf0]  ;;  %7941 = vmatpush.bf16.msrb.mxu1 %v12870_v49  ;;  %7833 = vmatpush.bf16.msrb.mxu3 %v13378_v23  ;;  %v12263_v23 = vld [vmem:[#allocation8 + $0x5e8] sm:$0xf0] }
 0x439   :  { %v13157_v55 = vld [vmem:[#allocation8 + $0xcc8] sm:$0xf]  ;;  %7957 = vmatpush.bf16.msrb.mxu2 %v13190_v0  ;;  %v12582_v4 = vor.u32 %v14608_v59, %v12581_v48  ;;  %v14388_v0 = vld [vmem:[#allocation8 + $0x18c] sm:$0xf]  ;;  %v12266_v40 = vor.u32 %v14524_v5, %v12263_v23 }
 0x43a   :  { %v12837_v53 = vld [vmem:[#allocation8 + $0xa48] sm:$0xf]  ;;  %v14452_v48 = vld [vmem:[#allocation8 + $0x38c] sm:$0xf]  ;;  %v11722_v29 = vor.u32 %v14388_v0, %v11719_v35  ;;  %v11914_v0 = vor.u32 %v14436_v8, %v11911_v46 }
 0x43b   :  { %v14672_v27 = vld [vmem:[#allocation8 + $0xa64] sm:$0xf0]  ;;  %7924 = vmatpush.bf16.msrb.mxu0 %v12582_v4  ;;  %v11975_v59 = vld [vmem:[#allocation8 + $0x3a8] sm:$0xf0] }
 0x43c   :  { %v14752_v45 = vld [vmem:[#allocation8 + $0xce4] sm:$0xf0]  ;;  %v12838_v33 = vor.u32 %v14672_v27, %v12837_v53  ;;  %v7590_v53 = vpop.f32.mrf.mxu1  ;;  %v14787_v27 = vld [vmem:[#allocation8 + $0xe04] sm:$0xf]  ;;  %v11978_v10 = vor.u32 %v14452_v48, %v11975_v59  ;;  %7834 = vmatpush.bf16.msrb.mxu3 %v13346_v9  ;;  %v14364_v35 = vld [vmem:[#allocation8 + $0xcc] sm:$0xf] }
 0x43d   :  { %v13158_v34 = vor.u32 %v14752_v45, %v13157_v55  ;;  %v12549_v13 = vld [vmem:[#allocation8 + $0x808] sm:$0xf]  ;;  %v7572_v55 = vpop.f32.mrf.mxu0  ;;  %v13314_v4 = vor.u32 %v14787_v27, %v13311_v44  ;;  %7764 = vmatmul.bf16.vlgmr.msra.gmra.mxu3 %v15415_v6  ;;  %v12231_v59 = vld [vmem:[#allocation8 + $0x5a8] sm:$0xf0] }
 0x43e   :  { %v14600_v28 = vld [vmem:[#allocation8 + $0x824] sm:$0xf0]  ;;  %7942 = vmatpush.bf16.msrb.mxu1 %v12838_v33  ;;  %v14500_v46 = vld [vmem:[#allocation8 + $0x50c] sm:$0xf]  ;;  %7895 = vmatmul.bf16.gmra.mxu2 %v15532_v26 }
 0x43f   :  { %v12805_v38 = vld [vmem:[#allocation8 + $0xa08] sm:$0xf]  ;;  %7958 = vmatpush.bf16.msrb.mxu2 %v13158_v34  ;;  %v12550_v60 = vor.u32 %v14600_v28, %v12549_v13  ;;  %v7573_v34 = vadd.f32 %v7572_v55, %v15652_v51  ;;  %v14380_v13 = vld [vmem:[#allocation8 + $0x14c] sm:$0xf]  ;;  %v7626_v2 = vpop.f32.mrf.mxu3 }
 0x440   :  { %v13125_v15 = vld [vmem:[#allocation8 + $0xc88] sm:$0xf]  ;;  %7835 = vmatpush.bf16.msrb.mxu3 %v13314_v4  ;;  %v14428_v55 = vld [vmem:[#allocation8 + $0x2cc] sm:$0xf] }
 0x441   :  { %v14664_v22 = vld [vmem:[#allocation8 + $0xa24] sm:$0xf0]  ;;  %7925 = vmatpush.bf16.msrb.mxu0 %v12550_v60  ;;  %v7591_v12 = vadd.f32 %v7590_v53, %v7573_v34  ;;  %v11879_v53 = vld [vmem:[#allocation8 + $0x2e8] sm:$0xf0] }
 0x442   :  { %v14744_v39 = vld [vmem:[#allocation8 + $0xca4] sm:$0xf0]  ;;  %v12806_v61 = vor.u32 %v14664_v22, %v12805_v38  ;;  %v11687_v38 = vld [vmem:[#allocation8 + $0x168] sm:$0xf0] }
 0x443   :  { %v13126_v30 = vor.u32 %v14744_v39, %v13125_v15  ;;  %v13093_v57 = vld [vmem:[#allocation8 + $0xc48] sm:$0xf]  ;;  %v11690_v15 = vor.u32 %v14380_v13, %v11687_v38  ;;  %v14372_v22 = vld [vmem:[#allocation8 + $0x10c] sm:$0xf] }
 0x444   :  { %v14736_v18 = vld [vmem:[#allocation8 + $0xc64] sm:$0xf0]  ;;  %7943 = vmatpush.bf16.msrb.mxu1 %v12806_v61  ;;  %v11655_v39 = vld [vmem:[#allocation8 + $0x128] sm:$0xf0]  ;;  %v7592_v61 = vpop.f32.mrf.mxu1  ;;  %7926 = vmatmul.bf16.vlgmr.msrb.gmra.mxu0 %v15452_v41 }
 0x445   :  { %7959 = vmatpush.bf16.msrb.mxu2 %v13126_v30  ;;  %v13094_v49 = vor.u32 %v14736_v18, %v13093_v57  ;;  %v13061_v45 = vld [vmem:[#allocation8 + $0xc08] sm:$0xf]  ;;  %7990 = vmatpush.bf16.msra.mxu0 %v11754_v42  ;;  %v7608_v30 = vpop.f32.mrf.mxu2  ;;  %v7574_v60 = vpop.f32.mrf.mxu0  ;;  %v14516_v42 = vld [vmem:[#allocation8 + $0x58c] sm:$0xf]  ;;  %v7606_v61 = vadd.f32 %v15666_v52, %v15664_v36 }
 0x446   :  { %v14728_v28 = vld [vmem:[#allocation8 + $0xc24] sm:$0xf0]  ;;  %v7609_v16 = vadd.f32 %v7608_v30, %v7591_v12  ;;  %v12234_v27 = vor.u32 %v14516_v42, %v12231_v59  ;;  %v14356_v38 = vld [vmem:[#allocation8 + $0x8c] sm:$0xf] }
 0x447   :  { %v13062_v33 = vor.u32 %v14728_v28, %v13061_v45  ;;  %v12517_v54 = vld [vmem:[#allocation8 + $0x7c8] sm:$0xf]  ;;  %v11882_v28 = vor.u32 %v14428_v55, %v11879_v53  ;;  %v14420_v12 = vld [vmem:[#allocation8 + $0x28c] sm:$0xf]  ;;  %7944 = vmatmul.bf16.vlgmr.msrb.gmra.mxu1 %v15490_v31 }
 0x448   :  { %8008 = vmatpush.bf16.msra.mxu1 %v12010_v32  ;;  %v14592_v51 = vld [vmem:[#allocation8 + $0x7e4] sm:$0xf0]  ;;  %v11658_v32 = vor.u32 %v14372_v22, %v11655_v39  ;;  %v15675_v9 = vadd.f32 %v7626_v2, %v7609_v16  ;;  %v11847_v4 = vld [vmem:[#allocation8 + $0x2a8] sm:$0xf0] }
 0x449   :  { %7960 = vmatpush.bf16.msrb.mxu2 %v13094_v49  ;;  %7991 = vmatpush.bf16.msra.mxu0 %v11722_v29  ;;  %v12518_v19 = vor.u32 %v14592_v51, %v12517_v54  ;;  %v12485_v57 = vld [vmem:[#allocation8 + $0x788] sm:$0xf]  ;;  %v11623_v49 = vld [vmem:[#allocation8 + $0xe8] sm:$0xf0]  ;;  %v7628_v54 = vpop.f32.mrf.mxu3  ;;  %v11850_v23 = vor.u32 %v14420_v12, %v11847_v4 }
 0x44a   :  { %v14584_v18 = vld [vmem:[#allocation8 + $0x7a4] sm:$0xf0]  ;;  %v14508_v29 = vld [vmem:[#allocation8 + $0x54c] sm:$0xf]  ;;  %v11626_v13 = vor.u32 %v14364_v35, %v11623_v49 }
 0x44b   :  { %7900 = vmatpush.bf16.msra.mxu3 %v12518_v19  ;;  %v12486_v48 = vor.u32 %v14584_v18, %v12485_v57  ;;  %v12453_v44 = vld [vmem:[#allocation8 + $0x748] sm:$0xf]  ;;  %v14348_v39 = vld [vmem:[#allocation8 + $0x4c] sm:$0xf] }
 0x44c   :  { %8009 = vmatpush.bf16.msra.mxu1 %v11978_v10  ;;  %v14576_v45 = vld [vmem:[#allocation8 + $0x764] sm:$0xf0]  ;;  %v12199_v10 = vld [vmem:[#allocation8 + $0x568] sm:$0xf0]  ;;  %v7657_v5 = vpop.f32.mrf.mxu1 }
 0x44d   :  { %7961 = vmatpush.bf16.msrb.mxu2 %v13062_v33  ;;  %7992 = vmatpush.bf16.msra.mxu0 %v11690_v15  ;;  %v12454_v34 = vor.u32 %v14576_v45, %v12453_v44  ;;  %v12202_v3 = vor.u32 %v14508_v29, %v12199_v10  ;;  %v7610_v33 = vpop.f32.mrf.mxu2  ;;  %v7639_v51 = vpop.f32.mrf.mxu0  ;;  %v11594_v15 = vor.u32 %v14356_v38, %v11591_v43  ;;  %v14568_v22 = vld [vmem:[#allocation8 + $0x724] sm:$0xf0]  ;;  %v11559_v30 = vld [vmem:[#allocation8 + $0x68] sm:$0xf0] }
 0x44e   :  { %v7640_v19 = vadd.f32 %v7639_v51, %v15662_v24  ;;  %v14412_v2 = vld [vmem:[#allocation8 + $0x24c] sm:$0xf]  ;;  %v12389_v24 = vld [vmem:[#allocation8 + $0x6c8] sm:$0xf]  ;;  %7769 = vmatmul.bf16.gmra.mxu3 %v15536_v25 }
 0x44f   :  { %7901 = vmatpush.bf16.msra.mxu3 %v12486_v48  ;;  %v11815_v16 = vld [vmem:[#allocation8 + $0x268] sm:$0xf0]  ;;  %v14560_v18 = vld [vmem:[#allocation8 + $0x6e4] sm:$0xf0] }
 0x450   :  { %8010 = vmatpush.bf16.msra.mxu1 %v11946_v63  ;;  %v12421_v63 = vld [vmem:[#allocation8 + $0x708] sm:$0xf]  ;;  %v15680_v57 = vadd.f32 %v7657_v5, %v7640_v19  ;;  %v14492_v42 = vld [vmem:[#allocation8 + $0x4cc] sm:$0xf]  ;;  %v12390_v59 = vor.u32 %v14560_v18, %v12389_v24  ;;  %7962 = vmatmul.bf16.vlgmr.msrb.gmra.mxu2 %v15581_v62 }
 0x451   :  { %8026 = vmatpush.bf16.msra.mxu2 %v12266_v40  ;;  %7993 = vmatpush.bf16.msra.mxu0 %v11658_v32  ;;  %v12422_v8 = vor.u32 %v14568_v22, %v12421_v63  ;;  %v12167_v40 = vld [vmem:[#allocation8 + $0x528] sm:$0xf0]  ;;  %v11562_v32 = vor.u32 %v14348_v39, %v11559_v30  ;;  %v14552_v38 = vld [vmem:[#allocation8 + $0x6a4] sm:$0xf0] }
 0x452   :  { %v12170_v60 = vor.u32 %v14500_v46, %v12167_v40  ;;  %v14340_v35 = vld [vmem:[#allocation8 + $0xc] sm:$0xf]  ;;  %v14544_v39 = vld [vmem:[#allocation8 + $0x664] sm:$0xf0] }
 0x453   :  { %7902 = vmatpush.bf16.msra.mxu3 %v12454_v34  ;;  %v11527_v48 = vld [vmem:[#allocation8 + $0x28] sm:$0xf0] }
 0x454   :  { %8011 = vmatpush.bf16.msra.mxu1 %v11914_v0  ;;  %v11818_v0 = vor.u32 %v14412_v2, %v11815_v16  ;;  %v12135_v49 = vld [vmem:[#allocation8 + $0x4e8] sm:$0xf0]  ;;  %v7659_v10 = vpop.f32.mrf.mxu1  ;;  %7931 = vmatmul.bf16.gmra.mxu0 %v15574_v7 }
 0x455   :  { %8027 = vmatpush.bf16.msra.mxu2 %v12234_v27  ;;  %7994 = vmatpush.bf16.msra.mxu0 %v11626_v13  ;;  %v14404_v36 = vld [vmem:[#allocation8 + $0x20c] sm:$0xf]  ;;  %v12138_v53 = vor.u32 %v14492_v42, %v12135_v49  ;;  %v7624_v27 = vadd.f32 %v15668_v20, %v7606_v61  ;;  %v7641_v29 = vpop.f32.mrf.mxu0  ;;  %v11530_v13 = vor.u32 %v14340_v35, %v11527_v48  ;;  %v14536_v35 = vld [vmem:[#allocation8 + $0x624] sm:$0xf0] }
 0x456   :  { %v11783_v52 = vld [vmem:[#allocation8 + $0x228] sm:$0xf0] }
 0x457   :  { %7903 = vmatpush.bf16.msra.mxu3 %v12422_v8  ;;  %v14652_v55 = vld [vmem:[#allocation8 + $0x9cc] sm:$0xf]  ;;  %v11786_v12 = vor.u32 %v14404_v36, %v11783_v52  ;;  %7949 = vmatmul.bf16.gmra.mxu1 %v15576_v58 }
 0x458   :  { %8012 = vmatpush.bf16.msra.mxu1 %v11882_v28  ;;  %v12775_v44 = vld [vmem:[#allocation8 + $0x9e8] sm:$0xf0]  ;;  %v12357_v28 = vld [vmem:[#allocation8 + $0x688] sm:$0xf] }
 0x459   :  { %8028 = vmatpush.bf16.msra.mxu2 %v12202_v3  ;;  %7995 = vmatpush.bf16.msra.mxu0 %v11594_v15  ;;  %v14716_v45 = vld [vmem:[#allocation8 + $0xbcc] sm:$0xf]  ;;  %v7642_v3 = vadd.f32 %v7641_v29, %v7624_v27  ;;  %v12358_v4 = vor.u32 %v14552_v38, %v12357_v28  ;;  %v12778_v54 = vor.u32 %v14652_v55, %v12775_v44 }
 0x45a   :  { %v13031_v34 = vld [vmem:[#allocation8 + $0xbe8] sm:$0xf0] }
 0x45b   :  { %7904 = vmatpush.bf16.msra.mxu3 %v12390_v59  ;;  %v14484_v43 = vld [vmem:[#allocation8 + $0x48c] sm:$0xf]  ;;  %v13034_v51 = vor.u32 %v14716_v45, %v13031_v34  ;;  %v15687_v22 = vadd.f32 %v7659_v10, %v7642_v3  ;;  %v14848_v10 = vld [vmem:[#allocation8 + $0xfe4] sm:$0xf0] }
 0x45c   :  { %8013 = vmatpush.bf16.msra.mxu1 %v11850_v23  ;;  %v12103_v33 = vld [vmem:[#allocation8 + $0x4a8] sm:$0xf0]  ;;  %v12325_v23 = vld [vmem:[#allocation8 + $0x648] sm:$0xf] }
 0x45d   :  { %8029 = vmatpush.bf16.msra.mxu2 %v12170_v60  ;;  %7996 = vmatpush.bf16.msra.mxu0 %v11562_v32  ;;  %v14644_v20 = vld [vmem:[#allocation8 + $0x98c] sm:$0xf]  ;;  %v12106_v63 = vor.u32 %v14484_v43, %v12103_v33  ;;  %v12326_v8 = vor.u32 %v14544_v39, %v12325_v23  ;;  %v7644_v42 = vpop.f32.mrf.mxu0  ;;  %v7662_v32 = vpop.f32.mrf.mxu1 }
 0x45e   :  { %v12743_v5 = vld [vmem:[#allocation8 + $0x9a8] sm:$0xf0]  ;;  %v7645_v59 = vadd.f32 %v7644_v42, %v15675_v9  ;;  %v13541_v9 = vld [vmem:[#allocation8 + $0xfc8] sm:$0xf]  ;;  %7836 = vmatmul.bf16.vlgmr.msrb.gmra.mxu3 %v15645_v56  ;;  %v7675_v23 = vpop.f32.mrf.mxu2 }
 0x45f   :  { %v14708_v15 = vld [vmem:[#allocation8 + $0xb8c] sm:$0xf]  ;;  %7905 = vmatpush.bf16.msra.mxu3 %v12358_v4  ;;  %v12746_v2 = vor.u32 %v14644_v20, %v12743_v5  ;;  %v13542_v28 = vor.u32 %v14848_v10, %v13541_v9 }
 0x460   :  { %8014 = vmatpush.bf16.msra.mxu1 %v11818_v0  ;;  %v12999_v19 = vld [vmem:[#allocation8 + $0xba8] sm:$0xf0]  ;;  %v12293_v0 = vld [vmem:[#allocation8 + $0x608] sm:$0xf]  ;;  %7967 = vmatmul.bf16.gmra.mxu2 %v15590_v11 }
 0x461   :  { %8030 = vmatpush.bf16.msra.mxu2 %v12138_v53  ;;  %v14476_v46 = vld [vmem:[#allocation8 + $0x44c] sm:$0xf]  ;;  %7997 = vmatpush.bf16.msra.mxu0 %v11530_v13  ;;  %v13002_v16 = vor.u32 %v14708_v15, %v12999_v19  ;;  %v12294_v49 = vor.u32 %v14536_v35, %v12293_v0  ;;  %v15690_v53 = vadd.f32 %v7662_v32, %v7645_v59  ;;  %v13509_v15 = vld [vmem:[#allocation8 + $0xf88] sm:$0xf] }
 0x462   :  { %v12071_v40 = vld [vmem:[#allocation8 + $0x468] sm:$0xf0] }
 0x463   :  { %v12074_v30 = vor.u32 %v14476_v46, %v12071_v40  ;;  %v14636_v60 = vld [vmem:[#allocation8 + $0x94c] sm:$0xf]  ;;  %7906 = vmatpush.bf16.msra.mxu3 %v12326_v8  ;;  %v15697_v46 = vadd.f32 %v7675_v23, %v15680_v57 }
 0x464   :  { %8015 = vmatpush.bf16.msra.mxu1 %v11786_v12  ;;  %v12711_v61 = vld [vmem:[#allocation8 + $0x968] sm:$0xf0]  ;;  %7998 = vmatmul.bf16.vlgmr.msra.gmra.mxu0 %v15308_v50 }
 0x465   :  { %8031 = vmatpush.bf16.msra.mxu2 %v12106_v63  ;;  %8062 = vmatpush.bf16.msrb.mxu0 %v12778_v54  ;;  %v14700_v24 = vld [vmem:[#allocation8 + $0xb4c] sm:$0xf]  ;;  %v12714_v27 = vor.u32 %v14636_v60, %v12711_v61  ;;  %v7646_v20 = vpop.f32.mrf.mxu0  ;;  %v7664_v5 = vpop.f32.mrf.mxu1  ;;  %v14840_v63 = vld [vmem:[#allocation8 + $0xfa4] sm:$0xf0] }
 0x466   :  { %v12967_v18 = vld [vmem:[#allocation8 + $0xb68] sm:$0xf0]  ;;  %v13510_v39 = vor.u32 %v14840_v63, %v13509_v15  ;;  %v13477_v60 = vld [vmem:[#allocation8 + $0xf48] sm:$0xf] }
 0x467   :  { %v14468_v48 = vld [vmem:[#allocation8 + $0x40c] sm:$0xf]  ;;  %v12970_v44 = vor.u32 %v14700_v24, %v12967_v18  ;;  %7907 = vmatpush.bf16.msra.mxu3 %v12294_v49  ;;  %v14832_v61 = vld [vmem:[#allocation8 + $0xf64] sm:$0xf0]  ;;  %8016 = vmatmul.bf16.vlgmr.msra.gmra.mxu1 %v15343_v21 }
 0x468   :  { %8080 = vmatpush.bf16.msrb.mxu1 %v13034_v51  ;;  %v12039_v36 = vld [vmem:[#allocation8 + $0x428] sm:$0xf0]  ;;  %v13478_v18 = vor.u32 %v14832_v61, %v13477_v60  ;;  %v13413_v20 = vld [vmem:[#allocation8 + $0xec8] sm:$0xf] }
 0x469   :  { %8032 = vmatpush.bf16.msra.mxu2 %v12074_v30  ;;  %8063 = vmatpush.bf16.msrb.mxu0 %v12746_v2  ;;  %v14628_v52 = vld [vmem:[#allocation8 + $0x90c] sm:$0xf]  ;;  %v12042_v55 = vor.u32 %v14468_v48, %v12039_v36  ;;  %v15700_v30 = vperm.slane %v15649_v17, 1  ;;  %v14816_v5 = vld [vmem:[#allocation8 + $0xee4] sm:$0xf0] }
 0x46a   :  { %v12679_v45 = vld [vmem:[#allocation8 + $0x928] sm:$0xf0] }
 0x46b   :  { %v14692_v34 = vld [vmem:[#allocation8 + $0xb0c] sm:$0xf]  ;;  %v12682_v12 = vor.u32 %v14628_v52, %v12679_v45  ;;  %7972 = vmatpush.bf16.msrb.mxu3 %v13542_v28 }
 0x46c   :  { %8081 = vmatpush.bf16.msrb.mxu1 %v13002_v16  ;;  %v12935_v29 = vld [vmem:[#allocation8 + $0xb28] sm:$0xf0] }
 0x46d   :  { %8033 = vmatpush.bf16.msra.mxu2 %v12042_v55  ;;  %v14780_v13 = vld [vmem:[#allocation8 + $0xdcc] sm:$0xf]  ;;  %8064 = vmatpush.bf16.msrb.mxu0 %v12714_v27  ;;  %v12938_v4 = vor.u32 %v14692_v34, %v12935_v29  ;;  %v7711_v49 = vpop.f32.mrf.mxu0  ;;  %v7729_v36 = vpop.f32.mrf.mxu1  ;;  %v13445_v27 = vld [vmem:[#allocation8 + $0xf08] sm:$0xf] }
 0x46e   :  { %v13287_v38 = vld [vmem:[#allocation8 + $0xde8] sm:$0xf0]  ;;  %v7677_v34 = vpop.f32.mrf.mxu2  ;;  %v7712_v29 = vadd.f32 %v7711_v49, %v15700_v30  ;;  %7841 = vmatmul.bf16.gmra.mxu3 %v15657_v1 }
 0x46f   :  { %v14620_v43 = vld [vmem:[#allocation8 + $0x8cc] sm:$0xf]  ;;  %v13290_v3 = vor.u32 %v14780_v13, %v13287_v38  ;;  %7973 = vmatpush.bf16.msrb.mxu3 %v13510_v39  ;;  %v15704_v38 = vadd.f32 %v7677_v34, %v15687_v22  ;;  %v11757_v22 = vld [vmem:[#allocation8 + $0x1d0] sm:$0xf]  ;;  %v13349_v34 = vld [vmem:[#allocation8 + $0xe48] sm:$0xf] }
 0x470   :  { %8082 = vmatpush.bf16.msrb.mxu1 %v12970_v44  ;;  %v12647_v33 = vld [vmem:[#allocation8 + $0x8e8] sm:$0xf0]  ;;  %v14824_v44 = vld [vmem:[#allocation8 + $0xf24] sm:$0xf0]  ;;  %v14401_v39 = vld [vmem:[#allocation8 + $0x1ec] sm:$0xf0]  ;;  %8034 = vmatmul.bf16.vlgmr.msra.gmra.mxu2 %v15380_v14 }
 0x471   :  { %v14684_v54 = vld [vmem:[#allocation8 + $0xacc] sm:$0xf]  ;;  %8098 = vmatpush.bf16.msrb.mxu2 %v13290_v3  ;;  %8065 = vmatpush.bf16.msrb.mxu0 %v12682_v12  ;;  %v12650_v2 = vor.u32 %v14620_v43, %v12647_v33  ;;  %v13446_v13 = vor.u32 %v14824_v44, %v13445_v27  ;;  %v15706_v3 = vadd.f32 %v7729_v36, %v7712_v29  ;;  %v14393_v36 = vld [vmem:[#allocation8 + $0x1ac] sm:$0xf0]  ;;  %v14800_v29 = vld [vmem:[#allocation8 + $0xe64] sm:$0xf0] }
 0x472   :  { %v12903_v51 = vld [vmem:[#allocation8 + $0xae8] sm:$0xf0] }
 0x473   :  { %v14772_v19 = vld [vmem:[#allocation8 + $0xd8c] sm:$0xf]  ;;  %v12906_v16 = vor.u32 %v14684_v54, %v12903_v51  ;;  %7974 = vmatpush.bf16.msrb.mxu3 %v13478_v18  ;;  %v13381_v18 = vld [vmem:[#allocation8 + $0xe88] sm:$0xf] }
 0x474   :  { %v13255_v8 = vld [vmem:[#allocation8 + $0xda8] sm:$0xf0]  ;;  %8083 = vmatpush.bf16.msrb.mxu1 %v12938_v4  ;;  %8003 = vmatmul.bf16.gmra.mxu0 %v15520_v37 }
 0x475   :  { %v13258_v40 = vor.u32 %v14772_v19, %v13255_v8  ;;  %v14612_v24 = vld [vmem:[#allocation8 + $0x88c] sm:$0xf]  ;;  %8066 = vmatpush.bf16.msrb.mxu0 %v12650_v2  ;;  %v13414_v19 = vor.u32 %v14816_v5, %v13413_v20  ;;  %v12013_v8 = vld [vmem:[#allocation8 + $0x3d0] sm:$0xf]  ;;  %v7731_v60 = vpop.f32.mrf.mxu1  ;;  %v13317_v5 = vld [vmem:[#allocation8 + $0xe08] sm:$0xf] }
 0x476   :  { %v14764_v42 = vld [vmem:[#allocation8 + $0xd4c] sm:$0xf] }
 0x477   :  { %8099 = vmatpush.bf16.msrb.mxu2 %v13258_v40  ;;  %v13223_v32 = vld [vmem:[#allocation8 + $0xd68] sm:$0xf0]  ;;  %7975 = vmatpush.bf16.msrb.mxu3 %v13446_v13  ;;  %v14465_v40 = vld [vmem:[#allocation8 + $0x3ec] sm:$0xf0] }
 0x478   :  { %v12615_v0 = vld [vmem:[#allocation8 + $0x8a8] sm:$0xf0]  ;;  %v13226_v48 = vor.u32 %v14764_v42, %v13223_v32  ;;  %8084 = vmatpush.bf16.msrb.mxu1 %v12906_v16  ;;  %v7713_v16 = vpop.f32.mrf.mxu0  ;;  %v14808_v42 = vld [vmem:[#allocation8 + $0xea4] sm:$0xf0] }
 0x479   :  { %v14676_v35 = vld [vmem:[#allocation8 + $0xa8c] sm:$0xf]  ;;  %v12618_v52 = vor.u32 %v14612_v24, %v12615_v0  ;;  %v7680_v0 = vpop.f32.mrf.mxu2  ;;  %v13382_v27 = vor.u32 %v14808_v42, %v13381_v18  ;;  %8021 = vmatmul.bf16.gmra.mxu1 %v15528_v47 }
 0x47a   :  { %v12871_v57 = vld [vmem:[#allocation8 + $0xaa8] sm:$0xf0]  ;;  %v15714_v49 = vadd.f32 %v7680_v0, %v15690_v53  ;;  %v14385_v53 = vld [vmem:[#allocation8 + $0x16c] sm:$0xf0] }
 0x47b   :  { %v14604_v17 = vld [vmem:[#allocation8 + $0x84c] sm:$0xf]  ;;  %v12874_v55 = vor.u32 %v14676_v35, %v12871_v57  ;;  %8100 = vmatpush.bf16.msrb.mxu2 %v13226_v48  ;;  %8067 = vmatpush.bf16.msrb.mxu0 %v12618_v52  ;;  %v7714_v35 = vadd.f32 %v7713_v16, %v15700_v30  ;;  %v11758_v57 = vor.u32 %v14401_v39, %v11757_v22  ;;  %v11981_v52 = vld [vmem:[#allocation8 + $0x390] sm:$0xf] }
 0x47c   :  { %v12583_v59 = vld [vmem:[#allocation8 + $0x868] sm:$0xf0]  ;;  %v12014_v48 = vor.u32 %v14465_v40, %v12013_v8  ;;  %7976 = vmatpush.bf16.msrb.mxu3 %v13414_v19  ;;  %v11661_v8 = vld [vmem:[#allocation8 + $0x110] sm:$0xf] }
 0x47d   :  { %v14756_v45 = vld [vmem:[#allocation8 + $0xd0c] sm:$0xf]  ;;  %8085 = vmatpush.bf16.msrb.mxu1 %v12874_v55  ;;  %v12586_v54 = vor.u32 %v14604_v17, %v12583_v59  ;;  %v11725_v17 = vld [vmem:[#allocation8 + $0x190] sm:$0xf]  ;;  %v7734_v20 = vpop.f32.mrf.mxu1 }
 0x47e   :  { %v14668_v9 = vld [vmem:[#allocation8 + $0xa4c] sm:$0xf]  ;;  %v14457_v55 = vld [vmem:[#allocation8 + $0x3ac] sm:$0xf0]  ;;  %v11726_v13 = vor.u32 %v14393_v36, %v11725_v17  ;;  %7908 = vmatmul.bf16.vlgmr.msra.gmra.mxu3 %v15415_v6 }
 0x47f   :  { %v12839_v10 = vld [vmem:[#allocation8 + $0xa68] sm:$0xf0]  ;;  %8068 = vmatpush.bf16.msrb.mxu0 %v12586_v54  ;;  %v11917_v16 = vld [vmem:[#allocation8 + $0x310] sm:$0xf] }
 0x480   :  { %v13191_v28 = vld [vmem:[#allocation8 + $0xd28] sm:$0xf0]  ;;  %v12842_v51 = vor.u32 %v14668_v9, %v12839_v10  ;;  %7977 = vmatpush.bf16.msrb.mxu3 %v13382_v27  ;;  %v14529_v17 = vld [vmem:[#allocation8 + $0x5ec] sm:$0xf0]  ;;  %8039 = vmatmul.bf16.gmra.mxu2 %v15532_v26 }
 0x481   :  { %v13194_v43 = vor.u32 %v14756_v45, %v13191_v28  ;;  %v14596_v12 = vld [vmem:[#allocation8 + $0x80c] sm:$0xf]  ;;  %v15716_v45 = vadd.f32 %v7731_v60, %v7714_v35  ;;  %v11982_v28 = vor.u32 %v14457_v55, %v11981_v52  ;;  %v7682_v22 = vpop.f32.mrf.mxu2  ;;  %v14441_v60 = vld [vmem:[#allocation8 + $0x32c] sm:$0xf0] }
 0x482   :  { %v12551_v4 = vld [vmem:[#allocation8 + $0x828] sm:$0xf0]  ;;  %8086 = vmatpush.bf16.msrb.mxu1 %v12842_v51  ;;  %v7716_v51 = vpop.f32.mrf.mxu0  ;;  %v11918_v35 = vor.u32 %v14441_v60, %v11917_v16  ;;  %v11885_v36 = vld [vmem:[#allocation8 + $0x2d0] sm:$0xf] }
 0x483   :  { %v14660_v33 = vld [vmem:[#allocation8 + $0xa0c] sm:$0xf]  ;;  %8101 = vmatpush.bf16.msrb.mxu2 %v13194_v43  ;;  %v12554_v61 = vor.u32 %v14596_v12, %v12551_v4  ;;  %v11693_v43 = vld [vmem:[#allocation8 + $0x150] sm:$0xf]  ;;  %v7717_v19 = vadd.f32 %v7716_v51, %v15700_v30 }
 0x484   :  { %v14748_v15 = vld [vmem:[#allocation8 + $0xccc] sm:$0xf]  ;;  %v11949_v12 = vld [vmem:[#allocation8 + $0x350] sm:$0xf] }
 0x485   :  { %v12807_v63 = vld [vmem:[#allocation8 + $0xa28] sm:$0xf0]  ;;  %8069 = vmatpush.bf16.msrb.mxu0 %v12554_v61  ;;  %v14449_v4 = vld [vmem:[#allocation8 + $0x36c] sm:$0xf0]  ;;  %v15719_v61 = vadd.f32 %v7734_v20, %v7717_v19 }
 0x486   :  { %v13159_v23 = vld [vmem:[#allocation8 + $0xce8] sm:$0xf0]  ;;  %v12810_v24 = vor.u32 %v14660_v33, %v12807_v63  ;;  %v13350_v33 = vor.u32 %v14800_v29, %v13349_v34  ;;  %v11950_v39 = vor.u32 %v14449_v4, %v11949_v12  ;;  %v14433_v52 = vld [vmem:[#allocation8 + $0x2ec] sm:$0xf0] }
 0x487   :  { %v13162_v2 = vor.u32 %v14748_v15, %v13159_v23  ;;  %v14740_v32 = vld [vmem:[#allocation8 + $0xc8c] sm:$0xf]  ;;  %v14792_v15 = vld [vmem:[#allocation8 + $0xe24] sm:$0xf0]  ;;  %v11694_v23 = vor.u32 %v14385_v53, %v11693_v43  ;;  %v11597_v43 = vld [vmem:[#allocation8 + $0x90] sm:$0xf] }
 0x488   :  { %v13127_v59 = vld [vmem:[#allocation8 + $0xca8] sm:$0xf0]  ;;  %8087 = vmatpush.bf16.msrb.mxu1 %v12810_v24  ;;  %7978 = vmatpush.bf16.msrb.mxu3 %v13350_v33  ;;  %v13318_v24 = vor.u32 %v14792_v15, %v13317_v5  ;;  %v14521_v12 = vld [vmem:[#allocation8 + $0x5ac] sm:$0xf0] }
 0x489   :  { %8102 = vmatpush.bf16.msrb.mxu2 %v13162_v2  ;;  %v13130_v44 = vor.u32 %v14740_v32, %v13127_v59  ;;  %v14732_v9 = vld [vmem:[#allocation8 + $0xc4c] sm:$0xf]  ;;  %8134 = vmatpush.bf16.msra.mxu0 %v11758_v57  ;;  %v14377_v2 = vld [vmem:[#allocation8 + $0x12c] sm:$0xf0] }
 0x48a   :  { %v13095_v10 = vld [vmem:[#allocation8 + $0xc68] sm:$0xf0]  ;;  %v12269_v32 = vld [vmem:[#allocation8 + $0x5d0] sm:$0xf]  ;;  %v11662_v0 = vor.u32 %v14377_v2, %v11661_v8  ;;  %v7718_v27 = vpop.f32.mrf.mxu0  ;;  %8070 = vmatmul.bf16.vlgmr.msrb.gmra.mxu0 %v15452_v41 }
 0x48b   :  { %v13098_v54 = vor.u32 %v14732_v9, %v13095_v10  ;;  %v14724_v63 = vld [vmem:[#allocation8 + $0xc0c] sm:$0xf]  ;;  %v11629_v57 = vld [vmem:[#allocation8 + $0xd0] sm:$0xf]  ;;  %v12270_v55 = vor.u32 %v14529_v17, %v12269_v32  ;;  %v7747_v10 = vpop.f32.mrf.mxu2  ;;  %8088 = vmatmul.bf16.vlgmr.msrb.gmra.mxu1 %v15490_v31 }
 0x48c   :  { %8152 = vmatpush.bf16.msra.mxu1 %v12014_v48  ;;  %v13063_v40 = vld [vmem:[#allocation8 + $0xc28] sm:$0xf0]  ;;  %v14369_v59 = vld [vmem:[#allocation8 + $0xec] sm:$0xf0]  ;;  %7979 = vmatpush.bf16.msrb.mxu3 %v13318_v24  ;;  %v15726_v4 = vadd.f32 %v7747_v10, %v15706_v3 }
 0x48d   :  { %8103 = vmatpush.bf16.msrb.mxu2 %v13130_v44  ;;  %8135 = vmatpush.bf16.msra.mxu0 %v11726_v13  ;;  %v13066_v18 = vor.u32 %v14724_v63, %v13063_v40  ;;  %v14588_v30 = vld [vmem:[#allocation8 + $0x7cc] sm:$0xf]  ;;  %v7736_v44 = vpop.f32.mrf.mxu1  ;;  %v12237_v9 = vld [vmem:[#allocation8 + $0x590] sm:$0xf]  ;;  %v11630_v13 = vor.u32 %v14369_v59, %v11629_v57 }
 0x48e   :  { %v12519_v42 = vld [vmem:[#allocation8 + $0x7e8] sm:$0xf0]  ;;  %v14361_v33 = vld [vmem:[#allocation8 + $0xac] sm:$0xf0]  ;;  %v12238_v20 = vor.u32 %v14521_v12, %v12237_v9  ;;  %7913 = vmatmul.bf16.gmra.mxu3 %v15536_v25 }
 0x48f   :  { %v12522_v48 = vor.u32 %v14588_v30, %v12519_v42  ;;  %v14580_v34 = vld [vmem:[#allocation8 + $0x78c] sm:$0xf]  ;;  %v14425_v51 = vld [vmem:[#allocation8 + $0x2ac] sm:$0xf0]  ;;  %v11598_v22 = vor.u32 %v14361_v33, %v11597_v43 }
 0x490   :  { %8153 = vmatpush.bf16.msra.mxu1 %v11982_v28  ;;  %v12487_v29 = vld [vmem:[#allocation8 + $0x7a8] sm:$0xf0]  ;;  %v11886_v28 = vor.u32 %v14433_v52, %v11885_v36  ;;  %v12205_v63 = vld [vmem:[#allocation8 + $0x550] sm:$0xf] }
 0x491   :  { %8104 = vmatpush.bf16.msrb.mxu2 %v13098_v54  ;;  %8136 = vmatpush.bf16.msra.mxu0 %v11694_v23  ;;  %v12490_v53 = vor.u32 %v14580_v34, %v12487_v29  ;;  %v11853_v54 = vld [vmem:[#allocation8 + $0x290] sm:$0xf]  ;;  %v14572_v5 = vld [vmem:[#allocation8 + $0x74c] sm:$0xf] }
 0x492   :  { %8044 = vmatpush.bf16.msra.mxu3 %v12522_v48  ;;  %v12455_v15 = vld [vmem:[#allocation8 + $0x768] sm:$0xf0]  ;;  %v11854_v19 = vor.u32 %v14425_v51, %v11853_v54  ;;  %v11565_v23 = vld [vmem:[#allocation8 + $0x50] sm:$0xf]  ;;  %v15728_v60 = vpop.f32.mrf.mxu0 }
 0x493   :  { %v14513_v8 = vld [vmem:[#allocation8 + $0x56c] sm:$0xf0]  ;;  %v14564_v30 = vld [vmem:[#allocation8 + $0x70c] sm:$0xf]  ;;  %v7749_v32 = vpop.f32.mrf.mxu2 }
 0x494   :  { %8154 = vmatpush.bf16.msra.mxu1 %v11950_v39  ;;  %v12458_v39 = vor.u32 %v14572_v5, %v12455_v15  ;;  %v14353_v40 = vld [vmem:[#allocation8 + $0x6c] sm:$0xf0]  ;;  %v12206_v16 = vor.u32 %v14513_v8, %v12205_v63  ;;  %v12423_v42 = vld [vmem:[#allocation8 + $0x728] sm:$0xf0]  ;;  %v15733_v36 = vadd.f32 %v7749_v32, %v15716_v45 }
 0x495   :  { %8105 = vmatpush.bf16.msrb.mxu2 %v13066_v18  ;;  %8137 = vmatpush.bf16.msra.mxu0 %v11662_v0  ;;  %v11821_v2 = vld [vmem:[#allocation8 + $0x250] sm:$0xf]  ;;  %v15730_v24 = vpop.f32.mrf.mxu1  ;;  %v11566_v0 = vor.u32 %v14353_v40, %v11565_v23  ;;  %v12426_v48 = vor.u32 %v14564_v30, %v12423_v42  ;;  %v14556_v10 = vld [vmem:[#allocation8 + $0x6cc] sm:$0xf] }
 0x496   :  { %8045 = vmatpush.bf16.msra.mxu3 %v12490_v53  ;;  %v14417_v3 = vld [vmem:[#allocation8 + $0x26c] sm:$0xf0]  ;;  %v14548_v23 = vld [vmem:[#allocation8 + $0x68c] sm:$0xf] }
 0x497   :  { %v11533_v18 = vld [vmem:[#allocation8 + $0x10] sm:$0xf] }
 0x498   :  { %8155 = vmatpush.bf16.msra.mxu1 %v11918_v35  ;;  %v11822_v35 = vor.u32 %v14417_v3, %v11821_v2  ;;  %v14345_v57 = vld [vmem:[#allocation8 + $0x2c] sm:$0xf0]  ;;  %8106 = vmatmul.bf16.vlgmr.msrb.gmra.mxu2 %v15581_v62 }
 0x499   :  { %8170 = vmatpush.bf16.msra.mxu2 %v12270_v55  ;;  %8138 = vmatpush.bf16.msra.mxu0 %v11630_v13  ;;  %v12173_v17 = vld [vmem:[#allocation8 + $0x510] sm:$0xf]  ;;  %v12391_v13 = vld [vmem:[#allocation8 + $0x6e8] sm:$0xf0]  ;;  %v11534_v45 = vor.u32 %v14345_v57, %v11533_v18 }
 0x49a   :  { %8046 = vmatpush.bf16.msra.mxu3 %v12458_v39  ;;  %v14505_v59 = vld [vmem:[#allocation8 + $0x52c] sm:$0xf0]  ;;  %v12394_v53 = vor.u32 %v14556_v10, %v12391_v13  ;;  %v12359_v39 = vld [vmem:[#allocation8 + $0x6a8] sm:$0xf0]  ;;  %8075 = vmatmul.bf16.gmra.mxu0 %v15574_v7 }
 0x49b   :  { %v11789_v52 = vld [vmem:[#allocation8 + $0x210] sm:$0xf]  ;;  %v12174_v27 = vor.u32 %v14505_v59, %v12173_v17  ;;  %v7752_v40 = vpop.f32.mrf.mxu2  ;;  %v12362_v3 = vor.u32 %v14548_v23, %v12359_v39  ;;  %v12327_v17 = vld [vmem:[#allocation8 + $0x668] sm:$0xf0]  ;;  %8093 = vmatmul.bf16.gmra.mxu1 %v15576_v58 }
 0x49c   :  { %8156 = vmatpush.bf16.msra.mxu1 %v11886_v28  ;;  %v14409_v55 = vld [vmem:[#allocation8 + $0x22c] sm:$0xf0]  ;;  %v15744_v18 = vadd.f32 %v7752_v40, %v15719_v61  ;;  %v13543_v40 = vld [vmem:[#allocation8 + $0xfe8] sm:$0xf0] }
 0x49d   :  { %8171 = vmatpush.bf16.msra.mxu2 %v12238_v20  ;;  %8139 = vmatpush.bf16.msra.mxu0 %v11598_v22  ;;  %v12781_v44 = vld [vmem:[#allocation8 + $0x9d0] sm:$0xf]  ;;  %v11790_v43 = vor.u32 %v14409_v55, %v11789_v52  ;;  %v15739_v22 = vpop.f32.mrf.mxu0 }
 0x49e   :  { %v14657_v34 = vld [vmem:[#allocation8 + $0x9ec] sm:$0xf0]  ;;  %8047 = vmatpush.bf16.msra.mxu3 %v12426_v48  ;;  %v14540_v48 = vld [vmem:[#allocation8 + $0x64c] sm:$0xf] }
 0x49f   :  { %v13037_v29 = vld [vmem:[#allocation8 + $0xbd0] sm:$0xf]  ;;  %v12782_v33 = vor.u32 %v14657_v34, %v12781_v44  ;;  %v12330_v52 = vor.u32 %v14540_v48, %v12327_v17  ;;  %7980 = vmatmul.bf16.vlgmr.msrb.gmra.mxu3 %v15645_v56 }
 0x4a0   :  { %8157 = vmatpush.bf16.msra.mxu1 %v11854_v19  ;;  %v14721_v9 = vld [vmem:[#allocation8 + $0xbec] sm:$0xf0]  ;;  %v15741_v19 = vpop.f32.mrf.mxu1 }
 0x4a1   :  { %8172 = vmatpush.bf16.msra.mxu2 %v12206_v16  ;;  %v12141_v28 = vld [vmem:[#allocation8 + $0x4d0] sm:$0xf]  ;;  %8140 = vmatpush.bf16.msra.mxu0 %v11566_v0  ;;  %v13038_v54 = vor.u32 %v14721_v9, %v13037_v29 }
 0x4a2   :  { %v14497_v12 = vld [vmem:[#allocation8 + $0x4ec] sm:$0xf0]  ;;  %8048 = vmatpush.bf16.msra.mxu3 %v12394_v53 }
 0x4a3   :  { %v12142_v51 = vor.u32 %v14497_v12, %v12141_v28  ;;  %v12749_v20 = vld [vmem:[#allocation8 + $0x990] sm:$0xf]  ;;  %v7754_v12 = vpop.f32.mrf.mxu2 }
 0x4a4   :  { %8158 = vmatpush.bf16.msra.mxu1 %v11822_v35  ;;  %v14649_v5 = vld [vmem:[#allocation8 + $0x9ac] sm:$0xf0] }
 0x4a5   :  { %8173 = vmatpush.bf16.msra.mxu2 %v12174_v27  ;;  %v13005_v15 = vld [vmem:[#allocation8 + $0xb90] sm:$0xf]  ;;  %8141 = vmatpush.bf16.msra.mxu0 %v11534_v45  ;;  %v12750_v2 = vor.u32 %v14649_v5, %v12749_v20  ;;  %v15746_v13 = vpop.f32.mrf.mxu0  ;;  %v14532_v45 = vld [vmem:[#allocation8 + $0x60c] sm:$0xf] }
 0x4a6   :  { %v14713_v63 = vld [vmem:[#allocation8 + $0xbac] sm:$0xf0]  ;;  %8049 = vmatpush.bf16.msra.mxu3 %v12362_v3 }
 0x4a7   :  { %v12109_v8 = vld [vmem:[#allocation8 + $0x490] sm:$0xf]  ;;  %v13006_v30 = vor.u32 %v14713_v63, %v13005_v15 }
 0x4a8   :  { %8159 = vmatpush.bf16.msra.mxu1 %v11790_v43  ;;  %v14489_v16 = vld [vmem:[#allocation8 + $0x4ac] sm:$0xf0]  ;;  %v15748_v28 = vpop.f32.mrf.mxu1  ;;  %v12295_v43 = vld [vmem:[#allocation8 + $0x628] sm:$0xf0]  ;;  %8111 = vmatmul.bf16.gmra.mxu2 %v15590_v11 }
 0x4a9   :  { %8174 = vmatpush.bf16.msra.mxu2 %v12142_v51  ;;  %8206 = vmatpush.bf16.msrb.mxu0 %v12782_v33  ;;  %v12110_v42 = vor.u32 %v14489_v16, %v12109_v8  ;;  %v12717_v32 = vld [vmem:[#allocation8 + $0x950] sm:$0xf]  ;;  %v12298_v33 = vor.u32 %v14532_v45, %v12295_v43  ;;  %v14844_v8 = vld [vmem:[#allocation8 + $0xfcc] sm:$0xf]  ;;  %v15759_v45 = vld [vmem:[#allocation10] sm:$0xff] }
 0x4aa   :  { %v14641_v0 = vld [vmem:[#allocation8 + $0x96c] sm:$0xf0]  ;;  %8050 = vmatpush.bf16.msra.mxu3 %v12330_v52  ;;  %v13546_v3 = vor.u32 %v14844_v8, %v13543_v40  ;;  %v14836_v52 = vld [vmem:[#allocation8 + $0xf8c] sm:$0xf]  ;;  %v15762_v43 = vperm.slane %v15759_v45, 2  ;;  %8142 = vmatmul.bf16.vlgmr.msra.gmra.mxu0 %v15308_v50 }
 0x4ab   :  { %v12973_v35 = vld [vmem:[#allocation8 + $0xb50] sm:$0xf]  ;;  %v12718_v27 = vor.u32 %v14641_v0, %v12717_v32  ;;  %8160 = vmatmul.bf16.vlgmr.msra.gmra.mxu1 %v15343_v21 }
 0x4ac   :  { %8224 = vmatpush.bf16.msrb.mxu1 %v13038_v54  ;;  %v14705_v57 = vld [vmem:[#allocation8 + $0xb6c] sm:$0xf0] }
 0x4ad   :  { %8175 = vmatpush.bf16.msra.mxu2 %v12110_v42  ;;  %v12077_v59 = vld [vmem:[#allocation8 + $0x450] sm:$0xf]  ;;  %8207 = vmatpush.bf16.msrb.mxu0 %v12750_v2  ;;  %v12974_v61 = vor.u32 %v14705_v57, %v12973_v35  ;;  %v7790_v17 = vpop.f32.mrf.mxu0 }
 0x4ae   :  { %v14481_v55 = vld [vmem:[#allocation8 + $0x46c] sm:$0xf0]  ;;  %8051 = vmatpush.bf16.msra.mxu3 %v12298_v33 }
 0x4af   :  { %v12078_v44 = vor.u32 %v14481_v55, %v12077_v59  ;;  %v12685_v34 = vld [vmem:[#allocation8 + $0x910] sm:$0xf]  ;;  %v13511_v55 = vld [vmem:[#allocation8 + $0xfa8] sm:$0xf0]  ;;  %7985 = vmatmul.bf16.gmra.mxu3 %v15657_v1 }
 0x4b0   :  { %8225 = vmatpush.bf16.msrb.mxu1 %v13006_v30  ;;  %v14633_v29 = vld [vmem:[#allocation8 + $0x92c] sm:$0xf0]  ;;  %v7808_v59 = vpop.f32.mrf.mxu1 }
 0x4b1   :  { %v12941_v9 = vld [vmem:[#allocation8 + $0xb10] sm:$0xf]  ;;  %8176 = vmatpush.bf16.msra.mxu2 %v12078_v44  ;;  %8208 = vmatpush.bf16.msrb.mxu0 %v12718_v27  ;;  %v12686_v5 = vor.u32 %v14633_v29, %v12685_v34  ;;  %v15754_v44 = vpop.f32.mrf.mxu2  ;;  %v13514_v34 = vor.u32 %v14836_v52, %v13511_v55 }
 0x4b2   :  { %v14697_v10 = vld [vmem:[#allocation8 + $0xb2c] sm:$0xf0]  ;;  %8116 = vmatpush.bf16.msrb.mxu3 %v13546_v3 }
 0x4b3   :  { %v12045_v53 = vld [vmem:[#allocation8 + $0x410] sm:$0xf]  ;;  %v12942_v15 = vor.u32 %v14697_v10, %v12941_v9 }
 0x4b4   :  { %v14473_v54 = vld [vmem:[#allocation8 + $0x42c] sm:$0xf0]  ;;  %8226 = vmatpush.bf16.msrb.mxu1 %v12974_v61  ;;  %v7693_v61 = vpop.f32.mrf.mxu3 }
 0x4b5   :  { %v12046_v51 = vor.u32 %v14473_v54, %v12045_v53  ;;  %v12653_v20 = vld [vmem:[#allocation8 + $0x8d0] sm:$0xf]  ;;  %8209 = vmatpush.bf16.msrb.mxu0 %v12686_v5  ;;  %v15757_v9 = vadd.f32 %v7693_v61, %v15697_v46  ;;  %v13479_v5 = vld [vmem:[#allocation8 + $0xf68] sm:$0xf0] }
 0x4b6   :  { %v14625_v63 = vld [vmem:[#allocation8 + $0x8ec] sm:$0xf0]  ;;  %8117 = vmatpush.bf16.msrb.mxu3 %v13514_v34  ;;  %v14397_v34 = vld [vmem:[#allocation8 + $0x1d4] sm:$0xf] }
 0x4b7   :  { %v12909_v23 = vld [vmem:[#allocation8 + $0xad0] sm:$0xf]  ;;  %8177 = vmatpush.bf16.msra.mxu2 %v12046_v51  ;;  %v12654_v32 = vor.u32 %v14625_v63, %v12653_v20  ;;  %v14828_v20 = vld [vmem:[#allocation8 + $0xf4c] sm:$0xf] }
 0x4b8   :  { %v14689_v39 = vld [vmem:[#allocation8 + $0xaec] sm:$0xf0]  ;;  %8227 = vmatpush.bf16.msrb.mxu1 %v12942_v15  ;;  %v13482_v46 = vor.u32 %v14828_v20, %v13479_v5  ;;  %v7873_v3 = vpop.f32.mrf.mxu1  ;;  %v14812_v5 = vld [vmem:[#allocation8 + $0xecc] sm:$0xf] }
 0x4b9   :  { %v13293_v2 = vld [vmem:[#allocation8 + $0xdd0] sm:$0xf]  ;;  %v12910_v0 = vor.u32 %v14689_v39, %v12909_v23  ;;  %8210 = vmatpush.bf16.msrb.mxu0 %v12654_v32  ;;  %v13447_v32 = vld [vmem:[#allocation8 + $0xf28] sm:$0xf0] }
 0x4ba   :  { %v14785_v16 = vld [vmem:[#allocation8 + $0xdec] sm:$0xf0]  ;;  %8118 = vmatpush.bf16.msrb.mxu3 %v13482_v46  ;;  %8147 = vmatmul.bf16.gmra.mxu0 %v15520_v37 }
 0x4bb   :  { %v13294_v30 = vor.u32 %v14785_v16, %v13293_v2  ;;  %v12621_v42 = vld [vmem:[#allocation8 + $0x890] sm:$0xf]  ;;  %v7855_v2 = vpop.f32.mrf.mxu0  ;;  %8165 = vmatmul.bf16.gmra.mxu1 %v15528_v47  ;;  %8178 = vmatmul.bf16.vlgmr.msra.gmra.mxu2 %v15380_v14 }
 0x4bc   :  { %v14617_v35 = vld [vmem:[#allocation8 + $0x8ac] sm:$0xf0]  ;;  %8228 = vmatpush.bf16.msrb.mxu1 %v12910_v0 }
 0x4bd   :  { %v12877_v57 = vld [vmem:[#allocation8 + $0xa90] sm:$0xf]  ;;  %8242 = vmatpush.bf16.msrb.mxu2 %v13294_v30  ;;  %v12622_v53 = vor.u32 %v14617_v35, %v12621_v42  ;;  %v14820_v42 = vld [vmem:[#allocation8 + $0xf0c] sm:$0xf]  ;;  %v7695_v35 = vpop.f32.mrf.mxu3 }
 0x4be   :  { %v14681_v48 = vld [vmem:[#allocation8 + $0xaac] sm:$0xf0]  ;;  %v13450_v52 = vor.u32 %v14820_v42, %v13447_v32  ;;  %v14804_v32 = vld [vmem:[#allocation8 + $0xe8c] sm:$0xf] }
 0x4bf   :  { %v13261_v27 = vld [vmem:[#allocation8 + $0xd90] sm:$0xf]  ;;  %v12878_v12 = vor.u32 %v14681_v48, %v12877_v57  ;;  %8211 = vmatpush.bf16.msrb.mxu0 %v12622_v53  ;;  %v15764_v57 = vpop.f32.mrf.mxu2  ;;  %v7856_v48 = vadd.f32 %v7855_v2, %v15762_v43  ;;  %8052 = vmatmul.bf16.vlgmr.msra.gmra.mxu3 %v15415_v6 }
 0x4c0   :  { %v14777_v29 = vld [vmem:[#allocation8 + $0xdac] sm:$0xf0]  ;;  %8119 = vmatpush.bf16.msrb.mxu3 %v13450_v52  ;;  %v7875_v42 = vpop.f32.mrf.mxu1 }
 0x4c1   :  { %v13262_v10 = vor.u32 %v14777_v29, %v13261_v27  ;;  %v12589_v33 = vld [vmem:[#allocation8 + $0x850] sm:$0xf]  ;;  %8229 = vmatpush.bf16.msrb.mxu1 %v12878_v12  ;;  %v7696_v27 = vadd.f32 %v7695_v35, %v15704_v38  ;;  %v11759_v29 = vld [vmem:[#allocation8 + $0x1f0] sm:$0xf0]  ;;  %v15768_v53 = vadd.f32 %v7873_v3, %v7856_v48  ;;  %v13415_v38 = vld [vmem:[#allocation8 + $0xee8] sm:$0xf0] }
 0x4c2   :  { %v14609_v54 = vld [vmem:[#allocation8 + $0x86c] sm:$0xf0]  ;;  %v12015_v12 = vld [vmem:[#allocation8 + $0x3f0] sm:$0xf0] }
 0x4c3   :  { %8243 = vmatpush.bf16.msrb.mxu2 %v13262_v10  ;;  %v12845_v51 = vld [vmem:[#allocation8 + $0xa50] sm:$0xf]  ;;  %v12590_v16 = vor.u32 %v14609_v54, %v12589_v33  ;;  %v14461_v10 = vld [vmem:[#allocation8 + $0x3d4] sm:$0xf]  ;;  %v8710_v33 = vmax.f32 %v15757_v9, 0.0  ;;  %v8718_v54 = vmax.f32 %v7696_v27, 0.0  ;;  %v13418_v9 = vor.u32 %v14812_v5, %v13415_v38 }
 0x4c4   :  { %v14673_v15 = vld [vmem:[#allocation8 + $0xa6c] sm:$0xf0]  ;;  %v12018_v46 = vor.u32 %v14461_v10, %v12015_v12  ;;  %v14389_v3 = vld [vmem:[#allocation8 + $0x194] sm:$0xf]  ;;  %v13351_v5 = vld [vmem:[#allocation8 + $0xe68] sm:$0xf0] }
 0x4c5   :  { %v13229_v63 = vld [vmem:[#allocation8 + $0xd50] sm:$0xf]  ;;  %v12846_v30 = vor.u32 %v14673_v15, %v12845_v51  ;;  %8212 = vmatpush.bf16.msrb.mxu0 %v12590_v16  ;;  %v11762_v15 = vor.u32 %v14397_v34, %v11759_v29  ;;  %v11727_v16 = vld [vmem:[#allocation8 + $0x1b0] sm:$0xf0]  ;;  %v7698_v48 = vpop.f32.mrf.mxu3  ;;  %8120 = vmatpush.bf16.msrb.mxu3 %v13418_v9 }
 0x4c6   :  { %v14769_v23 = vld [vmem:[#allocation8 + $0xd6c] sm:$0xf0]  ;;  %v11730_v52 = vor.u32 %v14389_v3, %v11727_v16  ;;  %v14381_v10 = vld [vmem:[#allocation8 + $0x154] sm:$0xf] }
 0x4c7   :  { %v13230_v39 = vor.u32 %v14769_v23, %v13229_v63  ;;  %v12557_v8 = vld [vmem:[#allocation8 + $0x810] sm:$0xf]  ;;  %8230 = vmatpush.bf16.msrb.mxu1 %v12846_v30  ;;  %v7857_v30 = vpop.f32.mrf.mxu0  ;;  %v11695_v12 = vld [vmem:[#allocation8 + $0x170] sm:$0xf0] }
 0x4c8   :  { %v14601_v40 = vld [vmem:[#allocation8 + $0x82c] sm:$0xf0]  ;;  %v11698_v38 = vor.u32 %v14381_v10, %v11695_v12  ;;  %v14373_v9 = vld [vmem:[#allocation8 + $0x114] sm:$0xf] }
 0x4c9   :  { %8244 = vmatpush.bf16.msrb.mxu2 %v13230_v39  ;;  %v13197_v0 = vld [vmem:[#allocation8 + $0xd10] sm:$0xf]  ;;  %v12558_v51 = vor.u32 %v14601_v40, %v12557_v8  ;;  %v15773_v39 = vpack.c.bf16 %v8718_v54, %v8710_v33  ;;  %v14453_v8 = vld [vmem:[#allocation8 + $0x394] sm:$0xf] }
 0x4ca   :  { %v12813_v17 = vld [vmem:[#allocation8 + $0xa10] sm:$0xf]  ;;  %v11983_v40 = vld [vmem:[#allocation8 + $0x3b0] sm:$0xf0] }
 0x4cb   :  { %v14665_v59 = vld [vmem:[#allocation8 + $0xa2c] sm:$0xf0]  ;;  %8213 = vmatpush.bf16.msrb.mxu0 %v12558_v51  ;;  %v14445_v33 = vld [vmem:[#allocation8 + $0x354] sm:$0xf]  ;;  %8183 = vmatmul.bf16.gmra.mxu2 %v15532_v26 }
 0x4cc   :  { %v14761_v55 = vld [vmem:[#allocation8 + $0xd2c] sm:$0xf0]  ;;  %v12814_v20 = vor.u32 %v14665_v59, %v12813_v17  ;;  %v15777_v17 = vpop.f32.mrf.mxu2  ;;  %v7858_v59 = vadd.f32 %v7857_v30, %v15762_v43  ;;  %v11951_v51 = vld [vmem:[#allocation8 + $0x370] sm:$0xf0]  ;;  %v14788_v30 = vld [vmem:[#allocation8 + $0xe0c] sm:$0xf] }
 0x4cd   :  { %v13198_v61 = vor.u32 %v14761_v55, %v13197_v0  ;;  %v13165_v63 = vld [vmem:[#allocation8 + $0xcd0] sm:$0xf]  ;;  %v13383_v0 = vld [vmem:[#allocation8 + $0xea8] sm:$0xf0]  ;;  %v11986_v55 = vor.u32 %v14453_v8, %v11983_v40  ;;  %v14437_v3 = vld [vmem:[#allocation8 + $0x314] sm:$0xf]  ;;  %v7878_v40 = vpop.f32.mrf.mxu1 }
 0x4ce   :  { %v14753_v23 = vld [vmem:[#allocation8 + $0xcec] sm:$0xf0]  ;;  %8231 = vmatpush.bf16.msrb.mxu1 %v12814_v20  ;;  %v13386_v34 = vor.u32 %v14804_v32, %v13383_v0  ;;  %v15783_v54 = vadd.f32 %v7875_v42, %v7858_v59  ;;  %v14796_v20 = vld [vmem:[#allocation8 + $0xe4c] sm:$0xf]  ;;  %v11919_v16 = vld [vmem:[#allocation8 + $0x330] sm:$0xf0]  ;;  %v7700_v0 = vpop.f32.mrf.mxu3  ;;  %8214 = vmatmul.bf16.vlgmr.msrb.gmra.mxu0 %v15452_v41 }
 0x4cf   :  { %8245 = vmatpush.bf16.msrb.mxu2 %v13198_v61  ;;  %v13166_v2 = vor.u32 %v14753_v23, %v13165_v63  ;;  %v13133_v35 = vld [vmem:[#allocation8 + $0xc90] sm:$0xf]  ;;  %8278 = vmatpush.bf16.msra.mxu0 %v11762_v15  ;;  %v15781_v61 = vadd.f32 %v7698_v48, %v15714_v49  ;;  %v11954_v15 = vor.u32 %v14445_v33, %v11951_v51  ;;  %v7860_v8 = vpop.f32.mrf.mxu0  ;;  %v13319_v42 = vld [vmem:[#allocation8 + $0xe28] sm:$0xf0]  ;;  %v11887_v51 = vld [vmem:[#allocation8 + $0x2f0] sm:$0xf0] }
 0x4d0   :  { %v14745_v27 = vld [vmem:[#allocation8 + $0xcac] sm:$0xf0]  ;;  %8121 = vmatpush.bf16.msrb.mxu3 %v13386_v34  ;;  %v13354_v49 = vor.u32 %v14796_v20, %v13351_v5  ;;  %v7861_v48 = vadd.f32 %v7860_v8, %v15762_v43  ;;  %v11631_v34 = vld [vmem:[#allocation8 + $0xf0] sm:$0xf0]  ;;  %v13322_v12 = vor.u32 %v14788_v30, %v13319_v42 }
 0x4d1   :  { %v13134_v29 = vor.u32 %v14745_v27, %v13133_v35  ;;  %v14737_v63 = vld [vmem:[#allocation8 + $0xc6c] sm:$0xf0]  ;;  %v14365_v27 = vld [vmem:[#allocation8 + $0xd4] sm:$0xf]  ;;  %8232 = vmatmul.bf16.vlgmr.msrb.gmra.mxu1 %v15490_v31  ;;  %8057 = vmatmul.bf16.gmra.mxu3 %v15536_v25 }
 0x4d2   :  { %8296 = vmatpush.bf16.msra.mxu1 %v12018_v46  ;;  %v13101_v46 = vld [vmem:[#allocation8 + $0xc50] sm:$0xf]  ;;  %v15786_v10 = vadd.f32 %v7878_v40, %v7861_v48  ;;  %v14525_v5 = vld [vmem:[#allocation8 + $0x5d4] sm:$0xf] }
 0x4d3   :  { %8246 = vmatpush.bf16.msrb.mxu2 %v13166_v2  ;;  %8279 = vmatpush.bf16.msra.mxu0 %v11730_v52  ;;  %v13102_v23 = vor.u32 %v14737_v63, %v13101_v46  ;;  %v11663_v2 = vld [vmem:[#allocation8 + $0x130] sm:$0xf0]  ;;  %v13069_v32 = vld [vmem:[#allocation8 + $0xc10] sm:$0xf]  ;;  %v11922_v52 = vor.u32 %v14437_v3, %v11919_v16 }
 0x4d4   :  { %v7826_v35 = vpop.f32.mrf.mxu2  ;;  %v11666_v59 = vor.u32 %v14373_v9, %v11663_v2  ;;  %8122 = vmatpush.bf16.msrb.mxu3 %v13354_v49  ;;  %v12525_v43 = vld [vmem:[#allocation8 + $0x7d0] sm:$0xf]  ;;  %v12271_v63 = vld [vmem:[#allocation8 + $0x5f0] sm:$0xf0] }
 0x4d5   :  { %v14593_v20 = vld [vmem:[#allocation8 + $0x7ec] sm:$0xf0]  ;;  %v12274_v49 = vor.u32 %v14525_v5, %v12271_v63  ;;  %v11599_v9 = vld [vmem:[#allocation8 + $0xb0] sm:$0xf0]  ;;  %v7880_v8 = vpop.f32.mrf.mxu1 }
 0x4d6   :  { %8297 = vmatpush.bf16.msra.mxu1 %v11986_v55  ;;  %v14729_v55 = vld [vmem:[#allocation8 + $0xc2c] sm:$0xf0]  ;;  %v12526_v46 = vor.u32 %v14593_v20, %v12525_v43  ;;  %v14421_v2 = vld [vmem:[#allocation8 + $0x294] sm:$0xf] }
 0x4d7   :  { %8247 = vmatpush.bf16.msrb.mxu2 %v13134_v29  ;;  %8280 = vmatpush.bf16.msra.mxu0 %v11698_v38  ;;  %v14429_v29 = vld [vmem:[#allocation8 + $0x2d4] sm:$0xf]  ;;  %v13070_v33 = vor.u32 %v14729_v55, %v13069_v32  ;;  %v11634_v38 = vor.u32 %v14365_v27, %v11631_v34  ;;  %v7862_v16 = vpop.f32.mrf.mxu0  ;;  %v12493_v40 = vld [vmem:[#allocation8 + $0x790] sm:$0xf]  ;;  %v7765_v32 = vpop.f32.mrf.mxu3 }
 0x4d8   :  { %8123 = vmatpush.bf16.msrb.mxu3 %v13322_v12  ;;  %v11855_v3 = vld [vmem:[#allocation8 + $0x2b0] sm:$0xf0]  ;;  %v14585_v30 = vld [vmem:[#allocation8 + $0x7ac] sm:$0xf0]  ;;  %v7766_v55 = vadd.f32 %v7765_v32, %v15726_v4 }
 0x4d9   :  { %v14517_v42 = vld [vmem:[#allocation8 + $0x594] sm:$0xf]  ;;  %v11858_v48 = vor.u32 %v14421_v2, %v11855_v3  ;;  %v12461_v20 = vld [vmem:[#allocation8 + $0x750] sm:$0xf] }
 0x4da   :  { %8298 = vmatpush.bf16.msra.mxu1 %v11954_v15  ;;  %v11890_v15 = vor.u32 %v14429_v29, %v11887_v51  ;;  %v14349_v29 = vld [vmem:[#allocation8 + $0x54] sm:$0xf]  ;;  %v7784_v43 = vadd.f32 %v15728_v60, %v7766_v55  ;;  %v14577_v5 = vld [vmem:[#allocation8 + $0x76c] sm:$0xf0] }
 0x4db   :  { %8248 = vmatpush.bf16.msrb.mxu2 %v13102_v23  ;;  %8281 = vmatpush.bf16.msra.mxu0 %v11666_v59  ;;  %v14357_v23 = vld [vmem:[#allocation8 + $0x94] sm:$0xf]  ;;  %v12494_v59 = vor.u32 %v14585_v30, %v12493_v40  ;;  %v12462_v4 = vor.u32 %v14577_v5, %v12461_v20  ;;  %v12429_v40 = vld [vmem:[#allocation8 + $0x710] sm:$0xf] }
 0x4dc   :  { %8188 = vmatpush.bf16.msra.mxu3 %v12526_v46  ;;  %v7891_v0 = vpop.f32.mrf.mxu2  ;;  %v11602_v35 = vor.u32 %v14357_v23, %v11599_v9  ;;  %v11567_v12 = vld [vmem:[#allocation8 + $0x70] sm:$0xf0]  ;;  %v14569_v30 = vld [vmem:[#allocation8 + $0x72c] sm:$0xf0] }
 0x4dd   :  { %v15794_v27 = vadd.f32 %v7891_v0, %v15768_v53  ;;  %v11823_v51 = vld [vmem:[#allocation8 + $0x270] sm:$0xf0]  ;;  %v7802_v53 = vadd.f32 %v15730_v24, %v7784_v43  ;;  %v15800_v60 = vpop.f32.mrf.mxu1  ;;  %v12397_v5 = vld [vmem:[#allocation8 + $0x6d0] sm:$0xf] }
 0x4de   :  { %8299 = vmatpush.bf16.msra.mxu1 %v11922_v52  ;;  %v12239_v52 = vld [vmem:[#allocation8 + $0x5b0] sm:$0xf0]  ;;  %8219 = vmatmul.bf16.gmra.mxu0 %v15574_v7 }
 0x4df   :  { %8249 = vmatpush.bf16.msrb.mxu2 %v13070_v33  ;;  %8282 = vmatpush.bf16.msra.mxu0 %v11634_v38  ;;  %v12242_v34 = vor.u32 %v14517_v42, %v12239_v52  ;;  %v14413_v33 = vld [vmem:[#allocation8 + $0x254] sm:$0xf]  ;;  %v15798_v16 = vpop.f32.mrf.mxu0  ;;  %v15803_v8 = vadd.f32 %v15754_v44, %v7802_v53  ;;  %v7767_v42 = vpop.f32.mrf.mxu3 }
 0x4e0   :  { %8189 = vmatpush.bf16.msra.mxu3 %v12494_v59  ;;  %v14509_v38 = vld [vmem:[#allocation8 + $0x554] sm:$0xf]  ;;  %v11826_v46 = vor.u32 %v14413_v33, %v11823_v51  ;;  %v7768_v52 = vadd.f32 %v7767_v42, %v15733_v36  ;;  %v14561_v36 = vld [vmem:[#allocation8 + $0x6ec] sm:$0xf0] }
 0x4e1   :  { %v12207_v63 = vld [vmem:[#allocation8 + $0x570] sm:$0xf0]  ;;  %8237 = vmatmul.bf16.gmra.mxu1 %v15576_v58  ;;  %8124 = vmatmul.bf16.vlgmr.msrb.gmra.mxu3 %v15645_v56 }
 0x4e2   :  { %8300 = vmatpush.bf16.msra.mxu1 %v11890_v15  ;;  %v11570_v15 = vor.u32 %v14349_v29, %v11567_v12  ;;  %v14341_v23 = vld [vmem:[#allocation8 + $0x14] sm:$0xf]  ;;  %v7786_v43 = vadd.f32 %v15739_v22, %v7768_v52  ;;  %8250 = vmatmul.bf16.vlgmr.msrb.gmra.mxu2 %v15581_v62 }
 0x4e3   :  { %8314 = vmatpush.bf16.msra.mxu2 %v12274_v49  ;;  %8283 = vmatpush.bf16.msra.mxu0 %v11602_v35  ;;  %v12210_v49 = vor.u32 %v14509_v38, %v12207_v63  ;;  %v11535_v9 = vld [vmem:[#allocation8 + $0x30] sm:$0xf0]  ;;  %v12430_v35 = vor.u32 %v14569_v30, %v12429_v40  ;;  %v12365_v30 = vld [vmem:[#allocation8 + $0x690] sm:$0xf] }
 0x4e4   :  { %v14405_v2 = vld [vmem:[#allocation8 + $0x214] sm:$0xf]  ;;  %8190 = vmatpush.bf16.msra.mxu3 %v12462_v4  ;;  %v7893_v32 = vpop.f32.mrf.mxu2  ;;  %v11538_v24 = vor.u32 %v14341_v23, %v11535_v9 }
 0x4e5   :  { %v11791_v3 = vld [vmem:[#allocation8 + $0x230] sm:$0xf0]  ;;  %v15807_v55 = vadd.f32 %v7893_v32, %v15783_v54  ;;  %v12398_v54 = vor.u32 %v14561_v36, %v12397_v5 }
 0x4e6   :  { %8301 = vmatpush.bf16.msra.mxu1 %v11858_v48  ;;  %v11794_v0 = vor.u32 %v14405_v2, %v11791_v3  ;;  %v14501_v48 = vld [vmem:[#allocation8 + $0x514] sm:$0xf]  ;;  %v15817_v2 = vpop.f32.mrf.mxu1 }
 0x4e7   :  { %8315 = vmatpush.bf16.msra.mxu2 %v12242_v34  ;;  %8284 = vmatpush.bf16.msra.mxu0 %v11570_v15  ;;  %v12175_v59 = vld [vmem:[#allocation8 + $0x530] sm:$0xf0]  ;;  %v15815_v9 = vpop.f32.mrf.mxu0  ;;  %v7770_v32 = vpop.f32.mrf.mxu3 }
 0x4e8   :  { %v12178_v44 = vor.u32 %v14501_v48, %v12175_v59  ;;  %v14653_v34 = vld [vmem:[#allocation8 + $0x9d4] sm:$0xf]  ;;  %8191 = vmatpush.bf16.msra.mxu3 %v12430_v35  ;;  %v7771_v48 = vadd.f32 %v7770_v32, %v15744_v18 }
 0x4e9   :  { %v12783_v29 = vld [vmem:[#allocation8 + $0x9f0] sm:$0xf0] }
 0x4ea   :  { %8302 = vmatpush.bf16.msra.mxu1 %v11826_v46  ;;  %v14717_v12 = vld [vmem:[#allocation8 + $0xbd4] sm:$0xf]  ;;  %v12786_v33 = vor.u32 %v14653_v34, %v12783_v29  ;;  %v7804_v46 = vadd.f32 %v15741_v19, %v7786_v43  ;;  %v14553_v19 = vld [vmem:[#allocation8 + $0x6ac] sm:$0xf0] }
 0x4eb   :  { %8316 = vmatpush.bf16.msra.mxu2 %v12210_v49  ;;  %v13039_v51 = vld [vmem:[#allocation8 + $0xbf0] sm:$0xf0]  ;;  %8285 = vmatpush.bf16.msra.mxu0 %v11538_v24  ;;  %v12333_v43 = vld [vmem:[#allocation8 + $0x650] sm:$0xf] }
 0x4ec   :  { %v13042_v20 = vor.u32 %v14717_v12, %v13039_v51  ;;  %v14493_v38 = vld [vmem:[#allocation8 + $0x4d4] sm:$0xf]  ;;  %v15820_v3 = vadd.f32 %v15764_v57, %v7804_v46  ;;  %8192 = vmatpush.bf16.msra.mxu3 %v12398_v54  ;;  %v7896_v24 = vpop.f32.mrf.mxu2 }
 0x4ed   :  { %v12143_v15 = vld [vmem:[#allocation8 + $0x4f0] sm:$0xf0]  ;;  %v15824_v59 = vadd.f32 %v7896_v24, %v15786_v10 }
 0x4ee   :  { %8303 = vmatpush.bf16.msra.mxu1 %v11794_v0  ;;  %v12146_v4 = vor.u32 %v14493_v38, %v12143_v15  ;;  %v14645_v63 = vld [vmem:[#allocation8 + $0x994] sm:$0xf]  ;;  %v12366_v0 = vor.u32 %v14553_v19, %v12365_v30  ;;  %8286 = vmatmul.bf16.vlgmr.msra.gmra.mxu0 %v15308_v50 }
 0x4ef   :  { %8317 = vmatpush.bf16.msra.mxu2 %v12178_v44  ;;  %v12751_v53 = vld [vmem:[#allocation8 + $0x9b0] sm:$0xf0]  ;;  %8350 = vmatpush.bf16.msrb.mxu0 %v12786_v33  ;;  %v7789_v33 = vadd.f32 %v15746_v13, %v7771_v48  ;;  %v15830_v13 = vpop.f32.mrf.mxu1  ;;  %v7772_v30 = vpop.f32.mrf.mxu3 }
 0x4f0   :  { %v14709_v22 = vld [vmem:[#allocation8 + $0xb94] sm:$0xf]  ;;  %v12754_v49 = vor.u32 %v14645_v63, %v12751_v53  ;;  %8193 = vmatpush.bf16.msra.mxu3 %v12366_v0  ;;  %v15828_v63 = vpop.f32.mrf.mxu0 }
 0x4f1   :  { %v13007_v23 = vld [vmem:[#allocation8 + $0xbb0] sm:$0xf0]  ;;  %v7807_v10 = vadd.f32 %v15748_v28, %v7789_v33  ;;  %v14537_v28 = vld [vmem:[#allocation8 + $0x62c] sm:$0xf0]  ;;  %8304 = vmatmul.bf16.vlgmr.msra.gmra.mxu1 %v15343_v21  ;;  %8129 = vmatmul.bf16.gmra.mxu3 %v15657_v1 }
 0x4f2   :  { %8368 = vmatpush.bf16.msrb.mxu1 %v13042_v20  ;;  %v13010_v40 = vor.u32 %v14709_v22, %v13007_v23  ;;  %v14485_v42 = vld [vmem:[#allocation8 + $0x494] sm:$0xf]  ;;  %v14545_v20 = vld [vmem:[#allocation8 + $0x66c] sm:$0xf0]  ;;  %8255 = vmatmul.bf16.gmra.mxu2 %v15590_v11 }
 0x4f3   :  { %8318 = vmatpush.bf16.msra.mxu2 %v12146_v4  ;;  %v12111_v35 = vld [vmem:[#allocation8 + $0x4b0] sm:$0xf0]  ;;  %8351 = vmatpush.bf16.msrb.mxu0 %v12754_v49  ;;  %v12334_v18 = vor.u32 %v14545_v20, %v12333_v43  ;;  %v15833_v53 = vadd.f32 %v15777_v17, %v7807_v10  ;;  %v12301_v23 = vld [vmem:[#allocation8 + $0x610] sm:$0xf] }
 0x4f4   :  { %v12114_v52 = vor.u32 %v14485_v42, %v12111_v35  ;;  %v14637_v44 = vld [vmem:[#allocation8 + $0x954] sm:$0xf]  ;;  %v7898_v19 = vpop.f32.mrf.mxu2  ;;  %v12302_v42 = vor.u32 %v14537_v28, %v12301_v23 }
 0x4f5   :  { %v12719_v34 = vld [vmem:[#allocation8 + $0x970] sm:$0xf0]  ;;  %8194 = vmatpush.bf16.msra.mxu3 %v12334_v18 }
 0x4f6   :  { %v14701_v57 = vld [vmem:[#allocation8 + $0xb54] sm:$0xf]  ;;  %8369 = vmatpush.bf16.msrb.mxu1 %v13010_v40  ;;  %v12722_v29 = vor.u32 %v14637_v44, %v12719_v34  ;;  %v13549_v34 = vld [vmem:[#allocation8 + $0xfd0] sm:$0xf] }
 0x4f7   :  { %v12975_v12 = vld [vmem:[#allocation8 + $0xb70] sm:$0xf0]  ;;  %8319 = vmatpush.bf16.msra.mxu2 %v12114_v52  ;;  %v7952_v10 = vpop.f32.mrf.mxu1 }
 0x4f8   :  { %v12978_v51 = vor.u32 %v14701_v57, %v12975_v12  ;;  %v14477_v5 = vld [vmem:[#allocation8 + $0x454] sm:$0xf]  ;;  %8352 = vmatpush.bf16.msrb.mxu0 %v12722_v29  ;;  %v14849_v57 = vld [vmem:[#allocation8 + $0xfec] sm:$0xf0] }
 0x4f9   :  { %v12079_v36 = vld [vmem:[#allocation8 + $0x470] sm:$0xf0]  ;;  %8195 = vmatpush.bf16.msra.mxu3 %v12302_v42  ;;  %v13550_v12 = vor.u32 %v14849_v57, %v13549_v34  ;;  %v14825_v10 = vld [vmem:[#allocation8 + $0xf2c] sm:$0xf0] }
 0x4fa   :  { %v12082_v38 = vor.u32 %v14477_v5, %v12079_v36  ;;  %v14629_v54 = vld [vmem:[#allocation8 + $0x914] sm:$0xf]  ;;  %8370 = vmatpush.bf16.msrb.mxu1 %v12978_v51  ;;  %v7934_v36 = vpop.f32.mrf.mxu0 }
 0x4fb   :  { %v12687_v15 = vld [vmem:[#allocation8 + $0x930] sm:$0xf0]  ;;  %v13453_v36 = vld [vmem:[#allocation8 + $0xf10] sm:$0xf] }
 0x4fc   :  { %v14693_v46 = vld [vmem:[#allocation8 + $0xb14] sm:$0xf]  ;;  %8320 = vmatpush.bf16.msra.mxu2 %v12082_v38  ;;  %v12690_v22 = vor.u32 %v14629_v54, %v12687_v15  ;;  %v13517_v15 = vld [vmem:[#allocation8 + $0xf90] sm:$0xf] }
 0x4fd   :  { %v12943_v4 = vld [vmem:[#allocation8 + $0xb30] sm:$0xf0]  ;;  %8260 = vmatpush.bf16.msrb.mxu3 %v13550_v12 }
 0x4fe   :  { %v12946_v49 = vor.u32 %v14693_v46, %v12943_v4  ;;  %v14469_v40 = vld [vmem:[#allocation8 + $0x414] sm:$0xf]  ;;  %8353 = vmatpush.bf16.msrb.mxu0 %v12690_v22  ;;  %v14841_v46 = vld [vmem:[#allocation8 + $0xfac] sm:$0xf0]  ;;  %v7837_v22 = vpop.f32.mrf.mxu3 }
 0x4ff   :  { %v12047_v32 = vld [vmem:[#allocation8 + $0x430] sm:$0xf0]  ;;  %v13518_v23 = vor.u32 %v14841_v46, %v13517_v15  ;;  %v13454_v46 = vor.u32 %v14825_v10, %v13453_v36  ;;  %v13389_v36 = vld [vmem:[#allocation8 + $0xe90] sm:$0xf]  ;;  %8291 = vmatmul.bf16.gmra.mxu0 %v15520_v37 }
 0x500   :  { %v12050_v24 = vor.u32 %v14469_v40, %v12047_v32  ;;  %v14621_v0 = vld [vmem:[#allocation8 + $0x8d4] sm:$0xf]  ;;  %8371 = vmatpush.bf16.msrb.mxu1 %v12946_v49  ;;  %v15839_v49 = vpop.f32.mrf.mxu2  ;;  %v7838_v40 = vadd.f32 %v7837_v22, %v15803_v8  ;;  %v14809_v10 = vld [vmem:[#allocation8 + $0xeac] sm:$0xf0] }
 0x501   :  { %v12655_v35 = vld [vmem:[#allocation8 + $0x8f0] sm:$0xf0]  ;;  %8261 = vmatpush.bf16.msrb.mxu3 %v13518_v23  ;;  %8309 = vmatmul.bf16.gmra.mxu1 %v15528_v47 }
 0x502   :  { %v14685_v48 = vld [vmem:[#allocation8 + $0xad4] sm:$0xf]  ;;  %v12658_v52 = vor.u32 %v14621_v0, %v12655_v35  ;;  %8321 = vmatpush.bf16.msra.mxu2 %v12050_v24  ;;  %8196 = vmatmul.bf16.vlgmr.msra.gmra.mxu3 %v15415_v6 }
 0x503   :  { %v12911_v17 = vld [vmem:[#allocation8 + $0xaf0] sm:$0xf0] }
 0x504   :  { %v12914_v44 = vor.u32 %v14685_v48, %v12911_v17  ;;  %v14781_v29 = vld [vmem:[#allocation8 + $0xdd4] sm:$0xf]  ;;  %8354 = vmatpush.bf16.msrb.mxu0 %v12658_v52  ;;  %v13485_v48 = vld [vmem:[#allocation8 + $0xf50] sm:$0xf]  ;;  %v15843_v52 = vperm.slane %v15759_v45, 3 }
 0x505   :  { %v13295_v33 = vld [vmem:[#allocation8 + $0xdf0] sm:$0xf0]  ;;  %v14833_v17 = vld [vmem:[#allocation8 + $0xf6c] sm:$0xf0]  ;;  %8322 = vmatmul.bf16.vlgmr.msra.gmra.mxu2 %v15380_v14 }
 0x506   :  { %v13298_v51 = vor.u32 %v14781_v29, %v13295_v33  ;;  %v14613_v43 = vld [vmem:[#allocation8 + $0x894] sm:$0xf]  ;;  %8372 = vmatpush.bf16.msrb.mxu1 %v12914_v44  ;;  %v13486_v44 = vor.u32 %v14833_v17, %v13485_v48  ;;  %v13421_v17 = vld [vmem:[#allocation8 + $0xed0] sm:$0xf] }
 0x507   :  { %v12623_v20 = vld [vmem:[#allocation8 + $0x8b0] sm:$0xf0] }
 0x508   :  { %v14677_v5 = vld [vmem:[#allocation8 + $0xa94] sm:$0xf]  ;;  %v12626_v38 = vor.u32 %v14613_v43, %v12623_v20  ;;  %8386 = vmatpush.bf16.msrb.mxu2 %v13298_v51  ;;  %8262 = vmatpush.bf16.msrb.mxu3 %v13486_v44  ;;  %v7999_v43 = vpop.f32.mrf.mxu0  ;;  %v8017_v20 = vpop.f32.mrf.mxu1  ;;  %v14817_v44 = vld [vmem:[#allocation8 + $0xeec] sm:$0xf0] }
 0x509   :  { %v12879_v18 = vld [vmem:[#allocation8 + $0xab0] sm:$0xf0]  ;;  %v8000_v15 = vadd.f32 %v7999_v43, %v15843_v52  ;;  %v14458_v43 = vld [vmem:[#allocation8 + $0x3b4] sm:$0xf0] }
 0x50a   :  { %v12882_v54 = vor.u32 %v14677_v5, %v12879_v18  ;;  %v14773_v4 = vld [vmem:[#allocation8 + $0xd94] sm:$0xf]  ;;  %8355 = vmatpush.bf16.msrb.mxu0 %v12626_v38  ;;  %v7839_v38 = vpop.f32.mrf.mxu3 }
 0x50b   :  { %v13263_v28 = vld [vmem:[#allocation8 + $0xdb0] sm:$0xf0]  ;;  %v7840_v22 = vadd.f32 %v7839_v38, %v15820_v3  ;;  %v13422_v3 = vor.u32 %v14817_v44, %v13421_v17  ;;  %v13357_v17 = vld [vmem:[#allocation8 + $0xe50] sm:$0xf] }
 0x50c   :  { %v13266_v30 = vor.u32 %v14773_v4, %v13263_v28  ;;  %v14605_v19 = vld [vmem:[#allocation8 + $0x854] sm:$0xf]  ;;  %8373 = vmatpush.bf16.msrb.mxu1 %v12882_v54  ;;  %v15845_v54 = vpop.f32.mrf.mxu2  ;;  %v11765_v28 = vld [vmem:[#allocation8 + $0x1d8] sm:$0xf]  ;;  %8263 = vmatpush.bf16.msrb.mxu3 %v13454_v46  ;;  %v14801_v44 = vld [vmem:[#allocation8 + $0xe6c] sm:$0xf0] }
 0x50d   :  { %v12591_v42 = vld [vmem:[#allocation8 + $0x870] sm:$0xf0] }
 0x50e   :  { %v14669_v32 = vld [vmem:[#allocation8 + $0xa54] sm:$0xf]  ;;  %v12594_v0 = vor.u32 %v14605_v19, %v12591_v42  ;;  %8387 = vmatpush.bf16.msrb.mxu2 %v13266_v30  ;;  %v14402_v30 = vld [vmem:[#allocation8 + $0x1f4] sm:$0xf0]  ;;  %v15849_v42 = vadd.f32 %v8017_v20, %v8000_v15 }
 0x50f   :  { %v12847_v24 = vld [vmem:[#allocation8 + $0xa70] sm:$0xf0]  ;;  %v12021_v19 = vld [vmem:[#allocation8 + $0x3d8] sm:$0xf] }
 0x510   :  { %v12850_v35 = vor.u32 %v14669_v32, %v12847_v24  ;;  %v14765_v34 = vld [vmem:[#allocation8 + $0xd54] sm:$0xf]  ;;  %8356 = vmatpush.bf16.msrb.mxu0 %v12594_v0  ;;  %v11766_v32 = vor.u32 %v14402_v30, %v11765_v28  ;;  %v14466_v24 = vld [vmem:[#allocation8 + $0x3f4] sm:$0xf0]  ;;  %v8711_v0 = vmax.f32 %v7838_v40, 0.0  ;;  %v8001_v20 = vpop.f32.mrf.mxu0  ;;  %8264 = vmatpush.bf16.msrb.mxu3 %v13422_v3  ;;  %v13358_v3 = vor.u32 %v14801_v44, %v13357_v17 }
 0x511   :  { %v13231_v57 = vld [vmem:[#allocation8 + $0xd70] sm:$0xf0]  ;;  %v12022_v48 = vor.u32 %v14466_v24, %v12021_v19  ;;  %v14394_v40 = vld [vmem:[#allocation8 + $0x1b4] sm:$0xf0]  ;;  %v8002_v46 = vadd.f32 %v8001_v20, %v15843_v52 }
 0x512   :  { %v13234_v8 = vor.u32 %v14765_v34, %v13231_v57  ;;  %v14597_v29 = vld [vmem:[#allocation8 + $0x814] sm:$0xf]  ;;  %8374 = vmatpush.bf16.msrb.mxu1 %v12850_v35  ;;  %v8719_v35 = vmax.f32 %v7840_v22, 0.0  ;;  %v7842_v38 = vpop.f32.mrf.mxu3  ;;  %v11701_v30 = vld [vmem:[#allocation8 + $0x158] sm:$0xf]  ;;  %8201 = vmatmul.bf16.gmra.mxu3 %v15536_v25 }
 0x513   :  { %v12559_v12 = vld [vmem:[#allocation8 + $0x830] sm:$0xf0]  ;;  %v14386_v19 = vld [vmem:[#allocation8 + $0x174] sm:$0xf0] }
 0x514   :  { %v14661_v33 = vld [vmem:[#allocation8 + $0xa14] sm:$0xf]  ;;  %v12562_v5 = vor.u32 %v14597_v29, %v12559_v12  ;;  %8388 = vmatpush.bf16.msrb.mxu2 %v13234_v8  ;;  %v15853_v8 = vpack.c.bf16 %v8719_v35, %v8711_v0  ;;  %v11733_v12 = vld [vmem:[#allocation8 + $0x198] sm:$0xf]  ;;  %v15857_v15 = vpop.f32.mrf.mxu2  ;;  %v11702_v0 = vor.u32 %v14386_v19, %v11701_v30 }
 0x515   :  { %v12815_v51 = vld [vmem:[#allocation8 + $0xa30] sm:$0xf0]  ;;  %v14450_v35 = vld [vmem:[#allocation8 + $0x374] sm:$0xf0]  ;;  %8327 = vmatmul.bf16.gmra.mxu2 %v15532_v26 }
 0x516   :  { %v12818_v18 = vor.u32 %v14661_v33, %v12815_v51  ;;  %v14757_v45 = vld [vmem:[#allocation8 + $0xd14] sm:$0xf]  ;;  %8357 = vmatpush.bf16.msrb.mxu0 %v12562_v5  ;;  %v11989_v33 = vld [vmem:[#allocation8 + $0x398] sm:$0xf]  ;;  %v11734_v51 = vor.u32 %v14394_v40, %v11733_v12  ;;  %v8019_v5 = vpop.f32.mrf.mxu1 }
 0x517   :  { %v13199_v4 = vld [vmem:[#allocation8 + $0xd30] sm:$0xf0]  ;;  %v15863_v24 = vadd.f32 %v8019_v5, %v8002_v46  ;;  %v14378_v12 = vld [vmem:[#allocation8 + $0x134] sm:$0xf0] }
 0x518   :  { %v13202_v23 = vor.u32 %v14757_v45, %v13199_v4  ;;  %8375 = vmatpush.bf16.msrb.mxu1 %v12818_v18  ;;  %v14749_v34 = vld [vmem:[#allocation8 + $0xcd4] sm:$0xf]  ;;  %v11990_v18 = vor.u32 %v14458_v43, %v11989_v33  ;;  %v13390_v4 = vor.u32 %v14809_v10, %v13389_v36  ;;  %v11925_v40 = vld [vmem:[#allocation8 + $0x318] sm:$0xf]  ;;  %v8004_v43 = vpop.f32.mrf.mxu0  ;;  %v14793_v36 = vld [vmem:[#allocation8 + $0xe2c] sm:$0xf0] }
 0x519   :  { %v13167_v57 = vld [vmem:[#allocation8 + $0xcf0] sm:$0xf0]  ;;  %v14442_v33 = vld [vmem:[#allocation8 + $0x334] sm:$0xf0]  ;;  %v8005_v46 = vadd.f32 %v8004_v43, %v15843_v52  ;;  %8358 = vmatmul.bf16.vlgmr.msrb.gmra.mxu0 %v15452_v41 }
 0x51a   :  { %8389 = vmatpush.bf16.msrb.mxu2 %v13202_v23  ;;  %v13170_v29 = vor.u32 %v14749_v34, %v13167_v57  ;;  %8422 = vmatpush.bf16.msra.mxu0 %v11766_v32  ;;  %v14741_v45 = vld [vmem:[#allocation8 + $0xc94] sm:$0xf]  ;;  %v15861_v23 = vadd.f32 %v7842_v38, %v15833_v53  ;;  %v11957_v32 = vld [vmem:[#allocation8 + $0x358] sm:$0xf]  ;;  %v11926_v5 = vor.u32 %v14442_v33, %v11925_v40 }
 0x51b   :  { %v13135_v22 = vld [vmem:[#allocation8 + $0xcb0] sm:$0xf0]  ;;  %8265 = vmatpush.bf16.msrb.mxu3 %v13390_v4  ;;  %v11637_v30 = vld [vmem:[#allocation8 + $0xd8] sm:$0xf]  ;;  %8376 = vmatmul.bf16.vlgmr.msrb.gmra.mxu1 %v15490_v31 }
 0x51c   :  { %8440 = vmatpush.bf16.msra.mxu1 %v12022_v48  ;;  %v13138_v28 = vor.u32 %v14741_v45, %v13135_v22  ;;  %v11958_v48 = vor.u32 %v14450_v35, %v11957_v32  ;;  %v14733_v34 = vld [vmem:[#allocation8 + $0xc54] sm:$0xf]  ;;  %v7844_v45 = vpop.f32.mrf.mxu3  ;;  %v7970_v38 = vpop.f32.mrf.mxu2  ;;  %v14370_v19 = vld [vmem:[#allocation8 + $0xf4] sm:$0xf0] }
 0x51d   :  { %v13103_v57 = vld [vmem:[#allocation8 + $0xc70] sm:$0xf0]  ;;  %v11893_v32 = vld [vmem:[#allocation8 + $0x2d8] sm:$0xf] }
 0x51e   :  { %8390 = vmatpush.bf16.msrb.mxu2 %v13170_v29  ;;  %8423 = vmatpush.bf16.msra.mxu0 %v11734_v51  ;;  %v13106_v53 = vor.u32 %v14733_v34, %v13103_v57  ;;  %v11669_v29 = vld [vmem:[#allocation8 + $0x118] sm:$0xf]  ;;  %v8022_v51 = vpop.f32.mrf.mxu1  ;;  %v14725_v10 = vld [vmem:[#allocation8 + $0xc14] sm:$0xf] }
 0x51f   :  { %v11670_v20 = vor.u32 %v14378_v12, %v11669_v29  ;;  %8266 = vmatpush.bf16.msrb.mxu3 %v13358_v3  ;;  %v13071_v22 = vld [vmem:[#allocation8 + $0xc30] sm:$0xf0]  ;;  %v14434_v35 = vld [vmem:[#allocation8 + $0x2f4] sm:$0xf0] }
 0x520   :  { %8441 = vmatpush.bf16.msra.mxu1 %v11990_v18  ;;  %v13325_v18 = vld [vmem:[#allocation8 + $0xe10] sm:$0xf]  ;;  %v11894_v17 = vor.u32 %v14434_v35, %v11893_v32  ;;  %v14589_v52 = vld [vmem:[#allocation8 + $0x7d4] sm:$0xf]  ;;  %v12277_v3 = vld [vmem:[#allocation8 + $0x5d8] sm:$0xf]  ;;  %v8006_v43 = vpop.f32.mrf.mxu0 }
 0x521   :  { %v13326_v4 = vor.u32 %v14793_v36, %v13325_v18  ;;  %v12527_v44 = vld [vmem:[#allocation8 + $0x7f0] sm:$0xf0]  ;;  %v14530_v57 = vld [vmem:[#allocation8 + $0x5f4] sm:$0xf0] }
 0x522   :  { %8391 = vmatpush.bf16.msrb.mxu2 %v13138_v28  ;;  %8424 = vmatpush.bf16.msra.mxu0 %v11702_v0  ;;  %v13074_v28 = vor.u32 %v14725_v10, %v13071_v22  ;;  %v15866_v0 = vadd.f32 %v8022_v51, %v8005_v46  ;;  %v12530_v34 = vor.u32 %v14589_v52, %v12527_v44  ;;  %v11605_v29 = vld [vmem:[#allocation8 + $0x98] sm:$0xf]  ;;  %v14581_v18 = vld [vmem:[#allocation8 + $0x794] sm:$0xf] }
 0x523   :  { %8267 = vmatpush.bf16.msrb.mxu3 %v13326_v4  ;;  %v14362_v12 = vld [vmem:[#allocation8 + $0xb4] sm:$0xf0]  ;;  %v12495_v36 = vld [vmem:[#allocation8 + $0x7b0] sm:$0xf0] }
 0x524   :  { %8442 = vmatpush.bf16.msra.mxu1 %v11958_v48  ;;  %v11638_v48 = vor.u32 %v14370_v19, %v11637_v30  ;;  %v11861_v40 = vld [vmem:[#allocation8 + $0x298] sm:$0xf]  ;;  %v7909_v45 = vpop.f32.mrf.mxu3  ;;  %v8035_v38 = vpop.f32.mrf.mxu2  ;;  %v12498_v46 = vor.u32 %v14581_v18, %v12495_v36  ;;  %v14565_v36 = vld [vmem:[#allocation8 + $0x714] sm:$0xf] }
 0x525   :  { %v14426_v33 = vld [vmem:[#allocation8 + $0x2b4] sm:$0xf0]  ;;  %v7910_v22 = vadd.f32 %v7909_v45, %v15794_v27 }
 0x526   :  { %8392 = vmatpush.bf16.msrb.mxu2 %v13106_v53  ;;  %8425 = vmatpush.bf16.msra.mxu0 %v11670_v20  ;;  %v12278_v53 = vor.u32 %v14530_v57, %v12277_v3  ;;  %v8024_v51 = vpop.f32.mrf.mxu1  ;;  %v11606_v20 = vor.u32 %v14362_v12, %v11605_v29  ;;  %v12245_v10 = vld [vmem:[#allocation8 + $0x598] sm:$0xf]  ;;  %v14573_v3 = vld [vmem:[#allocation8 + $0x754] sm:$0xf] }
 0x527   :  { %8332 = vmatpush.bf16.msra.mxu3 %v12530_v34  ;;  %v14522_v4 = vld [vmem:[#allocation8 + $0x5b4] sm:$0xf0]  ;;  %v12463_v34 = vld [vmem:[#allocation8 + $0x770] sm:$0xf0] }
 0x528   :  { %8443 = vmatpush.bf16.msra.mxu1 %v11926_v5  ;;  %v11862_v5 = vor.u32 %v14426_v33, %v11861_v40  ;;  %v12246_v30 = vor.u32 %v14522_v4, %v12245_v10  ;;  %v11573_v19 = vld [vmem:[#allocation8 + $0x58] sm:$0xf]  ;;  %v12466_v27 = vor.u32 %v14573_v3, %v12463_v34  ;;  %v15878_v51 = vpop.f32.mrf.mxu0  ;;  %v12431_v10 = vld [vmem:[#allocation8 + $0x730] sm:$0xf0]  ;;  %8268 = vmatmul.bf16.vlgmr.msrb.gmra.mxu3 %v15645_v56 }
 0x529   :  { %v14354_v32 = vld [vmem:[#allocation8 + $0x74] sm:$0xf0]  ;;  %v14557_v3 = vld [vmem:[#allocation8 + $0x6d4] sm:$0xf]  ;;  %8363 = vmatmul.bf16.gmra.mxu0 %v15574_v7 }
 0x52a   :  { %8393 = vmatpush.bf16.msrb.mxu2 %v13074_v28  ;;  %8426 = vmatpush.bf16.msra.mxu0 %v11638_v48  ;;  %v15874_v28 = vadd.f32 %v8035_v38, %v15849_v42  ;;  %v11829_v35 = vld [vmem:[#allocation8 + $0x258] sm:$0xf]  ;;  %v11574_v52 = vor.u32 %v14354_v32, %v11573_v19  ;;  %v12434_v38 = vor.u32 %v14565_v36, %v12431_v10  ;;  %v14549_v36 = vld [vmem:[#allocation8 + $0x694] sm:$0xf] }
 0x52b   :  { %8333 = vmatpush.bf16.msra.mxu3 %v12498_v46  ;;  %v14418_v48 = vld [vmem:[#allocation8 + $0x274] sm:$0xf0]  ;;  %v12367_v10 = vld [vmem:[#allocation8 + $0x6b0] sm:$0xf0]  ;;  %8381 = vmatmul.bf16.gmra.mxu1 %v15576_v58 }
 0x52c   :  { %8444 = vmatpush.bf16.msra.mxu1 %v11894_v17  ;;  %v7928_v17 = vadd.f32 %v15798_v16, %v7910_v22  ;;  %v11830_v44 = vor.u32 %v14418_v48, %v11829_v35  ;;  %v12213_v57 = vld [vmem:[#allocation8 + $0x558] sm:$0xf]  ;;  %v8037_v45 = vpop.f32.mrf.mxu2 }
 0x52d   :  { %v11541_v12 = vld [vmem:[#allocation8 + $0x18] sm:$0xf]  ;;  %8394 = vmatmul.bf16.vlgmr.msrb.gmra.mxu2 %v15581_v62 }
 0x52e   :  { %8458 = vmatpush.bf16.msra.mxu2 %v12278_v53  ;;  %8427 = vmatpush.bf16.msra.mxu0 %v11606_v20  ;;  %v14514_v53 = vld [vmem:[#allocation8 + $0x574] sm:$0xf0]  ;;  %v7946_v42 = vadd.f32 %v15800_v60, %v7928_v17  ;;  %v15880_v16 = vpop.f32.mrf.mxu1  ;;  %v7911_v60 = vpop.f32.mrf.mxu3 }
 0x52f   :  { %v12214_v29 = vor.u32 %v14514_v53, %v12213_v57  ;;  %v14346_v40 = vld [vmem:[#allocation8 + $0x34] sm:$0xf0]  ;;  %8334 = vmatpush.bf16.msra.mxu3 %v12466_v27  ;;  %v7912_v22 = vadd.f32 %v7911_v60, %v15807_v55  ;;  %v12399_v55 = vld [vmem:[#allocation8 + $0x6f0] sm:$0xf0] }
 0x530   :  { %8445 = vmatpush.bf16.msra.mxu1 %v11862_v5  ;;  %v11797_v33 = vld [vmem:[#allocation8 + $0x218] sm:$0xf]  ;;  %v15883_v20 = vadd.f32 %v15839_v49, %v7946_v42  ;;  %v11542_v5 = vor.u32 %v14346_v40, %v11541_v12 }
 0x531   :  { %v14410_v43 = vld [vmem:[#allocation8 + $0x234] sm:$0xf0] }
 0x532   :  { %8459 = vmatpush.bf16.msra.mxu2 %v12246_v30  ;;  %8428 = vmatpush.bf16.msra.mxu0 %v11574_v52  ;;  %v11798_v18 = vor.u32 %v14410_v43, %v11797_v33  ;;  %v12181_v46 = vld [vmem:[#allocation8 + $0x518] sm:$0xf]  ;;  %v15887_v30 = vadd.f32 %v8037_v45, %v15863_v24  ;;  %v7930_v52 = vadd.f32 %v15815_v9, %v7912_v22  ;;  %v15895_v33 = vpop.f32.mrf.mxu0 }
 0x533   :  { %v14506_v4 = vld [vmem:[#allocation8 + $0x534] sm:$0xf0]  ;;  %8335 = vmatpush.bf16.msra.mxu3 %v12434_v38  ;;  %v12402_v24 = vor.u32 %v14557_v3, %v12399_v55  ;;  %v12370_v38 = vor.u32 %v14549_v36, %v12367_v10  ;;  %v12335_v3 = vld [vmem:[#allocation8 + $0x670] sm:$0xf0] }
 0x534   :  { %8446 = vmatpush.bf16.msra.mxu1 %v11830_v44  ;;  %v12182_v19 = vor.u32 %v14506_v4, %v12181_v46  ;;  %v12789_v49 = vld [vmem:[#allocation8 + $0x9d8] sm:$0xf]  ;;  %v7948_v27 = vadd.f32 %v15817_v2, %v7930_v52  ;;  %v8040_v45 = vpop.f32.mrf.mxu2  ;;  %v12303_v36 = vld [vmem:[#allocation8 + $0x630] sm:$0xf0] }
 0x535   :  { %v14658_v32 = vld [vmem:[#allocation8 + $0x9f4] sm:$0xf0]  ;;  %v15904_v22 = vadd.f32 %v8040_v45, %v15866_v0 }
 0x536   :  { %8460 = vmatpush.bf16.msra.mxu2 %v12214_v29  ;;  %v13045_v35 = vld [vmem:[#allocation8 + $0xbd8] sm:$0xf]  ;;  %v12790_v48 = vor.u32 %v14658_v32, %v12789_v49  ;;  %8429 = vmatpush.bf16.msra.mxu0 %v11542_v5  ;;  %v15897_v43 = vpop.f32.mrf.mxu1  ;;  %v15900_v5 = vadd.f32 %v15845_v54, %v7948_v27  ;;  %v7914_v2 = vpop.f32.mrf.mxu3 }
 0x537   :  { %v14722_v17 = vld [vmem:[#allocation8 + $0xbf4] sm:$0xf0]  ;;  %8336 = vmatpush.bf16.msra.mxu3 %v12402_v24  ;;  %v7915_v4 = vadd.f32 %v7914_v2, %v15824_v59 }
 0x538   :  { %8447 = vmatpush.bf16.msra.mxu1 %v11798_v18  ;;  %v13046_v44 = vor.u32 %v14722_v17, %v13045_v35  ;;  %v12149_v34 = vld [vmem:[#allocation8 + $0x4d8] sm:$0xf]  ;;  %8273 = vmatmul.bf16.gmra.mxu3 %v15657_v1 }
 0x539   :  { %v14498_v57 = vld [vmem:[#allocation8 + $0x4f4] sm:$0xf0]  ;;  %v7933_v17 = vadd.f32 %v15828_v63, %v7915_v4  ;;  %8430 = vmatmul.bf16.vlgmr.msra.gmra.mxu0 %v15308_v50 }
 0x53a   :  { %8461 = vmatpush.bf16.msra.mxu2 %v12182_v19  ;;  %v12150_v53 = vor.u32 %v14498_v57, %v12149_v34  ;;  %v12757_v42 = vld [vmem:[#allocation8 + $0x998] sm:$0xf]  ;;  %8494 = vmatpush.bf16.msrb.mxu0 %v12790_v48 }
 0x53b   :  { %v14650_v29 = vld [vmem:[#allocation8 + $0x9b4] sm:$0xf0]  ;;  %8337 = vmatpush.bf16.msra.mxu3 %v12370_v38  ;;  %v7951_v0 = vadd.f32 %v15830_v13, %v7933_v17  ;;  %8448 = vmatmul.bf16.vlgmr.msra.gmra.mxu1 %v15343_v21 }
 0x53c   :  { %v13013_v9 = vld [vmem:[#allocation8 + $0xb98] sm:$0xf]  ;;  %8512 = vmatpush.bf16.msrb.mxu1 %v13046_v44  ;;  %v12758_v12 = vor.u32 %v14650_v29, %v12757_v42  ;;  %v14541_v44 = vld [vmem:[#allocation8 + $0x654] sm:$0xf]  ;;  %v15908_v29 = vpop.f32.mrf.mxu0 }
 0x53d   :  { %v14714_v40 = vld [vmem:[#allocation8 + $0xbb4] sm:$0xf0]  ;;  %v12338_v59 = vor.u32 %v14541_v44, %v12335_v3  ;;  %8399 = vmatmul.bf16.gmra.mxu2 %v15590_v11 }
 0x53e   :  { %v13014_v18 = vor.u32 %v14714_v40, %v13013_v9  ;;  %v12117_v60 = vld [vmem:[#allocation8 + $0x498] sm:$0xf]  ;;  %8462 = vmatpush.bf16.msra.mxu2 %v12150_v53  ;;  %8495 = vmatpush.bf16.msrb.mxu0 %v12758_v12  ;;  %v15910_v63 = vpop.f32.mrf.mxu1  ;;  %v15913_v9 = vadd.f32 %v15857_v15, %v7951_v0  ;;  %v7916_v13 = vpop.f32.mrf.mxu3 }
 0x53f   :  { %v14490_v46 = vld [vmem:[#allocation8 + $0x4b4] sm:$0xf0]  ;;  %8338 = vmatpush.bf16.msra.mxu3 %v12338_v59 }
 0x540   :  { %v12118_v19 = vor.u32 %v14490_v46, %v12117_v60  ;;  %v12725_v49 = vld [vmem:[#allocation8 + $0x958] sm:$0xf]  ;;  %8513 = vmatpush.bf16.msrb.mxu1 %v13014_v18  ;;  %v14533_v18 = vld [vmem:[#allocation8 + $0x614] sm:$0xf]  ;;  %v8042_v60 = vpop.f32.mrf.mxu2 }
 0x541   :  { %v14642_v32 = vld [vmem:[#allocation8 + $0x974] sm:$0xf0]  ;;  %v12306_v2 = vor.u32 %v14533_v18, %v12303_v36 }
 0x542   :  { %v12981_v54 = vld [vmem:[#allocation8 + $0xb58] sm:$0xf]  ;;  %v12726_v35 = vor.u32 %v14642_v32, %v12725_v49  ;;  %8463 = vmatpush.bf16.msra.mxu2 %v12118_v19 }
 0x543   :  { %v14706_v48 = vld [vmem:[#allocation8 + $0xb74] sm:$0xf0]  ;;  %8339 = vmatpush.bf16.msra.mxu3 %v12306_v2 }
 0x544   :  { %v12982_v52 = vor.u32 %v14706_v48, %v12981_v54  ;;  %v12085_v55 = vld [vmem:[#allocation8 + $0x458] sm:$0xf]  ;;  %8496 = vmatpush.bf16.msrb.mxu0 %v12726_v35  ;;  %v14845_v54 = vld [vmem:[#allocation8 + $0xfd4] sm:$0xf]  ;;  %v8078_v0 = vpop.f32.mrf.mxu0 }
 0x545   :  { %v14482_v34 = vld [vmem:[#allocation8 + $0x474] sm:$0xf0]  ;;  %v13551_v35 = vld [vmem:[#allocation8 + $0xff0] sm:$0xf0] }
 0x546   :  { %v12086_v24 = vor.u32 %v14482_v34, %v12085_v55  ;;  %v12693_v57 = vld [vmem:[#allocation8 + $0x918] sm:$0xf]  ;;  %8514 = vmatpush.bf16.msrb.mxu1 %v12982_v52  ;;  %v13554_v17 = vor.u32 %v14845_v54, %v13551_v35 }
 0x547   :  { %v14634_v27 = vld [vmem:[#allocation8 + $0x934] sm:$0xf0] }
 0x548   :  { %v12949_v53 = vld [vmem:[#allocation8 + $0xb18] sm:$0xf]  ;;  %v12694_v12 = vor.u32 %v14634_v27, %v12693_v57  ;;  %8464 = vmatpush.bf16.msra.mxu2 %v12086_v24  ;;  %8404 = vmatpush.bf16.msrb.mxu3 %v13554_v17  ;;  %v8096_v24 = vpop.f32.mrf.mxu1  ;;  %v15919_v18 = vpop.f32.mrf.mxu2 }
 0x549   :  { %v14698_v42 = vld [vmem:[#allocation8 + $0xb34] sm:$0xf0]  ;;  %8435 = vmatmul.bf16.gmra.mxu0 %v15520_v37  ;;  %8340 = vmatmul.bf16.vlgmr.msra.gmra.mxu3 %v15415_v6 }
 0x54a   :  { %v12950_v40 = vor.u32 %v14698_v42, %v12949_v53  ;;  %v12053_v10 = vld [vmem:[#allocation8 + $0x418] sm:$0xf]  ;;  %8497 = vmatpush.bf16.msrb.mxu0 %v12694_v12  ;;  %v14837_v53 = vld [vmem:[#allocation8 + $0xf94] sm:$0xf] }
 0x54b   :  { %v14474_v45 = vld [vmem:[#allocation8 + $0x434] sm:$0xf0]  ;;  %v13519_v42 = vld [vmem:[#allocation8 + $0xfb0] sm:$0xf0]  ;;  %8453 = vmatmul.bf16.gmra.mxu1 %v15528_v47 }
 0x54c   :  { %v12054_v38 = vor.u32 %v14474_v45, %v12053_v10  ;;  %v12661_v46 = vld [vmem:[#allocation8 + $0x8d8] sm:$0xf]  ;;  %8515 = vmatpush.bf16.msrb.mxu1 %v12950_v40  ;;  %v7981_v40 = vpop.f32.mrf.mxu3  ;;  %v13522_v36 = vor.u32 %v14837_v53, %v13519_v42 }
 0x54d   :  { %v14626_v4 = vld [vmem:[#allocation8 + $0x8f4] sm:$0xf0]  ;;  %v15922_v13 = vadd.f32 %v7981_v40, %v15883_v20 }
 0x54e   :  { %v12917_v19 = vld [vmem:[#allocation8 + $0xad8] sm:$0xf]  ;;  %v12662_v49 = vor.u32 %v14626_v4, %v12661_v46  ;;  %8465 = vmatpush.bf16.msra.mxu2 %v12054_v38  ;;  %8405 = vmatpush.bf16.msrb.mxu3 %v13522_v36 }
 0x54f   :  { %v14690_v15 = vld [vmem:[#allocation8 + $0xaf4] sm:$0xf0] }
 0x550   :  { %v12918_v32 = vor.u32 %v14690_v15, %v12917_v19  ;;  %v13301_v48 = vld [vmem:[#allocation8 + $0xdd8] sm:$0xf]  ;;  %8498 = vmatpush.bf16.msrb.mxu0 %v12662_v49  ;;  %v14829_v15 = vld [vmem:[#allocation8 + $0xf54] sm:$0xf] }
 0x551   :  { %v14786_v52 = vld [vmem:[#allocation8 + $0xdf4] sm:$0xf0]  ;;  %v13487_v49 = vld [vmem:[#allocation8 + $0xf70] sm:$0xf0]  ;;  %8466 = vmatmul.bf16.vlgmr.msra.gmra.mxu2 %v15380_v14 }
 0x552   :  { %v13302_v44 = vor.u32 %v14786_v52, %v13301_v48  ;;  %v12629_v3 = vld [vmem:[#allocation8 + $0x898] sm:$0xf]  ;;  %8516 = vmatpush.bf16.msrb.mxu1 %v12918_v32  ;;  %v15924_v32 = vld [vmem:[#allocation10] sm:$0xff]  ;;  %v13490_v20 = vor.u32 %v14829_v15, %v13487_v49  ;;  %v12023_v15 = vld [vmem:[#allocation8 + $0x3f8] sm:$0xf0]  ;;  %v8712_v49 = vmax.f32 %v15922_v13, 0.0 }
 0x553   :  { %v14618_v55 = vld [vmem:[#allocation8 + $0x8b4] sm:$0xf0]  ;;  %v15927_v54 = vperm.slane %v15924_v32, 4  ;;  %v11735_v13 = vld [vmem:[#allocation8 + $0x1b8] sm:$0xf0] }
 0x554   :  { %v12885_v59 = vld [vmem:[#allocation8 + $0xa98] sm:$0xf]  ;;  %v12630_v57 = vor.u32 %v14618_v55, %v12629_v3  ;;  %8530 = vmatpush.bf16.msrb.mxu2 %v13302_v44  ;;  %8406 = vmatpush.bf16.msrb.mxu3 %v13490_v20  ;;  %v7983_v42 = vpop.f32.mrf.mxu3 }
 0x555   :  { %v14682_v34 = vld [vmem:[#allocation8 + $0xab4] sm:$0xf0] }
 0x556   :  { %v12886_v27 = vor.u32 %v14682_v34, %v12885_v59  ;;  %v13269_v12 = vld [vmem:[#allocation8 + $0xd98] sm:$0xf]  ;;  %8499 = vmatpush.bf16.msrb.mxu0 %v12630_v57  ;;  %v8143_v59 = vpop.f32.mrf.mxu0  ;;  %v8161_v34 = vpop.f32.mrf.mxu1  ;;  %v14821_v57 = vld [vmem:[#allocation8 + $0xf14] sm:$0xf] }
 0x557   :  { %v14778_v10 = vld [vmem:[#allocation8 + $0xdb4] sm:$0xf0]  ;;  %v8144_v40 = vadd.f32 %v8143_v59, %v15927_v54  ;;  %v14390_v59 = vld [vmem:[#allocation8 + $0x19c] sm:$0xf] }
 0x558   :  { %v13270_v60 = vor.u32 %v14778_v10, %v13269_v12  ;;  %v12597_v2 = vld [vmem:[#allocation8 + $0x858] sm:$0xf]  ;;  %8517 = vmatpush.bf16.msrb.mxu1 %v12886_v27  ;;  %v13455_v27 = vld [vmem:[#allocation8 + $0xf30] sm:$0xf0]  ;;  %v15929_v12 = vpop.f32.mrf.mxu2 }
 0x559   :  { %v14610_v45 = vld [vmem:[#allocation8 + $0x874] sm:$0xf0]  ;;  %v13458_v36 = vor.u32 %v14821_v57, %v13455_v27  ;;  %8345 = vmatmul.bf16.gmra.mxu3 %v15536_v25 }
 0x55a   :  { %v12853_v38 = vld [vmem:[#allocation8 + $0xa58] sm:$0xf]  ;;  %v12598_v4 = vor.u32 %v14610_v45, %v12597_v2  ;;  %8531 = vmatpush.bf16.msrb.mxu2 %v13270_v60  ;;  %v7984_v60 = vadd.f32 %v7983_v42, %v15900_v5  ;;  %v14398_v45 = vld [vmem:[#allocation8 + $0x1dc] sm:$0xf]  ;;  %v13423_v5 = vld [vmem:[#allocation8 + $0xef0] sm:$0xf0] }
 0x55b   :  { %v14674_v46 = vld [vmem:[#allocation8 + $0xa74] sm:$0xf0]  ;;  %8407 = vmatpush.bf16.msrb.mxu3 %v13458_v36  ;;  %v14805_v42 = vld [vmem:[#allocation8 + $0xe94] sm:$0xf] }
 0x55c   :  { %v12854_v19 = vor.u32 %v14674_v46, %v12853_v38  ;;  %v13237_v35 = vld [vmem:[#allocation8 + $0xd58] sm:$0xf]  ;;  %8500 = vmatpush.bf16.msrb.mxu0 %v12598_v4  ;;  %v11767_v38 = vld [vmem:[#allocation8 + $0x1f8] sm:$0xf0]  ;;  %v15933_v4 = vadd.f32 %v8161_v34, %v8144_v40  ;;  %v8720_v20 = vmax.f32 %v7984_v60, 0.0 }
 0x55d   :  { %v14770_v48 = vld [vmem:[#allocation8 + $0xd74] sm:$0xf0]  ;;  %v14462_v46 = vld [vmem:[#allocation8 + $0x3dc] sm:$0xf]  ;;  %v13391_v40 = vld [vmem:[#allocation8 + $0xeb0] sm:$0xf0] }
 0x55e   :  { %v13238_v17 = vor.u32 %v14770_v48, %v13237_v35  ;;  %v12565_v52 = vld [vmem:[#allocation8 + $0x818] sm:$0xf]  ;;  %8518 = vmatpush.bf16.msrb.mxu1 %v12854_v19  ;;  %v11770_v19 = vor.u32 %v14398_v45, %v11767_v38  ;;  %v12026_v35 = vor.u32 %v14462_v46, %v12023_v15  ;;  %v14813_v48 = vld [vmem:[#allocation8 + $0xed4] sm:$0xf]  ;;  %v14454_v34 = vld [vmem:[#allocation8 + $0x39c] sm:$0xf]  ;;  %v8145_v57 = vpop.f32.mrf.mxu0  ;;  %v8163_v27 = vpop.f32.mrf.mxu1  ;;  %v13394_v45 = vor.u32 %v14805_v42, %v13391_v40 }
 0x55f   :  { %v14602_v44 = vld [vmem:[#allocation8 + $0x834] sm:$0xf0]  ;;  %v14382_v15 = vld [vmem:[#allocation8 + $0x15c] sm:$0xf] }
 0x560   :  { %v12821_v3 = vld [vmem:[#allocation8 + $0xa18] sm:$0xf]  ;;  %v12566_v0 = vor.u32 %v14602_v44, %v12565_v52  ;;  %8532 = vmatpush.bf16.msrb.mxu2 %v13238_v17  ;;  %v13426_v17 = vor.u32 %v14813_v48, %v13423_v5  ;;  %v15942_v60 = vpop.f32.mrf.mxu2  ;;  %v11959_v5 = vld [vmem:[#allocation8 + $0x378] sm:$0xf0] }
 0x561   :  { %v14666_v55 = vld [vmem:[#allocation8 + $0xa34] sm:$0xf0]  ;;  %8471 = vmatmul.bf16.gmra.mxu2 %v15532_v26 }
 0x562   :  { %v12822_v24 = vor.u32 %v14666_v55, %v12821_v3  ;;  %v13205_v53 = vld [vmem:[#allocation8 + $0xd18] sm:$0xf]  ;;  %8501 = vmatpush.bf16.msrb.mxu0 %v12566_v0  ;;  %v15938_v3 = vpack.c.bf16 %v8720_v20, %v8712_v49  ;;  %v11738_v0 = vor.u32 %v14390_v59, %v11735_v13  ;;  %8408 = vmatpush.bf16.msrb.mxu3 %v13426_v17  ;;  %v11703_v49 = vld [vmem:[#allocation8 + $0x178] sm:$0xf0]  ;;  %v13359_v59 = vld [vmem:[#allocation8 + $0xe70] sm:$0xf0] }
 0x563   :  { %v14762_v10 = vld [vmem:[#allocation8 + $0xd34] sm:$0xf0]  ;;  %v14446_v20 = vld [vmem:[#allocation8 + $0x35c] sm:$0xf]  ;;  %v11706_v48 = vor.u32 %v14382_v15, %v11703_v49 }
 0x564   :  { %v13206_v2 = vor.u32 %v14762_v10, %v13205_v53  ;;  %8519 = vmatpush.bf16.msrb.mxu1 %v12822_v24  ;;  %v13173_v52 = vld [vmem:[#allocation8 + $0xcd8] sm:$0xf]  ;;  %v11991_v24 = vld [vmem:[#allocation8 + $0x3b8] sm:$0xf0]  ;;  %v7986_v10 = vpop.f32.mrf.mxu3 }
 0x565   :  { %v14754_v44 = vld [vmem:[#allocation8 + $0xcf4] sm:$0xf0]  ;;  %v11994_v53 = vor.u32 %v14454_v34, %v11991_v24  ;;  %v15946_v46 = vadd.f32 %v7986_v10, %v15913_v9  ;;  %v14374_v34 = vld [vmem:[#allocation8 + $0x11c] sm:$0xf]  ;;  %v13327_v10 = vld [vmem:[#allocation8 + $0xe30] sm:$0xf0]  ;;  %8502 = vmatmul.bf16.vlgmr.msrb.gmra.mxu0 %v15452_v41 }
 0x566   :  { %8533 = vmatpush.bf16.msrb.mxu2 %v13206_v2  ;;  %v13174_v55 = vor.u32 %v14754_v44, %v13173_v52  ;;  %8566 = vmatpush.bf16.msra.mxu0 %v11770_v19  ;;  %v13141_v36 = vld [vmem:[#allocation8 + $0xc98] sm:$0xf]  ;;  %v8146_v2 = vadd.f32 %v8145_v57, %v15927_v54  ;;  %v11962_v52 = vor.u32 %v14446_v20, %v11959_v5  ;;  %v14797_v44 = vld [vmem:[#allocation8 + $0xe54] sm:$0xf]  ;;  %v11671_v24 = vld [vmem:[#allocation8 + $0x138] sm:$0xf0]  ;;  %v8148_v42 = vpop.f32.mrf.mxu0 }
 0x567   :  { %v14746_v38 = vld [vmem:[#allocation8 + $0xcb4] sm:$0xf0]  ;;  %8409 = vmatpush.bf16.msrb.mxu3 %v13394_v45  ;;  %v13362_v17 = vor.u32 %v14797_v44, %v13359_v59  ;;  %v14438_v57 = vld [vmem:[#allocation8 + $0x31c] sm:$0xf]  ;;  %8520 = vmatmul.bf16.vlgmr.msrb.gmra.mxu1 %v15490_v31 }
 0x568   :  { %8584 = vmatpush.bf16.msra.mxu1 %v12026_v35  ;;  %v13142_v19 = vor.u32 %v14746_v38, %v13141_v36  ;;  %v15948_v35 = vadd.f32 %v8163_v27, %v8146_v2  ;;  %v14738_v13 = vld [vmem:[#allocation8 + $0xc74] sm:$0xf0]  ;;  %v11927_v27 = vld [vmem:[#allocation8 + $0x338] sm:$0xf0]  ;;  %v14789_v36 = vld [vmem:[#allocation8 + $0xe14] sm:$0xf]  ;;  %v8114_v45 = vpop.f32.mrf.mxu2 }
 0x569   :  { %v11930_v40 = vor.u32 %v14438_v57, %v11927_v27  ;;  %v13077_v2 = vld [vmem:[#allocation8 + $0xc18] sm:$0xf]  ;;  %v13330_v15 = vor.u32 %v14789_v36, %v13327_v10  ;;  %v14366_v5 = vld [vmem:[#allocation8 + $0xdc] sm:$0xf] }
 0x56a   :  { %8534 = vmatpush.bf16.msrb.mxu2 %v13174_v55  ;;  %8567 = vmatpush.bf16.msra.mxu0 %v11738_v0  ;;  %v13109_v55 = vld [vmem:[#allocation8 + $0xc58] sm:$0xf]  ;;  %v8166_v0 = vpop.f32.mrf.mxu1  ;;  %v11895_v59 = vld [vmem:[#allocation8 + $0x2f8] sm:$0xf0] }
 0x56b   :  { %v13110_v9 = vor.u32 %v14738_v13, %v13109_v55  ;;  %8410 = vmatpush.bf16.msrb.mxu3 %v13362_v17  ;;  %v14730_v49 = vld [vmem:[#allocation8 + $0xc34] sm:$0xf0]  ;;  %v14358_v27 = vld [vmem:[#allocation8 + $0x9c] sm:$0xf] }
 0x56c   :  { %8585 = vmatpush.bf16.msra.mxu1 %v11994_v53  ;;  %v11674_v53 = vor.u32 %v14374_v34, %v11671_v24  ;;  %v7988_v38 = vpop.f32.mrf.mxu3  ;;  %v13078_v20 = vor.u32 %v14730_v49, %v13077_v2  ;;  %v14594_v17 = vld [vmem:[#allocation8 + $0x7f4] sm:$0xf0]  ;;  %v12279_v24 = vld [vmem:[#allocation8 + $0x5f8] sm:$0xf0] }
 0x56d   :  { %v12501_v38 = vld [vmem:[#allocation8 + $0x798] sm:$0xf] }
 0x56e   :  { %8535 = vmatpush.bf16.msrb.mxu2 %v13142_v19  ;;  %8568 = vmatpush.bf16.msra.mxu0 %v11706_v48  ;;  %v8149_v19 = vadd.f32 %v8148_v42, %v15927_v54  ;;  %v11639_v48 = vld [vmem:[#allocation8 + $0xf8] sm:$0xf0]  ;;  %v12533_v54 = vld [vmem:[#allocation8 + $0x7d8] sm:$0xf] }
 0x56f   :  { %v11642_v55 = vor.u32 %v14366_v5, %v11639_v48  ;;  %8411 = vmatpush.bf16.msrb.mxu3 %v13330_v15  ;;  %v12534_v34 = vor.u32 %v14594_v17, %v12533_v54  ;;  %v11607_v42 = vld [vmem:[#allocation8 + $0xb8] sm:$0xf0]  ;;  %v14586_v45 = vld [vmem:[#allocation8 + $0x7b4] sm:$0xf0] }
 0x570   :  { %8586 = vmatpush.bf16.msra.mxu1 %v11962_v52  ;;  %v14430_v52 = vld [vmem:[#allocation8 + $0x2dc] sm:$0xf]  ;;  %v15951_v44 = vadd.f32 %v8166_v0, %v8149_v19  ;;  %v11610_v10 = vor.u32 %v14358_v27, %v11607_v42  ;;  %v8179_v49 = vpop.f32.mrf.mxu2  ;;  %v14578_v27 = vld [vmem:[#allocation8 + $0x774] sm:$0xf0] }
 0x571   :  { %v11898_v13 = vor.u32 %v14430_v52, %v11895_v59  ;;  %v14422_v0 = vld [vmem:[#allocation8 + $0x29c] sm:$0xf]  ;;  %v15959_v52 = vadd.f32 %v8179_v49, %v15933_v4  ;;  %v12437_v49 = vld [vmem:[#allocation8 + $0x718] sm:$0xf] }
 0x572   :  { %8536 = vmatpush.bf16.msrb.mxu2 %v13110_v9  ;;  %8569 = vmatpush.bf16.msra.mxu0 %v11674_v53  ;;  %v14526_v9 = vld [vmem:[#allocation8 + $0x5dc] sm:$0xf]  ;;  %v8168_v36 = vpop.f32.mrf.mxu1 }
 0x573   :  { %v12282_v57 = vor.u32 %v14526_v9, %v12279_v24  ;;  %8476 = vmatpush.bf16.msra.mxu3 %v12534_v34  ;;  %v11863_v53 = vld [vmem:[#allocation8 + $0x2b8] sm:$0xf0] }
 0x574   :  { %8587 = vmatpush.bf16.msra.mxu1 %v11930_v40  ;;  %v8150_v40 = vpop.f32.mrf.mxu0  ;;  %v11866_v2 = vor.u32 %v14422_v0, %v11863_v53  ;;  %v14518_v19 = vld [vmem:[#allocation8 + $0x59c] sm:$0xf]  ;;  %v8053_v15 = vpop.f32.mrf.mxu3  ;;  %8412 = vmatmul.bf16.vlgmr.msrb.gmra.mxu3 %v15645_v56 }
 0x575   :  { %v12247_v5 = vld [vmem:[#allocation8 + $0x5b8] sm:$0xf0]  ;;  %v8054_v48 = vadd.f32 %v8053_v15, %v15874_v28  ;;  %8507 = vmatmul.bf16.gmra.mxu0 %v15574_v7 }
 0x576   :  { %8537 = vmatpush.bf16.msrb.mxu2 %v13078_v20  ;;  %8570 = vmatpush.bf16.msra.mxu0 %v11642_v55  ;;  %v12502_v20 = vor.u32 %v14586_v45, %v12501_v38  ;;  %v12250_v59 = vor.u32 %v14518_v19, %v12247_v5  ;;  %v14350_v54 = vld [vmem:[#allocation8 + $0x5c] sm:$0xf] }
 0x577   :  { %v11575_v17 = vld [vmem:[#allocation8 + $0x78] sm:$0xf0]  ;;  %v8072_v9 = vadd.f32 %v15878_v51, %v8054_v48  ;;  %8525 = vmatmul.bf16.gmra.mxu1 %v15576_v58 }
 0x578   :  { %8588 = vmatpush.bf16.msra.mxu1 %v11898_v13  ;;  %v14414_v55 = vld [vmem:[#allocation8 + $0x25c] sm:$0xf]  ;;  %8477 = vmatpush.bf16.msra.mxu3 %v12502_v20  ;;  %v11578_v34 = vor.u32 %v14350_v54, %v11575_v17  ;;  %v14570_v20 = vld [vmem:[#allocation8 + $0x734] sm:$0xf0]  ;;  %v8181_v5 = vpop.f32.mrf.mxu2 }
 0x579   :  { %v11831_v13 = vld [vmem:[#allocation8 + $0x278] sm:$0xf0]  ;;  %v8090_v4 = vadd.f32 %v15880_v16, %v8072_v9  ;;  %v12438_v48 = vor.u32 %v14570_v20, %v12437_v49  ;;  %8538 = vmatmul.bf16.vlgmr.msrb.gmra.mxu2 %v15581_v62 }
 0x57a   :  { %8602 = vmatpush.bf16.msra.mxu2 %v12282_v57  ;;  %8571 = vmatpush.bf16.msra.mxu0 %v11610_v10  ;;  %v11834_v24 = vor.u32 %v14414_v55, %v11831_v13  ;;  %v12469_v57 = vld [vmem:[#allocation8 + $0x758] sm:$0xf]  ;;  %v14510_v42 = vld [vmem:[#allocation8 + $0x55c] sm:$0xf]  ;;  %v15965_v51 = vpop.f32.mrf.mxu1  ;;  %v15972_v55 = vadd.f32 %v8181_v5, %v15948_v35 }
 0x57b   :  { %v12470_v28 = vor.u32 %v14578_v27, %v12469_v57  ;;  %v12215_v0 = vld [vmem:[#allocation8 + $0x578] sm:$0xf0]  ;;  %v15968_v10 = vadd.f32 %v15919_v18, %v8090_v4  ;;  %v12373_v5 = vld [vmem:[#allocation8 + $0x698] sm:$0xf] }
 0x57c   :  { %8589 = vmatpush.bf16.msra.mxu1 %v11866_v2  ;;  %v12218_v53 = vor.u32 %v14510_v42, %v12215_v0  ;;  %v14342_v40 = vld [vmem:[#allocation8 + $0x1c] sm:$0xf]  ;;  %v15963_v19 = vpop.f32.mrf.mxu0  ;;  %v8055_v16 = vpop.f32.mrf.mxu3 }
 0x57d   :  { %v11543_v36 = vld [vmem:[#allocation8 + $0x38] sm:$0xf0]  ;;  %8478 = vmatpush.bf16.msra.mxu3 %v12470_v28  ;;  %v8056_v17 = vadd.f32 %v8055_v16, %v15887_v30  ;;  %v12405_v28 = vld [vmem:[#allocation8 + $0x6d8] sm:$0xf] }
 0x57e   :  { %8603 = vmatpush.bf16.msra.mxu2 %v12250_v59  ;;  %v14406_v38 = vld [vmem:[#allocation8 + $0x21c] sm:$0xf]  ;;  %8572 = vmatpush.bf16.msra.mxu0 %v11578_v34  ;;  %v11546_v2 = vor.u32 %v14342_v40, %v11543_v36  ;;  %v14562_v30 = vld [vmem:[#allocation8 + $0x6f4] sm:$0xf0] }
 0x57f   :  { %v11799_v45 = vld [vmem:[#allocation8 + $0x238] sm:$0xf0]  ;;  %v8074_v27 = vadd.f32 %v15895_v33, %v8056_v17  ;;  %v12406_v35 = vor.u32 %v14562_v30, %v12405_v28 }
 0x580   :  { %8590 = vmatpush.bf16.msra.mxu1 %v11834_v24  ;;  %v11802_v15 = vor.u32 %v14406_v38, %v11799_v45  ;;  %v14502_v59 = vld [vmem:[#allocation8 + $0x51c] sm:$0xf] }
 0x581   :  { %v12183_v54 = vld [vmem:[#allocation8 + $0x538] sm:$0xf0]  ;;  %8479 = vmatpush.bf16.msra.mxu3 %v12438_v48  ;;  %v14554_v48 = vld [vmem:[#allocation8 + $0x6b4] sm:$0xf0] }
 0x582   :  { %8604 = vmatpush.bf16.msra.mxu2 %v12218_v53  ;;  %v12186_v13 = vor.u32 %v14502_v59, %v12183_v54  ;;  %v14654_v18 = vld [vmem:[#allocation8 + $0x9dc] sm:$0xf]  ;;  %8573 = vmatpush.bf16.msra.mxu0 %v11546_v2  ;;  %v8092_v53 = vadd.f32 %v15897_v43, %v8074_v27  ;;  %v15982_v49 = vpop.f32.mrf.mxu1  ;;  %v8184_v54 = vpop.f32.mrf.mxu2  ;;  %v12374_v17 = vor.u32 %v14554_v48, %v12373_v5 }
 0x583   :  { %v12791_v9 = vld [vmem:[#allocation8 + $0x9f8] sm:$0xf0] }
 0x584   :  { %v14718_v34 = vld [vmem:[#allocation8 + $0xbdc] sm:$0xf]  ;;  %v12794_v24 = vor.u32 %v14654_v18, %v12791_v9  ;;  %8591 = vmatpush.bf16.msra.mxu1 %v11802_v15  ;;  %v15980_v15 = vpop.f32.mrf.mxu0  ;;  %v15985_v20 = vadd.f32 %v15929_v12, %v8092_v53  ;;  %v8058_v43 = vpop.f32.mrf.mxu3  ;;  %v15989_v9 = vadd.f32 %v8184_v54, %v15951_v44  ;;  %8417 = vmatmul.bf16.gmra.mxu3 %v15657_v1 }
 0x585   :  { %v13047_v57 = vld [vmem:[#allocation8 + $0xbf8] sm:$0xf0]  ;;  %8480 = vmatpush.bf16.msra.mxu3 %v12406_v35  ;;  %v8059_v18 = vadd.f32 %v8058_v43, %v15904_v22  ;;  %v14546_v35 = vld [vmem:[#allocation8 + $0x674] sm:$0xf0]  ;;  %8574 = vmatmul.bf16.vlgmr.msra.gmra.mxu0 %v15308_v50 }
 0x586   :  { %v13050_v42 = vor.u32 %v14718_v34, %v13047_v57  ;;  %v14494_v0 = vld [vmem:[#allocation8 + $0x4dc] sm:$0xf]  ;;  %8605 = vmatpush.bf16.msra.mxu2 %v12186_v13  ;;  %8638 = vmatpush.bf16.msrb.mxu0 %v12794_v24  ;;  %v14538_v43 = vld [vmem:[#allocation8 + $0x634] sm:$0xf0] }
 0x587   :  { %v12151_v4 = vld [vmem:[#allocation8 + $0x4f8] sm:$0xf0]  ;;  %v8077_v28 = vadd.f32 %v15908_v29, %v8059_v18  ;;  %8592 = vmatmul.bf16.vlgmr.msra.gmra.mxu1 %v15343_v21 }
 0x588   :  { %v12154_v40 = vor.u32 %v14494_v0, %v12151_v4  ;;  %v14646_v36 = vld [vmem:[#allocation8 + $0x99c] sm:$0xf]  ;;  %8656 = vmatpush.bf16.msrb.mxu1 %v13050_v42  ;;  %v12341_v0 = vld [vmem:[#allocation8 + $0x658] sm:$0xf] }
 0x589   :  { %v12759_v38 = vld [vmem:[#allocation8 + $0x9b8] sm:$0xf0]  ;;  %8481 = vmatpush.bf16.msra.mxu3 %v12374_v17  ;;  %v12342_v22 = vor.u32 %v14546_v35, %v12341_v0  ;;  %v8095_v44 = vadd.f32 %v15910_v63, %v8077_v28  ;;  %v13557_v28 = vld [vmem:[#allocation8 + $0xfd8] sm:$0xf]  ;;  %8543 = vmatmul.bf16.gmra.mxu2 %v15590_v11 }
 0x58a   :  { %v14710_v33 = vld [vmem:[#allocation8 + $0xb9c] sm:$0xf]  ;;  %v12762_v45 = vor.u32 %v14646_v36, %v12759_v38  ;;  %8606 = vmatpush.bf16.msra.mxu2 %v12154_v40  ;;  %v15995_v29 = vpop.f32.mrf.mxu1  ;;  %v8186_v17 = vpop.f32.mrf.mxu2 }
 0x58b   :  { %v13015_v2 = vld [vmem:[#allocation8 + $0xbb8] sm:$0xf0] }
 0x58c   :  { %v13018_v16 = vor.u32 %v14710_v33, %v13015_v2  ;;  %v14486_v59 = vld [vmem:[#allocation8 + $0x49c] sm:$0xf]  ;;  %8639 = vmatpush.bf16.msrb.mxu0 %v12762_v45  ;;  %v15993_v2 = vpop.f32.mrf.mxu0  ;;  %v8060_v63 = vpop.f32.mrf.mxu3 }
 0x58d   :  { %v12119_v13 = vld [vmem:[#allocation8 + $0x4b8] sm:$0xf0]  ;;  %8482 = vmatpush.bf16.msra.mxu3 %v12342_v22 }
 0x58e   :  { %v12122_v34 = vor.u32 %v14486_v59, %v12119_v13  ;;  %v14638_v24 = vld [vmem:[#allocation8 + $0x95c] sm:$0xf]  ;;  %8657 = vmatpush.bf16.msrb.mxu1 %v13018_v16  ;;  %v15998_v16 = vadd.f32 %v15942_v60, %v8095_v44  ;;  %v12309_v59 = vld [vmem:[#allocation8 + $0x618] sm:$0xf] }
 0x58f   :  { %v12727_v57 = vld [vmem:[#allocation8 + $0x978] sm:$0xf0]  ;;  %v12310_v13 = vor.u32 %v14538_v43, %v12309_v59  ;;  %v14842_v59 = vld [vmem:[#allocation8 + $0xfb4] sm:$0xf0] }
 0x590   :  { %v14702_v12 = vld [vmem:[#allocation8 + $0xb5c] sm:$0xf]  ;;  %v12730_v27 = vor.u32 %v14638_v24, %v12727_v57  ;;  %8607 = vmatpush.bf16.msra.mxu2 %v12122_v34 }
 0x591   :  { %v12983_v42 = vld [vmem:[#allocation8 + $0xb78] sm:$0xf0]  ;;  %8483 = vmatpush.bf16.msra.mxu3 %v12310_v13 }
 0x592   :  { %v12986_v30 = vor.u32 %v14702_v12, %v12983_v42  ;;  %v14478_v4 = vld [vmem:[#allocation8 + $0x45c] sm:$0xf]  ;;  %8640 = vmatpush.bf16.msrb.mxu0 %v12730_v27  ;;  %v16004_v63 = vpop.f32.mrf.mxu2 }
 0x593   :  { %v12087_v53 = vld [vmem:[#allocation8 + $0x478] sm:$0xf0] }
 0x594   :  { %v12090_v40 = vor.u32 %v14478_v4, %v12087_v53  ;;  %v14630_v36 = vld [vmem:[#allocation8 + $0x91c] sm:$0xf]  ;;  %8658 = vmatpush.bf16.msrb.mxu1 %v12986_v30  ;;  %v14850_v30 = vld [vmem:[#allocation8 + $0xff4] sm:$0xf0]  ;;  %8484 = vmatmul.bf16.vlgmr.msra.gmra.mxu3 %v15415_v6 }
 0x595   :  { %v12695_v38 = vld [vmem:[#allocation8 + $0x938] sm:$0xf0]  ;;  %v13558_v35 = vor.u32 %v14850_v30, %v13557_v28  ;;  %v13493_v28 = vld [vmem:[#allocation8 + $0xf58] sm:$0xf]  ;;  %8579 = vmatmul.bf16.gmra.mxu0 %v15520_v37 }
 0x596   :  { %v14694_v33 = vld [vmem:[#allocation8 + $0xb1c] sm:$0xf]  ;;  %v12698_v5 = vor.u32 %v14630_v36, %v12695_v38  ;;  %8608 = vmatpush.bf16.msra.mxu2 %v12090_v40  ;;  %v8222_v38 = vpop.f32.mrf.mxu0  ;;  %v14834_v30 = vld [vmem:[#allocation8 + $0xf74] sm:$0xf0] }
 0x597   :  { %v12951_v45 = vld [vmem:[#allocation8 + $0xb38] sm:$0xf0]  ;;  %8548 = vmatpush.bf16.msrb.mxu3 %v13558_v35  ;;  %v13494_v35 = vor.u32 %v14834_v30, %v13493_v28  ;;  %v13429_v30 = vld [vmem:[#allocation8 + $0xed8] sm:$0xf]  ;;  %8597 = vmatmul.bf16.gmra.mxu1 %v15528_v47 }
 0x598   :  { %v12954_v48 = vor.u32 %v14694_v33, %v12951_v45  ;;  %v14470_v54 = vld [vmem:[#allocation8 + $0x41c] sm:$0xf]  ;;  %8641 = vmatpush.bf16.msrb.mxu0 %v12698_v5  ;;  %v8240_v33 = vpop.f32.mrf.mxu1 }
 0x599   :  { %v12055_v18 = vld [vmem:[#allocation8 + $0x438] sm:$0xf0] }
 0x59a   :  { %v12058_v34 = vor.u32 %v14470_v54, %v12055_v18  ;;  %v14622_v24 = vld [vmem:[#allocation8 + $0x8dc] sm:$0xf]  ;;  %8659 = vmatpush.bf16.msrb.mxu1 %v12954_v48  ;;  %v13525_v48 = vld [vmem:[#allocation8 + $0xf98] sm:$0xf]  ;;  %v8125_v54 = vpop.f32.mrf.mxu3 }
 0x59b   :  { %v12663_v57 = vld [vmem:[#allocation8 + $0x8f8] sm:$0xf0]  ;;  %v13526_v17 = vor.u32 %v14842_v59, %v13525_v48  ;;  %v8126_v18 = vadd.f32 %v8125_v54, %v15968_v10  ;;  %v13461_v48 = vld [vmem:[#allocation8 + $0xf18] sm:$0xf]  ;;  %v16010_v54 = vpop.f32.mrf.mxu2 }
 0x59c   :  { %v14686_v12 = vld [vmem:[#allocation8 + $0xadc] sm:$0xf]  ;;  %v12666_v27 = vor.u32 %v14622_v24, %v12663_v57  ;;  %8609 = vmatpush.bf16.msra.mxu2 %v12058_v34  ;;  %v14826_v59 = vld [vmem:[#allocation8 + $0xf34] sm:$0xf0] }
 0x59d   :  { %v12919_v60 = vld [vmem:[#allocation8 + $0xaf8] sm:$0xf0]  ;;  %8549 = vmatpush.bf16.msrb.mxu3 %v13526_v17 }
 0x59e   :  { %v12922_v42 = vor.u32 %v14686_v12, %v12919_v60  ;;  %v14782_v0 = vld [vmem:[#allocation8 + $0xddc] sm:$0xf]  ;;  %8642 = vmatpush.bf16.msrb.mxu0 %v12666_v27  ;;  %v8287_v38 = vpop.f32.mrf.mxu0 }
 0x59f   :  { %v13303_v4 = vld [vmem:[#allocation8 + $0xdf8] sm:$0xf0]  ;;  %8610 = vmatmul.bf16.vlgmr.msra.gmra.mxu2 %v15380_v14  ;;  %v14852_v14 = vld [vmem:[#allocation11 + $0x8] sm:$0xff] }
 0x5a0   :  { %v13306_v22 = vor.u32 %v14782_v0, %v13303_v4  ;;  %v14614_v53 = vld [vmem:[#allocation8 + $0x89c] sm:$0xf]  ;;  %8660 = vmatpush.bf16.msrb.mxu1 %v12922_v42  ;;  %v16008_v0 = vperm.slane %v15924_v32, 5  ;;  %v8305_v33 = vpop.f32.mrf.mxu1 }
 0x5a1   :  { %v12631_v44 = vld [vmem:[#allocation8 + $0x8b8] sm:$0xf0]  ;;  %8550 = vmatpush.bf16.msrb.mxu3 %v13494_v35  ;;  %v14818_v35 = vld [vmem:[#allocation8 + $0xef4] sm:$0xf0] }
 0x5a2   :  { %v14678_v40 = vld [vmem:[#allocation8 + $0xa9c] sm:$0xf]  ;;  %v12634_v45 = vor.u32 %v14614_v53, %v12631_v44  ;;  %8674 = vmatpush.bf16.msrb.mxu2 %v13306_v22  ;;  %v8288_v17 = vadd.f32 %v8287_v38, %v16008_v0 }
 0x5a3   :  { %v12887_v36 = vld [vmem:[#allocation8 + $0xab8] sm:$0xf0] }
 0x5a4   :  { %v12890_v5 = vor.u32 %v14678_v40, %v12887_v36  ;;  %v14774_v43 = vld [vmem:[#allocation8 + $0xd9c] sm:$0xf]  ;;  %8643 = vmatpush.bf16.msrb.mxu0 %v12634_v45  ;;  %8489 = vmatmul.bf16.gmra.mxu3 %v15536_v25 }
 0x5a5   :  { %v13271_v13 = vld [vmem:[#allocation8 + $0xdb8] sm:$0xf0] }
 0x5a6   :  { %v13274_v34 = vor.u32 %v14774_v43, %v13271_v13  ;;  %v14606_v24 = vld [vmem:[#allocation8 + $0x85c] sm:$0xf]  ;;  %8661 = vmatpush.bf16.msrb.mxu1 %v12890_v5  ;;  %v8127_v43 = vpop.f32.mrf.mxu3  ;;  %v13462_v13 = vor.u32 %v14826_v59, %v13461_v48 }
 0x5a7   :  { %v12599_v57 = vld [vmem:[#allocation8 + $0x878] sm:$0xf0] }
 0x5a8   :  { %v14670_v12 = vld [vmem:[#allocation8 + $0xa5c] sm:$0xf]  ;;  %v12602_v27 = vor.u32 %v14606_v24, %v12599_v57  ;;  %8675 = vmatpush.bf16.msrb.mxu2 %v13274_v34  ;;  %v8128_v24 = vadd.f32 %v8127_v43, %v15985_v20  ;;  %8551 = vmatpush.bf16.msrb.mxu3 %v13462_v13  ;;  %v14856_v13 = vld [vmem:[#allocation11 + $0x28] sm:$0xff] }
 0x5a9   :  { %v12855_v60 = vld [vmem:[#allocation8 + $0xa78] sm:$0xf0] }
 0x5aa   :  { %v12858_v42 = vor.u32 %v14670_v12, %v12855_v60  ;;  %v14766_v4 = vld [vmem:[#allocation8 + $0xd5c] sm:$0xf]  ;;  %8644 = vmatpush.bf16.msrb.mxu0 %v12602_v27  ;;  %v16014_v12 = vadd.f32 %v8305_v33, %v8288_v17  ;;  %v14858_v60 = vld [vmem:[#allocation11 + $0x38] sm:$0xff]  ;;  %v8721_v28 = vmax.f32 %v8128_v24, 0.0  ;;  %v13365_v24 = vld [vmem:[#allocation8 + $0xe58] sm:$0xf] }
 0x5ab   :  { %v13239_v22 = vld [vmem:[#allocation8 + $0xd78] sm:$0xf0]  ;;  %v14866_v27 = vld [vmem:[#allocation11 + $0x78] sm:$0xff] }
 0x5ac   :  { %v13242_v10 = vor.u32 %v14766_v4, %v13239_v22  ;;  %v14598_v53 = vld [vmem:[#allocation8 + $0x81c] sm:$0xf]  ;;  %8662 = vmatpush.bf16.msrb.mxu1 %v12858_v42  ;;  %v8713_v42 = vmax.f32 %v8126_v18, 0.0  ;;  %v13430_v4 = vor.u32 %v14818_v35, %v13429_v30  ;;  %v14855_v30 = vld [vmem:[#allocation11 + $0x20] sm:$0xff] }
 0x5ad   :  { %v12567_v44 = vld [vmem:[#allocation8 + $0x838] sm:$0xf0] }
 0x5ae   :  { %v14662_v40 = vld [vmem:[#allocation8 + $0xa1c] sm:$0xf]  ;;  %v12570_v45 = vor.u32 %v14598_v53, %v12567_v44  ;;  %8676 = vmatpush.bf16.msrb.mxu2 %v13242_v10  ;;  %v16018_v10 = vpack.c.bf16 %v8721_v28, %v8713_v42  ;;  %v8289_v53 = vpop.f32.mrf.mxu0  ;;  %v8307_v44 = vpop.f32.mrf.mxu1  ;;  %8552 = vmatpush.bf16.msrb.mxu3 %v13430_v4 }
 0x5af   :  { %v12823_v36 = vld [vmem:[#allocation8 + $0xa38] sm:$0xf0]  ;;  %v8130_v33 = vpop.f32.mrf.mxu3  ;;  %8615 = vmatmul.bf16.gmra.mxu2 %v15532_v26 }
 0x5b0   :  { %v12826_v5 = vor.u32 %v14662_v40, %v12823_v36  ;;  %v14758_v32 = vld [vmem:[#allocation8 + $0xd1c] sm:$0xf]  ;;  %8645 = vmatpush.bf16.msrb.mxu0 %v12570_v45  ;;  %v13397_v40 = vld [vmem:[#allocation8 + $0xe98] sm:$0xf]  ;;  %v16022_v45 = vpop.f32.mrf.mxu2 }
 0x5b1   :  { %v13207_v34 = vld [vmem:[#allocation8 + $0xd38] sm:$0xf0]  ;;  %v14810_v36 = vld [vmem:[#allocation8 + $0xeb4] sm:$0xf0] }
 0x5b2   :  { %v13210_v57 = vor.u32 %v14758_v32, %v13207_v34  ;;  %8663 = vmatpush.bf16.msrb.mxu1 %v12826_v5  ;;  %v14750_v22 = vld [vmem:[#allocation8 + $0xcdc] sm:$0xf]  ;;  %v8290_v5 = vadd.f32 %v8289_v53, %v16008_v0  ;;  %v13398_v48 = vor.u32 %v14810_v36, %v13397_v40  ;;  %v16026_v32 = vadd.f32 %v8130_v33, %v15998_v16  ;;  %v14864_v34 = vld [vmem:[#allocation11 + $0x68] sm:$0xff]  ;;  %v14863_v16 = vld [vmem:[#allocation11 + $0x60] sm:$0xff] }
 0x5b3   :  { %v13175_v20 = vld [vmem:[#allocation8 + $0xcf8] sm:$0xf0]  ;;  %v14854_v33 = vld [vmem:[#allocation11 + $0x18] sm:$0xff]  ;;  %8646 = vmatmul.bf16.vlgmr.msrb.gmra.mxu0 %v15452_v41 }
 0x5b4   :  { %8677 = vmatpush.bf16.msrb.mxu2 %v13210_v57  ;;  %v13178_v50 = vor.u32 %v14750_v22, %v13175_v20  ;;  %9266 = vmatpush.bf16.msra.mxu0 %v14858_v60  ;;  %v14857_v21 = vld [vmem:[#allocation11 + $0x30] sm:$0xff]  ;;  %v16028_v17 = vadd.f32 %v8307_v44, %v8290_v5  ;;  %v14862_v5 = vld [vmem:[#allocation11 + $0x58] sm:$0xff] }
 0x5b5   :  { %v14865_v18 = vld [vmem:[#allocation11 + $0x70] sm:$0xff]  ;;  %8553 = vmatpush.bf16.msrb.mxu3 %v13398_v48  ;;  %8664 = vmatmul.bf16.vlgmr.msrb.gmra.mxu1 %v15490_v31 }
 0x5b6   :  { %9284 = vmatpush.bf16.msra.mxu1 %v14866_v27  ;;  %v14742_v38 = vld [vmem:[#allocation8 + $0xc9c] sm:$0xf]  ;;  %v14802_v57 = vld [vmem:[#allocation8 + $0xe74] sm:$0xf0]  ;;  %v8292_v35 = vpop.f32.mrf.mxu0  ;;  %v8310_v4 = vpop.f32.mrf.mxu1 }
 0x5b7   :  { %v13143_v59 = vld [vmem:[#allocation8 + $0xcb8] sm:$0xf0]  ;;  %v13366_v60 = vor.u32 %v14802_v57, %v13365_v24  ;;  %v13333_v22 = vld [vmem:[#allocation8 + $0xe18] sm:$0xf]  ;;  %v8293_v53 = vadd.f32 %v8292_v35, %v16008_v0  ;;  %v14860_v35 = vld [vmem:[#allocation11 + $0x48] sm:$0xff] }
 0x5b8   :  { %8678 = vmatpush.bf16.msrb.mxu2 %v13178_v50  ;;  %v13146_v43 = vor.u32 %v14742_v38, %v13143_v59  ;;  %9267 = vmatpush.bf16.msra.mxu0 %v14857_v21  ;;  %v14734_v27 = vld [vmem:[#allocation8 + $0xc5c] sm:$0xf]  ;;  %v14794_v20 = vld [vmem:[#allocation8 + $0xe34] sm:$0xf0]  ;;  %v8132_v21 = vpop.f32.mrf.mxu3 }
 0x5b9   :  { %v13111_v42 = vld [vmem:[#allocation8 + $0xc78] sm:$0xf0]  ;;  %8554 = vmatpush.bf16.msrb.mxu3 %v13366_v60  ;;  %v13334_v44 = vor.u32 %v14794_v20, %v13333_v22  ;;  %v16031_v38 = vadd.f32 %v8310_v4, %v8293_v53 }
 0x5ba   :  { %9285 = vmatpush.bf16.msra.mxu1 %v14865_v18  ;;  %v13114_v28 = vor.u32 %v14734_v27, %v13111_v42  ;;  %v14726_v50 = vld [vmem:[#allocation8 + $0xc1c] sm:$0xf]  ;;  %v8258_v18 = vpop.f32.mrf.mxu2 }
 0x5bb   :  { %v13079_v40 = vld [vmem:[#allocation8 + $0xc38] sm:$0xf0] }
 0x5bc   :  { %8679 = vmatpush.bf16.msrb.mxu2 %v13146_v43  ;;  %9268 = vmatpush.bf16.msra.mxu0 %v14856_v13  ;;  %v13082_v36 = vor.u32 %v14726_v50, %v13079_v40  ;;  %v14590_v48 = vld [vmem:[#allocation8 + $0x7dc] sm:$0xf]  ;;  %v14874_v43 = vld [vmem:[#allocation11 + $0xb8] sm:$0xff]  ;;  %v14872_v50 = vld [vmem:[#allocation11 + $0xa8] sm:$0xff] }
 0x5bd   :  { %v12535_v59 = vld [vmem:[#allocation8 + $0x7f8] sm:$0xf0]  ;;  %8555 = vmatpush.bf16.msrb.mxu3 %v13334_v44 }
 0x5be   :  { %9286 = vmatpush.bf16.msra.mxu1 %v14864_v34  ;;  %v12538_v0 = vor.u32 %v14590_v48, %v12535_v59  ;;  %v14853_v13 = vld [vmem:[#allocation11 + $0x10] sm:$0xff]  ;;  %v8294_v37 = vpop.f32.mrf.mxu0  ;;  %v8312_v34 = vpop.f32.mrf.mxu1  ;;  %v14871_v59 = vld [vmem:[#allocation11 + $0xa0] sm:$0xff] }
 0x5bf   :  { %v14861_v47 = vld [vmem:[#allocation11 + $0x50] sm:$0xff] }
 0x5c0   :  { %8680 = vmatpush.bf16.msrb.mxu2 %v13114_v28  ;;  %9269 = vmatpush.bf16.msra.mxu0 %v14855_v30  ;;  %v14582_v24 = vld [vmem:[#allocation8 + $0x79c] sm:$0xf]  ;;  %v8197_v60 = vpop.f32.mrf.mxu3 }
 0x5c1   :  { %8620 = vmatpush.bf16.msra.mxu3 %v12538_v0  ;;  %v12503_v57 = vld [vmem:[#allocation8 + $0x7b8] sm:$0xf0]  ;;  %v8198_v30 = vadd.f32 %v8197_v60, %v15959_v52  ;;  %v14851_v52 = vld [vmem:[#allocation11] sm:$0xff] }
 0x5c2   :  { %9287 = vmatpush.bf16.msra.mxu1 %v14863_v16  ;;  %v8323_v27 = vpop.f32.mrf.mxu2  ;;  %v12506_v42 = vor.u32 %v14582_v24, %v12503_v57  ;;  %v14873_v28 = vld [vmem:[#allocation11 + $0xb0] sm:$0xff]  ;;  %8556 = vmatmul.bf16.vlgmr.msrb.gmra.mxu3 %v15645_v56 }
 0x5c3   :  { %v16039_v16 = vadd.f32 %v8323_v27, %v16014_v12  ;;  %v8216_v4 = vadd.f32 %v15963_v19, %v8198_v30  ;;  %v14574_v22 = vld [vmem:[#allocation8 + $0x75c] sm:$0xf]  ;;  %v14859_v19 = vld [vmem:[#allocation11 + $0x40] sm:$0xff]  ;;  %v14888_v30 = vld [vmem:[#allocation11 + $0x128] sm:$0xff]  ;;  %8651 = vmatmul.bf16.gmra.mxu0 %v15574_v7 }
 0x5c4   :  { %8681 = vmatpush.bf16.msrb.mxu2 %v13082_v36  ;;  %9270 = vmatpush.bf16.msra.mxu0 %v14854_v33  ;;  %v12471_v20 = vld [vmem:[#allocation8 + $0x778] sm:$0xf0] }
 0x5c5   :  { %8621 = vmatpush.bf16.msra.mxu3 %v12506_v42  ;;  %v12474_v21 = vor.u32 %v14574_v22, %v12471_v20  ;;  %v8234_v18 = vadd.f32 %v15965_v51, %v8216_v4  ;;  %v14566_v40 = vld [vmem:[#allocation8 + $0x71c] sm:$0xf]  ;;  %v14868_v22 = vld [vmem:[#allocation11 + $0x88] sm:$0xff]  ;;  %8669 = vmatmul.bf16.gmra.mxu1 %v15576_v58 }
 0x5c6   :  { %9288 = vmatpush.bf16.msra.mxu1 %v14862_v5  ;;  %v16043_v53 = vpop.f32.mrf.mxu0  ;;  %v16045_v12 = vpop.f32.mrf.mxu1  ;;  %v12439_v36 = vld [vmem:[#allocation8 + $0x738] sm:$0xf0] }
 0x5c7   :  { %v16048_v44 = vadd.f32 %v16004_v63, %v8234_v18  ;;  %v12442_v48 = vor.u32 %v14566_v40, %v12439_v36  ;;  %v14890_v63 = vld [vmem:[#allocation11 + $0x138] sm:$0xff]  ;;  %v12407_v37 = vld [vmem:[#allocation8 + $0x6f8] sm:$0xf0]  ;;  %v14867_v36 = vld [vmem:[#allocation11 + $0x80] sm:$0xff]  ;;  %8682 = vmatmul.bf16.vlgmr.msrb.gmra.mxu2 %v15581_v62 }
 0x5c8   :  { %9302 = vmatpush.bf16.msra.mxu2 %v14874_v43  ;;  %9271 = vmatpush.bf16.msra.mxu0 %v14853_v13  ;;  %v8199_v33 = vpop.f32.mrf.mxu3  ;;  %v14558_v13 = vld [vmem:[#allocation8 + $0x6dc] sm:$0xf] }
 0x5c9   :  { %8622 = vmatpush.bf16.msra.mxu3 %v12474_v21  ;;  %v8200_v51 = vadd.f32 %v8199_v33, %v15972_v55  ;;  %v12410_v34 = vor.u32 %v14558_v13, %v12407_v37  ;;  %v14889_v41 = vld [vmem:[#allocation11 + $0x130] sm:$0xff]  ;;  %v14884_v37 = vld [vmem:[#allocation11 + $0x108] sm:$0xff] }
 0x5ca   :  { %9289 = vmatpush.bf16.msra.mxu1 %v14861_v47  ;;  %v8325_v5 = vpop.f32.mrf.mxu2  ;;  %v14870_v47 = vld [vmem:[#allocation11 + $0x98] sm:$0xff]  ;;  %v14550_v24 = vld [vmem:[#allocation8 + $0x69c] sm:$0xf] }
 0x5cb   :  { %v16052_v0 = vadd.f32 %v8325_v5, %v16028_v17  ;;  %v8218_v43 = vadd.f32 %v15980_v15, %v8200_v51  ;;  %v12375_v57 = vld [vmem:[#allocation8 + $0x6b8] sm:$0xf0] }
 0x5cc   :  { %9303 = vmatpush.bf16.msra.mxu2 %v14873_v28  ;;  %9272 = vmatpush.bf16.msra.mxu0 %v14852_v14  ;;  %v12378_v42 = vor.u32 %v14550_v24, %v12375_v57  ;;  %v14869_v28 = vld [vmem:[#allocation11 + $0x90] sm:$0xff] }
 0x5cd   :  { %8623 = vmatpush.bf16.msra.mxu3 %v12442_v48  ;;  %v8236_v55 = vadd.f32 %v15982_v49, %v8218_v43  ;;  %v14534_v18 = vld [vmem:[#allocation8 + $0x61c] sm:$0xf] }
 0x5ce   :  { %9290 = vmatpush.bf16.msra.mxu1 %v14860_v35  ;;  %v16060_v31 = vpop.f32.mrf.mxu0  ;;  %v16062_v17 = vpop.f32.mrf.mxu1  ;;  %v14542_v35 = vld [vmem:[#allocation8 + $0x65c] sm:$0xf] }
 0x5cf   :  { %v16065_v15 = vadd.f32 %v16010_v54, %v8236_v55  ;;  %v12343_v54 = vld [vmem:[#allocation8 + $0x678] sm:$0xf0]  ;;  %v16086_v55 = vld [vmem:[#allocation10] sm:$0xff] }
 0x5d0   :  { %9304 = vmatpush.bf16.msra.mxu2 %v14872_v50  ;;  %9273 = vmatpush.bf16.msra.mxu0 %v14851_v52  ;;  %v8202_v60 = vpop.f32.mrf.mxu3  ;;  %v12346_v4 = vor.u32 %v14542_v35, %v12343_v54  ;;  %v12311_v52 = vld [vmem:[#allocation8 + $0x638] sm:$0xf0]  ;;  %v4988_v62 = vperm.slane %v16086_v55, 6 }
 0x5d1   :  { %8624 = vmatpush.bf16.msra.mxu3 %v12410_v34  ;;  %v8203_v26 = vadd.f32 %v8202_v60, %v15989_v9  ;;  %v12314_v40 = vor.u32 %v14534_v18, %v12311_v52  ;;  %v14846_v33 = vld [vmem:[#allocation8 + $0xfdc] sm:$0xf] }
 0x5d2   :  { %9291 = vmatpush.bf16.msra.mxu1 %v14859_v19  ;;  %v8328_v27 = vpop.f32.mrf.mxu2  ;;  %v13559_v5 = vld [vmem:[#allocation8 + $0xff8] sm:$0xf0]  ;;  %8561 = vmatmul.bf16.gmra.mxu3 %v15657_v1 }
 0x5d3   :  { %v16069_v49 = vadd.f32 %v8328_v27, %v16031_v38  ;;  %v8221_v14 = vadd.f32 %v15993_v2, %v8203_v26  ;;  %v14887_v38 = vld [vmem:[#allocation11 + $0x120] sm:$0xff]  ;;  %v14885_v51 = vld [vmem:[#allocation11 + $0x110] sm:$0xff]  ;;  %9274 = vmatmul.bf16.vlgmr.msra.gmra.mxu0 %v15773_v39 }
 0x5d4   :  { %9305 = vmatpush.bf16.msra.mxu2 %v14871_v59  ;;  %9338 = vmatpush.bf16.msrb.mxu0 %v14890_v63  ;;  %v14838_v63 = vld [vmem:[#allocation8 + $0xf9c] sm:$0xf]  ;;  %v14883_v27 = vld [vmem:[#allocation11 + $0x100] sm:$0xff] }
 0x5d5   :  { %8625 = vmatpush.bf16.msra.mxu3 %v12378_v42  ;;  %v8239_v20 = vadd.f32 %v15995_v29, %v8221_v14  ;;  %v14886_v29 = vld [vmem:[#allocation11 + $0x118] sm:$0xff]  ;;  %v13527_v7 = vld [vmem:[#allocation8 + $0xfb8] sm:$0xf0]  ;;  %9292 = vmatmul.bf16.vlgmr.msra.gmra.mxu1 %v15853_v8 }
 0x5d6   :  { %v16073_v50 = vpop.f32.mrf.mxu0  ;;  %v16075_v21 = vpop.f32.mrf.mxu1  ;;  %v13530_v13 = vor.u32 %v14838_v63, %v13527_v7  ;;  %v14830_v34 = vld [vmem:[#allocation8 + $0xf5c] sm:$0xf]  ;;  %v14896_v7 = vld [vmem:[#allocation11 + $0x168] sm:$0xff] }
 0x5d7   :  { %v16078_v9 = vadd.f32 %v16022_v45, %v8239_v20  ;;  %v13562_v45 = vor.u32 %v14846_v33, %v13559_v5  ;;  %v14822_v42 = vld [vmem:[#allocation8 + $0xf1c] sm:$0xf]  ;;  %8687 = vmatmul.bf16.gmra.mxu2 %v15590_v11  ;;  %v8726_v11 = vmax.f32 %v15781_v61, 0.0  ;;  %v14895_v61 = vld [vmem:[#allocation11 + $0x160] sm:$0xff] }
 0x5d8   :  { %9306 = vmatpush.bf16.msra.mxu2 %v14870_v47  ;;  %9339 = vmatpush.bf16.msrb.mxu0 %v14889_v41  ;;  %v8204_v2 = vpop.f32.mrf.mxu3  ;;  %v13495_v47 = vld [vmem:[#allocation8 + $0xf78] sm:$0xf0] }
 0x5d9   :  { %8626 = vmatpush.bf16.msra.mxu3 %v12346_v4  ;;  %v13498_v41 = vor.u32 %v14830_v34, %v13495_v47  ;;  %v14814_v20 = vld [vmem:[#allocation8 + $0xedc] sm:$0xf]  ;;  %v8742_v47 = vpack.c.bf16 %v8726_v11, %v8726_v11 }
 0x5da   :  { %v8330_v19 = vpop.f32.mrf.mxu2  ;;  %v14806_v39 = vld [vmem:[#allocation8 + $0xe9c] sm:$0xf] }
 0x5db   :  { %v13335_v34 = vld [vmem:[#allocation8 + $0xe38] sm:$0xf0] }
 0x5dc   :  { %9307 = vmatpush.bf16.msra.mxu2 %v14869_v28  ;;  %9340 = vmatpush.bf16.msrb.mxu0 %v14888_v30  ;;  %v13463_v28 = vld [vmem:[#allocation8 + $0xf38] sm:$0xf0] }
 0x5dd   :  { %8627 = vmatpush.bf16.msra.mxu3 %v12314_v40  ;;  %v13466_v35 = vor.u32 %v14822_v42, %v13463_v28  ;;  %v13399_v40 = vld [vmem:[#allocation8 + $0xeb8] sm:$0xf0]  ;;  %v14894_v28 = vld [vmem:[#allocation11 + $0x158] sm:$0xff] }
 0x5de   :  { %v8366_v48 = vpop.f32.mrf.mxu0  ;;  %v8384_v59 = vpop.f32.mrf.mxu1  ;;  %v13402_v33 = vor.u32 %v14806_v39, %v13399_v40  ;;  %v14879_v40 = vld [vmem:[#allocation11 + $0xe0] sm:$0xff] }
 0x5df   :  { %v14798_v48 = vld [vmem:[#allocation8 + $0xe5c] sm:$0xf] }
 0x5e0   :  { %9308 = vmatpush.bf16.msra.mxu2 %v14868_v22  ;;  %9341 = vmatpush.bf16.msrb.mxu0 %v14887_v38  ;;  %v8269_v43 = vpop.f32.mrf.mxu3  ;;  %v13431_v38 = vld [vmem:[#allocation8 + $0xef8] sm:$0xf0] }
 0x5e1   :  { %8692 = vmatpush.bf16.msrb.mxu3 %v13562_v45  ;;  %v8270_v24 = vadd.f32 %v8269_v43, %v16048_v44  ;;  %v13434_v18 = vor.u32 %v14814_v20, %v13431_v38  ;;  %v14897_v45 = vld [vmem:[#allocation11 + $0x170] sm:$0xff] }
 0x5e2   :  { %v16084_v58 = vpop.f32.mrf.mxu2  ;;  %v13367_v59 = vld [vmem:[#allocation8 + $0xe78] sm:$0xf0]  ;;  %8628 = vmatmul.bf16.vlgmr.msra.gmra.mxu3 %v15415_v6  ;;  %v14880_v6 = vld [vmem:[#allocation11 + $0xe8] sm:$0xff] }
 0x5e3   :  { %v8714_v44 = vmax.f32 %v8270_v24, 0.0  ;;  %v13370_v63 = vor.u32 %v14798_v48, %v13367_v59  ;;  %9279 = vmatmul.bf16.gmra.mxu0 %v8742_v47  ;;  %v14893_v20 = vld [vmem:[#allocation11 + $0x150] sm:$0xff] }
 0x5e4   :  { %9309 = vmatpush.bf16.msra.mxu2 %v14867_v36  ;;  %9342 = vmatpush.bf16.msrb.mxu0 %v14886_v29  ;;  %v14877_v59 = vld [vmem:[#allocation11 + $0xd0] sm:$0xff] }
 0x5e5   :  { %8693 = vmatpush.bf16.msrb.mxu3 %v13530_v13 }
 0x5e6   :  { %v8431_v57 = vpop.f32.mrf.mxu0  ;;  %v8449_v60 = vpop.f32.mrf.mxu1 }
 0x5e7   :  { %v8432_v14 = vadd.f32 %v8431_v57, %v4988_v62  ;;  %9310 = vmatmul.bf16.vlgmr.msra.gmra.mxu2 %v15938_v3 }
 0x5e8   :  { %9343 = vmatpush.bf16.msrb.mxu0 %v14885_v51  ;;  %v8271_v26 = vpop.f32.mrf.mxu3  ;;  %v8727_v51 = vmax.f32 %v15861_v23, 0.0  ;;  %v14882_v23 = vld [vmem:[#allocation11 + $0xf8] sm:$0xff] }
 0x5e9   :  { %8694 = vmatpush.bf16.msrb.mxu3 %v13498_v41  ;;  %v8272_v54 = vadd.f32 %v8271_v26, %v16065_v15  ;;  %v16093_v4 = vadd.f32 %v8449_v60, %v8432_v14  ;;  %v14898_v15 = vld [vmem:[#allocation11 + $0x178] sm:$0xff] }
 0x5ea   :  { %v16090_v30 = vpop.f32.mrf.mxu2  ;;  %9356 = vmatpush.bf16.msrb.mxu1 %v14898_v15  ;;  %v8743_v41 = vpack.c.bf16 %v8727_v51, %v8727_v51  ;;  %v8728_v15 = vmax.f32 %v15946_v46, 0.0 }
 0x5eb   :  { %v8722_v22 = vmax.f32 %v8272_v54, 0.0 }
 0x5ec   :  { %9344 = vmatpush.bf16.msrb.mxu0 %v14884_v37  ;;  %v14790_v37 = vld [vmem:[#allocation8 + $0xe1c] sm:$0xf]  ;;  %9297 = vmatmul.bf16.gmra.mxu1 %v8743_v41 }
 0x5ed   :  { %8695 = vmatpush.bf16.msrb.mxu3 %v13466_v35  ;;  %v16097_v52 = vpack.c.bf16 %v8722_v22, %v8714_v44 }
 0x5ee   :  { %v8433_v2 = vpop.f32.mrf.mxu0  ;;  %v8451_v19 = vpop.f32.mrf.mxu1  ;;  %9357 = vmatpush.bf16.msrb.mxu1 %v14897_v45  ;;  %v14878_v45 = vld [vmem:[#allocation11 + $0xd8] sm:$0xff] }
 0x5ef   :  { %v8434_v29 = vadd.f32 %v8433_v2, %v4988_v62 }
 0x5f0   :  { %9345 = vmatpush.bf16.msrb.mxu0 %v14883_v27  ;;  %v16101_v8 = vpop.f32.mrf.mxu3  ;;  %v13338_v27 = vor.u32 %v14790_v37, %v13335_v34 }
 0x5f1   :  { %8696 = vmatpush.bf16.msrb.mxu3 %v13434_v18  ;;  %v8452_v5 = vadd.f32 %v8451_v19, %v8434_v29  ;;  %v14892_v18 = vld [vmem:[#allocation11 + $0x148] sm:$0xff] }
 0x5f2   :  { %v16103_v36 = vpop.f32.mrf.mxu2  ;;  %9358 = vmatpush.bf16.msrb.mxu1 %v14896_v7  ;;  %8633 = vmatmul.bf16.gmra.mxu3 %v15536_v25 }
 0x5f3   :  { %9346 = vmatmul.bf16.vlgmr.msrb.gmra.mxu0 %v16097_v52 }
 0x5f5   :  { %8697 = vmatpush.bf16.msrb.mxu3 %v13402_v33  ;;  %v8744_v33 = vpack.c.bf16 %v8728_v15, %v8728_v15 }
 0x5f6   :  { %v8436_v43 = vpop.f32.mrf.mxu0  ;;  %v8454_v13 = vpop.f32.mrf.mxu1  ;;  %9359 = vmatpush.bf16.msrb.mxu1 %v14895_v61 }
 0x5f7   :  { %v8437_v60 = vadd.f32 %v8436_v43, %v4988_v62  ;;  %v14881_v62 = vld [vmem:[#allocation11 + $0xf0] sm:$0xff]  ;;  %9315 = vmatmul.bf16.gmra.mxu2 %v8744_v33 }
 0x5f8   :  { %v8276_v24 = vpop.f32.mrf.mxu3 }
 0x5f9   :  { %8698 = vmatpush.bf16.msrb.mxu3 %v13370_v63  ;;  %v8455_v42 = vadd.f32 %v8454_v13, %v8437_v60  ;;  %v14876_v63 = vld [vmem:[#allocation11 + $0xc8] sm:$0xff] }
 0x5fa   :  { %v8402_v57 = vpop.f32.mrf.mxu2  ;;  %9360 = vmatpush.bf16.msrb.mxu1 %v14894_v28 }
 0x5fb   :  { %v4989_v57 = vperm.slane %v16086_v55, 7 }
 0x5fd   :  { %8699 = vmatpush.bf16.msrb.mxu3 %v13338_v27 }
 0x5fe   :  { %v8438_v26 = vpop.f32.mrf.mxu0  ;;  %v8456_v14 = vpop.f32.mrf.mxu1  ;;  %9361 = vmatpush.bf16.msrb.mxu1 %v14893_v20 }
 0x600   :  { %v8341_v35 = vpop.f32.mrf.mxu3 }
 0x601   :  { %9320 = vmatpush.bf16.msra.mxu3 %v14882_v23  ;;  %v8342_v44 = vadd.f32 %v8341_v35, %v16039_v16 }
 0x602   :  { %v8467_v54 = vpop.f32.mrf.mxu2  ;;  %9362 = vmatpush.bf16.msrb.mxu1 %v14892_v18  ;;  %8700 = vmatmul.bf16.vlgmr.msrb.gmra.mxu3 %v15645_v56  ;;  %v14904_v18 = vld [vmem:[#allocation11 + $0x1a8] sm:$0xff] }
 0x603   :  { %v16111_v22 = vadd.f32 %v8467_v54, %v16093_v4  ;;  %v8360_v38 = vadd.f32 %v16043_v53, %v8342_v44 }
 0x605   :  { %9321 = vmatpush.bf16.msra.mxu3 %v14881_v62  ;;  %v8378_v3 = vadd.f32 %v16045_v12, %v8360_v38  ;;  %v14891_v12 = vld [vmem:[#allocation11 + $0x140] sm:$0xff]  ;;  %v14906_v62 = vld [vmem:[#allocation11 + $0x1b8] sm:$0xff] }
 0x606   :  { %v16116_v2 = vpop.f32.mrf.mxu0  ;;  %v16118_v19 = vpop.f32.mrf.mxu1  ;;  %9363 = vmatpush.bf16.msrb.mxu1 %v14891_v12  ;;  %9374 = vmatpush.bf16.msrb.mxu2 %v14906_v62 }
 0x607   :  { %v8396_v16 = vadd.f32 %v16084_v58, %v8378_v3 }
 0x608   :  { %v8343_v4 = vpop.f32.mrf.mxu3 }
 0x609   :  { %9322 = vmatpush.bf16.msra.mxu3 %v14880_v6  ;;  %v8344_v53 = vadd.f32 %v8343_v4, %v16052_v0  ;;  %v8275_v0 = vadd.f32 %v16101_v8, %v16078_v9  ;;  %v14905_v6 = vld [vmem:[#allocation11 + $0x1b0] sm:$0xff] }
 0x60a   :  { %v8469_v39 = vpop.f32.mrf.mxu2  ;;  %9375 = vmatpush.bf16.msrb.mxu2 %v14905_v6 }
 0x60b   :  { %v16122_v29 = vadd.f32 %v8469_v39, %v8452_v5  ;;  %v8362_v46 = vadd.f32 %v16060_v31, %v8344_v53  ;;  %v8730_v25 = vmax.f32 %v8275_v0, 0.0 }
 0x60d   :  { %9323 = vmatpush.bf16.msra.mxu3 %v14879_v40  ;;  %v8746_v8 = vpack.c.bf16 %v8730_v25, %v8730_v25 }
 0x60e   :  { %v16127_v58 = vpop.f32.mrf.mxu0  ;;  %v16129_v48 = vpop.f32.mrf.mxu1  ;;  %9376 = vmatpush.bf16.msrb.mxu2 %v14904_v18 }
 0x60f   :  { %9351 = vmatmul.bf16.gmra.mxu0 %v8746_v8 }
 0x610   :  { %v8346_v5 = vpop.f32.mrf.mxu3 }
 0x611   :  { %9324 = vmatpush.bf16.msra.mxu3 %v14878_v45  ;;  %v8347_v11 = vadd.f32 %v8346_v5, %v16069_v49  ;;  %v14875_v49 = vld [vmem:[#allocation11 + $0xc0] sm:$0xff] }
 0x612   :  { %v8472_v52 = vpop.f32.mrf.mxu2  ;;  %8705 = vmatmul.bf16.gmra.mxu3 %v15657_v1  ;;  %v14903_v1 = vld [vmem:[#allocation11 + $0x1a0] sm:$0xff] }
 0x613   :  { %v16134_v51 = vadd.f32 %v8472_v52, %v8455_v42  ;;  %v8365_v31 = vadd.f32 %v16073_v50, %v8347_v11  ;;  %9377 = vmatpush.bf16.msrb.mxu2 %v14903_v1  ;;  %v14913_v1 = vld [vmem:[#allocation11 + $0x1f0] sm:$0xff] }
 0x615   :  { %9325 = vmatpush.bf16.msra.mxu3 %v14877_v59  ;;  %v8383_v7 = vadd.f32 %v16075_v21, %v8365_v31  ;;  %v8380_v21 = vadd.f32 %v16062_v17, %v8362_v46  ;;  %v14902_v46 = vld [vmem:[#allocation11 + $0x198] sm:$0xff]  ;;  %v14901_v31 = vld [vmem:[#allocation11 + $0x190] sm:$0xff] }
 0x616   :  { %v16138_v43 = vpop.f32.mrf.mxu0  ;;  %v16140_v13 = vpop.f32.mrf.mxu1 }
 0x617   :  { %v8401_v9 = vadd.f32 %v16103_v36, %v8383_v7  ;;  %v8398_v27 = vadd.f32 %v16090_v30, %v8380_v21  ;;  %9378 = vmatpush.bf16.msrb.mxu2 %v14902_v46  ;;  %v14900_v7 = vld [vmem:[#allocation11 + $0x188] sm:$0xff] }
 0x618   :  { %v8348_v37 = vpop.f32.mrf.mxu3 }
 0x619   :  { %9326 = vmatpush.bf16.msra.mxu3 %v14876_v63 }
 0x61a   :  { %v8474_v34 = vpop.f32.mrf.mxu2 }
 0x61b   :  { %9379 = vmatpush.bf16.msrb.mxu2 %v14901_v31 }
 0x61d   :  { %9327 = vmatpush.bf16.msra.mxu3 %v14875_v49 }
 0x61e   :  { %v8510_v50 = vpop.f32.mrf.mxu0  ;;  %v8528_v47 = vpop.f32.mrf.mxu1 }
 0x61f   :  { %9380 = vmatpush.bf16.msrb.mxu2 %v14900_v7  ;;  %v14899_v47 = vld [vmem:[#allocation11 + $0x180] sm:$0xff] }
 0x620   :  { %v8413_v41 = vpop.f32.mrf.mxu3 }
 0x621   :  { %v8414_v60 = vadd.f32 %v8413_v41, %v8396_v16 }
 0x622   :  { %v8539_v24 = vpop.f32.mrf.mxu2  ;;  %9328 = vmatmul.bf16.vlgmr.msra.gmra.mxu3 %v16018_v10  ;;  %v8729_v10 = vmax.f32 %v16026_v32, 0.0 }
 0x623   :  { %v8715_v56 = vmax.f32 %v8414_v60, 0.0  ;;  %9381 = vmatpush.bf16.msrb.mxu2 %v14899_v47  ;;  %v14909_v47 = vld [vmem:[#allocation11 + $0x1d0] sm:$0xff] }
 0x626   :  { %v8575_v36 = vpop.f32.mrf.mxu0  ;;  %v8593_v42 = vpop.f32.mrf.mxu1 }
 0x627   :  { %v8576_v28 = vadd.f32 %v8575_v36, %v4989_v57 }
 0x628   :  { %v8415_v61 = vpop.f32.mrf.mxu3 }
 0x629   :  { %v8416_v26 = vadd.f32 %v8415_v61, %v8398_v27  ;;  %v8594_v14 = vadd.f32 %v8593_v42, %v8576_v28 }
 0x62a   :  { %v16147_v23 = vpop.f32.mrf.mxu2 }
 0x62b   :  { %v8723_v35 = vmax.f32 %v8416_v26, 0.0 }
 0x62d   :  { %v8739_v54 = vpack.c.bf16 %v8723_v35, %v8715_v56 }
 0x62e   :  { %v8577_v17 = vpop.f32.mrf.mxu0  ;;  %v8595_v55 = vpop.f32.mrf.mxu1 }
 0x62f   :  { %9364 = vmatmul.bf16.vlgmr.msrb.gmra.mxu1 %v8739_v54  ;;  %v8578_v30 = vadd.f32 %v8577_v17, %v4989_v57  ;;  %v14929_v54 = vld [vmem:[#allocation13] ss:$0 sm:$0xff] }
 0x630   :  { %v8418_v44 = vpop.f32.mrf.mxu3 }
 0x631   :  { %v8596_v38 = vadd.f32 %v8595_v55, %v8578_v30  ;;  %v8419_v3 = vadd.f32 %v8418_v44, %v8401_v9 }
 0x632   :  { %v8544_v20 = vpop.f32.mrf.mxu2 }
 0x633   :  { %v8731_v53 = vmax.f32 %v8419_v3, 0.0  ;;  %v14914_v3 = vld [vmem:[#allocation11 + $0x1f8] sm:$0xff] }
 0x634   :  { %9392 = vmatpush.bf16.msrb.mxu3 %v14914_v3 }
 0x635   :  { %v8747_v33 = vpack.c.bf16 %v8731_v53, %v8731_v53  ;;  %v14912_v53 = vld [vmem:[#allocation11 + $0x1e8] sm:$0xff] }
 0x636   :  { %v8580_v15 = vpop.f32.mrf.mxu0  ;;  %v8598_v16 = vpop.f32.mrf.mxu1 }
 0x637   :  { %v8581_v40 = vadd.f32 %v8580_v15, %v4989_v57 }
 0x638   :  { %v8420_v4 = vpop.f32.mrf.mxu3  ;;  %9393 = vmatpush.bf16.msrb.mxu3 %v14913_v1 }
 0x639   :  { %v8599_v12 = vadd.f32 %v8598_v16, %v8581_v40 }
 0x63a   :  { %v8546_v39 = vpop.f32.mrf.mxu2 }
 0x63c   :  { %9394 = vmatpush.bf16.msrb.mxu3 %v14912_v53 }
 0x63e   :  { %v8582_v45 = vpop.f32.mrf.mxu0  ;;  %v8600_v0 = vpop.f32.mrf.mxu1 }
 0x63f   :  { %9369 = vmatmul.bf16.gmra.mxu1 %v8747_v33 }
 0x640   :  { %v8485_v5 = vpop.f32.mrf.mxu3 }
 0x641   :  { %v8486_v59 = vadd.f32 %v8485_v5, %v16111_v22 }
 0x642   :  { %v8611_v52 = vpop.f32.mrf.mxu2 }
 0x643   :  { %v16152_v11 = vadd.f32 %v8611_v52, %v8594_v14  ;;  %v8504_v25 = vadd.f32 %v16116_v2, %v8486_v59  ;;  %v8745_v2 = vpack.c.bf16 %v8729_v10, %v8729_v10  ;;  %v14911_v52 = vld [vmem:[#allocation11 + $0x1e0] sm:$0xff] }
 0x644   :  { %9395 = vmatpush.bf16.msrb.mxu3 %v14911_v52 }
 0x645   :  { %v8522_v63 = vadd.f32 %v16118_v19, %v8504_v25  ;;  %9333 = vmatmul.bf16.gmra.mxu3 %v8745_v2  ;;  %v14910_v25 = vld [vmem:[#allocation11 + $0x1d8] sm:$0xff] }
 0x646   :  { %v16157_v9 = vpop.f32.mrf.mxu0  ;;  %v16159_v8 = vpop.f32.mrf.mxu1 }
 0x647   :  { %v8540_v37 = vadd.f32 %v8539_v24, %v8522_v63 }
 0x648   :  { %v8487_v34 = vpop.f32.mrf.mxu3  ;;  %9396 = vmatpush.bf16.msrb.mxu3 %v14910_v25 }
 0x649   :  { %v8488_v22 = vadd.f32 %v8487_v34, %v16122_v29 }
 0x64a   :  { %v8613_v49 = vpop.f32.mrf.mxu2 }
 0x64b   :  { %v16162_v50 = vadd.f32 %v8613_v49, %v8596_v38  ;;  %v8506_v41 = vadd.f32 %v16127_v58, %v8488_v22 }
 0x64c   :  { %9397 = vmatpush.bf16.msrb.mxu3 %v14909_v47 }
 0x64d   :  { %v8524_v32 = vadd.f32 %v16129_v48, %v8506_v41  ;;  %v14908_v41 = vld [vmem:[#allocation11 + $0x1c8] sm:$0xff] }
 0x64e   :  { %v16166_v19 = vpop.f32.mrf.mxu0  ;;  %v16168_v21 = vpop.f32.mrf.mxu1 }
 0x650   :  { %v8490_v24 = vpop.f32.mrf.mxu3  ;;  %9398 = vmatpush.bf16.msrb.mxu3 %v14908_v41 }
 0x651   :  { %v8491_v60 = vadd.f32 %v8490_v24, %v16134_v51  ;;  %v8542_v51 = vadd.f32 %v16147_v23, %v8524_v32 }
 0x652   :  { %v8616_v57 = vpop.f32.mrf.mxu2 }
 0x653   :  { %v16171_v27 = vadd.f32 %v8616_v57, %v8599_v12  ;;  %v8509_v29 = vadd.f32 %v16138_v43, %v8491_v60 }
 0x655   :  { %v8527_v36 = vadd.f32 %v16140_v13, %v8509_v29 }
 0x656   :  { %v16175_v42 = vpop.f32.mrf.mxu0  ;;  %v16177_v58 = vpop.f32.mrf.mxu1 }
 0x657   :  { %v8545_v61 = vadd.f32 %v8544_v20, %v8527_v36 }
 0x658   :  { %v8492_v48 = vpop.f32.mrf.mxu3 }
 0x659   :  { %v14907_v48 = vld [vmem:[#allocation11 + $0x1c0] sm:$0xff] }
 0x65a   :  { %v8618_v28 = vpop.f32.mrf.mxu2  ;;  %9399 = vmatpush.bf16.msrb.mxu3 %v14907_v48 }
 0x65e   :  { %v8654_v26 = vpop.f32.mrf.mxu0  ;;  %v8672_v14 = vpop.f32.mrf.mxu1 }
 0x660   :  { %v8557_v56 = vpop.f32.mrf.mxu3 }
 0x661   :  { %v8558_v62 = vadd.f32 %v8557_v56, %v8540_v37 }
 0x662   :  { %v8683_v35 = vpop.f32.mrf.mxu2 }
 0x663   :  { %v8716_v6 = vmax.f32 %v8558_v62, 0.0 }
 0x666   :  { %v9275_v17 = vpop.f32.mrf.mxu0  ;;  %v9293_v55 = vpop.f32.mrf.mxu1 }
 0x667   :  { %v9276_v13 = vadd.f32 %v14929_v54, %v9275_v17 }
 0x668   :  { %v8559_v43 = vpop.f32.mrf.mxu3 }
 0x669   :  { %v8560_v30 = vadd.f32 %v8559_v43, %v8542_v51  ;;  %v9294_v38 = vadd.f32 %v9293_v55, %v9276_v13 }
 0x66a   :  { %v16180_v44 = vpop.f32.mrf.mxu2 }
 0x66b   :  { %v8724_v20 = vmax.f32 %v8560_v30, 0.0 }
 0x66d   :  { %v8740_v18 = vpack.c.bf16 %v8724_v20, %v8716_v6 }
 0x66e   :  { %v9277_v15 = vpop.f32.mrf.mxu0  ;;  %v9295_v16 = vpop.f32.mrf.mxu1 }
 0x66f   :  { %9382 = vmatmul.bf16.vlgmr.msrb.gmra.mxu2 %v8740_v18  ;;  %v9278_v40 = vadd.f32 %v14929_v54, %v9277_v15 }
 0x670   :  { %v8562_v4 = vpop.f32.mrf.mxu3 }
 0x671   :  { %v9296_v23 = vadd.f32 %v9295_v16, %v9278_v40  ;;  %v8563_v12 = vadd.f32 %v8562_v4, %v8545_v61 }
 0x672   :  { %v8688_v39 = vpop.f32.mrf.mxu2 }
 0x673   :  { %v8732_v59 = vmax.f32 %v8563_v12, 0.0 }
 0x675   :  { %v8748_v63 = vpack.c.bf16 %v8732_v59, %v8732_v59 }
 0x676   :  { %v9280_v33 = vpop.f32.mrf.mxu0  ;;  %v9298_v46 = vpop.f32.mrf.mxu1 }
 0x677   :  { %v9281_v5 = vadd.f32 %v14929_v54, %v9280_v33 }
 0x678   :  { %v8564_v45 = vpop.f32.mrf.mxu3 }
 0x679   :  { %v9299_v31 = vadd.f32 %v9298_v46, %v9281_v5 }
 0x67a   :  { %v8690_v0 = vpop.f32.mrf.mxu2 }
 0x67e   :  { %v9282_v7 = vpop.f32.mrf.mxu0  ;;  %v9300_v10 = vpop.f32.mrf.mxu1 }
 0x67f   :  { %9387 = vmatmul.bf16.gmra.mxu2 %v8748_v63 }
 0x680   :  { %v8629_v37 = vpop.f32.mrf.mxu3 }
 0x681   :  { %v8630_v49 = vadd.f32 %v8629_v37, %v16152_v11 }
 0x682   :  { %v9311_v34 = vpop.f32.mrf.mxu2 }
 0x683   :  { %v9312_v22 = vadd.f32 %v9311_v34, %v9294_v38  ;;  %v8648_v2 = vadd.f32 %v16157_v9, %v8630_v49 }
 0x685   :  { %v8666_v32 = vadd.f32 %v16159_v8, %v8648_v2 }
 0x686   :  { %v9347_v24 = vpop.f32.mrf.mxu0 }
 0x687   :  { %v8684_v57 = vadd.f32 %v8683_v35, %v8666_v32 }
 0x688   :  { %v8631_v60 = vpop.f32.mrf.mxu3 }
 0x689   :  { %v8632_v36 = vadd.f32 %v8631_v60, %v16162_v50 }
 0x68a   :  { %v9313_v29 = vpop.f32.mrf.mxu2 }
 0x68b   :  { %v9314_v61 = vadd.f32 %v9313_v29, %v9296_v23  ;;  %v8650_v28 = vadd.f32 %v16166_v19, %v8632_v36 }
 0x68d   :  { %v8668_v11 = vadd.f32 %v16168_v21, %v8650_v28 }
 0x68e   :  { %v9349_v26 = vpop.f32.mrf.mxu0 }
 0x68f   :  { %v8686_v13 = vadd.f32 %v16180_v44, %v8668_v11 }
 0x690   :  { %v8634_v9 = vpop.f32.mrf.mxu3 }
 0x691   :  { %v8635_v56 = vadd.f32 %v8634_v9, %v16171_v27 }
 0x692   :  { %v9316_v14 = vpop.f32.mrf.mxu2 }
 0x693   :  { %v9317_v8 = vadd.f32 %v9316_v14, %v9299_v31  ;;  %v8653_v35 = vadd.f32 %v16175_v42, %v8635_v56 }
 0x695   :  { %v8671_v54 = vadd.f32 %v16177_v58, %v8653_v35 }
 0x696   :  { %v9352_v62 = vpop.f32.mrf.mxu0 }
 0x697   :  { %v8689_v51 = vadd.f32 %v8688_v39, %v8671_v54 }
 0x698   :  { %v8636_v50 = vpop.f32.mrf.mxu3 }
 0x69a   :  { %v9318_v17 = vpop.f32.mrf.mxu2 }
 0x69e   :  { %v9354_v55 = vpop.f32.mrf.mxu0 }
 0x6a0   :  { %v8701_v43 = vpop.f32.mrf.mxu3 }
 0x6a1   :  { %v8702_v19 = vadd.f32 %v8701_v43, %v8684_v57 }
 0x6a3   :  { %v8717_v38 = vmax.f32 %v8702_v19, 0.0 }
 0x6a8   :  { %v8703_v21 = vpop.f32.mrf.mxu3 }
 0x6a9   :  { %v8704_v30 = vadd.f32 %v8703_v21, %v8686_v13 }
 0x6ab   :  { %v8725_v6 = vmax.f32 %v8704_v30, 0.0 }
 0x6ac   :  { %v9365_v20 = vpop.f32.mrf.mxu1 }
 0x6ad   :  { %v8741_v27 = vpack.c.bf16 %v8725_v6, %v8717_v38 }
 0x6af   :  { %9400 = vmatmul.bf16.vlgmr.msrb.gmra.mxu3 %v8741_v27 }
 0x6b0   :  { %v8706_v3 = vpop.f32.mrf.mxu3 }
 0x6b1   :  { %v8707_v18 = vadd.f32 %v8706_v3, %v8689_v51 }
 0x6b3   :  { %v8733_v15 = vmax.f32 %v8707_v18, 0.0 }
 0x6b4   :  { %v9367_v42 = vpop.f32.mrf.mxu1 }
 0x6b5   :  { %v8749_v4 = vpack.c.bf16 %v8733_v15, %v8733_v15 }
 0x6b8   :  { %v8708_v58 = vpop.f32.mrf.mxu3 }
 0x6bc   :  { %v9370_v16 = vpop.f32.mrf.mxu1 }
 0x6bf   :  { %9405 = vmatmul.bf16.gmra.mxu3 %v8749_v4 }
 0x6c0   :  { %v9329_v39 = vpop.f32.mrf.mxu3 }
 0x6c1   :  { %v9330_v40 = vadd.f32 %v9329_v39, %v9312_v22 }
 0x6c3   :  { %v9348_v23 = vadd.f32 %v9347_v24, %v9330_v40 }
 0x6c4   :  { %v9372_v1 = vpop.f32.mrf.mxu1 }
 0x6c5   :  { %v9366_v44 = vadd.f32 %v9365_v20, %v9348_v23 }
 0x6c8   :  { %v9331_v53 = vpop.f32.mrf.mxu3 }
 0x6c9   :  { %v9332_v12 = vadd.f32 %v9331_v53, %v9314_v61 }
 0x6cb   :  { %v9350_v33 = vadd.f32 %v9349_v26, %v9332_v12 }
 0x6cd   :  { %v9368_v46 = vadd.f32 %v9367_v42, %v9350_v33 }
 0x6d0   :  { %v9334_v45 = vpop.f32.mrf.mxu3 }
 0x6d1   :  { %v9335_v0 = vadd.f32 %v9334_v45, %v9317_v8 }
 0x6d3   :  { %v9353_v5 = vadd.f32 %v9352_v62, %v9335_v0 }
 0x6d5   :  { %v9371_v52 = vadd.f32 %v9370_v16, %v9353_v5 }
 0x6d8   :  { %v9336_v59 = vpop.f32.mrf.mxu3 }
 0x6f2   :  { %v9383_v31 = vpop.f32.mrf.mxu2 }
 0x6f3   :  { %v9384_v10 = vadd.f32 %v9383_v31, %v9366_v44 }
 0x6fa   :  { %v9385_v25 = vpop.f32.mrf.mxu2 }
 0x6fb   :  { %v9386_v49 = vadd.f32 %v9385_v25, %v9368_v46 }
 0x702   :  { %v9388_v63 = vpop.f32.mrf.mxu2 }
 0x703   :  { %v9389_v2 = vadd.f32 %v9388_v63, %v9371_v52 }
 0x70a   :  { %v9390_v7 = vpop.f32.mrf.mxu2 }
 0x732   :  { %v9401_v37 = vpop.f32.mrf.mxu3 }
 0x733   :  { %v9402_v34 = vadd.f32 %v9401_v37, %v9384_v10 }
 0x735   :  { %9410 = vst [vmem:[#allocation14] sm:$0xff] %v9402_v34 }
 0x73a   :  { %v9403_v22 = vpop.f32.mrf.mxu3 }
 0x73b   :  { %v9404_v47 = vadd.f32 %v9403_v22, %v9386_v49 }
 0x73d   :  { %9411 = vst [vmem:[#allocation14 + $0x8] sm:$0xff] %v9404_v47 }
 0x742   :  { %v9406_v41 = vpop.f32.mrf.mxu3 }
 0x743   :  { %v9407_v32 = vadd.f32 %v9406_v41, %v9389_v2 }
 0x745   :  { %9412 = vst [vmem:[#allocation14 + $0x10] sm:$0xff] %v9407_v32 }
 0x746   :  { %9425 = dma.vmem_to_hbm [thread:$0]  %s9418_s6, 384, %s9420_s14, [#allocation4], %s15150_s15, %s15150_s15, %s15151_s1  }
 0x74a   :  { %v9408_v24 = vpop.f32.mrf.mxu3 }
 0x74b   :  { %15136 = dma.done.wait [#allocation4], 384  }
 0x74c   :  { %15137 = vsyncadd [#allocation4], 4294966912 }
 0x74d   :  { %9430 = vsyncpa [#allocation3], 1 }
 0x74e   :  { %9431 = vsyncpa [#allocation6], 1 }
 0x74f   :  { %9432 = vsyncpa [#allocation9], 1 }
 0x750   :  { %9433 = vsyncpa [#allocation12], 1 }
 0x751   :  { %9434 = vsyncpa [#allocation4], 1 }

</bundles_post_ra>
